<compile_context>
chip_gen: v6e
topology: v6e:2x2x1
jax: 0.10.0
libtpu: 0.0.40
codegen_flags: <defaults>
</compile_context>

<pallas_src>
import functools

import jax
import jax.numpy as jnp
from jax.experimental import pallas as pl
from jax.experimental.pallas import tpu as pltpu


def _round_up(x, m):
    return (x + m - 1) // m * m


def _vmem_limit_bytes():
    cap = 64 * 1024 * 1024                      # safe default (v7x physical)
    try:
        cap = int(pltpu.get_tpu_info().vmem_capacity_bytes)
    except Exception:
        pass
    return int(min(cap * 3 // 4, 96 * 1024 * 1024))


_VMEM_LIMIT = _vmem_limit_bytes()
_VMEM_SPEC = pl.BlockSpec(memory_space=pltpu.MemorySpace.VMEM)


# ----------------------------------------------------------------------------
# Pallas kernels
# ----------------------------------------------------------------------------
def _fused_matmul_kernel(x_ref, w_ref, bias_ref, *refs, has_residual, apply_relu):
    """One (tm, tn) tile of relu((x @ w_folded) + bias [+ residual]).

    Grid = (M_tiles, N_tiles, K_tiles); acc_ref (f32 VMEM scratch) lives across
    the K axis. x/w/residual are bf16, accumulation and epilogue are f32.
    """
    if has_residual:
        res_ref, o_ref, acc_ref = refs
    else:
        res_ref = None
        o_ref, acc_ref = refs

    k = pl.program_id(2)

    @pl.when(k == 0)
    def _init():
        acc_ref[...] = jnp.zeros_like(acc_ref)

    acc_ref[...] += jnp.dot(x_ref[...], w_ref[...],
                            preferred_element_type=jnp.float32)

    @pl.when(k == pl.num_programs(2) - 1)
    def _finalize():
        out = acc_ref[...] + bias_ref[...]               # folded-BN bias
        if has_residual:
            out = out + res_ref[...].astype(jnp.float32)  # residual skip
        if apply_relu:
            out = jnp.maximum(out, 0.0)
        o_ref[...] = out.astype(o_ref.dtype)


def _pool_fc_kernel(x_ref, w_ref, b_ref, o_ref):
    """Global average pool + Linear: x [N, H*W, C] -> [N, classes].
    1/(H*W) is pre-folded into w_ref, so this is sum + matmul + bias."""
    pooled = jnp.sum(x_ref[...].astype(jnp.float32), axis=1)        # [N, C]
    o_ref[...] = (jnp.dot(pooled, w_ref[...],
                          preferred_element_type=jnp.float32) + b_ref[...])


# ----------------------------------------------------------------------------
# Pallas wrappers
# ----------------------------------------------------------------------------
def _im2col(x, kh, kw, stride, pad):
    """NHWC -> [N*Ho*Wo, kh*kw*C] patches (plain-JAX glue; fed in bf16)."""
    N, H, W, C = x.shape
    if pad:
        x = jnp.pad(x, ((0, 0), (pad, pad), (pad, pad), (0, 0)))
    Hp, Wp = H + 2 * pad, W + 2 * pad
    Ho = (Hp - kh) // stride + 1
    Wo = (Wp - kw) // stride + 1
    patches = []
    for i in range(kh):
        for j in range(kw):
            patches.append(jax.lax.slice(
                x, (0, i, j, 0),
                (N, i + (Ho - 1) * stride + 1, j + (Wo - 1) * stride + 1, C),
                (1, stride, stride, 1)))
    p = jnp.stack(patches, axis=3)                      # [N, Ho, Wo, kh*kw, C]
    return p.reshape(N * Ho * Wo, kh * kw * C), (N, Ho, Wo)


def _pick_tk(K, max_tk=1024):
    """Largest multiple of 128 that divides round_up(K,128) and is <= max_tk."""
    kp = _round_up(K, 128)
    tk, t = 128, 256
    while t <= min(kp, max_tk):
        if kp % t == 0:
            tk = t
        t += 128
    return tk, kp


def pallas_conv_bn_act(x, p, stride, pad, residual=None, apply_relu=True):
    """Conv2d(bias=False) + folded BatchNorm [+ residual] [+ ReLU] as one
    tiled fused-matmul Pallas kernel. Returns NHWC bfloat16 activations."""
    w4d, scale, bias = p                                # w4d: [KH, KW, Cin, Cout]
    kh, kw, cin, cout = w4d.shape

    x2d, (N, Ho, Wo) = _im2col(x.astype(jnp.bfloat16), kh, kw, stride, pad)
    M, K = x2d.shape
    # Fold BN scale into the (constant) weights; keep bias separate in f32.
    w2d = (w4d.reshape(kh * kw * cin, cout) * scale).astype(jnp.bfloat16)

    # Tile sizes: biggest (8,128)-aligned blocks that keep VMEM small; the K
    # tile divides the 128-padded K exactly (no wasted MXU work).
    tm = min(512, _round_up(M, 8))
    tn = min(256, _round_up(cout, 128))
    tk, Kp = _pick_tk(K)
    Mp = _round_up(M, tm)
    Np = _round_up(cout, tn)

    x2d = jnp.pad(x2d, ((0, Mp - M), (0, Kp - K)))
    w2d = jnp.pad(w2d, ((0, Kp - K), (0, Np - cout)))
    bias2d = jnp.pad(bias.astype(jnp.float32).reshape(1, cout),
                     ((0, 0), (0, Np - cout)))

    inputs = [x2d, w2d, bias2d]
    in_specs = [
        pl.BlockSpec((tm, tk), lambda i, j, k: (i, k)),
        pl.BlockSpec((tk, tn), lambda i, j, k: (k, j)),
        pl.BlockSpec((1, tn), lambda i, j, k: (0, j)),
    ]
    if residual is not None:
        res2d = jnp.pad(residual.astype(jnp.bfloat16).reshape(M, cout),
                        ((0, Mp - M), (0, Np - cout)))
        inputs.append(res2d)
        in_specs.append(pl.BlockSpec((tm, tn), lambda i, j, k: (i, j)))

    kernel = functools.partial(_fused_matmul_kernel,
                               has_residual=residual is not None,
                               apply_relu=apply_relu)
    out2d = pl.pallas_call(
        kernel,
        out_shape=jax.ShapeDtypeStruct((Mp, Np), jnp.bfloat16),
        grid_spec=pltpu.PrefetchScalarGridSpec(
            num_scalar_prefetch=0,
            grid=(Mp // tm, Np // tn, Kp // tk),
            in_specs=in_specs,
            out_specs=pl.BlockSpec((tm, tn), lambda i, j, k: (i, j)),
            scratch_shapes=[pltpu.VMEM((tm, tn), jnp.float32)]),
        compiler_params=pltpu.CompilerParams(
            dimension_semantics=("parallel", "parallel", "arbitrary"),
            vmem_limit_bytes=_VMEM_LIMIT),
    )(*inputs)
    return out2d[:M, :cout].reshape(N, Ho, Wo, cout)


def pallas_pool_fc(x, fc_w, fc_b):
    """AdaptiveAvgPool2d((1,1)) + flatten + Linear, fused (tiny, whole-array)."""
    N, H, W, C = x.shape
    w_scaled = (fc_w / float(H * W)).astype(jnp.float32)   # fold mean divisor
    return pl.pallas_call(
        _pool_fc_kernel,
        out_shape=jax.ShapeDtypeStruct((N, fc_w.shape[1]), jnp.float32),
        in_specs=[_VMEM_SPEC] * 3,
        out_specs=_VMEM_SPEC,
        compiler_params=pltpu.CompilerParams(vmem_limit_bytes=_VMEM_LIMIT),
    )(x.astype(jnp.bfloat16).reshape(N, H * W, C), w_scaled,
      fc_b.astype(jnp.float32).reshape(1, -1))


# ----------------------------------------------------------------------------
# Numerics-mirrored pure-JAX reference (bf16 inputs, f32 accumulation,
# bf16-rounded activations) for the correctness check.
# ----------------------------------------------------------------------------
def ref_conv_bn_act(x, p, stride, pad, residual=None, apply_relu=True):
    w4d, scale, bias = p
    w_f = (w4d * scale).astype(jnp.bfloat16).astype(jnp.float32)
    x_f = x.astype(jnp.bfloat16).astype(jnp.float32)
    y = jax.lax.conv_general_dilated(
        x_f, w_f, (stride, stride), [(pad, pad), (pad, pad)],
        dimension_numbers=('NHWC', 'HWIO', 'NHWC'))
    y = y + bias
    if residual is not None:
        y = y + residual.astype(jnp.bfloat16).astype(jnp.float32)
    if apply_relu:
        y = jnp.maximum(y, 0.0)
    return y.astype(jnp.bfloat16).astype(jnp.float32)


def ref_pool_fc(x, fc_w, fc_b):
    pooled = jnp.mean(x.astype(jnp.bfloat16).astype(jnp.float32), axis=(1, 2))
    return pooled @ fc_w + fc_b


# ----------------------------------------------------------------------------
# ResNet forward (mirrors the PyTorch module structure; BasicBlock, ext=1)
# ----------------------------------------------------------------------------
def forward(x_nchw, params, conv_fn, poolfc_fn):
    x = jnp.transpose(x_nchw, (0, 2, 3, 1))             # NCHW -> NHWC
    # self.base: Conv3x3(3->64, s=1, p=1) + BN + ReLU
    x = conv_fn(x, params['base'], stride=1, pad=1)
    # conv2_x .. conv5_x, each a stack of BasicBlocks
    for blocks in params['layers']:
        for blk in blocks:
            identity = x
            out = conv_fn(x, blk['conv1'], stride=blk['stride'], pad=1)
            if blk['downsample'] is not None:
                identity = conv_fn(x, blk['downsample'], stride=blk['stride'],
                                   pad=0, apply_relu=False)
            # conv2 + bn2 + residual add + final ReLU, fused
            x = conv_fn(out, blk['conv2'], stride=1, pad=1,
                        residual=identity, apply_relu=True)
    # AdaptiveAvgPool2d((1,1)) + flatten + Linear
    return poolfc_fn(x, params['fc_w'], params['fc_b'])


# ----------------------------------------------------------------------------
# Deterministic parameter construction (BN folded: scale = g/sqrt(v+eps), ...)
# ----------------------------------------------------------------------------
def init_conv_bn(key, cin, cout, kh, kw):
    k1, k2, k3, k4, k5 = jax.random.split(key, 5)
    w = jax.random.normal(k1, (kh, kw, cin, cout), jnp.float32) * \
        (2.0 / (kh * kw * cin)) ** 0.5
    gamma = jax.random.uniform(k2, (cout,), jnp.float32, 0.5, 1.5)
    beta = jax.random.normal(k3, (cout,), jnp.float32) * 0.1
    mean = jax.random.normal(k4, (cout,), jnp.float32) * 0.1
    var = jax.random.uniform(k5, (cout,), jnp.float32, 0.5, 1.5)
    scale = gamma / jnp.sqrt(var + 1e-5)
    bias = beta - mean * scale
    return (w, scale, bias)


def init_resnet(key, num_blocks=(1, 1, 1, 1), num_classes=10):
    keys = iter(jax.random.split(key, 64))
    params = {'base': init_conv_bn(next(keys), 3, 64, 3, 3)}
    in_ch, layers = 64, []
    for out_ch, nb, stride in zip((64, 128, 256, 512), num_blocks, (1, 2, 2, 2)):
        blocks = []
        for b in range(nb):
            s = stride if b == 0 else 1
            need_ds = (s != 1) or (in_ch != out_ch)       # block.extension == 1
            blocks.append({
                'stride': s,
                'conv1': init_conv_bn(next(keys), in_ch, out_ch, 3, 3),
                'conv2': init_conv_bn(next(keys), out_ch, out_ch, 3, 3),
                'downsample': (init_conv_bn(next(keys), in_ch, out_ch, 1, 1)
                               if need_ds else None),
            })
            in_ch = out_ch
        layers.append(blocks)
    params['layers'] = layers
    kfc1, kfc2 = jax.random.split(next(keys))
    params['fc_w'] = jax.random.normal(kfc1, (512, num_classes), jnp.float32) * 0.05
    params['fc_b'] = jax.random.normal(kfc2, (num_classes,), jnp.float32) * 0.05
    return params


if __name__ == "__main__":
    key = jax.random.PRNGKey(0)
    kp, kx = jax.random.split(key)
    params = init_resnet(kp, num_blocks=(1, 1, 1, 1), num_classes=10)
    x = jax.random.normal(kx, (2, 3, 16, 16), jnp.float32)   # NCHW, like PyTorch

    run = jax.jit(lambda xx: forward(xx, params, pallas_conv_bn_act, pallas_pool_fc))
    out = run(x)
    jax.block_until_ready(out)

    ref = forward(x, params, ref_conv_bn_act, ref_pool_fc)
    err = float(jnp.max(jnp.abs(out - ref)))
    bound = 1e-2 * (1.0 + float(jnp.max(jnp.abs(ref))))
    assert out.shape == (2, 10), out.shape
    assert err <= bound, f"mismatch: max|diff|={err}, bound={bound}"
    print("KERNEL_OK")
</pallas_src>

<mosaic_0001>
module attributes {stable_mosaic.version = 11 : i64} {
  func.func @_fused_matmul_kernel(%arg0: i32, %arg1: i32, %arg2: i32, %arg3: memref<512x128xbf16, #tpu.memory_space<vmem>>, %arg4: memref<128x128xbf16, #tpu.memory_space<vmem>>, %arg5: memref<1x128xf32, #tpu.memory_space<vmem>>, %arg6: memref<512x128xbf16, #tpu.memory_space<vmem>>, %arg7: memref<512x128xf32, #tpu.memory_space<vmem>>) attributes {dimension_semantics = [#tpu.dimension_semantics<parallel>, #tpu.dimension_semantics<parallel>, #tpu.dimension_semantics<arbitrary>], iteration_bounds = array<i64: 1, 1, 1>, scalar_prefetch = 0 : i64, scratch_operands = 1 : i64, tpu.core_type = #tpu.core_type<tc>, window_params = [{transform_indices = @transform_0, window_bounds = array<i64: 512, 128>}, {transform_indices = @transform_1, window_bounds = array<i64: 128, 128>}, {transform_indices = @transform_2, window_bounds = array<i64: 1, 128>}, {transform_indices = @transform_3, window_bounds = array<i64: 512, 128>}]} {
    %c0_i32 = arith.constant 0 : i32
    %0 = arith.cmpi eq, %arg2, %c0_i32 : i32
    %1 = arith.extui %0 : i1 to i32
    %c0_i32_0 = arith.constant 0 : i32
    %2 = arith.cmpi ne, %1, %c0_i32_0 : i32
    scf.if %2 {
      %cst_10 = arith.constant 0.000000e+00 : f32
      %12 = vector.broadcast %cst_10 : f32 to vector<512x128xf32>
      %c0_11 = arith.constant 0 : index
      %c0_12 = arith.constant 0 : index
      %13 = vector.load %arg7[%c0_11, %c0_12] : memref<512x128xf32, #tpu.memory_space<vmem>>, vector<512x128xf32>
      tpu.vector_store %arg7[%c0_11, %c0_12], %12 {strides = array<i32>} : memref<512x128xf32, #tpu.memory_space<vmem>>, vector<512x128xf32>,
    } else {
    }
    %c0 = arith.constant 0 : index
    %c0_1 = arith.constant 0 : index
    %3 = vector.load %arg7[%c0, %c0_1] : memref<512x128xf32, #tpu.memory_space<vmem>>, vector<512x128xf32>
    %c0_2 = arith.constant 0 : index
    %c0_3 = arith.constant 0 : index
    %4 = vector.load %arg3[%c0_2, %c0_3] : memref<512x128xbf16, #tpu.memory_space<vmem>>, vector<512x128xbf16>
    %c0_4 = arith.constant 0 : index
    %c0_5 = arith.constant 0 : index
    %5 = vector.load %arg4[%c0_4, %c0_5] : memref<128x128xbf16, #tpu.memory_space<vmem>>, vector<128x128xbf16>
    %cst = arith.constant dense<0.000000e+00> : vector<512x128xf32>
    %6 = tpu.matmul %4, %5, %cst {dimension_numbers = #tpu.dot_dimension_numbers<[1], [0], [0], [1], [0, 0, 1, 1], [], []>} : vector<512x128xbf16>, vector<128x128xbf16>, vector<512x128xf32> -> vector<512x128xf32>
    %7 = arith.addf %3, %6 : vector<512x128xf32>
    %c0_6 = arith.constant 0 : index
    %c0_7 = arith.constant 0 : index
    %8 = vector.load %arg7[%c0_6, %c0_7] : memref<512x128xf32, #tpu.memory_space<vmem>>, vector<512x128xf32>
    tpu.vector_store %arg7[%c0_6, %c0_7], %7 {strides = array<i32>} : memref<512x128xf32, #tpu.memory_space<vmem>>, vector<512x128xf32>,
    %c0_i32_8 = arith.constant 0 : i32
    %9 = arith.cmpi eq, %arg2, %c0_i32_8 : i32
    %10 = arith.extui %9 : i1 to i32
    %c0_i32_9 = arith.constant 0 : i32
    %11 = arith.cmpi ne, %10, %c0_i32_9 : i32
    scf.if %11 {
      %c0_10 = arith.constant 0 : index
      %c0_11 = arith.constant 0 : index
      %12 = vector.load %arg7[%c0_10, %c0_11] : memref<512x128xf32, #tpu.memory_space<vmem>>, vector<512x128xf32>
      %c0_12 = arith.constant 0 : index
      %c0_13 = arith.constant 0 : index
      %13 = vector.load %arg5[%c0_12, %c0_13] : memref<1x128xf32, #tpu.memory_space<vmem>>, vector<1x128xf32>
      %14 = vector.broadcast %13 : vector<1x128xf32> to vector<512x128xf32>
      %15 = arith.addf %12, %14 : vector<512x128xf32>
      %cst_14 = arith.constant 0.000000e+00 : f32
      %16 = vector.broadcast %cst_14 : f32 to vector<512x128xf32>
      %17 = arith.maximumf %15, %16 : vector<512x128xf32>
      %18 = arith.truncf %17 : vector<512x128xf32> to vector<512x128xbf16>
      %c0_15 = arith.constant 0 : index
      %c0_16 = arith.constant 0 : index
      %19 = vector.load %arg6[%c0_15, %c0_16] : memref<512x128xbf16, #tpu.memory_space<vmem>>, vector<512x128xbf16>
      tpu.vector_store %arg6[%c0_15, %c0_16], %18 {strides = array<i32>} : memref<512x128xbf16, #tpu.memory_space<vmem>>, vector<512x128xbf16>,
    } else {
    }
    return
  }
  func.func @transform_0(%arg0: i32, %arg1: i32, %arg2: i32) -> (i32, i32) {
    %c0_i32 = arith.constant 0 : i32
    return %arg0, %arg2 : i32, i32
  }
  func.func @transform_1(%arg0: i32, %arg1: i32, %arg2: i32) -> (i32, i32) {
    %c0_i32 = arith.constant 0 : i32
    return %arg2, %arg1 : i32, i32
  }
  func.func @transform_2(%arg0: i32, %arg1: i32, %arg2: i32) -> (i32, i32) {
    %c0_i32 = arith.constant 0 : i32
    %c0_i32_0 = arith.constant 0 : i32
    return %c0_i32, %arg1 : i32, i32
  }
  func.func @transform_3(%arg0: i32, %arg1: i32, %arg2: i32) -> (i32, i32) {
    %c0_i32 = arith.constant 0 : i32
    return %arg0, %arg1 : i32, i32
  }
}

module attributes {stable_mosaic.version = 11 : i64} {
  func.func @_fused_matmul_kernel(%arg0: i32, %arg1: i32, %arg2: i32, %arg3: memref<512x640xbf16, #tpu.memory_space<vmem>>, %arg4: memref<640x128xbf16, #tpu.memory_space<vmem>>, %arg5: memref<1x128xf32, #tpu.memory_space<vmem>>, %arg6: memref<512x128xbf16, #tpu.memory_space<vmem>>, %arg7: memref<512x128xf32, #tpu.memory_space<vmem>>) attributes {dimension_semantics = [#tpu.dimension_semantics<parallel>, #tpu.dimension_semantics<parallel>, #tpu.dimension_semantics<arbitrary>], iteration_bounds = array<i64: 1, 1, 1>, scalar_prefetch = 0 : i64, scratch_operands = 1 : i64, tpu.core_type = #tpu.core_type<tc>, window_params = [{transform_indices = @transform_0, window_bounds = array<i64: 512, 640>}, {transform_indices = @transform_1, window_bounds = array<i64: 640, 128>}, {transform_indices = @transform_2, window_bounds = array<i64: 1, 128>}, {transform_indices = @transform_3, window_bounds = array<i64: 512, 128>}]} {
    %c0_i32 = arith.constant 0 : i32
    %0 = arith.cmpi eq, %arg2, %c0_i32 : i32
    %1 = arith.extui %0 : i1 to i32
    %c0_i32_0 = arith.constant 0 : i32
    %2 = arith.cmpi ne, %1, %c0_i32_0 : i32
    scf.if %2 {
      %cst_10 = arith.constant 0.000000e+00 : f32
      %12 = vector.broadcast %cst_10 : f32 to vector<512x128xf32>
      %c0_11 = arith.constant 0 : index
      %c0_12 = arith.constant 0 : index
      %13 = vector.load %arg7[%c0_11, %c0_12] : memref<512x128xf32, #tpu.memory_space<vmem>>, vector<512x128xf32>
      tpu.vector_store %arg7[%c0_11, %c0_12], %12 {strides = array<i32>} : memref<512x128xf32, #tpu.memory_space<vmem>>, vector<512x128xf32>,
    } else {
    }
    %c0 = arith.constant 0 : index
    %c0_1 = arith.constant 0 : index
    %3 = vector.load %arg7[%c0, %c0_1] : memref<512x128xf32, #tpu.memory_space<vmem>>, vector<512x128xf32>
    %c0_2 = arith.constant 0 : index
    %c0_3 = arith.constant 0 : index
    %4 = vector.load %arg3[%c0_2, %c0_3] : memref<512x640xbf16, #tpu.memory_space<vmem>>, vector<512x640xbf16>
    %c0_4 = arith.constant 0 : index
    %c0_5 = arith.constant 0 : index
    %5 = vector.load %arg4[%c0_4, %c0_5] : memref<640x128xbf16, #tpu.memory_space<vmem>>, vector<640x128xbf16>
    %cst = arith.constant dense<0.000000e+00> : vector<512x128xf32>
    %6 = tpu.matmul %4, %5, %cst {dimension_numbers = #tpu.dot_dimension_numbers<[1], [0], [0], [1], [0, 0, 1, 1], [], []>} : vector<512x640xbf16>, vector<640x128xbf16>, vector<512x128xf32> -> vector<512x128xf32>
    %7 = arith.addf %3, %6 : vector<512x128xf32>
    %c0_6 = arith.constant 0 : index
    %c0_7 = arith.constant 0 : index
    %8 = vector.load %arg7[%c0_6, %c0_7] : memref<512x128xf32, #tpu.memory_space<vmem>>, vector<512x128xf32>
    tpu.vector_store %arg7[%c0_6, %c0_7], %7 {strides = array<i32>} : memref<512x128xf32, #tpu.memory_space<vmem>>, vector<512x128xf32>,
    %c0_i32_8 = arith.constant 0 : i32
    %9 = arith.cmpi eq, %arg2, %c0_i32_8 : i32
    %10 = arith.extui %9 : i1 to i32
    %c0_i32_9 = arith.constant 0 : i32
    %11 = arith.cmpi ne, %10, %c0_i32_9 : i32
    scf.if %11 {
      %c0_10 = arith.constant 0 : index
      %c0_11 = arith.constant 0 : index
      %12 = vector.load %arg7[%c0_10, %c0_11] : memref<512x128xf32, #tpu.memory_space<vmem>>, vector<512x128xf32>
      %c0_12 = arith.constant 0 : index
      %c0_13 = arith.constant 0 : index
      %13 = vector.load %arg5[%c0_12, %c0_13] : memref<1x128xf32, #tpu.memory_space<vmem>>, vector<1x128xf32>
      %14 = vector.broadcast %13 : vector<1x128xf32> to vector<512x128xf32>
      %15 = arith.addf %12, %14 : vector<512x128xf32>
      %cst_14 = arith.constant 0.000000e+00 : f32
      %16 = vector.broadcast %cst_14 : f32 to vector<512x128xf32>
      %17 = arith.maximumf %15, %16 : vector<512x128xf32>
      %18 = arith.truncf %17 : vector<512x128xf32> to vector<512x128xbf16>
      %c0_15 = arith.constant 0 : index
      %c0_16 = arith.constant 0 : index
      %19 = vector.load %arg6[%c0_15, %c0_16] : memref<512x128xbf16, #tpu.memory_space<vmem>>, vector<512x128xbf16>
      tpu.vector_store %arg6[%c0_15, %c0_16], %18 {strides = array<i32>} : memref<512x128xbf16, #tpu.memory_space<vmem>>, vector<512x128xbf16>,
    } else {
    }
    return
  }
  func.func @transform_0(%arg0: i32, %arg1: i32, %arg2: i32) -> (i32, i32) {
    %c0_i32 = arith.constant 0 : i32
    return %arg0, %arg2 : i32, i32
  }
  func.func @transform_1(%arg0: i32, %arg1: i32, %arg2: i32) -> (i32, i32) {
    %c0_i32 = arith.constant 0 : i32
    return %arg2, %arg1 : i32, i32
  }
  func.func @transform_2(%arg0: i32, %arg1: i32, %arg2: i32) -> (i32, i32) {
    %c0_i32 = arith.constant 0 : i32
    %c0_i32_0 = arith.constant 0 : i32
    return %c0_i32, %arg1 : i32, i32
  }
  func.func @transform_3(%arg0: i32, %arg1: i32, %arg2: i32) -> (i32, i32) {
    %c0_i32 = arith.constant 0 : i32
    return %arg0, %arg1 : i32, i32
  }
}

module attributes {stable_mosaic.version = 11 : i64} {
  func.func @_fused_matmul_kernel(%arg0: i32, %arg1: i32, %arg2: i32, %arg3: memref<512x640xbf16, #tpu.memory_space<vmem>>, %arg4: memref<640x128xbf16, #tpu.memory_space<vmem>>, %arg5: memref<1x128xf32, #tpu.memory_space<vmem>>, %arg6: memref<512x128xbf16, #tpu.memory_space<vmem>>, %arg7: memref<512x128xbf16, #tpu.memory_space<vmem>>, %arg8: memref<512x128xf32, #tpu.memory_space<vmem>>) attributes {dimension_semantics = [#tpu.dimension_semantics<parallel>, #tpu.dimension_semantics<parallel>, #tpu.dimension_semantics<arbitrary>], iteration_bounds = array<i64: 1, 1, 1>, scalar_prefetch = 0 : i64, scratch_operands = 1 : i64, tpu.core_type = #tpu.core_type<tc>, window_params = [{transform_indices = @transform_0, window_bounds = array<i64: 512, 640>}, {transform_indices = @transform_1, window_bounds = array<i64: 640, 128>}, {transform_indices = @transform_2, window_bounds = array<i64: 1, 128>}, {transform_indices = @transform_3, window_bounds = array<i64: 512, 128>}, {transform_indices = @transform_4, window_bounds = array<i64: 512, 128>}]} {
    %c0_i32 = arith.constant 0 : i32
    %0 = arith.cmpi eq, %arg2, %c0_i32 : i32
    %1 = arith.extui %0 : i1 to i32
    %c0_i32_0 = arith.constant 0 : i32
    %2 = arith.cmpi ne, %1, %c0_i32_0 : i32
    scf.if %2 {
      %cst_10 = arith.constant 0.000000e+00 : f32
      %12 = vector.broadcast %cst_10 : f32 to vector<512x128xf32>
      %c0_11 = arith.constant 0 : index
      %c0_12 = arith.constant 0 : index
      %13 = vector.load %arg8[%c0_11, %c0_12] : memref<512x128xf32, #tpu.memory_space<vmem>>, vector<512x128xf32>
      tpu.vector_store %arg8[%c0_11, %c0_12], %12 {strides = array<i32>} : memref<512x128xf32, #tpu.memory_space<vmem>>, vector<512x128xf32>,
    } else {
    }
    %c0 = arith.constant 0 : index
    %c0_1 = arith.constant 0 : index
    %3 = vector.load %arg8[%c0, %c0_1] : memref<512x128xf32, #tpu.memory_space<vmem>>, vector<512x128xf32>
    %c0_2 = arith.constant 0 : index
    %c0_3 = arith.constant 0 : index
    %4 = vector.load %arg3[%c0_2, %c0_3] : memref<512x640xbf16, #tpu.memory_space<vmem>>, vector<512x640xbf16>
    %c0_4 = arith.constant 0 : index
    %c0_5 = arith.constant 0 : index
    %5 = vector.load %arg4[%c0_4, %c0_5] : memref<640x128xbf16, #tpu.memory_space<vmem>>, vector<640x128xbf16>
    %cst = arith.constant dense<0.000000e+00> : vector<512x128xf32>
    %6 = tpu.matmul %4, %5, %cst {dimension_numbers = #tpu.dot_dimension_numbers<[1], [0], [0], [1], [0, 0, 1, 1], [], []>} : vector<512x640xbf16>, vector<640x128xbf16>, vector<512x128xf32> -> vector<512x128xf32>
    %7 = arith.addf %3, %6 : vector<512x128xf32>
    %c0_6 = arith.constant 0 : index
    %c0_7 = arith.constant 0 : index
    %8 = vector.load %arg8[%c0_6, %c0_7] : memref<512x128xf32, #tpu.memory_space<vmem>>, vector<512x128xf32>
    tpu.vector_store %arg8[%c0_6, %c0_7], %7 {strides = array<i32>} : memref<512x128xf32, #tpu.memory_space<vmem>>, vector<512x128xf32>,
    %c0_i32_8 = arith.constant 0 : i32
    %9 = arith.cmpi eq, %arg2, %c0_i32_8 : i32
    %10 = arith.extui %9 : i1 to i32
    %c0_i32_9 = arith.constant 0 : i32
    %11 = arith.cmpi ne, %10, %c0_i32_9 : i32
    scf.if %11 {
      %c0_10 = arith.constant 0 : index
      %c0_11 = arith.constant 0 : index
      %12 = vector.load %arg8[%c0_10, %c0_11] : memref<512x128xf32, #tpu.memory_space<vmem>>, vector<512x128xf32>
      %c0_12 = arith.constant 0 : index
      %c0_13 = arith.constant 0 : index
      %13 = vector.load %arg5[%c0_12, %c0_13] : memref<1x128xf32, #tpu.memory_space<vmem>>, vector<1x128xf32>
      %14 = vector.broadcast %13 : vector<1x128xf32> to vector<512x128xf32>
      %15 = arith.addf %12, %14 : vector<512x128xf32>
      %c0_14 = arith.constant 0 : index
      %c0_15 = arith.constant 0 : index
      %16 = vector.load %arg6[%c0_14, %c0_15] : memref<512x128xbf16, #tpu.memory_space<vmem>>, vector<512x128xbf16>
      %17 = arith.extf %16 : vector<512x128xbf16> to vector<512x128xf32>
      %18 = arith.addf %15, %17 : vector<512x128xf32>
      %cst_16 = arith.constant 0.000000e+00 : f32
      %19 = vector.broadcast %cst_16 : f32 to vector<512x128xf32>
      %20 = arith.maximumf %18, %19 : vector<512x128xf32>
      %21 = arith.truncf %20 : vector<512x128xf32> to vector<512x128xbf16>
      %c0_17 = arith.constant 0 : index
      %c0_18 = arith.constant 0 : index
      %22 = vector.load %arg7[%c0_17, %c0_18] : memref<512x128xbf16, #tpu.memory_space<vmem>>, vector<512x128xbf16>
      tpu.vector_store %arg7[%c0_17, %c0_18], %21 {strides = array<i32>} : memref<512x128xbf16, #tpu.memory_space<vmem>>, vector<512x128xbf16>,
    } else {
    }
    return
  }
  func.func @transform_0(%arg0: i32, %arg1: i32, %arg2: i32) -> (i32, i32) {
    %c0_i32 = arith.constant 0 : i32
    return %arg0, %arg2 : i32, i32
  }
  func.func @transform_1(%arg0: i32, %arg1: i32, %arg2: i32) -> (i32, i32) {
    %c0_i32 = arith.constant 0 : i32
    return %arg2, %arg1 : i32, i32
  }
  func.func @transform_2(%arg0: i32, %arg1: i32, %arg2: i32) -> (i32, i32) {
    %c0_i32 = arith.constant 0 : i32
    %c0_i32_0 = arith.constant 0 : i32
    return %c0_i32, %arg1 : i32, i32
  }
  func.func @transform_3(%arg0: i32, %arg1: i32, %arg2: i32) -> (i32, i32) {
    %c0_i32 = arith.constant 0 : i32
    return %arg0, %arg1 : i32, i32
  }
  func.func @transform_4(%arg0: i32, %arg1: i32, %arg2: i32) -> (i32, i32) {
    %c0_i32 = arith.constant 0 : i32
    return %arg0, %arg1 : i32, i32
  }
}

module attributes {stable_mosaic.version = 11 : i64} {
  func.func @_fused_matmul_kernel(%arg0: i32, %arg1: i32, %arg2: i32, %arg3: memref<128x128xbf16, #tpu.memory_space<vmem>>, %arg4: memref<128x128xbf16, #tpu.memory_space<vmem>>, %arg5: memref<1x128xf32, #tpu.memory_space<vmem>>, %arg6: memref<128x128xbf16, #tpu.memory_space<vmem>>, %arg7: memref<128x128xf32, #tpu.memory_space<vmem>>) attributes {dimension_semantics = [#tpu.dimension_semantics<parallel>, #tpu.dimension_semantics<parallel>, #tpu.dimension_semantics<arbitrary>], iteration_bounds = array<i64: 1, 1, 1>, scalar_prefetch = 0 : i64, scratch_operands = 1 : i64, tpu.core_type = #tpu.core_type<tc>, window_params = [{transform_indices = @transform_0, window_bounds = array<i64: 128, 128>}, {transform_indices = @transform_1, window_bounds = array<i64: 128, 128>}, {transform_indices = @transform_2, window_bounds = array<i64: 1, 128>}, {transform_indices = @transform_3, window_bounds = array<i64: 128, 128>}]} {
    %c0_i32 = arith.constant 0 : i32
    %0 = arith.cmpi eq, %arg2, %c0_i32 : i32
    %1 = arith.extui %0 : i1 to i32
    %c0_i32_0 = arith.constant 0 : i32
    %2 = arith.cmpi ne, %1, %c0_i32_0 : i32
    scf.if %2 {
      %cst_10 = arith.constant 0.000000e+00 : f32
      %12 = vector.broadcast %cst_10 : f32 to vector<128x128xf32>
      %c0_11 = arith.constant 0 : index
      %c0_12 = arith.constant 0 : index
      %13 = vector.load %arg7[%c0_11, %c0_12] : memref<128x128xf32, #tpu.memory_space<vmem>>, vector<128x128xf32>
      tpu.vector_store %arg7[%c0_11, %c0_12], %12 {strides = array<i32>} : memref<128x128xf32, #tpu.memory_space<vmem>>, vector<128x128xf32>,
    } else {
    }
    %c0 = arith.constant 0 : index
    %c0_1 = arith.constant 0 : index
    %3 = vector.load %arg7[%c0, %c0_1] : memref<128x128xf32, #tpu.memory_space<vmem>>, vector<128x128xf32>
    %c0_2 = arith.constant 0 : index
    %c0_3 = arith.constant 0 : index
    %4 = vector.load %arg3[%c0_2, %c0_3] : memref<128x128xbf16, #tpu.memory_space<vmem>>, vector<128x128xbf16>
    %c0_4 = arith.constant 0 : index
    %c0_5 = arith.constant 0 : index
    %5 = vector.load %arg4[%c0_4, %c0_5] : memref<128x128xbf16, #tpu.memory_space<vmem>>, vector<128x128xbf16>
    %cst = arith.constant dense<0.000000e+00> : vector<128x128xf32>
    %6 = tpu.matmul %4, %5, %cst {dimension_numbers = #tpu.dot_dimension_numbers<[1], [0], [0], [1], [0, 0, 1, 1], [], []>} : vector<128x128xbf16>, vector<128x128xbf16>, vector<128x128xf32> -> vector<128x128xf32>
    %7 = arith.addf %3, %6 : vector<128x128xf32>
    %c0_6 = arith.constant 0 : index
    %c0_7 = arith.constant 0 : index
    %8 = vector.load %arg7[%c0_6, %c0_7] : memref<128x128xf32, #tpu.memory_space<vmem>>, vector<128x128xf32>
    tpu.vector_store %arg7[%c0_6, %c0_7], %7 {strides = array<i32>} : memref<128x128xf32, #tpu.memory_space<vmem>>, vector<128x128xf32>,
    %c0_i32_8 = arith.constant 0 : i32
    %9 = arith.cmpi eq, %arg2, %c0_i32_8 : i32
    %10 = arith.extui %9 : i1 to i32
    %c0_i32_9 = arith.constant 0 : i32
    %11 = arith.cmpi ne, %10, %c0_i32_9 : i32
    scf.if %11 {
      %c0_10 = arith.constant 0 : index
      %c0_11 = arith.constant 0 : index
      %12 = vector.load %arg7[%c0_10, %c0_11] : memref<128x128xf32, #tpu.memory_space<vmem>>, vector<128x128xf32>
      %c0_12 = arith.constant 0 : index
      %c0_13 = arith.constant 0 : index
      %13 = vector.load %arg5[%c0_12, %c0_13] : memref<1x128xf32, #tpu.memory_space<vmem>>, vector<1x128xf32>
      %14 = vector.broadcast %13 : vector<1x128xf32> to vector<128x128xf32>
      %15 = arith.addf %12, %14 : vector<128x128xf32>
      %16 = arith.truncf %15 : vector<128x128xf32> to vector<128x128xbf16>
      %c0_14 = arith.constant 0 : index
      %c0_15 = arith.constant 0 : index
      %17 = vector.load %arg6[%c0_14, %c0_15] : memref<128x128xbf16, #tpu.memory_space<vmem>>, vector<128x128xbf16>
      tpu.vector_store %arg6[%c0_14, %c0_15], %16 {strides = array<i32>} : memref<128x128xbf16, #tpu.memory_space<vmem>>, vector<128x128xbf16>,
    } else {
    }
    return
  }
  func.func @transform_0(%arg0: i32, %arg1: i32, %arg2: i32) -> (i32, i32) {
    %c0_i32 = arith.constant 0 : i32
    return %arg0, %arg2 : i32, i32
  }
  func.func @transform_1(%arg0: i32, %arg1: i32, %arg2: i32) -> (i32, i32) {
    %c0_i32 = arith.constant 0 : i32
    return %arg2, %arg1 : i32, i32
  }
  func.func @transform_2(%arg0: i32, %arg1: i32, %arg2: i32) -> (i32, i32) {
    %c0_i32 = arith.constant 0 : i32
    %c0_i32_0 = arith.constant 0 : i32
    return %c0_i32, %arg1 : i32, i32
  }
  func.func @transform_3(%arg0: i32, %arg1: i32, %arg2: i32) -> (i32, i32) {
    %c0_i32 = arith.constant 0 : i32
    return %arg0, %arg1 : i32, i32
  }
}

module attributes {stable_mosaic.version = 11 : i64} {
  func.func @_fused_matmul_kernel(%arg0: i32, %arg1: i32, %arg2: i32, %arg3: memref<128x640xbf16, #tpu.memory_space<vmem>>, %arg4: memref<640x128xbf16, #tpu.memory_space<vmem>>, %arg5: memref<1x128xf32, #tpu.memory_space<vmem>>, %arg6: memref<128x128xbf16, #tpu.memory_space<vmem>>, %arg7: memref<128x128xf32, #tpu.memory_space<vmem>>) attributes {dimension_semantics = [#tpu.dimension_semantics<parallel>, #tpu.dimension_semantics<parallel>, #tpu.dimension_semantics<arbitrary>], iteration_bounds = array<i64: 1, 1, 1>, scalar_prefetch = 0 : i64, scratch_operands = 1 : i64, tpu.core_type = #tpu.core_type<tc>, window_params = [{transform_indices = @transform_0, window_bounds = array<i64: 128, 640>}, {transform_indices = @transform_1, window_bounds = array<i64: 640, 128>}, {transform_indices = @transform_2, window_bounds = array<i64: 1, 128>}, {transform_indices = @transform_3, window_bounds = array<i64: 128, 128>}]} {
    %c0_i32 = arith.constant 0 : i32
    %0 = arith.cmpi eq, %arg2, %c0_i32 : i32
    %1 = arith.extui %0 : i1 to i32
    %c0_i32_0 = arith.constant 0 : i32
    %2 = arith.cmpi ne, %1, %c0_i32_0 : i32
    scf.if %2 {
      %cst_10 = arith.constant 0.000000e+00 : f32
      %12 = vector.broadcast %cst_10 : f32 to vector<128x128xf32>
      %c0_11 = arith.constant 0 : index
      %c0_12 = arith.constant 0 : index
      %13 = vector.load %arg7[%c0_11, %c0_12] : memref<128x128xf32, #tpu.memory_space<vmem>>, vector<128x128xf32>
      tpu.vector_store %arg7[%c0_11, %c0_12], %12 {strides = array<i32>} : memref<128x128xf32, #tpu.memory_space<vmem>>, vector<128x128xf32>,
    } else {
    }
    %c0 = arith.constant 0 : index
    %c0_1 = arith.constant 0 : index
    %3 = vector.load %arg7[%c0, %c0_1] : memref<128x128xf32, #tpu.memory_space<vmem>>, vector<128x128xf32>
    %c0_2 = arith.constant 0 : index
    %c0_3 = arith.constant 0 : index
    %4 = vector.load %arg3[%c0_2, %c0_3] : memref<128x640xbf16, #tpu.memory_space<vmem>>, vector<128x640xbf16>
    %c0_4 = arith.constant 0 : index
    %c0_5 = arith.constant 0 : index
    %5 = vector.load %arg4[%c0_4, %c0_5] : memref<640x128xbf16, #tpu.memory_space<vmem>>, vector<640x128xbf16>
    %cst = arith.constant dense<0.000000e+00> : vector<128x128xf32>
    %6 = tpu.matmul %4, %5, %cst {dimension_numbers = #tpu.dot_dimension_numbers<[1], [0], [0], [1], [0, 0, 1, 1], [], []>} : vector<128x640xbf16>, vector<640x128xbf16>, vector<128x128xf32> -> vector<128x128xf32>
    %7 = arith.addf %3, %6 : vector<128x128xf32>
    %c0_6 = arith.constant 0 : index
    %c0_7 = arith.constant 0 : index
    %8 = vector.load %arg7[%c0_6, %c0_7] : memref<128x128xf32, #tpu.memory_space<vmem>>, vector<128x128xf32>
    tpu.vector_store %arg7[%c0_6, %c0_7], %7 {strides = array<i32>} : memref<128x128xf32, #tpu.memory_space<vmem>>, vector<128x128xf32>,
    %c0_i32_8 = arith.constant 0 : i32
    %9 = arith.cmpi eq, %arg2, %c0_i32_8 : i32
    %10 = arith.extui %9 : i1 to i32
    %c0_i32_9 = arith.constant 0 : i32
    %11 = arith.cmpi ne, %10, %c0_i32_9 : i32
    scf.if %11 {
      %c0_10 = arith.constant 0 : index
      %c0_11 = arith.constant 0 : index
      %12 = vector.load %arg7[%c0_10, %c0_11] : memref<128x128xf32, #tpu.memory_space<vmem>>, vector<128x128xf32>
      %c0_12 = arith.constant 0 : index
      %c0_13 = arith.constant 0 : index
      %13 = vector.load %arg5[%c0_12, %c0_13] : memref<1x128xf32, #tpu.memory_space<vmem>>, vector<1x128xf32>
      %14 = vector.broadcast %13 : vector<1x128xf32> to vector<128x128xf32>
      %15 = arith.addf %12, %14 : vector<128x128xf32>
      %cst_14 = arith.constant 0.000000e+00 : f32
      %16 = vector.broadcast %cst_14 : f32 to vector<128x128xf32>
      %17 = arith.maximumf %15, %16 : vector<128x128xf32>
      %18 = arith.truncf %17 : vector<128x128xf32> to vector<128x128xbf16>
      %c0_15 = arith.constant 0 : index
      %c0_16 = arith.constant 0 : index
      %19 = vector.load %arg6[%c0_15, %c0_16] : memref<128x128xbf16, #tpu.memory_space<vmem>>, vector<128x128xbf16>
      tpu.vector_store %arg6[%c0_15, %c0_16], %18 {strides = array<i32>} : memref<128x128xbf16, #tpu.memory_space<vmem>>, vector<128x128xbf16>,
    } else {
    }
    return
  }
  func.func @transform_0(%arg0: i32, %arg1: i32, %arg2: i32) -> (i32, i32) {
    %c0_i32 = arith.constant 0 : i32
    return %arg0, %arg2 : i32, i32
  }
  func.func @transform_1(%arg0: i32, %arg1: i32, %arg2: i32) -> (i32, i32) {
    %c0_i32 = arith.constant 0 : i32
    return %arg2, %arg1 : i32, i32
  }
  func.func @transform_2(%arg0: i32, %arg1: i32, %arg2: i32) -> (i32, i32) {
    %c0_i32 = arith.constant 0 : i32
    %c0_i32_0 = arith.constant 0 : i32
    return %c0_i32, %arg1 : i32, i32
  }
  func.func @transform_3(%arg0: i32, %arg1: i32, %arg2: i32) -> (i32, i32) {
    %c0_i32 = arith.constant 0 : i32
    return %arg0, %arg1 : i32, i32
  }
}

module attributes {stable_mosaic.version = 11 : i64} {
  func.func @_fused_matmul_kernel(%arg0: i32, %arg1: i32, %arg2: i32, %arg3: memref<128x384xbf16, #tpu.memory_space<vmem>>, %arg4: memref<384x128xbf16, #tpu.memory_space<vmem>>, %arg5: memref<1x128xf32, #tpu.memory_space<vmem>>, %arg6: memref<128x128xbf16, #tpu.memory_space<vmem>>, %arg7: memref<128x128xbf16, #tpu.memory_space<vmem>>, %arg8: memref<128x128xf32, #tpu.memory_space<vmem>>) attributes {dimension_semantics = [#tpu.dimension_semantics<parallel>, #tpu.dimension_semantics<parallel>, #tpu.dimension_semantics<arbitrary>], iteration_bounds = array<i64: 1, 1, 3>, scalar_prefetch = 0 : i64, scratch_operands = 1 : i64, tpu.core_type = #tpu.core_type<tc>, window_params = [{transform_indices = @transform_0, window_bounds = array<i64: 128, 384>}, {transform_indices = @transform_1, window_bounds = array<i64: 384, 128>}, {transform_indices = @transform_2, window_bounds = array<i64: 1, 128>}, {transform_indices = @transform_3, window_bounds = array<i64: 128, 128>}, {transform_indices = @transform_4, window_bounds = array<i64: 128, 128>}]} {
    %c0_i32 = arith.constant 0 : i32
    %0 = arith.cmpi eq, %arg2, %c0_i32 : i32
    %1 = arith.extui %0 : i1 to i32
    %c0_i32_0 = arith.constant 0 : i32
    %2 = arith.cmpi ne, %1, %c0_i32_0 : i32
    scf.if %2 {
      %cst_9 = arith.constant 0.000000e+00 : f32
      %12 = vector.broadcast %cst_9 : f32 to vector<128x128xf32>
      %c0_10 = arith.constant 0 : index
      %c0_11 = arith.constant 0 : index
      %13 = vector.load %arg8[%c0_10, %c0_11] : memref<128x128xf32, #tpu.memory_space<vmem>>, vector<128x128xf32>
      tpu.vector_store %arg8[%c0_10, %c0_11], %12 {strides = array<i32>} : memref<128x128xf32, #tpu.memory_space<vmem>>, vector<128x128xf32>,
    } else {
    }
    %c0 = arith.constant 0 : index
    %c0_1 = arith.constant 0 : index
    %3 = vector.load %arg8[%c0, %c0_1] : memref<128x128xf32, #tpu.memory_space<vmem>>, vector<128x128xf32>
    %c0_2 = arith.constant 0 : index
    %c0_3 = arith.constant 0 : index
    %4 = vector.load %arg3[%c0_2, %c0_3] : memref<128x384xbf16, #tpu.memory_space<vmem>>, vector<128x384xbf16>
    %c0_4 = arith.constant 0 : index
    %c0_5 = arith.constant 0 : index
    %5 = vector.load %arg4[%c0_4, %c0_5] : memref<384x128xbf16, #tpu.memory_space<vmem>>, vector<384x128xbf16>
    %cst = arith.constant dense<0.000000e+00> : vector<128x128xf32>
    %6 = tpu.matmul %4, %5, %cst {dimension_numbers = #tpu.dot_dimension_numbers<[1], [0], [0], [1], [0, 0, 1, 1], [], []>} : vector<128x384xbf16>, vector<384x128xbf16>, vector<128x128xf32> -> vector<128x128xf32>
    %7 = arith.addf %3, %6 : vector<128x128xf32>
    %c0_6 = arith.constant 0 : index
    %c0_7 = arith.constant 0 : index
    %8 = vector.load %arg8[%c0_6, %c0_7] : memref<128x128xf32, #tpu.memory_space<vmem>>, vector<128x128xf32>
    tpu.vector_store %arg8[%c0_6, %c0_7], %7 {strides = array<i32>} : memref<128x128xf32, #tpu.memory_space<vmem>>, vector<128x128xf32>,
    %c2_i32 = arith.constant 2 : i32
    %9 = arith.cmpi eq, %arg2, %c2_i32 : i32
    %10 = arith.extui %9 : i1 to i32
    %c0_i32_8 = arith.constant 0 : i32
    %11 = arith.cmpi ne, %10, %c0_i32_8 : i32
    scf.if %11 {
      %c0_9 = arith.constant 0 : index
      %c0_10 = arith.constant 0 : index
      %12 = vector.load %arg8[%c0_9, %c0_10] : memref<128x128xf32, #tpu.memory_space<vmem>>, vector<128x128xf32>
      %c0_11 = arith.constant 0 : index
      %c0_12 = arith.constant 0 : index
      %13 = vector.load %arg5[%c0_11, %c0_12] : memref<1x128xf32, #tpu.memory_space<vmem>>, vector<1x128xf32>
      %14 = vector.broadcast %13 : vector<1x128xf32> to vector<128x128xf32>
      %15 = arith.addf %12, %14 : vector<128x128xf32>
      %c0_13 = arith.constant 0 : index
      %c0_14 = arith.constant 0 : index
      %16 = vector.load %arg6[%c0_13, %c0_14] : memref<128x128xbf16, #tpu.memory_space<vmem>>, vector<128x128xbf16>
      %17 = arith.extf %16 : vector<128x128xbf16> to vector<128x128xf32>
      %18 = arith.addf %15, %17 : vector<128x128xf32>
      %cst_15 = arith.constant 0.000000e+00 : f32
      %19 = vector.broadcast %cst_15 : f32 to vector<128x128xf32>
      %20 = arith.maximumf %18, %19 : vector<128x128xf32>
      %21 = arith.truncf %20 : vector<128x128xf32> to vector<128x128xbf16>
      %c0_16 = arith.constant 0 : index
      %c0_17 = arith.constant 0 : index
      %22 = vector.load %arg7[%c0_16, %c0_17] : memref<128x128xbf16, #tpu.memory_space<vmem>>, vector<128x128xbf16>
      tpu.vector_store %arg7[%c0_16, %c0_17], %21 {strides = array<i32>} : memref<128x128xbf16, #tpu.memory_space<vmem>>, vector<128x128xbf16>,
    } else {
    }
    return
  }
  func.func @transform_0(%arg0: i32, %arg1: i32, %arg2: i32) -> (i32, i32) {
    %c0_i32 = arith.constant 0 : i32
    return %arg0, %arg2 : i32, i32
  }
  func.func @transform_1(%arg0: i32, %arg1: i32, %arg2: i32) -> (i32, i32) {
    %c0_i32 = arith.constant 0 : i32
    return %arg2, %arg1 : i32, i32
  }
  func.func @transform_2(%arg0: i32, %arg1: i32, %arg2: i32) -> (i32, i32) {
    %c0_i32 = arith.constant 0 : i32
    %c0_i32_0 = arith.constant 0 : i32
    return %c0_i32, %arg1 : i32, i32
  }
  func.func @transform_3(%arg0: i32, %arg1: i32, %arg2: i32) -> (i32, i32) {
    %c0_i32 = arith.constant 0 : i32
    return %arg0, %arg1 : i32, i32
  }
  func.func @transform_4(%arg0: i32, %arg1: i32, %arg2: i32) -> (i32, i32) {
    %c0_i32 = arith.constant 0 : i32
    return %arg0, %arg1 : i32, i32
  }
}

module attributes {stable_mosaic.version = 11 : i64} {
  func.func @_fused_matmul_kernel(%arg0: i32, %arg1: i32, %arg2: i32, %arg3: memref<32x128xbf16, #tpu.memory_space<vmem>>, %arg4: memref<128x256xbf16, #tpu.memory_space<vmem>>, %arg5: memref<1x256xf32, #tpu.memory_space<vmem>>, %arg6: memref<32x256xbf16, #tpu.memory_space<vmem>>, %arg7: memref<32x256xf32, #tpu.memory_space<vmem>>) attributes {dimension_semantics = [#tpu.dimension_semantics<parallel>, #tpu.dimension_semantics<parallel>, #tpu.dimension_semantics<arbitrary>], iteration_bounds = array<i64: 1, 1, 1>, scalar_prefetch = 0 : i64, scratch_operands = 1 : i64, tpu.core_type = #tpu.core_type<tc>, window_params = [{transform_indices = @transform_0, window_bounds = array<i64: 32, 128>}, {transform_indices = @transform_1, window_bounds = array<i64: 128, 256>}, {transform_indices = @transform_2, window_bounds = array<i64: 1, 256>}, {transform_indices = @transform_3, window_bounds = array<i64: 32, 256>}]} {
    %c0_i32 = arith.constant 0 : i32
    %0 = arith.cmpi eq, %arg2, %c0_i32 : i32
    %1 = arith.extui %0 : i1 to i32
    %c0_i32_0 = arith.constant 0 : i32
    %2 = arith.cmpi ne, %1, %c0_i32_0 : i32
    scf.if %2 {
      %cst_10 = arith.constant 0.000000e+00 : f32
      %12 = vector.broadcast %cst_10 : f32 to vector<32x256xf32>
      %c0_11 = arith.constant 0 : index
      %c0_12 = arith.constant 0 : index
      %13 = vector.load %arg7[%c0_11, %c0_12] : memref<32x256xf32, #tpu.memory_space<vmem>>, vector<32x256xf32>
      tpu.vector_store %arg7[%c0_11, %c0_12], %12 {strides = array<i32>} : memref<32x256xf32, #tpu.memory_space<vmem>>, vector<32x256xf32>,
    } else {
    }
    %c0 = arith.constant 0 : index
    %c0_1 = arith.constant 0 : index
    %3 = vector.load %arg7[%c0, %c0_1] : memref<32x256xf32, #tpu.memory_space<vmem>>, vector<32x256xf32>
    %c0_2 = arith.constant 0 : index
    %c0_3 = arith.constant 0 : index
    %4 = vector.load %arg3[%c0_2, %c0_3] : memref<32x128xbf16, #tpu.memory_space<vmem>>, vector<32x128xbf16>
    %c0_4 = arith.constant 0 : index
    %c0_5 = arith.constant 0 : index
    %5 = vector.load %arg4[%c0_4, %c0_5] : memref<128x256xbf16, #tpu.memory_space<vmem>>, vector<128x256xbf16>
    %cst = arith.constant dense<0.000000e+00> : vector<32x256xf32>
    %6 = tpu.matmul %4, %5, %cst {dimension_numbers = #tpu.dot_dimension_numbers<[1], [0], [0], [1], [0, 0, 1, 1], [], []>} : vector<32x128xbf16>, vector<128x256xbf16>, vector<32x256xf32> -> vector<32x256xf32>
    %7 = arith.addf %3, %6 : vector<32x256xf32>
    %c0_6 = arith.constant 0 : index
    %c0_7 = arith.constant 0 : index
    %8 = vector.load %arg7[%c0_6, %c0_7] : memref<32x256xf32, #tpu.memory_space<vmem>>, vector<32x256xf32>
    tpu.vector_store %arg7[%c0_6, %c0_7], %7 {strides = array<i32>} : memref<32x256xf32, #tpu.memory_space<vmem>>, vector<32x256xf32>,
    %c0_i32_8 = arith.constant 0 : i32
    %9 = arith.cmpi eq, %arg2, %c0_i32_8 : i32
    %10 = arith.extui %9 : i1 to i32
    %c0_i32_9 = arith.constant 0 : i32
    %11 = arith.cmpi ne, %10, %c0_i32_9 : i32
    scf.if %11 {
      %c0_10 = arith.constant 0 : index
      %c0_11 = arith.constant 0 : index
      %12 = vector.load %arg7[%c0_10, %c0_11] : memref<32x256xf32, #tpu.memory_space<vmem>>, vector<32x256xf32>
      %c0_12 = arith.constant 0 : index
      %c0_13 = arith.constant 0 : index
      %13 = vector.load %arg5[%c0_12, %c0_13] : memref<1x256xf32, #tpu.memory_space<vmem>>, vector<1x256xf32>
      %14 = vector.broadcast %13 : vector<1x256xf32> to vector<32x256xf32>
      %15 = arith.addf %12, %14 : vector<32x256xf32>
      %16 = arith.truncf %15 : vector<32x256xf32> to vector<32x256xbf16>
      %c0_14 = arith.constant 0 : index
      %c0_15 = arith.constant 0 : index
      %17 = vector.load %arg6[%c0_14, %c0_15] : memref<32x256xbf16, #tpu.memory_space<vmem>>, vector<32x256xbf16>
      tpu.vector_store %arg6[%c0_14, %c0_15], %16 {strides = array<i32>} : memref<32x256xbf16, #tpu.memory_space<vmem>>, vector<32x256xbf16>,
    } else {
    }
    return
  }
  func.func @transform_0(%arg0: i32, %arg1: i32, %arg2: i32) -> (i32, i32) {
    %c0_i32 = arith.constant 0 : i32
    return %arg0, %arg2 : i32, i32
  }
  func.func @transform_1(%arg0: i32, %arg1: i32, %arg2: i32) -> (i32, i32) {
    %c0_i32 = arith.constant 0 : i32
    return %arg2, %arg1 : i32, i32
  }
  func.func @transform_2(%arg0: i32, %arg1: i32, %arg2: i32) -> (i32, i32) {
    %c0_i32 = arith.constant 0 : i32
    %c0_i32_0 = arith.constant 0 : i32
    return %c0_i32, %arg1 : i32, i32
  }
  func.func @transform_3(%arg0: i32, %arg1: i32, %arg2: i32) -> (i32, i32) {
    %c0_i32 = arith.constant 0 : i32
    return %arg0, %arg1 : i32, i32
  }
}

module attributes {stable_mosaic.version = 11 : i64} {
  func.func @_fused_matmul_kernel(%arg0: i32, %arg1: i32, %arg2: i32, %arg3: memref<32x384xbf16, #tpu.memory_space<vmem>>, %arg4: memref<384x256xbf16, #tpu.memory_space<vmem>>, %arg5: memref<1x256xf32, #tpu.memory_space<vmem>>, %arg6: memref<32x256xbf16, #tpu.memory_space<vmem>>, %arg7: memref<32x256xf32, #tpu.memory_space<vmem>>) attributes {dimension_semantics = [#tpu.dimension_semantics<parallel>, #tpu.dimension_semantics<parallel>, #tpu.dimension_semantics<arbitrary>], iteration_bounds = array<i64: 1, 1, 3>, scalar_prefetch = 0 : i64, scratch_operands = 1 : i64, tpu.core_type = #tpu.core_type<tc>, window_params = [{transform_indices = @transform_0, window_bounds = array<i64: 32, 384>}, {transform_indices = @transform_1, window_bounds = array<i64: 384, 256>}, {transform_indices = @transform_2, window_bounds = array<i64: 1, 256>}, {transform_indices = @transform_3, window_bounds = array<i64: 32, 256>}]} {
    %c0_i32 = arith.constant 0 : i32
    %0 = arith.cmpi eq, %arg2, %c0_i32 : i32
    %1 = arith.extui %0 : i1 to i32
    %c0_i32_0 = arith.constant 0 : i32
    %2 = arith.cmpi ne, %1, %c0_i32_0 : i32
    scf.if %2 {
      %cst_9 = arith.constant 0.000000e+00 : f32
      %12 = vector.broadcast %cst_9 : f32 to vector<32x256xf32>
      %c0_10 = arith.constant 0 : index
      %c0_11 = arith.constant 0 : index
      %13 = vector.load %arg7[%c0_10, %c0_11] : memref<32x256xf32, #tpu.memory_space<vmem>>, vector<32x256xf32>
      tpu.vector_store %arg7[%c0_10, %c0_11], %12 {strides = array<i32>} : memref<32x256xf32, #tpu.memory_space<vmem>>, vector<32x256xf32>,
    } else {
    }
    %c0 = arith.constant 0 : index
    %c0_1 = arith.constant 0 : index
    %3 = vector.load %arg7[%c0, %c0_1] : memref<32x256xf32, #tpu.memory_space<vmem>>, vector<32x256xf32>
    %c0_2 = arith.constant 0 : index
    %c0_3 = arith.constant 0 : index
    %4 = vector.load %arg3[%c0_2, %c0_3] : memref<32x384xbf16, #tpu.memory_space<vmem>>, vector<32x384xbf16>
    %c0_4 = arith.constant 0 : index
    %c0_5 = arith.constant 0 : index
    %5 = vector.load %arg4[%c0_4, %c0_5] : memref<384x256xbf16, #tpu.memory_space<vmem>>, vector<384x256xbf16>
    %cst = arith.constant dense<0.000000e+00> : vector<32x256xf32>
    %6 = tpu.matmul %4, %5, %cst {dimension_numbers = #tpu.dot_dimension_numbers<[1], [0], [0], [1], [0, 0, 1, 1], [], []>} : vector<32x384xbf16>, vector<384x256xbf16>, vector<32x256xf32> -> vector<32x256xf32>
    %7 = arith.addf %3, %6 : vector<32x256xf32>
    %c0_6 = arith.constant 0 : index
    %c0_7 = arith.constant 0 : index
    %8 = vector.load %arg7[%c0_6, %c0_7] : memref<32x256xf32, #tpu.memory_space<vmem>>, vector<32x256xf32>
    tpu.vector_store %arg7[%c0_6, %c0_7], %7 {strides = array<i32>} : memref<32x256xf32, #tpu.memory_space<vmem>>, vector<32x256xf32>,
    %c2_i32 = arith.constant 2 : i32
    %9 = arith.cmpi eq, %arg2, %c2_i32 : i32
    %10 = arith.extui %9 : i1 to i32
    %c0_i32_8 = arith.constant 0 : i32
    %11 = arith.cmpi ne, %10, %c0_i32_8 : i32
    scf.if %11 {
      %c0_9 = arith.constant 0 : index
      %c0_10 = arith.constant 0 : index
      %12 = vector.load %arg7[%c0_9, %c0_10] : memref<32x256xf32, #tpu.memory_space<vmem>>, vector<32x256xf32>
      %c0_11 = arith.constant 0 : index
      %c0_12 = arith.constant 0 : index
      %13 = vector.load %arg5[%c0_11, %c0_12] : memref<1x256xf32, #tpu.memory_space<vmem>>, vector<1x256xf32>
      %14 = vector.broadcast %13 : vector<1x256xf32> to vector<32x256xf32>
      %15 = arith.addf %12, %14 : vector<32x256xf32>
      %cst_13 = arith.constant 0.000000e+00 : f32
      %16 = vector.broadcast %cst_13 : f32 to vector<32x256xf32>
      %17 = arith.maximumf %15, %16 : vector<32x256xf32>
      %18 = arith.truncf %17 : vector<32x256xf32> to vector<32x256xbf16>
      %c0_14 = arith.constant 0 : index
      %c0_15 = arith.constant 0 : index
      %19 = vector.load %arg6[%c0_14, %c0_15] : memref<32x256xbf16, #tpu.memory_space<vmem>>, vector<32x256xbf16>
      tpu.vector_store %arg6[%c0_14, %c0_15], %18 {strides = array<i32>} : memref<32x256xbf16, #tpu.memory_space<vmem>>, vector<32x256xbf16>,
    } else {
    }
    return
  }
  func.func @transform_0(%arg0: i32, %arg1: i32, %arg2: i32) -> (i32, i32) {
    %c0_i32 = arith.constant 0 : i32
    return %arg0, %arg2 : i32, i32
  }
  func.func @transform_1(%arg0: i32, %arg1: i32, %arg2: i32) -> (i32, i32) {
    %c0_i32 = arith.constant 0 : i32
    return %arg2, %arg1 : i32, i32
  }
  func.func @transform_2(%arg0: i32, %arg1: i32, %arg2: i32) -> (i32, i32) {
    %c0_i32 = arith.constant 0 : i32
    %c0_i32_0 = arith.constant 0 : i32
    return %c0_i32, %arg1 : i32, i32
  }
  func.func @transform_3(%arg0: i32, %arg1: i32, %arg2: i32) -> (i32, i32) {
    %c0_i32 = arith.constant 0 : i32
    return %arg0, %arg1 : i32, i32
  }
}

module attributes {stable_mosaic.version = 11 : i64} {
  func.func @_fused_matmul_kernel(%arg0: i32, %arg1: i32, %arg2: i32, %arg3: memref<32x768xbf16, #tpu.memory_space<vmem>>, %arg4: memref<768x256xbf16, #tpu.memory_space<vmem>>, %arg5: memref<1x256xf32, #tpu.memory_space<vmem>>, %arg6: memref<32x256xbf16, #tpu.memory_space<vmem>>, %arg7: memref<32x256xbf16, #tpu.memory_space<vmem>>, %arg8: memref<32x256xf32, #tpu.memory_space<vmem>>) attributes {dimension_semantics = [#tpu.dimension_semantics<parallel>, #tpu.dimension_semantics<parallel>, #tpu.dimension_semantics<arbitrary>], iteration_bounds = array<i64: 1, 1, 3>, scalar_prefetch = 0 : i64, scratch_operands = 1 : i64, tpu.core_type = #tpu.core_type<tc>, window_params = [{transform_indices = @transform_0, window_bounds = array<i64: 32, 768>}, {transform_indices = @transform_1, window_bounds = array<i64: 768, 256>}, {transform_indices = @transform_2, window_bounds = array<i64: 1, 256>}, {transform_indices = @transform_3, window_bounds = array<i64: 32, 256>}, {transform_indices = @transform_4, window_bounds = array<i64: 32, 256>}]} {
    %c0_i32 = arith.constant 0 : i32
    %0 = arith.cmpi eq, %arg2, %c0_i32 : i32
    %1 = arith.extui %0 : i1 to i32
    %c0_i32_0 = arith.constant 0 : i32
    %2 = arith.cmpi ne, %1, %c0_i32_0 : i32
    scf.if %2 {
      %cst_9 = arith.constant 0.000000e+00 : f32
      %12 = vector.broadcast %cst_9 : f32 to vector<32x256xf32>
      %c0_10 = arith.constant 0 : index
      %c0_11 = arith.constant 0 : index
      %13 = vector.load %arg8[%c0_10, %c0_11] : memref<32x256xf32, #tpu.memory_space<vmem>>, vector<32x256xf32>
      tpu.vector_store %arg8[%c0_10, %c0_11], %12 {strides = array<i32>} : memref<32x256xf32, #tpu.memory_space<vmem>>, vector<32x256xf32>,
    } else {
    }
    %c0 = arith.constant 0 : index
    %c0_1 = arith.constant 0 : index
    %3 = vector.load %arg8[%c0, %c0_1] : memref<32x256xf32, #tpu.memory_space<vmem>>, vector<32x256xf32>
    %c0_2 = arith.constant 0 : index
    %c0_3 = arith.constant 0 : index
    %4 = vector.load %arg3[%c0_2, %c0_3] : memref<32x768xbf16, #tpu.memory_space<vmem>>, vector<32x768xbf16>
    %c0_4 = arith.constant 0 : index
    %c0_5 = arith.constant 0 : index
    %5 = vector.load %arg4[%c0_4, %c0_5] : memref<768x256xbf16, #tpu.memory_space<vmem>>, vector<768x256xbf16>
    %cst = arith.constant dense<0.000000e+00> : vector<32x256xf32>
    %6 = tpu.matmul %4, %5, %cst {dimension_numbers = #tpu.dot_dimension_numbers<[1], [0], [0], [1], [0, 0, 1, 1], [], []>} : vector<32x768xbf16>, vector<768x256xbf16>, vector<32x256xf32> -> vector<32x256xf32>
    %7 = arith.addf %3, %6 : vector<32x256xf32>
    %c0_6 = arith.constant 0 : index
    %c0_7 = arith.constant 0 : index
    %8 = vector.load %arg8[%c0_6, %c0_7] : memref<32x256xf32, #tpu.memory_space<vmem>>, vector<32x256xf32>
    tpu.vector_store %arg8[%c0_6, %c0_7], %7 {strides = array<i32>} : memref<32x256xf32, #tpu.memory_space<vmem>>, vector<32x256xf32>,
    %c2_i32 = arith.constant 2 : i32
    %9 = arith.cmpi eq, %arg2, %c2_i32 : i32
    %10 = arith.extui %9 : i1 to i32
    %c0_i32_8 = arith.constant 0 : i32
    %11 = arith.cmpi ne, %10, %c0_i32_8 : i32
    scf.if %11 {
      %c0_9 = arith.constant 0 : index
      %c0_10 = arith.constant 0 : index
      %12 = vector.load %arg8[%c0_9, %c0_10] : memref<32x256xf32, #tpu.memory_space<vmem>>, vector<32x256xf32>
      %c0_11 = arith.constant 0 : index
      %c0_12 = arith.constant 0 : index
      %13 = vector.load %arg5[%c0_11, %c0_12] : memref<1x256xf32, #tpu.memory_space<vmem>>, vector<1x256xf32>
      %14 = vector.broadcast %13 : vector<1x256xf32> to vector<32x256xf32>
      %15 = arith.addf %12, %14 : vector<32x256xf32>
      %c0_13 = arith.constant 0 : index
      %c0_14 = arith.constant 0 : index
      %16 = vector.load %arg6[%c0_13, %c0_14] : memref<32x256xbf16, #tpu.memory_space<vmem>>, vector<32x256xbf16>
      %17 = arith.extf %16 : vector<32x256xbf16> to vector<32x256xf32>
      %18 = arith.addf %15, %17 : vector<32x256xf32>
      %cst_15 = arith.constant 0.000000e+00 : f32
      %19 = vector.broadcast %cst_15 : f32 to vector<32x256xf32>
      %20 = arith.maximumf %18, %19 : vector<32x256xf32>
      %21 = arith.truncf %20 : vector<32x256xf32> to vector<32x256xbf16>
      %c0_16 = arith.constant 0 : index
      %c0_17 = arith.constant 0 : index
      %22 = vector.load %arg7[%c0_16, %c0_17] : memref<32x256xbf16, #tpu.memory_space<vmem>>, vector<32x256xbf16>
      tpu.vector_store %arg7[%c0_16, %c0_17], %21 {strides = array<i32>} : memref<32x256xbf16, #tpu.memory_space<vmem>>, vector<32x256xbf16>,
    } else {
    }
    return
  }
  func.func @transform_0(%arg0: i32, %arg1: i32, %arg2: i32) -> (i32, i32) {
    %c0_i32 = arith.constant 0 : i32
    return %arg0, %arg2 : i32, i32
  }
  func.func @transform_1(%arg0: i32, %arg1: i32, %arg2: i32) -> (i32, i32) {
    %c0_i32 = arith.constant 0 : i32
    return %arg2, %arg1 : i32, i32
  }
  func.func @transform_2(%arg0: i32, %arg1: i32, %arg2: i32) -> (i32, i32) {
    %c0_i32 = arith.constant 0 : i32
    %c0_i32_0 = arith.constant 0 : i32
    return %c0_i32, %arg1 : i32, i32
  }
  func.func @transform_3(%arg0: i32, %arg1: i32, %arg2: i32) -> (i32, i32) {
    %c0_i32 = arith.constant 0 : i32
    return %arg0, %arg1 : i32, i32
  }
  func.func @transform_4(%arg0: i32, %arg1: i32, %arg2: i32) -> (i32, i32) {
    %c0_i32 = arith.constant 0 : i32
    return %arg0, %arg1 : i32, i32
  }
}

module attributes {stable_mosaic.version = 11 : i64} {
  func.func @_fused_matmul_kernel(%arg0: i32, %arg1: i32, %arg2: i32, %arg3: memref<8x256xbf16, #tpu.memory_space<vmem>>, %arg4: memref<256x256xbf16, #tpu.memory_space<vmem>>, %arg5: memref<1x256xf32, #tpu.memory_space<vmem>>, %arg6: memref<8x256xbf16, #tpu.memory_space<vmem>>, %arg7: memref<8x256xf32, #tpu.memory_space<vmem>>) attributes {dimension_semantics = [#tpu.dimension_semantics<parallel>, #tpu.dimension_semantics<parallel>, #tpu.dimension_semantics<arbitrary>], iteration_bounds = array<i64: 1, 2, 1>, scalar_prefetch = 0 : i64, scratch_operands = 1 : i64, tpu.core_type = #tpu.core_type<tc>, window_params = [{transform_indices = @transform_0, window_bounds = array<i64: 8, 256>}, {transform_indices = @transform_1, window_bounds = array<i64: 256, 256>}, {transform_indices = @transform_2, window_bounds = array<i64: 1, 256>}, {transform_indices = @transform_3, window_bounds = array<i64: 8, 256>}]} {
    %c0_i32 = arith.constant 0 : i32
    %0 = arith.cmpi eq, %arg2, %c0_i32 : i32
    %1 = arith.extui %0 : i1 to i32
    %c0_i32_0 = arith.constant 0 : i32
    %2 = arith.cmpi ne, %1, %c0_i32_0 : i32
    scf.if %2 {
      %cst_10 = arith.constant 0.000000e+00 : f32
      %12 = vector.broadcast %cst_10 : f32 to vector<8x256xf32>
      %c0_11 = arith.constant 0 : index
      %c0_12 = arith.constant 0 : index
      %13 = vector.load %arg7[%c0_11, %c0_12] : memref<8x256xf32, #tpu.memory_space<vmem>>, vector<8x256xf32>
      tpu.vector_store %arg7[%c0_11, %c0_12], %12 {strides = array<i32>} : memref<8x256xf32, #tpu.memory_space<vmem>>, vector<8x256xf32>,
    } else {
    }
    %c0 = arith.constant 0 : index
    %c0_1 = arith.constant 0 : index
    %3 = vector.load %arg7[%c0, %c0_1] : memref<8x256xf32, #tpu.memory_space<vmem>>, vector<8x256xf32>
    %c0_2 = arith.constant 0 : index
    %c0_3 = arith.constant 0 : index
    %4 = vector.load %arg3[%c0_2, %c0_3] : memref<8x256xbf16, #tpu.memory_space<vmem>>, vector<8x256xbf16>
    %c0_4 = arith.constant 0 : index
    %c0_5 = arith.constant 0 : index
    %5 = vector.load %arg4[%c0_4, %c0_5] : memref<256x256xbf16, #tpu.memory_space<vmem>>, vector<256x256xbf16>
    %cst = arith.constant dense<0.000000e+00> : vector<8x256xf32>
    %6 = tpu.matmul %4, %5, %cst {dimension_numbers = #tpu.dot_dimension_numbers<[1], [0], [0], [1], [0, 0, 1, 1], [], []>} : vector<8x256xbf16>, vector<256x256xbf16>, vector<8x256xf32> -> vector<8x256xf32>
    %7 = arith.addf %3, %6 : vector<8x256xf32>
    %c0_6 = arith.constant 0 : index
    %c0_7 = arith.constant 0 : index
    %8 = vector.load %arg7[%c0_6, %c0_7] : memref<8x256xf32, #tpu.memory_space<vmem>>, vector<8x256xf32>
    tpu.vector_store %arg7[%c0_6, %c0_7], %7 {strides = array<i32>} : memref<8x256xf32, #tpu.memory_space<vmem>>, vector<8x256xf32>,
    %c0_i32_8 = arith.constant 0 : i32
    %9 = arith.cmpi eq, %arg2, %c0_i32_8 : i32
    %10 = arith.extui %9 : i1 to i32
    %c0_i32_9 = arith.constant 0 : i32
    %11 = arith.cmpi ne, %10, %c0_i32_9 : i32
    scf.if %11 {
      %c0_10 = arith.constant 0 : index
      %c0_11 = arith.constant 0 : index
      %12 = vector.load %arg7[%c0_10, %c0_11] : memref<8x256xf32, #tpu.memory_space<vmem>>, vector<8x256xf32>
      %c0_12 = arith.constant 0 : index
      %c0_13 = arith.constant 0 : index
      %13 = vector.load %arg5[%c0_12, %c0_13] : memref<1x256xf32, #tpu.memory_space<vmem>>, vector<1x256xf32>
      %14 = vector.broadcast %13 : vector<1x256xf32> to vector<8x256xf32>
      %15 = arith.addf %12, %14 : vector<8x256xf32>
      %16 = arith.truncf %15 : vector<8x256xf32> to vector<8x256xbf16>
      %c0_14 = arith.constant 0 : index
      %c0_15 = arith.constant 0 : index
      %17 = vector.load %arg6[%c0_14, %c0_15] : memref<8x256xbf16, #tpu.memory_space<vmem>>, vector<8x256xbf16>
      tpu.vector_store %arg6[%c0_14, %c0_15], %16 {strides = array<i32>} : memref<8x256xbf16, #tpu.memory_space<vmem>>, vector<8x256xbf16>,
    } else {
    }
    return
  }
  func.func @transform_0(%arg0: i32, %arg1: i32, %arg2: i32) -> (i32, i32) {
    %c0_i32 = arith.constant 0 : i32
    return %arg0, %arg2 : i32, i32
  }
  func.func @transform_1(%arg0: i32, %arg1: i32, %arg2: i32) -> (i32, i32) {
    %c0_i32 = arith.constant 0 : i32
    return %arg2, %arg1 : i32, i32
  }
  func.func @transform_2(%arg0: i32, %arg1: i32, %arg2: i32) -> (i32, i32) {
    %c0_i32 = arith.constant 0 : i32
    %c0_i32_0 = arith.constant 0 : i32
    return %c0_i32, %arg1 : i32, i32
  }
  func.func @transform_3(%arg0: i32, %arg1: i32, %arg2: i32) -> (i32, i32) {
    %c0_i32 = arith.constant 0 : i32
    return %arg0, %arg1 : i32, i32
  }
}

module attributes {stable_mosaic.version = 11 : i64} {
  func.func @_fused_matmul_kernel(%arg0: i32, %arg1: i32, %arg2: i32, %arg3: memref<8x768xbf16, #tpu.memory_space<vmem>>, %arg4: memref<768x256xbf16, #tpu.memory_space<vmem>>, %arg5: memref<1x256xf32, #tpu.memory_space<vmem>>, %arg6: memref<8x256xbf16, #tpu.memory_space<vmem>>, %arg7: memref<8x256xf32, #tpu.memory_space<vmem>>) attributes {dimension_semantics = [#tpu.dimension_semantics<parallel>, #tpu.dimension_semantics<parallel>, #tpu.dimension_semantics<arbitrary>], iteration_bounds = array<i64: 1, 2, 3>, scalar_prefetch = 0 : i64, scratch_operands = 1 : i64, tpu.core_type = #tpu.core_type<tc>, window_params = [{transform_indices = @transform_0, window_bounds = array<i64: 8, 768>}, {transform_indices = @transform_1, window_bounds = array<i64: 768, 256>}, {transform_indices = @transform_2, window_bounds = array<i64: 1, 256>}, {transform_indices = @transform_3, window_bounds = array<i64: 8, 256>}]} {
    %c0_i32 = arith.constant 0 : i32
    %0 = arith.cmpi eq, %arg2, %c0_i32 : i32
    %1 = arith.extui %0 : i1 to i32
    %c0_i32_0 = arith.constant 0 : i32
    %2 = arith.cmpi ne, %1, %c0_i32_0 : i32
    scf.if %2 {
      %cst_9 = arith.constant 0.000000e+00 : f32
      %12 = vector.broadcast %cst_9 : f32 to vector<8x256xf32>
      %c0_10 = arith.constant 0 : index
      %c0_11 = arith.constant 0 : index
      %13 = vector.load %arg7[%c0_10, %c0_11] : memref<8x256xf32, #tpu.memory_space<vmem>>, vector<8x256xf32>
      tpu.vector_store %arg7[%c0_10, %c0_11], %12 {strides = array<i32>} : memref<8x256xf32, #tpu.memory_space<vmem>>, vector<8x256xf32>,
    } else {
    }
    %c0 = arith.constant 0 : index
    %c0_1 = arith.constant 0 : index
    %3 = vector.load %arg7[%c0, %c0_1] : memref<8x256xf32, #tpu.memory_space<vmem>>, vector<8x256xf32>
    %c0_2 = arith.constant 0 : index
    %c0_3 = arith.constant 0 : index
    %4 = vector.load %arg3[%c0_2, %c0_3] : memref<8x768xbf16, #tpu.memory_space<vmem>>, vector<8x768xbf16>
    %c0_4 = arith.constant 0 : index
    %c0_5 = arith.constant 0 : index
    %5 = vector.load %arg4[%c0_4, %c0_5] : memref<768x256xbf16, #tpu.memory_space<vmem>>, vector<768x256xbf16>
    %cst = arith.constant dense<0.000000e+00> : vector<8x256xf32>
    %6 = tpu.matmul %4, %5, %cst {dimension_numbers = #tpu.dot_dimension_numbers<[1], [0], [0], [1], [0, 0, 1, 1], [], []>} : vector<8x768xbf16>, vector<768x256xbf16>, vector<8x256xf32> -> vector<8x256xf32>
    %7 = arith.addf %3, %6 : vector<8x256xf32>
    %c0_6 = arith.constant 0 : index
    %c0_7 = arith.constant 0 : index
    %8 = vector.load %arg7[%c0_6, %c0_7] : memref<8x256xf32, #tpu.memory_space<vmem>>, vector<8x256xf32>
    tpu.vector_store %arg7[%c0_6, %c0_7], %7 {strides = array<i32>} : memref<8x256xf32, #tpu.memory_space<vmem>>, vector<8x256xf32>,
    %c2_i32 = arith.constant 2 : i32
    %9 = arith.cmpi eq, %arg2, %c2_i32 : i32
    %10 = arith.extui %9 : i1 to i32
    %c0_i32_8 = arith.constant 0 : i32
    %11 = arith.cmpi ne, %10, %c0_i32_8 : i32
    scf.if %11 {
      %c0_9 = arith.constant 0 : index
      %c0_10 = arith.constant 0 : index
      %12 = vector.load %arg7[%c0_9, %c0_10] : memref<8x256xf32, #tpu.memory_space<vmem>>, vector<8x256xf32>
      %c0_11 = arith.constant 0 : index
      %c0_12 = arith.constant 0 : index
      %13 = vector.load %arg5[%c0_11, %c0_12] : memref<1x256xf32, #tpu.memory_space<vmem>>, vector<1x256xf32>
      %14 = vector.broadcast %13 : vector<1x256xf32> to vector<8x256xf32>
      %15 = arith.addf %12, %14 : vector<8x256xf32>
      %cst_13 = arith.constant 0.000000e+00 : f32
      %16 = vector.broadcast %cst_13 : f32 to vector<8x256xf32>
      %17 = arith.maximumf %15, %16 : vector<8x256xf32>
      %18 = arith.truncf %17 : vector<8x256xf32> to vector<8x256xbf16>
      %c0_14 = arith.constant 0 : index
      %c0_15 = arith.constant 0 : index
      %19 = vector.load %arg6[%c0_14, %c0_15] : memref<8x256xbf16, #tpu.memory_space<vmem>>, vector<8x256xbf16>
      tpu.vector_store %arg6[%c0_14, %c0_15], %18 {strides = array<i32>} : memref<8x256xbf16, #tpu.memory_space<vmem>>, vector<8x256xbf16>,
    } else {
    }
    return
  }
  func.func @transform_0(%arg0: i32, %arg1: i32, %arg2: i32) -> (i32, i32) {
    %c0_i32 = arith.constant 0 : i32
    return %arg0, %arg2 : i32, i32
  }
  func.func @transform_1(%arg0: i32, %arg1: i32, %arg2: i32) -> (i32, i32) {
    %c0_i32 = arith.constant 0 : i32
    return %arg2, %arg1 : i32, i32
  }
  func.func @transform_2(%arg0: i32, %arg1: i32, %arg2: i32) -> (i32, i32) {
    %c0_i32 = arith.constant 0 : i32
    %c0_i32_0 = arith.constant 0 : i32
    return %c0_i32, %arg1 : i32, i32
  }
  func.func @transform_3(%arg0: i32, %arg1: i32, %arg2: i32) -> (i32, i32) {
    %c0_i32 = arith.constant 0 : i32
    return %arg0, %arg1 : i32, i32
  }
}

module attributes {stable_mosaic.version = 11 : i64} {
  func.func @_pool_fc_kernel(%arg0: memref<2x4x512xbf16, #tpu.memory_space<vmem>>, %arg1: memref<512x10xf32, #tpu.memory_space<vmem>>, %arg2: memref<1x10xf32, #tpu.memory_space<vmem>>, %arg3: memref<2x10xf32, #tpu.memory_space<vmem>>) attributes {dimension_semantics = [], scalar_prefetch = 0 : i64, scratch_operands = 0 : i64, tpu.core_type = #tpu.core_type<tc>} {
    %c0 = arith.constant 0 : index
    %c0_0 = arith.constant 0 : index
    %c0_1 = arith.constant 0 : index
    %0 = vector.load %arg0[%c0, %c0_0, %c0_1] : memref<2x4x512xbf16, #tpu.memory_space<vmem>>, vector<2x4x512xbf16>
    %1 = arith.extf %0 : vector<2x4x512xbf16> to vector<2x4x512xf32>
    %cst = arith.constant dense<0.000000e+00> : vector<2x512xf32>
    %2 = vector.multi_reduction <add>, %1, %cst [1] : vector<2x4x512xf32> to vector<2x512xf32>
    %c0_2 = arith.constant 0 : index
    %c0_3 = arith.constant 0 : index
    %3 = vector.load %arg1[%c0_2, %c0_3] : memref<512x10xf32, #tpu.memory_space<vmem>>, vector<512x10xf32>
    %cst_4 = arith.constant dense<0.000000e+00> : vector<2x10xf32>
    %4 = tpu.matmul %2, %3, %cst_4 {dimension_numbers = #tpu.dot_dimension_numbers<[1], [0], [0], [1], [0, 0, 1, 1], [], []>} : vector<2x512xf32>, vector<512x10xf32>, vector<2x10xf32> -> vector<2x10xf32>
    %c0_5 = arith.constant 0 : index
    %c0_6 = arith.constant 0 : index
    %5 = vector.load %arg2[%c0_5, %c0_6] : memref<1x10xf32, #tpu.memory_space<vmem>>, vector<1x10xf32>
    %6 = vector.broadcast %5 : vector<1x10xf32> to vector<2x10xf32>
    %7 = arith.addf %4, %6 : vector<2x10xf32>
    %c0_7 = arith.constant 0 : index
    %c0_8 = arith.constant 0 : index
    %8 = vector.load %arg3[%c0_7, %c0_8] : memref<2x10xf32, #tpu.memory_space<vmem>>, vector<2x10xf32>
    tpu.vector_store %arg3[%c0_7, %c0_8], %7 {strides = array<i32>} : memref<2x10xf32, #tpu.memory_space<vmem>>, vector<2x10xf32>,
    return
  }
}

module attributes {stable_mosaic.version = 11 : i64} {
  func.func @_fused_matmul_kernel(%arg0: i32, %arg1: i32, %arg2: i32, %arg3: memref<8x768xbf16, #tpu.memory_space<vmem>>, %arg4: memref<768x256xbf16, #tpu.memory_space<vmem>>, %arg5: memref<1x256xf32, #tpu.memory_space<vmem>>, %arg6: memref<8x256xbf16, #tpu.memory_space<vmem>>, %arg7: memref<8x256xbf16, #tpu.memory_space<vmem>>, %arg8: memref<8x256xf32, #tpu.memory_space<vmem>>) attributes {dimension_semantics = [#tpu.dimension_semantics<parallel>, #tpu.dimension_semantics<parallel>, #tpu.dimension_semantics<arbitrary>], iteration_bounds = array<i64: 1, 2, 6>, scalar_prefetch = 0 : i64, scratch_operands = 1 : i64, tpu.core_type = #tpu.core_type<tc>, window_params = [{transform_indices = @transform_0, window_bounds = array<i64: 8, 768>}, {transform_indices = @transform_1, window_bounds = array<i64: 768, 256>}, {transform_indices = @transform_2, window_bounds = array<i64: 1, 256>}, {transform_indices = @transform_3, window_bounds = array<i64: 8, 256>}, {transform_indices = @transform_4, window_bounds = array<i64: 8, 256>}]} {
    %c0_i32 = arith.constant 0 : i32
    %0 = arith.cmpi eq, %arg2, %c0_i32 : i32
    %1 = arith.extui %0 : i1 to i32
    %c0_i32_0 = arith.constant 0 : i32
    %2 = arith.cmpi ne, %1, %c0_i32_0 : i32
    scf.if %2 {
      %cst_9 = arith.constant 0.000000e+00 : f32
      %12 = vector.broadcast %cst_9 : f32 to vector<8x256xf32>
      %c0_10 = arith.constant 0 : index
      %c0_11 = arith.constant 0 : index
      %13 = vector.load %arg8[%c0_10, %c0_11] : memref<8x256xf32, #tpu.memory_space<vmem>>, vector<8x256xf32>
      tpu.vector_store %arg8[%c0_10, %c0_11], %12 {strides = array<i32>} : memref<8x256xf32, #tpu.memory_space<vmem>>, vector<8x256xf32>,
    } else {
    }
    %c0 = arith.constant 0 : index
    %c0_1 = arith.constant 0 : index
    %3 = vector.load %arg8[%c0, %c0_1] : memref<8x256xf32, #tpu.memory_space<vmem>>, vector<8x256xf32>
    %c0_2 = arith.constant 0 : index
    %c0_3 = arith.constant 0 : index
    %4 = vector.load %arg3[%c0_2, %c0_3] : memref<8x768xbf16, #tpu.memory_space<vmem>>, vector<8x768xbf16>
    %c0_4 = arith.constant 0 : index
    %c0_5 = arith.constant 0 : index
    %5 = vector.load %arg4[%c0_4, %c0_5] : memref<768x256xbf16, #tpu.memory_space<vmem>>, vector<768x256xbf16>
    %cst = arith.constant dense<0.000000e+00> : vector<8x256xf32>
    %6 = tpu.matmul %4, %5, %cst {dimension_numbers = #tpu.dot_dimension_numbers<[1], [0], [0], [1], [0, 0, 1, 1], [], []>} : vector<8x768xbf16>, vector<768x256xbf16>, vector<8x256xf32> -> vector<8x256xf32>
    %7 = arith.addf %3, %6 : vector<8x256xf32>
    %c0_6 = arith.constant 0 : index
    %c0_7 = arith.constant 0 : index
    %8 = vector.load %arg8[%c0_6, %c0_7] : memref<8x256xf32, #tpu.memory_space<vmem>>, vector<8x256xf32>
    tpu.vector_store %arg8[%c0_6, %c0_7], %7 {strides = array<i32>} : memref<8x256xf32, #tpu.memory_space<vmem>>, vector<8x256xf32>,
    %c5_i32 = arith.constant 5 : i32
    %9 = arith.cmpi eq, %arg2, %c5_i32 : i32
    %10 = arith.extui %9 : i1 to i32
    %c0_i32_8 = arith.constant 0 : i32
    %11 = arith.cmpi ne, %10, %c0_i32_8 : i32
    scf.if %11 {
      %c0_9 = arith.constant 0 : index
      %c0_10 = arith.constant 0 : index
      %12 = vector.load %arg8[%c0_9, %c0_10] : memref<8x256xf32, #tpu.memory_space<vmem>>, vector<8x256xf32>
      %c0_11 = arith.constant 0 : index
      %c0_12 = arith.constant 0 : index
      %13 = vector.load %arg5[%c0_11, %c0_12] : memref<1x256xf32, #tpu.memory_space<vmem>>, vector<1x256xf32>
      %14 = vector.broadcast %13 : vector<1x256xf32> to vector<8x256xf32>
      %15 = arith.addf %12, %14 : vector<8x256xf32>
      %c0_13 = arith.constant 0 : index
      %c0_14 = arith.constant 0 : index
      %16 = vector.load %arg6[%c0_13, %c0_14] : memref<8x256xbf16, #tpu.memory_space<vmem>>, vector<8x256xbf16>
      %17 = arith.extf %16 : vector<8x256xbf16> to vector<8x256xf32>
      %18 = arith.addf %15, %17 : vector<8x256xf32>
      %cst_15 = arith.constant 0.000000e+00 : f32
      %19 = vector.broadcast %cst_15 : f32 to vector<8x256xf32>
      %20 = arith.maximumf %18, %19 : vector<8x256xf32>
      %21 = arith.truncf %20 : vector<8x256xf32> to vector<8x256xbf16>
      %c0_16 = arith.constant 0 : index
      %c0_17 = arith.constant 0 : index
      %22 = vector.load %arg7[%c0_16, %c0_17] : memref<8x256xbf16, #tpu.memory_space<vmem>>, vector<8x256xbf16>
      tpu.vector_store %arg7[%c0_16, %c0_17], %21 {strides = array<i32>} : memref<8x256xbf16, #tpu.memory_space<vmem>>, vector<8x256xbf16>,
    } else {
    }
    return
  }
  func.func @transform_0(%arg0: i32, %arg1: i32, %arg2: i32) -> (i32, i32) {
    %c0_i32 = arith.constant 0 : i32
    return %arg0, %arg2 : i32, i32
  }
  func.func @transform_1(%arg0: i32, %arg1: i32, %arg2: i32) -> (i32, i32) {
    %c0_i32 = arith.constant 0 : i32
    return %arg2, %arg1 : i32, i32
  }
  func.func @transform_2(%arg0: i32, %arg1: i32, %arg2: i32) -> (i32, i32) {
    %c0_i32 = arith.constant 0 : i32
    %c0_i32_0 = arith.constant 0 : i32
    return %c0_i32, %arg1 : i32, i32
  }
  func.func @transform_3(%arg0: i32, %arg1: i32, %arg2: i32) -> (i32, i32) {
    %c0_i32 = arith.constant 0 : i32
    return %arg0, %arg1 : i32, i32
  }
  func.func @transform_4(%arg0: i32, %arg1: i32, %arg2: i32) -> (i32, i32) {
    %c0_i32 = arith.constant 0 : i32
    return %arg0, %arg1 : i32, i32
  }
}

</mosaic_0001>

<bundles_post_ra>
// kernel: _lambda_.13
= control target key start
LH: loop header
LB: loop body
LE: loop exit
PB: predicated region body
PF: predicated region fallthrough
CT: control target
= control target key end

     0   :  { %s2251_s1 = inlined_call_operand.vmem [shape: bf16[128,128], index: 1, kind: input, shape index: {}]   ;;  %s2252_s0 = inlined_call_operand.vmem [shape: bf16[512,128], index: 0, kind: input, shape index: {}]   ;;  %s2253_s2 = inlined_call_operand.vmem [shape: f32[1,128], index: 2, kind: input, shape index: {}]   ;;  %s2254_s3 = inlined_call_operand.vmem [shape: bf16[512,128], index: 3, kind: output, shape index: {}]  }
   0x1   :  { %v1906_v0 = vld [vmem:[%s2251_s1 + $0x38] sm:$0xff]   ;;  %v1907_v1 = vld [vmem:[%s2251_s1 + $0x30] sm:$0xff]   ;;  %v1908_v2 = vld [vmem:[%s2251_s1 + $0x28] sm:$0xff]  }
   0x2   :  { %1810 = vmatprep.subr.bf16.mxu0 %v1906_v0  ;;  %1890 = vmatprep.subr.bf16.mxu1 %v1906_v0  ;;  %v1909_v3 = vld [vmem:[%s2251_s1 + $0x20] sm:$0xff]   ;;  %v1910_v6 = vld [vmem:[%s2251_s1 + $0x18] sm:$0xff]   ;;  %v1911_v7 = vld [vmem:[%s2251_s1 + $0x10] sm:$0xff]  }
   0x3   :  { %1811 = vmatpush3.bf16.msra.mxu0 %v1906_v0  ;;  %1898 = vmatpush3.bf16.msra.mxu1 %v1906_v0  ;;  %v1914_v4 = vld [vmem:[%s2252_s0] sm:$0xff]   ;;  %v1912_v8 = vld [vmem:[%s2251_s1 + $0x8] sm:$0xff]   ;;  %v1918_v12 = vld [vmem:[%s2252_s0 + $0x10] sm:$0xff]  }
   0x4   :  { %1812 = vmatprep.subr.bf16.mxu0 %v1907_v1  ;;  %1891 = vmatprep.subr.bf16.mxu1 %v1907_v1  ;;  %v1915_v5 = vld [vmem:[%s2252_s0 + $0x80] sm:$0xff]   ;;  %v1916_v10 = vld [vmem:[%s2252_s0 + $0x8] sm:$0xff]   ;;  %v1919_v13 = vld [vmem:[%s2252_s0 + $0x90] sm:$0xff]  }
   0x5   :  { %1826 = vmatprep.mubr.bf16.mxu0 %v1914_v4  ;;  %1858 = vmatprep.mubr.bf16.mxu1 %v1915_v5  ;;  %v1913_v9 = vld [vmem:[%s2251_s1] sm:$0xff]   ;;  %v1917_v11 = vld [vmem:[%s2252_s0 + $0x88] sm:$0xff]   ;;  %v1920_v14 = vld [vmem:[%s2252_s0 + $0x18] sm:$0xff]  }
   0x6   :  { %v1921_v15 = vld [vmem:[%s2252_s0 + $0x98] sm:$0xff]   ;;  %v1922_v16 = vld [vmem:[%s2252_s0 + $0x20] sm:$0xff]   ;;  %v1924_v18 = vld [vmem:[%s2252_s0 + $0x28] sm:$0xff]  }
   0x7   :  { %1813 = vmatpush3.bf16.msra.mxu0 %v1907_v1  ;;  %1899 = vmatpush3.bf16.msra.mxu1 %v1907_v1  ;;  %v1923_v17 = vld [vmem:[%s2252_s0 + $0xa0] sm:$0xff]   ;;  %v1925_v19 = vld [vmem:[%s2252_s0 + $0xa8] sm:$0xff]   ;;  %v1926_v20 = vld [vmem:[%s2252_s0 + $0x30] sm:$0xff]  }
   0x8   :  { %1814 = vmatprep.subr.bf16.mxu0 %v1908_v2  ;;  %1892 = vmatprep.subr.bf16.mxu1 %v1908_v2  ;;  %v1927_v21 = vld [vmem:[%s2252_s0 + $0xb0] sm:$0xff]   ;;  %v1928_v22 = vld [vmem:[%s2252_s0 + $0x38] sm:$0xff]   ;;  %v1930_v24 = vld [vmem:[%s2252_s0 + $0x40] sm:$0xff]  }
   0x9   :  { %v1929_v23 = vld [vmem:[%s2252_s0 + $0xb8] sm:$0xff]   ;;  %v1931_v25 = vld [vmem:[%s2252_s0 + $0xc0] sm:$0xff]   ;;  %v1932_v26 = vld [vmem:[%s2252_s0 + $0x48] sm:$0xff]  }
   0xa   :  { %v1933_v27 = vld [vmem:[%s2252_s0 + $0xc8] sm:$0xff]   ;;  %v1934_v28 = vld [vmem:[%s2252_s0 + $0x50] sm:$0xff]   ;;  %v1936_v30 = vld [vmem:[%s2252_s0 + $0x58] sm:$0xff]  }
   0xb   :  { %1815 = vmatpush3.bf16.msra.mxu0 %v1908_v2  ;;  %1900 = vmatpush3.bf16.msra.mxu1 %v1908_v2  ;;  %v1935_v29 = vld [vmem:[%s2252_s0 + $0xd0] sm:$0xff]   ;;  %v1937_v31 = vld [vmem:[%s2252_s0 + $0xd8] sm:$0xff]   ;;  %v1938_v32 = vld [vmem:[%s2252_s0 + $0x60] sm:$0xff]  }
   0xc   :  { %1816 = vmatprep.subr.bf16.mxu0 %v1909_v3  ;;  %1893 = vmatprep.subr.bf16.mxu1 %v1909_v3  ;;  %v1939_v33 = vld [vmem:[%s2252_s0 + $0xe0] sm:$0xff]   ;;  %v1940_v34 = vld [vmem:[%s2252_s0 + $0x68] sm:$0xff]   ;;  %v1942_v36 = vld [vmem:[%s2252_s0 + $0x70] sm:$0xff]  }
   0xd   :  { %v1941_v35 = vld [vmem:[%s2252_s0 + $0xe8] sm:$0xff]   ;;  %v1943_v37 = vld [vmem:[%s2252_s0 + $0xf0] sm:$0xff]   ;;  %v1944_v38 = vld [vmem:[%s2252_s0 + $0x78] sm:$0xff]  }
   0xe   :  { %v1945_v39 = vld [vmem:[%s2252_s0 + $0xf8] sm:$0xff]   ;;  %v2089_v40 = vld [vmem:[%s2253_s2] ss:$0 sm:$0xff] }
   0xf   :  { %1817 = vmatpush3.bf16.msra.mxu0 %v1909_v3  ;;  %1901 = vmatpush3.bf16.msra.mxu1 %v1909_v3 }
  0x10   :  { %1818 = vmatprep.subr.bf16.mxu0 %v1910_v6  ;;  %1894 = vmatprep.subr.bf16.mxu1 %v1910_v6 }
  0x13   :  { %1819 = vmatpush3.bf16.msra.mxu0 %v1910_v6  ;;  %1902 = vmatpush3.bf16.msra.mxu1 %v1910_v6 }
  0x14   :  { %1820 = vmatprep.subr.bf16.mxu0 %v1911_v7  ;;  %1895 = vmatprep.subr.bf16.mxu1 %v1911_v7 }
  0x17   :  { %1821 = vmatpush3.bf16.msra.mxu0 %v1911_v7  ;;  %1903 = vmatpush3.bf16.msra.mxu1 %v1911_v7 }
  0x18   :  { %1822 = vmatprep.subr.bf16.mxu0 %v1912_v8  ;;  %1896 = vmatprep.subr.bf16.mxu1 %v1912_v8 }
  0x1b   :  { %1823 = vmatpush3.bf16.msra.mxu0 %v1912_v8  ;;  %1904 = vmatpush3.bf16.msra.mxu1 %v1912_v8 }
  0x1c   :  { %1824 = vmatprep.subr.bf16.mxu0 %v1913_v9  ;;  %1897 = vmatprep.subr.bf16.mxu1 %v1913_v9 }
  0x1f   :  { %1825 = vmatpush3.bf16.msra.mxu0 %v1913_v9  ;;  %1905 = vmatpush3.bf16.msra.mxu1 %v1913_v9 }
  0x22   :  { %1827 = vmatmul.mubr.bf16.vlgmr.msra.gmra.mxu0 %v1916_v10  ;;  %1859 = vmatmul.mubr.bf16.vlgmr.msra.gmra.mxu1 %v1917_v11 }
  0x23   :  { %1830 = vmatprep.mubr.bf16.mxu0 %v1918_v12  ;;  %1862 = vmatprep.mubr.bf16.mxu1 %v1919_v13 }
  0x2a   :  { %1831 = vmatmul.mubr.bf16.gmra.mxu0 %v1920_v14  ;;  %1863 = vmatmul.mubr.bf16.gmra.mxu1 %v1921_v15 }
  0x2b   :  { %1834 = vmatprep.mubr.bf16.mxu0 %v1922_v16  ;;  %1866 = vmatprep.mubr.bf16.mxu1 %v1923_v17 }
  0x32   :  { %1835 = vmatmul.mubr.bf16.gmra.mxu0 %v1924_v18  ;;  %1867 = vmatmul.mubr.bf16.gmra.mxu1 %v1925_v19 }
  0x33   :  { %1838 = vmatprep.mubr.bf16.mxu0 %v1926_v20  ;;  %1870 = vmatprep.mubr.bf16.mxu1 %v1927_v21 }
  0x3a   :  { %1839 = vmatmul.mubr.bf16.gmra.mxu0 %v1928_v22  ;;  %1871 = vmatmul.mubr.bf16.gmra.mxu1 %v1929_v23 }
  0x3b   :  { %1842 = vmatprep.mubr.bf16.mxu0 %v1930_v24  ;;  %1874 = vmatprep.mubr.bf16.mxu1 %v1931_v25 }
  0x42   :  { %1843 = vmatmul.mubr.bf16.gmra.mxu0 %v1932_v26  ;;  %1875 = vmatmul.mubr.bf16.gmra.mxu1 %v1933_v27 }
  0x43   :  { %1846 = vmatprep.mubr.bf16.mxu0 %v1934_v28  ;;  %1878 = vmatprep.mubr.bf16.mxu1 %v1935_v29 }
  0x4a   :  { %1847 = vmatmul.mubr.bf16.gmra.mxu0 %v1936_v30  ;;  %1879 = vmatmul.mubr.bf16.gmra.mxu1 %v1937_v31 }
  0x4b   :  { %1850 = vmatprep.mubr.bf16.mxu0 %v1938_v32  ;;  %1882 = vmatprep.mubr.bf16.mxu1 %v1939_v33 }
  0x52   :  { %1851 = vmatmul.mubr.bf16.gmra.mxu0 %v1940_v34  ;;  %1883 = vmatmul.mubr.bf16.gmra.mxu1 %v1941_v35 }
  0x53   :  { %1854 = vmatprep.mubr.bf16.mxu0 %v1942_v36  ;;  %1886 = vmatprep.mubr.bf16.mxu1 %v1943_v37 }
  0x5a   :  { %1855 = vmatmul.mubr.bf16.gmra.mxu0 %v1944_v38  ;;  %1887 = vmatmul.mubr.bf16.gmra.mxu1 %v1945_v39 }
  0xe2   :  { %v1828_v41 = vpop.f32.mrf.mxu0  ;;  %v1860_v42 = vpop.f32.mrf.mxu1 }
  0xe3   :  { %v960_v43 = vadd.f32 %v1828_v41, %v2089_v40  ;;  %v992_v44 = vadd.f32 %v1860_v42, %v2089_v40 }
  0xe4   :  { %v501_v45 = vpop.f32.mrf.mxu0  ;;  %v629_v46 = vpop.f32.mrf.mxu1 }
  0xe5   :  { %v958_v47 = vadd.f32 %v2089_v40, %v501_v45  ;;  %v990_v48 = vadd.f32 %v2089_v40, %v629_v46  ;;  %v1024_v53 = vmax.f32 %v960_v43, 0.0  ;;  %v1056_v54 = vmax.f32 %v992_v44, 0.0 }
  0xe6   :  { %v1829_v49 = vpop.f32.mrf.mxu0  ;;  %v1861_v50 = vpop.f32.mrf.mxu1 }
  0xe7   :  { %v961_v51 = vadd.f32 %v1829_v49, %v2089_v40  ;;  %v993_v52 = vadd.f32 %v1861_v50, %v2089_v40  ;;  %v1022_v61 = vmax.f32 %v958_v47, 0.0  ;;  %v1054_v62 = vmax.f32 %v990_v48, 0.0 }
  0xe8   :  { %v504_v55 = vpop.f32.mrf.mxu0  ;;  %v632_v56 = vpop.f32.mrf.mxu1 }
  0xe9   :  { %v1025_v57 = vmax.f32 %v961_v51, 0.0  ;;  %v1057_v58 = vmax.f32 %v993_v52, 0.0  ;;  %v959_v59 = vadd.f32 %v2089_v40, %v504_v55  ;;  %v991_v60 = vadd.f32 %v2089_v40, %v632_v56 }
  0xea   :  { %v1832_v63 = vpop.f32.mrf.mxu0  ;;  %v1864_v0 = vpop.f32.mrf.mxu1 }
  0xeb   :  { %v1587_v1 = vpack.c.bf16 %v1025_v57, %v1024_v53  ;;  %v1667_v2 = vpack.c.bf16 %v1057_v58, %v1056_v54  ;;  %v1023_v3 = vmax.f32 %v959_v59, 0.0  ;;  %v1055_v4 = vmax.f32 %v991_v60, 0.0 }
  0xec   :  { %v964_v5 = vadd.f32 %v1832_v63, %v2089_v40  ;;  %v996_v6 = vadd.f32 %v1864_v0, %v2089_v40  ;;  %v517_v7 = vpop.f32.mrf.mxu0  ;;  %v645_v8 = vpop.f32.mrf.mxu1 }
  0xed   :  { %1739 = vst [vmem:[%s2254_s3 + $0x8] sm:$0xff] %v1587_v1   ;;  %1755 = vst [vmem:[%s2254_s3 + $0x88] sm:$0xff] %v1667_v2   ;;  %v1582_v9 = vpack.c.bf16 %v1023_v3, %v1022_v61  ;;  %v1662_v10 = vpack.c.bf16 %v1055_v4, %v1054_v62  ;;  %v962_v11 = vadd.f32 %v2089_v40, %v517_v7 }
  0xee   :  { %v994_v12 = vadd.f32 %v2089_v40, %v645_v8  ;;  %v1833_v13 = vpop.f32.mrf.mxu0  ;;  %v1865_v14 = vpop.f32.mrf.mxu1  ;;  %v1028_v17 = vmax.f32 %v964_v5, 0.0  ;;  %v1060_v18 = vmax.f32 %v996_v6, 0.0 }
  0xef   :  { %1583 = vst [vmem:[%s2254_s3] sm:$0xff] %v1582_v9   ;;  %1754 = vst [vmem:[%s2254_s3 + $0x80] sm:$0xff] %v1662_v10   ;;  %v965_v15 = vadd.f32 %v1833_v13, %v2089_v40  ;;  %v997_v16 = vadd.f32 %v1865_v14, %v2089_v40  ;;  %v1026_v25 = vmax.f32 %v962_v11, 0.0 }
  0xf0   :  { %v520_v19 = vpop.f32.mrf.mxu0  ;;  %v648_v20 = vpop.f32.mrf.mxu1  ;;  %v1058_v26 = vmax.f32 %v994_v12, 0.0 }
  0xf1   :  { %v1029_v21 = vmax.f32 %v965_v15, 0.0  ;;  %v1061_v22 = vmax.f32 %v997_v16, 0.0  ;;  %v963_v23 = vadd.f32 %v2089_v40, %v520_v19  ;;  %v995_v24 = vadd.f32 %v2089_v40, %v648_v20 }
  0xf2   :  { %v1836_v27 = vpop.f32.mrf.mxu0  ;;  %v1868_v28 = vpop.f32.mrf.mxu1 }
  0xf3   :  { %v1597_v29 = vpack.c.bf16 %v1029_v21, %v1028_v17  ;;  %v1677_v30 = vpack.c.bf16 %v1061_v22, %v1060_v18  ;;  %v1027_v31 = vmax.f32 %v963_v23, 0.0  ;;  %v1059_v32 = vmax.f32 %v995_v24, 0.0 }
  0xf4   :  { %v968_v33 = vadd.f32 %v1836_v27, %v2089_v40  ;;  %v1000_v34 = vadd.f32 %v1868_v28, %v2089_v40  ;;  %v533_v35 = vpop.f32.mrf.mxu0  ;;  %v661_v36 = vpop.f32.mrf.mxu1 }
  0xf5   :  { %1741 = vst [vmem:[%s2254_s3 + $0x18] sm:$0xff] %v1597_v29   ;;  %1757 = vst [vmem:[%s2254_s3 + $0x98] sm:$0xff] %v1677_v30   ;;  %v1592_v37 = vpack.c.bf16 %v1027_v31, %v1026_v25  ;;  %v1672_v38 = vpack.c.bf16 %v1059_v32, %v1058_v26  ;;  %v966_v39 = vadd.f32 %v2089_v40, %v533_v35 }
  0xf6   :  { %v998_v41 = vadd.f32 %v2089_v40, %v661_v36  ;;  %v1837_v42 = vpop.f32.mrf.mxu0  ;;  %v1869_v43 = vpop.f32.mrf.mxu1  ;;  %v1032_v46 = vmax.f32 %v968_v33, 0.0  ;;  %v1064_v47 = vmax.f32 %v1000_v34, 0.0 }
  0xf7   :  { %1740 = vst [vmem:[%s2254_s3 + $0x10] sm:$0xff] %v1592_v37   ;;  %1756 = vst [vmem:[%s2254_s3 + $0x90] sm:$0xff] %v1672_v38   ;;  %v969_v44 = vadd.f32 %v1837_v42, %v2089_v40  ;;  %v1001_v45 = vadd.f32 %v1869_v43, %v2089_v40  ;;  %v1030_v54 = vmax.f32 %v966_v39, 0.0 }
  0xf8   :  { %v536_v48 = vpop.f32.mrf.mxu0  ;;  %v664_v49 = vpop.f32.mrf.mxu1  ;;  %v1062_v55 = vmax.f32 %v998_v41, 0.0 }
  0xf9   :  { %v1033_v50 = vmax.f32 %v969_v44, 0.0  ;;  %v1065_v51 = vmax.f32 %v1001_v45, 0.0  ;;  %v967_v52 = vadd.f32 %v2089_v40, %v536_v48  ;;  %v999_v53 = vadd.f32 %v2089_v40, %v664_v49 }
  0xfa   :  { %v1840_v56 = vpop.f32.mrf.mxu0  ;;  %v1872_v57 = vpop.f32.mrf.mxu1 }
  0xfb   :  { %v1607_v58 = vpack.c.bf16 %v1033_v50, %v1032_v46  ;;  %v1687_v59 = vpack.c.bf16 %v1065_v51, %v1064_v47  ;;  %v1031_v60 = vmax.f32 %v967_v52, 0.0  ;;  %v1063_v61 = vmax.f32 %v999_v53, 0.0 }
  0xfc   :  { %v972_v62 = vadd.f32 %v1840_v56, %v2089_v40  ;;  %v1004_v63 = vadd.f32 %v1872_v57, %v2089_v40  ;;  %v549_v0 = vpop.f32.mrf.mxu0  ;;  %v677_v1 = vpop.f32.mrf.mxu1 }
  0xfd   :  { %1743 = vst [vmem:[%s2254_s3 + $0x28] sm:$0xff] %v1607_v58   ;;  %1759 = vst [vmem:[%s2254_s3 + $0xa8] sm:$0xff] %v1687_v59   ;;  %v1602_v2 = vpack.c.bf16 %v1031_v60, %v1030_v54  ;;  %v1682_v3 = vpack.c.bf16 %v1063_v61, %v1062_v55  ;;  %v970_v4 = vadd.f32 %v2089_v40, %v549_v0 }
  0xfe   :  { %v1002_v5 = vadd.f32 %v2089_v40, %v677_v1  ;;  %v1841_v6 = vpop.f32.mrf.mxu0  ;;  %v1873_v7 = vpop.f32.mrf.mxu1  ;;  %v1036_v10 = vmax.f32 %v972_v62, 0.0  ;;  %v1068_v11 = vmax.f32 %v1004_v63, 0.0 }
  0xff   :  { %1742 = vst [vmem:[%s2254_s3 + $0x20] sm:$0xff] %v1602_v2   ;;  %1758 = vst [vmem:[%s2254_s3 + $0xa0] sm:$0xff] %v1682_v3   ;;  %v973_v8 = vadd.f32 %v1841_v6, %v2089_v40  ;;  %v1005_v9 = vadd.f32 %v1873_v7, %v2089_v40  ;;  %v1034_v18 = vmax.f32 %v970_v4, 0.0 }
 0x100   :  { %v552_v12 = vpop.f32.mrf.mxu0  ;;  %v680_v13 = vpop.f32.mrf.mxu1  ;;  %v1066_v19 = vmax.f32 %v1002_v5, 0.0 }
 0x101   :  { %v1037_v14 = vmax.f32 %v973_v8, 0.0  ;;  %v1069_v15 = vmax.f32 %v1005_v9, 0.0  ;;  %v971_v16 = vadd.f32 %v2089_v40, %v552_v12  ;;  %v1003_v17 = vadd.f32 %v2089_v40, %v680_v13 }
 0x102   :  { %v1844_v20 = vpop.f32.mrf.mxu0  ;;  %v1876_v21 = vpop.f32.mrf.mxu1 }
 0x103   :  { %v1617_v22 = vpack.c.bf16 %v1037_v14, %v1036_v10  ;;  %v1697_v23 = vpack.c.bf16 %v1069_v15, %v1068_v11  ;;  %v1035_v24 = vmax.f32 %v971_v16, 0.0  ;;  %v1067_v25 = vmax.f32 %v1003_v17, 0.0 }
 0x104   :  { %v976_v26 = vadd.f32 %v1844_v20, %v2089_v40  ;;  %v1008_v27 = vadd.f32 %v1876_v21, %v2089_v40  ;;  %v565_v28 = vpop.f32.mrf.mxu0  ;;  %v693_v29 = vpop.f32.mrf.mxu1 }
 0x105   :  { %1745 = vst [vmem:[%s2254_s3 + $0x38] sm:$0xff] %v1617_v22   ;;  %1761 = vst [vmem:[%s2254_s3 + $0xb8] sm:$0xff] %v1697_v23   ;;  %v1612_v30 = vpack.c.bf16 %v1035_v24, %v1034_v18  ;;  %v1692_v31 = vpack.c.bf16 %v1067_v25, %v1066_v19  ;;  %v974_v32 = vadd.f32 %v2089_v40, %v565_v28 }
 0x106   :  { %v1006_v33 = vadd.f32 %v2089_v40, %v693_v29  ;;  %v1845_v34 = vpop.f32.mrf.mxu0  ;;  %v1877_v35 = vpop.f32.mrf.mxu1  ;;  %v1040_v38 = vmax.f32 %v976_v26, 0.0  ;;  %v1072_v39 = vmax.f32 %v1008_v27, 0.0 }
 0x107   :  { %1744 = vst [vmem:[%s2254_s3 + $0x30] sm:$0xff] %v1612_v30   ;;  %1760 = vst [vmem:[%s2254_s3 + $0xb0] sm:$0xff] %v1692_v31   ;;  %v977_v36 = vadd.f32 %v1845_v34, %v2089_v40  ;;  %v1009_v37 = vadd.f32 %v1877_v35, %v2089_v40  ;;  %v1038_v47 = vmax.f32 %v974_v32, 0.0 }
 0x108   :  { %v568_v41 = vpop.f32.mrf.mxu0  ;;  %v696_v42 = vpop.f32.mrf.mxu1  ;;  %v1070_v48 = vmax.f32 %v1006_v33, 0.0 }
 0x109   :  { %v1041_v43 = vmax.f32 %v977_v36, 0.0  ;;  %v1073_v44 = vmax.f32 %v1009_v37, 0.0  ;;  %v975_v45 = vadd.f32 %v2089_v40, %v568_v41  ;;  %v1007_v46 = vadd.f32 %v2089_v40, %v696_v42 }
 0x10a   :  { %v1848_v49 = vpop.f32.mrf.mxu0  ;;  %v1880_v50 = vpop.f32.mrf.mxu1 }
 0x10b   :  { %v1627_v51 = vpack.c.bf16 %v1041_v43, %v1040_v38  ;;  %v1707_v52 = vpack.c.bf16 %v1073_v44, %v1072_v39  ;;  %v1039_v53 = vmax.f32 %v975_v45, 0.0  ;;  %v1071_v54 = vmax.f32 %v1007_v46, 0.0 }
 0x10c   :  { %v980_v55 = vadd.f32 %v1848_v49, %v2089_v40  ;;  %v1012_v56 = vadd.f32 %v1880_v50, %v2089_v40  ;;  %v581_v57 = vpop.f32.mrf.mxu0  ;;  %v709_v58 = vpop.f32.mrf.mxu1 }
 0x10d   :  { %1747 = vst [vmem:[%s2254_s3 + $0x48] sm:$0xff] %v1627_v51   ;;  %1763 = vst [vmem:[%s2254_s3 + $0xc8] sm:$0xff] %v1707_v52   ;;  %v1622_v59 = vpack.c.bf16 %v1039_v53, %v1038_v47  ;;  %v1702_v60 = vpack.c.bf16 %v1071_v54, %v1070_v48  ;;  %v978_v61 = vadd.f32 %v2089_v40, %v581_v57 }
 0x10e   :  { %v1010_v62 = vadd.f32 %v2089_v40, %v709_v58  ;;  %v1849_v63 = vpop.f32.mrf.mxu0  ;;  %v1881_v0 = vpop.f32.mrf.mxu1  ;;  %v1044_v3 = vmax.f32 %v980_v55, 0.0  ;;  %v1076_v4 = vmax.f32 %v1012_v56, 0.0 }
 0x10f   :  { %1746 = vst [vmem:[%s2254_s3 + $0x40] sm:$0xff] %v1622_v59   ;;  %1762 = vst [vmem:[%s2254_s3 + $0xc0] sm:$0xff] %v1702_v60   ;;  %v981_v1 = vadd.f32 %v1849_v63, %v2089_v40  ;;  %v1013_v2 = vadd.f32 %v1881_v0, %v2089_v40  ;;  %v1042_v11 = vmax.f32 %v978_v61, 0.0 }
 0x110   :  { %v584_v5 = vpop.f32.mrf.mxu0  ;;  %v712_v6 = vpop.f32.mrf.mxu1  ;;  %v1074_v12 = vmax.f32 %v1010_v62, 0.0 }
 0x111   :  { %v1045_v7 = vmax.f32 %v981_v1, 0.0  ;;  %v1077_v8 = vmax.f32 %v1013_v2, 0.0  ;;  %v979_v9 = vadd.f32 %v2089_v40, %v584_v5  ;;  %v1011_v10 = vadd.f32 %v2089_v40, %v712_v6 }
 0x112   :  { %v1852_v13 = vpop.f32.mrf.mxu0  ;;  %v1884_v14 = vpop.f32.mrf.mxu1 }
 0x113   :  { %v1637_v15 = vpack.c.bf16 %v1045_v7, %v1044_v3  ;;  %v1717_v16 = vpack.c.bf16 %v1077_v8, %v1076_v4  ;;  %v1043_v17 = vmax.f32 %v979_v9, 0.0  ;;  %v1075_v18 = vmax.f32 %v1011_v10, 0.0 }
 0x114   :  { %v984_v19 = vadd.f32 %v1852_v13, %v2089_v40  ;;  %v1016_v20 = vadd.f32 %v1884_v14, %v2089_v40  ;;  %v597_v21 = vpop.f32.mrf.mxu0  ;;  %v725_v22 = vpop.f32.mrf.mxu1 }
 0x115   :  { %1749 = vst [vmem:[%s2254_s3 + $0x58] sm:$0xff] %v1637_v15   ;;  %1765 = vst [vmem:[%s2254_s3 + $0xd8] sm:$0xff] %v1717_v16   ;;  %v1632_v23 = vpack.c.bf16 %v1043_v17, %v1042_v11  ;;  %v1712_v24 = vpack.c.bf16 %v1075_v18, %v1074_v12  ;;  %v982_v25 = vadd.f32 %v2089_v40, %v597_v21 }
 0x116   :  { %v1014_v26 = vadd.f32 %v2089_v40, %v725_v22  ;;  %v1853_v27 = vpop.f32.mrf.mxu0  ;;  %v1885_v28 = vpop.f32.mrf.mxu1  ;;  %v1048_v31 = vmax.f32 %v984_v19, 0.0  ;;  %v1080_v32 = vmax.f32 %v1016_v20, 0.0 }
 0x117   :  { %1748 = vst [vmem:[%s2254_s3 + $0x50] sm:$0xff] %v1632_v23   ;;  %1764 = vst [vmem:[%s2254_s3 + $0xd0] sm:$0xff] %v1712_v24   ;;  %v985_v29 = vadd.f32 %v1853_v27, %v2089_v40  ;;  %v1017_v30 = vadd.f32 %v1885_v28, %v2089_v40  ;;  %v1046_v39 = vmax.f32 %v982_v25, 0.0 }
 0x118   :  { %v600_v33 = vpop.f32.mrf.mxu0  ;;  %v728_v34 = vpop.f32.mrf.mxu1  ;;  %v1078_v41 = vmax.f32 %v1014_v26, 0.0 }
 0x119   :  { %v1049_v35 = vmax.f32 %v985_v29, 0.0  ;;  %v1081_v36 = vmax.f32 %v1017_v30, 0.0  ;;  %v983_v37 = vadd.f32 %v2089_v40, %v600_v33  ;;  %v1015_v38 = vadd.f32 %v2089_v40, %v728_v34 }
 0x11a   :  { %v1856_v42 = vpop.f32.mrf.mxu0  ;;  %v1888_v43 = vpop.f32.mrf.mxu1 }
 0x11b   :  { %v1647_v44 = vpack.c.bf16 %v1049_v35, %v1048_v31  ;;  %v1727_v45 = vpack.c.bf16 %v1081_v36, %v1080_v32  ;;  %v1047_v46 = vmax.f32 %v983_v37, 0.0  ;;  %v1079_v47 = vmax.f32 %v1015_v38, 0.0 }
 0x11c   :  { %v988_v48 = vadd.f32 %v1856_v42, %v2089_v40  ;;  %v1020_v49 = vadd.f32 %v1888_v43, %v2089_v40  ;;  %v613_v50 = vpop.f32.mrf.mxu0  ;;  %v741_v51 = vpop.f32.mrf.mxu1 }
 0x11d   :  { %1751 = vst [vmem:[%s2254_s3 + $0x68] sm:$0xff] %v1647_v44   ;;  %1767 = vst [vmem:[%s2254_s3 + $0xe8] sm:$0xff] %v1727_v45   ;;  %v1642_v52 = vpack.c.bf16 %v1047_v46, %v1046_v39  ;;  %v1722_v53 = vpack.c.bf16 %v1079_v47, %v1078_v41  ;;  %v986_v54 = vadd.f32 %v2089_v40, %v613_v50 }
 0x11e   :  { %v1018_v55 = vadd.f32 %v2089_v40, %v741_v51  ;;  %v1857_v56 = vpop.f32.mrf.mxu0  ;;  %v1889_v57 = vpop.f32.mrf.mxu1  ;;  %v1052_v60 = vmax.f32 %v988_v48, 0.0  ;;  %v1084_v61 = vmax.f32 %v1020_v49, 0.0 }
 0x11f   :  { %1750 = vst [vmem:[%s2254_s3 + $0x60] sm:$0xff] %v1642_v52   ;;  %1766 = vst [vmem:[%s2254_s3 + $0xe0] sm:$0xff] %v1722_v53   ;;  %v989_v58 = vadd.f32 %v1857_v56, %v2089_v40  ;;  %v1021_v59 = vadd.f32 %v1889_v57, %v2089_v40  ;;  %v1050_v4 = vmax.f32 %v986_v54, 0.0 }
 0x120   :  { %v616_v62 = vpop.f32.mrf.mxu0  ;;  %v744_v63 = vpop.f32.mrf.mxu1  ;;  %v1082_v5 = vmax.f32 %v1018_v55, 0.0 }
 0x121   :  { %v1053_v0 = vmax.f32 %v989_v58, 0.0  ;;  %v1085_v1 = vmax.f32 %v1021_v59, 0.0  ;;  %v987_v2 = vadd.f32 %v2089_v40, %v616_v62  ;;  %v1019_v3 = vadd.f32 %v2089_v40, %v744_v63 }
 0x123   :  { %v1657_v6 = vpack.c.bf16 %v1053_v0, %v1052_v60  ;;  %v1737_v7 = vpack.c.bf16 %v1085_v1, %v1084_v61  ;;  %v1051_v8 = vmax.f32 %v987_v2, 0.0  ;;  %v1083_v9 = vmax.f32 %v1019_v3, 0.0 }
 0x125   :  { %1753 = vst [vmem:[%s2254_s3 + $0x78] sm:$0xff] %v1657_v6   ;;  %1769 = vst [vmem:[%s2254_s3 + $0xf8] sm:$0xff] %v1737_v7   ;;  %v1652_v10 = vpack.c.bf16 %v1051_v8, %v1050_v4  ;;  %v1732_v11 = vpack.c.bf16 %v1083_v9, %v1082_v5 }
 0x127   :  { %1752 = vst [vmem:[%s2254_s3 + $0x70] sm:$0xff] %v1652_v10   ;;  %1768 = vst [vmem:[%s2254_s3 + $0xf0] sm:$0xff] %v1732_v11  }

// kernel: _lambda_.14
= control target key start
LH: loop header
LB: loop body
LE: loop exit
PB: predicated region body
PF: predicated region fallthrough
CT: control target
= control target key end

     0   :  { %v3949_v0 = vmov 0   ;;  %s5137_s1 = inlined_call_operand.vmem [shape: bf16[640,128], index: 1, kind: input, shape index: {}]   ;;  %s5138_s0 = inlined_call_operand.vmem [shape: bf16[512,640], index: 0, kind: input, shape index: {}]   ;;  %s5139_s2 = inlined_call_operand.vmem [shape: f32[1,128], index: 2, kind: input, shape index: {}]   ;;  %s5140_s3 = inlined_call_operand.vmem [shape: bf16[512,128], index: 3, kind: output, shape index: {}]  }
   0x1   :  { %1491 = vmatprep.subr.bf16.mxu0 %v3949_v0  ;;  %3652 = vmatprep.subr.bf16.mxu1 %v3949_v0  ;;  %v3685_v1 = vld [vmem:[%s5137_s1 + $0x38] sm:$0xff]   ;;  %v3686_v2 = vld [vmem:[%s5137_s1 + $0x30] sm:$0xff]   ;;  %v3687_v3 = vld [vmem:[%s5137_s1 + $0x28] sm:$0xff]  }
   0x2   :  { %1492 = vmatpush1.bf16.msra.mxu0 %v3685_v1  ;;  %3668 = vmatpush1.bf16.msra.mxu1 %v3685_v1  ;;  %v3688_v4 = vld [vmem:[%s5137_s1 + $0x20] sm:$0xff]   ;;  %v3689_v5 = vld [vmem:[%s5137_s1 + $0x18] sm:$0xff]   ;;  %v3690_v7 = vld [vmem:[%s5137_s1 + $0x10] sm:$0xff]  }
   0x3   :  { %1493 = vmatprep.subr.bf16.mxu0 %v3949_v0  ;;  %3653 = vmatprep.subr.bf16.mxu1 %v3949_v0  ;;  %v3703_v6 = vld [vmem:[%s5138_s0 + $0x4] ss:$20 sps:$4 sm:$0xff]   ;;  %v3691_v9 = vld [vmem:[%s5137_s1 + $0x8] sm:$0xff]   ;;  %v3694_v12 = vld [vmem:[%s5137_s1 + $0x70] sm:$0xff]  }
   0x4   :  { %v3706_v8 = vld [vmem:[%s5138_s0 + $0x3c4] ss:$20 sps:$4 sm:$0xff]   ;;  %1523 = vmatprep.mubr.bf16.mxu0 %v3703_v6  ;;  %v3695_v13 = vld [vmem:[%s5137_s1 + $0x68] sm:$0xff]   ;;  %v3698_v16 = vld [vmem:[%s5137_s1 + $0x50] sm:$0xff]  }
   0x5   :  { %1715 = vmatprep.mubr.bf16.mxu1 %v3706_v8  ;;  %v3692_v10 = vld [vmem:[%s5137_s1] sm:$0xff]   ;;  %v3693_v11 = vld [vmem:[%s5137_s1 + $0x78] sm:$0xff]   ;;  %v3699_v17 = vld [vmem:[%s5137_s1 + $0x48] sm:$0xff]  }
   0x6   :  { %1494 = vmatpush1.bf16.msra.mxu0 %v3686_v2  ;;  %3669 = vmatpush1.bf16.msra.mxu1 %v3686_v2  ;;  %v3696_v14 = vld [vmem:[%s5137_s1 + $0x60] sm:$0xff]   ;;  %v3697_v15 = vld [vmem:[%s5137_s1 + $0x58] sm:$0xff]   ;;  %v3732_v25 = vld [vmem:[%s5137_s1 + $0x130] sm:$0xff]  }
   0x7   :  { %1495 = vmatprep.subr.bf16.mxu0 %v3949_v0  ;;  %3654 = vmatprep.subr.bf16.mxu1 %v3949_v0  ;;  %v3700_v18 = vld [vmem:[%s5137_s1 + $0x40] sm:$0xff]   ;;  %v3707_v19 = vld [vmem:[%s5137_s1 + $0x138] sm:$0xff]   ;;  %v3709_v26 = vld [vmem:[%s5137_s1 + $0xb0] sm:$0xff]  }
   0x8   :  { %v3701_v20 = vld [vmem:[%s5138_s0] ss:$20 sps:$4 sm:$0xff]   ;;  %v3708_v22 = vld [vmem:[%s5137_s1 + $0xb8] sm:$0xff]   ;;  %v3757_v27 = vld [vmem:[%s5137_s1 + $0x128] sm:$0xff]  }
   0x9   :  { %v3704_v21 = vld [vmem:[%s5138_s0 + $0x3c0] ss:$20 sps:$4 sm:$0xff]   ;;  %v3714_v28 = vld [vmem:[%s5138_s0 + $0x28] ss:$20 sps:$4 sm:$0xff]   ;;  %v3722_v35 = vld [vmem:[%s5138_s0 + $0x50] ss:$20 sps:$4 sm:$0xff]  }
   0xa   :  { %1496 = vmatpush1.bf16.msra.mxu0 %v3687_v3  ;;  %3670 = vmatpush1.bf16.msra.mxu1 %v3687_v3  ;;  %v3710_v23 = vld [vmem:[%s5138_s0 + $0x2c] ss:$20 sps:$4 sm:$0xff]   ;;  %v3715_v29 = vld [vmem:[%s5138_s0 + $0x3e8] ss:$20 sps:$4 sm:$0xff]   ;;  %v3723_v36 = vld [vmem:[%s5138_s0 + $0x410] ss:$20 sps:$4 sm:$0xff]  }
   0xb   :  { %1497 = vmatprep.subr.bf16.mxu0 %v3949_v0  ;;  %3655 = vmatprep.subr.bf16.mxu1 %v3949_v0  ;;  %v3712_v24 = vld [vmem:[%s5138_s0 + $0x3ec] ss:$20 sps:$4 sm:$0xff]   ;;  %v3718_v31 = vld [vmem:[%s5138_s0 + $0x54] ss:$20 sps:$4 sm:$0xff]   ;;  %v3724_v37 = vld [vmem:[%s5137_s1 + $0x98] sm:$0xff]  }
   0xc   :  { %v3716_v30 = vld [vmem:[%s5137_s1 + $0xa8] sm:$0xff]   ;;  %v3780_v33 = vld [vmem:[%s5137_s1 + $0x120] sm:$0xff]   ;;  %v3726_v38 = vld [vmem:[%s5138_s0 + $0x7c] ss:$20 sps:$4 sm:$0xff]  }
   0xd   :  { %v3720_v32 = vld [vmem:[%s5138_s0 + $0x414] ss:$20 sps:$4 sm:$0xff]   ;;  %v3717_v34 = vld [vmem:[%s5137_s1 + $0xa0] sm:$0xff]   ;;  %v3728_v39 = vld [vmem:[%s5138_s0 + $0x43c] ss:$20 sps:$4 sm:$0xff]  }
   0xe   :  { %1498 = vmatpush1.bf16.msra.mxu0 %v3688_v4  ;;  %3671 = vmatpush1.bf16.msra.mxu1 %v3688_v4  ;;  %v3799_v40 = vld [vmem:[%s5137_s1 + $0x118] sm:$0xff]   ;;  %v3725_v41 = vld [vmem:[%s5137_s1 + $0x90] sm:$0xff]   ;;  %v3733_v45 = vld [vmem:[%s5137_s1 + $0x88] sm:$0xff]  }
   0xf   :  { %1499 = vmatprep.subr.bf16.mxu0 %v3949_v0  ;;  %3656 = vmatprep.subr.bf16.mxu1 %v3949_v0  ;;  %v3818_v42 = vld [vmem:[%s5137_s1 + $0x110] sm:$0xff]   ;;  %v3730_v43 = vld [vmem:[%s5138_s0 + $0x78] ss:$20 sps:$4 sm:$0xff]   ;;  %v3734_v49 = vld [vmem:[%s5137_s1 + $0x80] sm:$0xff]  }
  0x10   :  { %v3731_v44 = vld [vmem:[%s5138_s0 + $0x438] ss:$20 sps:$4 sm:$0xff]   ;;  %v3739_v50 = vld [vmem:[%s5138_s0 + $0xa0] ss:$20 sps:$4 sm:$0xff]   ;;  %v3747_v56 = vld [vmem:[%s5138_s0 + $0xc8] ss:$20 sps:$4 sm:$0xff]  }
  0x11   :  { %v3735_v46 = vld [vmem:[%s5138_s0 + $0xa4] ss:$20 sps:$4 sm:$0xff]   ;;  %v3837_v48 = vld [vmem:[%s5137_s1 + $0x108] sm:$0xff]   ;;  %v3740_v51 = vld [vmem:[%s5138_s0 + $0x460] ss:$20 sps:$4 sm:$0xff]  }
  0x12   :  { %1500 = vmatpush1.bf16.msra.mxu0 %v3689_v5  ;;  %3672 = vmatpush1.bf16.msra.mxu1 %v3689_v5  ;;  %v3737_v47 = vld [vmem:[%s5138_s0 + $0x464] ss:$20 sps:$4 sm:$0xff]   ;;  %v3743_v53 = vld [vmem:[%s5138_s0 + $0xcc] ss:$20 sps:$4 sm:$0xff]   ;;  %v3742_v55 = vld [vmem:[%s5137_s1 + $0xf0] sm:$0xff]  }
  0x13   :  { %1501 = vmatprep.subr.bf16.mxu0 %v3949_v0  ;;  %3657 = vmatprep.subr.bf16.mxu1 %v3949_v0  ;;  %v3741_v52 = vld [vmem:[%s5137_s1 + $0xf8] sm:$0xff]   ;;  %v3745_v54 = vld [vmem:[%s5138_s0 + $0x48c] ss:$20 sps:$4 sm:$0xff]   ;;  %v3751_v59 = vld [vmem:[%s5138_s0 + $0xf4] ss:$20 sps:$4 sm:$0xff]  }
  0x14   :  { %v3748_v57 = vld [vmem:[%s5138_s0 + $0x488] ss:$20 sps:$4 sm:$0xff]   ;;  %v3856_v61 = vld [vmem:[%s5137_s1 + $0x100] sm:$0xff]   ;;  %v3759_v5 = vld [vmem:[%s5137_s1 + $0xd0] sm:$0xff]  }
  0x15   :  { %v3749_v58 = vld [vmem:[%s5137_s1 + $0xe8] sm:$0xff]   ;;  %v3750_v62 = vld [vmem:[%s5137_s1 + $0xe0] sm:$0xff]   ;;  %v3758_v2 = vld [vmem:[%s5137_s1 + $0xd8] sm:$0xff]  }
  0x16   :  { %1502 = vmatpush1.bf16.msra.mxu0 %v3690_v7  ;;  %3673 = vmatpush1.bf16.msra.mxu1 %v3690_v7  ;;  %v3753_v60 = vld [vmem:[%s5138_s0 + $0x4b4] ss:$20 sps:$4 sm:$0xff]   ;;  %v3755_v63 = vld [vmem:[%s5138_s0 + $0xf0] ss:$20 sps:$4 sm:$0xff]   ;;  %v3764_v6 = vld [vmem:[%s5138_s0 + $0x118] ss:$20 sps:$4 sm:$0xff]  }
  0x17   :  { %1503 = vmatprep.subr.bf16.mxu0 %v3949_v0  ;;  %3658 = vmatprep.subr.bf16.mxu1 %v3949_v0  ;;  %v3756_v1 = vld [vmem:[%s5138_s0 + $0x4b0] ss:$20 sps:$4 sm:$0xff]   ;;  %v3765_v7 = vld [vmem:[%s5138_s0 + $0x4d8] ss:$20 sps:$4 sm:$0xff]  }
  0x18   :  { %v3760_v3 = vld [vmem:[%s5138_s0 + $0x11c] ss:$20 sps:$4 sm:$0xff]   ;;  %v3766_v8 = vld [vmem:[%s5137_s1 + $0xc8] sm:$0xff]  }
  0x19   :  { %v3762_v4 = vld [vmem:[%s5138_s0 + $0x4dc] ss:$20 sps:$4 sm:$0xff]  }
  0x1a   :  { %1504 = vmatpush1.bf16.msra.mxu0 %v3691_v9  ;;  %3674 = vmatpush1.bf16.msra.mxu1 %v3691_v9  ;;  %v3768_v9 = vld [vmem:[%s5138_s0 + $0x144] ss:$20 sps:$4 sm:$0xff]  }
  0x1b   :  { %1505 = vmatprep.subr.bf16.mxu0 %v3949_v0  ;;  %3659 = vmatprep.subr.bf16.mxu1 %v3949_v0 }
  0x1e   :  { %1506 = vmatpush1.bf16.msra.mxu0 %v3692_v10  ;;  %3675 = vmatpush1.bf16.msra.mxu1 %v3692_v10  ;;  %v3772_v10 = vld [vmem:[%s5138_s0 + $0xc] ss:$20 sps:$4 sm:$0xff]  }
  0x1f   :  { %1507 = vmatprep.subr.bf16.mxu0 %v3949_v0  ;;  %3660 = vmatprep.subr.bf16.mxu1 %v3949_v0 }
  0x22   :  { %1508 = vmatpush2.bf16.msra.mxu0 %v3693_v11  ;;  %3676 = vmatpush2.bf16.msra.mxu1 %v3693_v11  ;;  %v3767_v11 = vld [vmem:[%s5137_s1 + $0xc0] sm:$0xff]  }
  0x23   :  { %1509 = vmatprep.subr.bf16.mxu0 %v3949_v0  ;;  %3661 = vmatprep.subr.bf16.mxu1 %v3949_v0 }
  0x26   :  { %1510 = vmatpush2.bf16.msra.mxu0 %v3694_v12  ;;  %3677 = vmatpush2.bf16.msra.mxu1 %v3694_v12  ;;  %v3770_v12 = vld [vmem:[%s5138_s0 + $0x8] ss:$20 sps:$4 sm:$0xff]  }
  0x27   :  { %1511 = vmatprep.subr.bf16.mxu0 %v3949_v0  ;;  %3662 = vmatprep.subr.bf16.mxu1 %v3949_v0 }
  0x2a   :  { %1512 = vmatpush2.bf16.msra.mxu0 %v3695_v13  ;;  %3678 = vmatpush2.bf16.msra.mxu1 %v3695_v13  ;;  %v3773_v13 = vld [vmem:[%s5138_s0 + $0x140] ss:$20 sps:$4 sm:$0xff]  }
  0x2b   :  { %1513 = vmatprep.subr.bf16.mxu0 %v3949_v0  ;;  %3663 = vmatprep.subr.bf16.mxu1 %v3949_v0 }
  0x2e   :  { %1514 = vmatpush2.bf16.msra.mxu0 %v3696_v14  ;;  %3679 = vmatpush2.bf16.msra.mxu1 %v3696_v14  ;;  %v3774_v14 = vld [vmem:[%s5138_s0 + $0x16c] ss:$20 sps:$4 sm:$0xff]  }
  0x2f   :  { %1515 = vmatprep.subr.bf16.mxu0 %v3949_v0  ;;  %3664 = vmatprep.subr.bf16.mxu1 %v3949_v0 }
  0x32   :  { %1516 = vmatpush2.bf16.msra.mxu0 %v3697_v15  ;;  %3680 = vmatpush2.bf16.msra.mxu1 %v3697_v15  ;;  %v3776_v15 = vld [vmem:[%s5138_s0 + $0x34] ss:$20 sps:$4 sm:$0xff]  }
  0x33   :  { %1517 = vmatprep.subr.bf16.mxu0 %v3949_v0  ;;  %3665 = vmatprep.subr.bf16.mxu1 %v3949_v0 }
  0x36   :  { %1518 = vmatpush2.bf16.msra.mxu0 %v3698_v16  ;;  %3681 = vmatpush2.bf16.msra.mxu1 %v3698_v16  ;;  %v3779_v16 = vld [vmem:[%s5138_s0 + $0x30] ss:$20 sps:$4 sm:$0xff]  }
  0x37   :  { %1519 = vmatprep.subr.bf16.mxu0 %v3949_v0  ;;  %3666 = vmatprep.subr.bf16.mxu1 %v3949_v0 }
  0x3a   :  { %1520 = vmatpush2.bf16.msra.mxu0 %v3699_v17  ;;  %3682 = vmatpush2.bf16.msra.mxu1 %v3699_v17  ;;  %v3781_v17 = vld [vmem:[%s5138_s0 + $0x194] ss:$20 sps:$4 sm:$0xff]  }
  0x3b   :  { %1521 = vmatprep.subr.bf16.mxu0 %v3949_v0  ;;  %3667 = vmatprep.subr.bf16.mxu1 %v3949_v0 }
  0x3e   :  { %1522 = vmatpush2.bf16.msra.mxu0 %v3700_v18  ;;  %3683 = vmatpush2.bf16.msra.mxu1 %v3700_v18  ;;  %v3783_v18 = vld [vmem:[%s5138_s0 + $0x5c] ss:$20 sps:$4 sm:$0xff]  }
  0x3f   :  { %1780 = vmatprep.subr.bf16.mxu1 %v3949_v0  ;;  %3572 = vmatprep.subr.bf16.mxu0 %v3707_v19 }
  0x41   :  { %1524 = vmatmul.mubr.bf16.vlgmr.msra.gmra.mxu0 %v3701_v20  ;;  %1716 = vmatmul.mubr.bf16.vlgmr.msra.gmra.mxu1 %v3704_v21  ;;  %v3786_v20 = vld [vmem:[%s5138_s0 + $0x58] ss:$20 sps:$4 sm:$0xff]   ;;  %v3787_v21 = vld [vmem:[%s5138_s0 + $0x1bc] ss:$20 sps:$4 sm:$0xff]  }
  0x42   :  { %1781 = vmatpush1.bf16.msra.mxu1 %v3708_v22  ;;  %3573 = vmatpush3.bf16.msra.mxu0 %v3707_v19  ;;  %v3785_v19 = vld [vmem:[%s5138_s0 + $0x190] ss:$20 sps:$4 sm:$0xff]  }
  0x43   :  { %1782 = vmatprep.subr.bf16.mxu1 %v3949_v0  ;;  %1531 = vmatprep.mubr.bf16.mxu0 %v3710_v23  ;;  %v3789_v22 = vld [vmem:[%s5138_s0 + $0x84] ss:$20 sps:$4 sm:$0xff]  }
  0x44   :  { %1723 = vmatprep.mubr.bf16.mxu1 %v3712_v24  ;;  %3574 = vmatprep.subr.bf16.mxu0 %v3732_v25  ;;  %v3791_v23 = vld [vmem:[%s5138_s0 + $0x1b8] ss:$20 sps:$4 sm:$0xff]   ;;  %v3792_v24 = vld [vmem:[%s5138_s0 + $0x80] ss:$20 sps:$4 sm:$0xff]  }
  0x46   :  { %1783 = vmatpush1.bf16.msra.mxu1 %v3709_v26  ;;  %3575 = vmatpush3.bf16.msra.mxu0 %v3732_v25  ;;  %v3793_v25 = vld [vmem:[%s5138_s0 + $0x1e4] ss:$20 sps:$4 sm:$0xff]   ;;  %v3795_v26 = vld [vmem:[%s5138_s0 + $0xac] ss:$20 sps:$4 sm:$0xff]  }
  0x47   :  { %1784 = vmatprep.subr.bf16.mxu1 %v3949_v0  ;;  %3576 = vmatprep.subr.bf16.mxu0 %v3757_v27 }
  0x49   :  { %1532 = vmatmul.mubr.bf16.gmra.mxu0 %v3714_v28  ;;  %1724 = vmatmul.mubr.bf16.gmra.mxu1 %v3715_v29  ;;  %v3798_v28 = vld [vmem:[%s5138_s0 + $0xa8] ss:$20 sps:$4 sm:$0xff]   ;;  %v3800_v29 = vld [vmem:[%s5138_s0 + $0x20c] ss:$20 sps:$4 sm:$0xff]  }
  0x4a   :  { %1785 = vmatpush1.bf16.msra.mxu1 %v3716_v30  ;;  %1539 = vmatprep.mubr.bf16.mxu0 %v3718_v31  ;;  %v3802_v30 = vld [vmem:[%s5138_s0 + $0xd4] ss:$20 sps:$4 sm:$0xff]  }
  0x4b   :  { %1786 = vmatprep.subr.bf16.mxu1 %v3949_v0  ;;  %1731 = vmatprep.mubr.bf16.mxu1 %v3720_v32  ;;  %v3804_v31 = vld [vmem:[%s5138_s0 + $0x208] ss:$20 sps:$4 sm:$0xff]   ;;  %v3805_v32 = vld [vmem:[%s5138_s0 + $0xd0] ss:$20 sps:$4 sm:$0xff]  }
  0x4c   :  { %3577 = vmatpush3.bf16.msra.mxu0 %v3757_v27  ;;  %v3797_v27 = vld [vmem:[%s5138_s0 + $0x1e0] ss:$20 sps:$4 sm:$0xff]  }
  0x4d   :  { %3578 = vmatprep.subr.bf16.mxu0 %v3780_v33 }
  0x4e   :  { %1787 = vmatpush1.bf16.msra.mxu1 %v3717_v34  ;;  %v3808_v34 = vld [vmem:[%s5138_s0 + $0xfc] ss:$20 sps:$4 sm:$0xff]  }
  0x4f   :  { %1788 = vmatprep.subr.bf16.mxu1 %v3949_v0 }
  0x50   :  { %3579 = vmatpush3.bf16.msra.mxu0 %v3780_v33  ;;  %v3806_v33 = vld [vmem:[%s5138_s0 + $0x234] ss:$20 sps:$4 sm:$0xff]  }
  0x51   :  { %1540 = vmatmul.mubr.bf16.gmra.mxu0 %v3722_v35  ;;  %1732 = vmatmul.mubr.bf16.gmra.mxu1 %v3723_v36  ;;  %v3810_v35 = vld [vmem:[%s5138_s0 + $0x230] ss:$20 sps:$4 sm:$0xff]   ;;  %v3811_v36 = vld [vmem:[%s5138_s0 + $0xf8] ss:$20 sps:$4 sm:$0xff]  }
  0x52   :  { %1789 = vmatpush1.bf16.msra.mxu1 %v3724_v37  ;;  %1547 = vmatprep.mubr.bf16.mxu0 %v3726_v38  ;;  %v3812_v37 = vld [vmem:[%s5138_s0 + $0x25c] ss:$20 sps:$4 sm:$0xff]   ;;  %v3814_v38 = vld [vmem:[%s5138_s0 + $0x124] ss:$20 sps:$4 sm:$0xff]  }
  0x53   :  { %1790 = vmatprep.subr.bf16.mxu1 %v3949_v0  ;;  %1739 = vmatprep.mubr.bf16.mxu1 %v3728_v39  ;;  %v3816_v39 = vld [vmem:[%s5138_s0 + $0x258] ss:$20 sps:$4 sm:$0xff]  }
  0x54   :  { %3580 = vmatprep.subr.bf16.mxu0 %v3799_v40 }
  0x55   :  { %3581 = vmatpush3.bf16.msra.mxu0 %v3799_v40  ;;  %v3817_v40 = vld [vmem:[%s5138_s0 + $0x120] ss:$20 sps:$4 sm:$0xff]  }
  0x56   :  { %1791 = vmatpush1.bf16.msra.mxu1 %v3725_v41  ;;  %3582 = vmatprep.subr.bf16.mxu0 %v3818_v42  ;;  %v3819_v41 = vld [vmem:[%s5138_s0 + $0x284] ss:$20 sps:$4 sm:$0xff]  }
  0x57   :  { %1792 = vmatprep.subr.bf16.mxu1 %v3949_v0 }
  0x59   :  { %1548 = vmatmul.mubr.bf16.gmra.mxu0 %v3730_v43  ;;  %1740 = vmatmul.mubr.bf16.gmra.mxu1 %v3731_v44  ;;  %v3823_v43 = vld [vmem:[%s5138_s0 + $0x280] ss:$20 sps:$4 sm:$0xff]   ;;  %v3824_v44 = vld [vmem:[%s5138_s0 + $0x148] ss:$20 sps:$4 sm:$0xff]  }
  0x5a   :  { %1793 = vmatpush1.bf16.msra.mxu1 %v3733_v45  ;;  %1555 = vmatprep.mubr.bf16.mxu0 %v3735_v46  ;;  %v3825_v45 = vld [vmem:[%s5138_s0 + $0x2ac] ss:$20 sps:$4 sm:$0xff]   ;;  %v3827_v46 = vld [vmem:[%s5138_s0 + $0x174] ss:$20 sps:$4 sm:$0xff]  }
  0x5b   :  { %1794 = vmatprep.subr.bf16.mxu1 %v3949_v0  ;;  %1747 = vmatprep.mubr.bf16.mxu1 %v3737_v47  ;;  %v3829_v47 = vld [vmem:[%s5138_s0 + $0x2a8] ss:$20 sps:$4 sm:$0xff]  }
  0x5c   :  { %3583 = vmatpush3.bf16.msra.mxu0 %v3818_v42  ;;  %v3821_v42 = vld [vmem:[%s5138_s0 + $0x14c] ss:$20 sps:$4 sm:$0xff]  }
  0x5d   :  { %3584 = vmatprep.subr.bf16.mxu0 %v3837_v48 }
  0x5e   :  { %1795 = vmatpush1.bf16.msra.mxu1 %v3734_v49  ;;  %v3831_v49 = vld [vmem:[%s5138_s0 + $0x2d4] ss:$20 sps:$4 sm:$0xff]  }
  0x5f   :  { %1796 = vmatprep.subr.bf16.mxu1 %v3949_v0 }
  0x60   :  { %3585 = vmatpush3.bf16.msra.mxu0 %v3837_v48  ;;  %v3830_v48 = vld [vmem:[%s5138_s0 + $0x170] ss:$20 sps:$4 sm:$0xff]  }
  0x61   :  { %1556 = vmatmul.mubr.bf16.gmra.mxu0 %v3739_v50  ;;  %1748 = vmatmul.mubr.bf16.gmra.mxu1 %v3740_v51  ;;  %v3833_v50 = vld [vmem:[%s5138_s0 + $0x19c] ss:$20 sps:$4 sm:$0xff]  }
  0x62   :  { %1797 = vmatpush2.bf16.msra.mxu1 %v3741_v52  ;;  %1563 = vmatprep.mubr.bf16.mxu0 %v3743_v53  ;;  %v3835_v51 = vld [vmem:[%s5138_s0 + $0x2d0] ss:$20 sps:$4 sm:$0xff]   ;;  %v3836_v52 = vld [vmem:[%s5138_s0 + $0x198] ss:$20 sps:$4 sm:$0xff]  }
  0x63   :  { %1798 = vmatprep.subr.bf16.mxu1 %v3949_v0  ;;  %1755 = vmatprep.mubr.bf16.mxu1 %v3745_v54  ;;  %v3838_v53 = vld [vmem:[%s5138_s0 + $0x2fc] ss:$20 sps:$4 sm:$0xff]   ;;  %v3840_v54 = vld [vmem:[%s5138_s0 + $0x1c4] ss:$20 sps:$4 sm:$0xff]  }
  0x64   :  { %3586 = vmatprep.subr.bf16.mxu0 %v3856_v61 }
  0x65   :  { %3587 = vmatpush3.bf16.msra.mxu0 %v3856_v61  ;;  %v3850_v61 = vld [vmem:[%s5138_s0 + $0x34c] ss:$20 sps:$4 sm:$0xff]  }
  0x66   :  { %1799 = vmatpush2.bf16.msra.mxu1 %v3742_v55  ;;  %v3842_v55 = vld [vmem:[%s5138_s0 + $0x2f8] ss:$20 sps:$4 sm:$0xff]  }
  0x67   :  { %1800 = vmatprep.subr.bf16.mxu1 %v3949_v0 }
  0x69   :  { %1564 = vmatmul.mubr.bf16.gmra.mxu0 %v3747_v56  ;;  %1756 = vmatmul.mubr.bf16.gmra.mxu1 %v3748_v57  ;;  %v3843_v56 = vld [vmem:[%s5138_s0 + $0x1c0] ss:$20 sps:$4 sm:$0xff]   ;;  %v3844_v57 = vld [vmem:[%s5138_s0 + $0x324] ss:$20 sps:$4 sm:$0xff]  }
  0x6a   :  { %1801 = vmatpush2.bf16.msra.mxu1 %v3749_v58  ;;  %1571 = vmatprep.mubr.bf16.mxu0 %v3751_v59  ;;  %v3846_v58 = vld [vmem:[%s5138_s0 + $0x1ec] ss:$20 sps:$4 sm:$0xff]  }
  0x6b   :  { %1802 = vmatprep.subr.bf16.mxu1 %v3949_v0  ;;  %1763 = vmatprep.mubr.bf16.mxu1 %v3753_v60  ;;  %v3848_v59 = vld [vmem:[%s5138_s0 + $0x320] ss:$20 sps:$4 sm:$0xff]   ;;  %v3849_v60 = vld [vmem:[%s5138_s0 + $0x1e8] ss:$20 sps:$4 sm:$0xff]  }
  0x6e   :  { %1803 = vmatpush2.bf16.msra.mxu1 %v3750_v62  ;;  %v3852_v62 = vld [vmem:[%s5138_s0 + $0x214] ss:$20 sps:$4 sm:$0xff]  }
  0x6f   :  { %1804 = vmatprep.subr.bf16.mxu1 %v3949_v0 }
  0x71   :  { %1572 = vmatmul.mubr.bf16.gmra.mxu0 %v3755_v63  ;;  %1764 = vmatmul.mubr.bf16.gmra.mxu1 %v3756_v1  ;;  %v3854_v63 = vld [vmem:[%s5138_s0 + $0x348] ss:$20 sps:$4 sm:$0xff]   ;;  %v3855_v1 = vld [vmem:[%s5138_s0 + $0x210] ss:$20 sps:$4 sm:$0xff]  }
  0x72   :  { %1805 = vmatpush2.bf16.msra.mxu1 %v3758_v2  ;;  %1579 = vmatprep.mubr.bf16.mxu0 %v3760_v3  ;;  %v3857_v2 = vld [vmem:[%s5138_s0 + $0x374] ss:$20 sps:$4 sm:$0xff]   ;;  %v3859_v3 = vld [vmem:[%s5138_s0 + $0x23c] ss:$20 sps:$4 sm:$0xff]  }
  0x73   :  { %1806 = vmatprep.subr.bf16.mxu1 %v3949_v0  ;;  %1771 = vmatprep.mubr.bf16.mxu1 %v3762_v4  ;;  %v3861_v4 = vld [vmem:[%s5138_s0 + $0x370] ss:$20 sps:$4 sm:$0xff]  }
  0x76   :  { %1807 = vmatpush2.bf16.msra.mxu1 %v3759_v5  ;;  %v3862_v5 = vld [vmem:[%s5138_s0 + $0x238] ss:$20 sps:$4 sm:$0xff]  }
  0x77   :  { %1808 = vmatprep.subr.bf16.mxu1 %v3949_v0 }
  0x79   :  { %1580 = vmatmul.mubr.bf16.gmra.mxu0 %v3764_v6  ;;  %1772 = vmatmul.mubr.bf16.gmra.mxu1 %v3765_v7  ;;  %v3863_v6 = vld [vmem:[%s5138_s0 + $0x39c] ss:$20 sps:$4 sm:$0xff]   ;;  %v3865_v7 = vld [vmem:[%s5138_s0 + $0x264] ss:$20 sps:$4 sm:$0xff]  }
  0x7a   :  { %1809 = vmatpush2.bf16.msra.mxu1 %v3766_v8  ;;  %1587 = vmatprep.mubr.bf16.mxu0 %v3768_v9  ;;  %v3867_v8 = vld [vmem:[%s5138_s0 + $0x398] ss:$20 sps:$4 sm:$0xff]   ;;  %v3868_v9 = vld [vmem:[%s5138_s0 + $0x260] ss:$20 sps:$4 sm:$0xff]  }
  0x7b   :  { %1810 = vmatprep.subr.bf16.mxu1 %v3949_v0  ;;  %1812 = vmatprep.mubr.bf16.mxu1 %v3772_v10  ;;  %v3778_v0 = vld [vmem:[%s5138_s0 + $0x168] ss:$20 sps:$4 sm:$0xff]   ;;  %v3869_v10 = vld [vmem:[%s5138_s0 + $0x28c] ss:$20 sps:$4 sm:$0xff]  }
  0x7e   :  { %1811 = vmatpush2.bf16.msra.mxu1 %v3767_v11  ;;  %v3871_v11 = vld [vmem:[%s5138_s0 + $0x10] ss:$20 sps:$4 sm:$0xff]  }
  0x81   :  { %1588 = vmatmul.mubr.bf16.gmra.mxu0 %v3773_v13  ;;  %1813 = vmatmul.mubr.bf16.vlgmr.msra.gmra.mxu1 %v3770_v12  ;;  %v3872_v12 = vld [vmem:[%s5138_s0 + $0x288] ss:$20 sps:$4 sm:$0xff]   ;;  %v3873_v13 = vld [vmem:[%s5138_s0 + $0x38] ss:$20 sps:$4 sm:$0xff]  }
  0x82   :  { %1595 = vmatprep.mubr.bf16.mxu0 %v3774_v14  ;;  %1820 = vmatprep.mubr.bf16.mxu1 %v3776_v15  ;;  %v3874_v14 = vld [vmem:[%s5138_s0 + $0x2b4] ss:$20 sps:$4 sm:$0xff]  }
  0x83   :  { %v3876_v15 = vld [vmem:[%s5138_s0 + $0x60] ss:$20 sps:$4 sm:$0xff]  }
  0x89   :  { %1596 = vmatmul.mubr.bf16.gmra.mxu0 %v3778_v0  ;;  %1821 = vmatmul.mubr.bf16.gmra.mxu1 %v3779_v16 }
  0x8a   :  { %1603 = vmatprep.mubr.bf16.mxu0 %v3781_v17  ;;  %1828 = vmatprep.mubr.bf16.mxu1 %v3783_v18 }
  0x91   :  { %1604 = vmatmul.mubr.bf16.gmra.mxu0 %v3785_v19  ;;  %1829 = vmatmul.mubr.bf16.gmra.mxu1 %v3786_v20 }
  0x92   :  { %1611 = vmatprep.mubr.bf16.mxu0 %v3787_v21  ;;  %1836 = vmatprep.mubr.bf16.mxu1 %v3789_v22  ;;  %v3877_v21 = vld [vmem:[%s5138_s0 + $0x2b0] ss:$20 sps:$4 sm:$0xff]   ;;  %v3878_v22 = vld [vmem:[%s5138_s0 + $0x88] ss:$20 sps:$4 sm:$0xff]  }
  0x99   :  { %1612 = vmatmul.mubr.bf16.gmra.mxu0 %v3791_v23  ;;  %1837 = vmatmul.mubr.bf16.gmra.mxu1 %v3792_v24  ;;  %v3879_v23 = vld [vmem:[%s5138_s0 + $0x2dc] ss:$20 sps:$4 sm:$0xff]  }
  0x9a   :  { %1619 = vmatprep.mubr.bf16.mxu0 %v3793_v25  ;;  %1844 = vmatprep.mubr.bf16.mxu1 %v3795_v26  ;;  %v3881_v24 = vld [vmem:[%s5138_s0 + $0xb0] ss:$20 sps:$4 sm:$0xff]  }
  0xa1   :  { %1620 = vmatmul.mubr.bf16.gmra.mxu0 %v3797_v27  ;;  %1845 = vmatmul.mubr.bf16.gmra.mxu1 %v3798_v28 }
  0xa2   :  { %1627 = vmatprep.mubr.bf16.mxu0 %v3800_v29  ;;  %1852 = vmatprep.mubr.bf16.mxu1 %v3802_v30 }
  0xa9   :  { %1628 = vmatmul.mubr.bf16.gmra.mxu0 %v3804_v31  ;;  %1853 = vmatmul.mubr.bf16.gmra.mxu1 %v3805_v32 }
  0xaa   :  { %1635 = vmatprep.mubr.bf16.mxu0 %v3806_v33  ;;  %1860 = vmatprep.mubr.bf16.mxu1 %v3808_v34  ;;  %v3882_v33 = vld [vmem:[%s5138_s0 + $0x2d8] ss:$20 sps:$4 sm:$0xff]  }
  0xab   :  { %v3883_v34 = vld [vmem:[%s5138_s0 + $0xd8] ss:$20 sps:$4 sm:$0xff]  }
  0xb1   :  { %1636 = vmatmul.mubr.bf16.gmra.mxu0 %v3810_v35  ;;  %1861 = vmatmul.mubr.bf16.gmra.mxu1 %v3811_v36  ;;  %v3884_v35 = vld [vmem:[%s5138_s0 + $0x304] ss:$20 sps:$4 sm:$0xff]   ;;  %v3886_v36 = vld [vmem:[%s5138_s0 + $0x100] ss:$20 sps:$4 sm:$0xff]  }
  0xb2   :  { %1643 = vmatprep.mubr.bf16.mxu0 %v3812_v37  ;;  %1868 = vmatprep.mubr.bf16.mxu1 %v3814_v38 }
  0xb9   :  { %1644 = vmatmul.mubr.bf16.gmra.mxu0 %v3816_v39  ;;  %1869 = vmatmul.mubr.bf16.gmra.mxu1 %v3817_v40 }
  0xba   :  { %1651 = vmatprep.mubr.bf16.mxu0 %v3819_v41  ;;  %1876 = vmatprep.mubr.bf16.mxu1 %v3821_v42 }
  0xc1   :  { %1652 = vmatmul.mubr.bf16.gmra.mxu0 %v3823_v43  ;;  %1877 = vmatmul.mubr.bf16.gmra.mxu1 %v3824_v44 }
  0xc2   :  { %1659 = vmatprep.mubr.bf16.mxu0 %v3825_v45  ;;  %1884 = vmatprep.mubr.bf16.mxu1 %v3827_v46  ;;  %v3887_v45 = vld [vmem:[%s5138_s0 + $0x300] ss:$20 sps:$4 sm:$0xff]   ;;  %v3888_v46 = vld [vmem:[%s5138_s0 + $0x128] ss:$20 sps:$4 sm:$0xff]  }
  0xc9   :  { %1660 = vmatmul.mubr.bf16.gmra.mxu0 %v3829_v47  ;;  %1885 = vmatmul.mubr.bf16.gmra.mxu1 %v3830_v48  ;;  %v3891_v47 = vld [vmem:[%s5138_s0 + $0x32c] ss:$20 sps:$4 sm:$0xff]   ;;  %v3892_v48 = vld [vmem:[%s5138_s0 + $0x150] ss:$20 sps:$4 sm:$0xff]  }
  0xca   :  { %1667 = vmatprep.mubr.bf16.mxu0 %v3831_v49  ;;  %1892 = vmatprep.mubr.bf16.mxu1 %v3833_v50 }
  0xd1   :  { %1668 = vmatmul.mubr.bf16.gmra.mxu0 %v3835_v51  ;;  %1893 = vmatmul.mubr.bf16.gmra.mxu1 %v3836_v52 }
  0xd2   :  { %1675 = vmatprep.mubr.bf16.mxu0 %v3838_v53  ;;  %1900 = vmatprep.mubr.bf16.mxu1 %v3840_v54 }
  0xd9   :  { %1676 = vmatmul.mubr.bf16.gmra.mxu0 %v3842_v55  ;;  %1901 = vmatmul.mubr.bf16.gmra.mxu1 %v3843_v56 }
  0xda   :  { %1683 = vmatprep.mubr.bf16.mxu0 %v3844_v57  ;;  %1908 = vmatprep.mubr.bf16.mxu1 %v3846_v58  ;;  %v3889_v57 = vld [vmem:[%s5138_s0 + $0x328] ss:$20 sps:$4 sm:$0xff]   ;;  %v3893_v58 = vld [vmem:[%s5138_s0 + $0x178] ss:$20 sps:$4 sm:$0xff]  }
  0xe1   :  { %1684 = vmatmul.mubr.bf16.gmra.mxu0 %v3848_v59  ;;  %1909 = vmatmul.mubr.bf16.gmra.mxu1 %v3849_v60  ;;  %v3896_v59 = vld [vmem:[%s5138_s0 + $0x354] ss:$20 sps:$4 sm:$0xff]  }
  0xe2   :  { %1691 = vmatprep.mubr.bf16.mxu0 %v3850_v61  ;;  %1916 = vmatprep.mubr.bf16.mxu1 %v3852_v62  ;;  %v3897_v60 = vld [vmem:[%s5138_s0 + $0x1a0] ss:$20 sps:$4 sm:$0xff]  }
  0xe9   :  { %1692 = vmatmul.mubr.bf16.gmra.mxu0 %v3854_v63  ;;  %1917 = vmatmul.mubr.bf16.gmra.mxu1 %v3855_v1 }
  0xea   :  { %1699 = vmatprep.mubr.bf16.mxu0 %v3857_v2  ;;  %1924 = vmatprep.mubr.bf16.mxu1 %v3859_v3 }
  0xf1   :  { %1700 = vmatmul.mubr.bf16.gmra.mxu0 %v3861_v4  ;;  %1925 = vmatmul.mubr.bf16.gmra.mxu1 %v3862_v5 }
  0xf2   :  { %1707 = vmatprep.mubr.bf16.mxu0 %v3863_v6  ;;  %1932 = vmatprep.mubr.bf16.mxu1 %v3865_v7  ;;  %v3894_v6 = vld [vmem:[%s5138_s0 + $0x350] ss:$20 sps:$4 sm:$0xff]   ;;  %v3898_v7 = vld [vmem:[%s5138_s0 + $0x1c8] ss:$20 sps:$4 sm:$0xff]  }
  0xf9   :  { %1708 = vmatmul.mubr.bf16.gmra.mxu0 %v3867_v8  ;;  %1933 = vmatmul.mubr.bf16.gmra.mxu1 %v3868_v9  ;;  %v3901_v8 = vld [vmem:[%s5138_s0 + $0x37c] ss:$20 sps:$4 sm:$0xff]  }
  0xfa   :  { %1940 = vmatprep.mubr.bf16.mxu1 %v3869_v10  ;;  %3588 = vmatprep.mubr.bf16.mxu0 %v3871_v11  ;;  %v3902_v9 = vld [vmem:[%s5138_s0 + $0x1f0] ss:$20 sps:$4 sm:$0xff]  }
 0x101   :  { %v4444_v0 = vpop.f32.mrf.mxu0  ;;  %v4446_v16 = vpop.f32.mrf.mxu1  ;;  %1941 = vmatmul.mubr.bf16.gmra.mxu1 %v3872_v12  ;;  %3589 = vmatmul.mubr.bf16.vlgmr.msra.gmra.mxu0 %v3873_v13 }
 0x102   :  { %5141 = vst [vmem:[#allocation3_spill] sm:$0xff] %v4446_v16  ;;  %1948 = vmatprep.mubr.bf16.mxu1 %v3874_v14  ;;  %3592 = vmatprep.mubr.bf16.mxu0 %v3876_v15 }
 0x103   :  { %v1527_v17 = vpop.f32.mrf.mxu0  ;;  %v1719_v18 = vpop.f32.mrf.mxu1 }
 0x105   :  { %v4448_v19 = vpop.f32.mrf.mxu0  ;;  %v4450_v20 = vpop.f32.mrf.mxu1 }
 0x106   :  { %5142 = vst [vmem:[#allocation4_spill] sm:$0xff] %v4450_v20 }
 0x107   :  { %v1530_v25 = vpop.f32.mrf.mxu0  ;;  %v1722_v26 = vpop.f32.mrf.mxu1 }
 0x109   :  { %v4464_v27 = vpop.f32.mrf.mxu0  ;;  %v4466_v28 = vpop.f32.mrf.mxu1  ;;  %1949 = vmatmul.mubr.bf16.gmra.mxu1 %v3877_v21  ;;  %3593 = vmatmul.mubr.bf16.gmra.mxu0 %v3878_v22  ;;  %v3899_v21 = vld [vmem:[%s5138_s0 + $0x378] ss:$20 sps:$4 sm:$0xff]  }
 0x10a   :  { %5143 = vst [vmem:[#allocation5_spill] sm:$0xff] %v4466_v28  ;;  %1956 = vmatprep.mubr.bf16.mxu1 %v3879_v23  ;;  %3596 = vmatprep.mubr.bf16.mxu0 %v3881_v24  ;;  %v3903_v22 = vld [vmem:[%s5138_s0 + $0x218] ss:$20 sps:$4 sm:$0xff]   ;;  %v3907_v24 = vld [vmem:[%s5138_s0 + $0x240] ss:$20 sps:$4 sm:$0xff]  }
 0x10b   :  { %v1535_v29 = vpop.f32.mrf.mxu0  ;;  %v1727_v30 = vpop.f32.mrf.mxu1  ;;  %v3906_v23 = vld [vmem:[%s5138_s0 + $0x3a4] ss:$20 sps:$4 sm:$0xff]  }
 0x10d   :  { %v4468_v31 = vpop.f32.mrf.mxu0  ;;  %v4470_v32 = vpop.f32.mrf.mxu1 }
 0x10e   :  { %5144 = vst [vmem:[#allocation6_spill] sm:$0xff] %v4470_v32 }
 0x10f   :  { %v1538_v37 = vpop.f32.mrf.mxu0  ;;  %v1730_v38 = vpop.f32.mrf.mxu1 }
 0x110   :  { %v3904_v37 = vld [vmem:[%s5138_s0 + $0x3a0] ss:$20 sps:$4 sm:$0xff]   ;;  %v3908_v38 = vld [vmem:[%s5138_s0 + $0x268] ss:$20 sps:$4 sm:$0xff]  }
 0x111   :  { %v4484_v39 = vpop.f32.mrf.mxu0  ;;  %v4486_v40 = vpop.f32.mrf.mxu1  ;;  %1957 = vmatmul.mubr.bf16.gmra.mxu1 %v3882_v33  ;;  %3597 = vmatmul.mubr.bf16.gmra.mxu0 %v3883_v34 }
 0x112   :  { %5145 = vst [vmem:[#allocation7_spill] sm:$0xff] %v4486_v40  ;;  %1964 = vmatprep.mubr.bf16.mxu1 %v3884_v35  ;;  %3600 = vmatprep.mubr.bf16.mxu0 %v3886_v36 }
 0x113   :  { %v1543_v41 = vpop.f32.mrf.mxu0  ;;  %v1735_v42 = vpop.f32.mrf.mxu1 }
 0x114   :  { %v3911_v41 = vld [vmem:[%s5138_s0 + $0x3cc] ss:$20 sps:$4 sm:$0xff]   ;;  %v3912_v42 = vld [vmem:[%s5138_s0 + $0x290] ss:$20 sps:$4 sm:$0xff]  }
 0x115   :  { %v4488_v43 = vpop.f32.mrf.mxu0  ;;  %v4490_v44 = vpop.f32.mrf.mxu1 }
 0x116   :  { %5146 = vst [vmem:[#allocation8_spill] sm:$0xff] %v4490_v44 }
 0x117   :  { %v1546_v49 = vpop.f32.mrf.mxu0  ;;  %v1738_v50 = vpop.f32.mrf.mxu1 }
 0x119   :  { %v4504_v51 = vpop.f32.mrf.mxu0  ;;  %v4506_v52 = vpop.f32.mrf.mxu1  ;;  %1965 = vmatmul.mubr.bf16.gmra.mxu1 %v3887_v45  ;;  %3601 = vmatmul.mubr.bf16.gmra.mxu0 %v3888_v46 }
 0x11a   :  { %5147 = vst [vmem:[#allocation9_spill] sm:$0xff] %v4506_v52  ;;  %1972 = vmatprep.mubr.bf16.mxu1 %v3891_v47  ;;  %3604 = vmatprep.mubr.bf16.mxu0 %v3892_v48 }
 0x11b   :  { %v1551_v53 = vpop.f32.mrf.mxu0  ;;  %v1743_v54 = vpop.f32.mrf.mxu1 }
 0x11d   :  { %v4508_v55 = vpop.f32.mrf.mxu0  ;;  %v4510_v56 = vpop.f32.mrf.mxu1 }
 0x11e   :  { %5148 = vst [vmem:[#allocation10_spill] sm:$0xff] %v4510_v56 }
 0x11f   :  { %v1554_v61 = vpop.f32.mrf.mxu0  ;;  %v1746_v62 = vpop.f32.mrf.mxu1 }
 0x121   :  { %v4524_v63 = vpop.f32.mrf.mxu0  ;;  %v4526_v1 = vpop.f32.mrf.mxu1  ;;  %1973 = vmatmul.mubr.bf16.gmra.mxu1 %v3889_v57  ;;  %3605 = vmatmul.mubr.bf16.gmra.mxu0 %v3893_v58  ;;  %v3909_v57 = vld [vmem:[%s5138_s0 + $0x3c8] ss:$20 sps:$4 sm:$0xff]   ;;  %v3913_v58 = vld [vmem:[%s5138_s0 + $0x2b8] ss:$20 sps:$4 sm:$0xff]  }
 0x122   :  { %5149 = vst [vmem:[#allocation11_spill] sm:$0xff] %v4526_v1  ;;  %1980 = vmatprep.mubr.bf16.mxu1 %v3896_v59  ;;  %3608 = vmatprep.mubr.bf16.mxu0 %v3897_v60  ;;  %v3916_v59 = vld [vmem:[%s5138_s0 + $0x3f4] ss:$20 sps:$4 sm:$0xff]  }
 0x123   :  { %v1559_v2 = vpop.f32.mrf.mxu0  ;;  %v1751_v3 = vpop.f32.mrf.mxu1  ;;  %v3917_v60 = vld [vmem:[%s5138_s0 + $0x2e0] ss:$20 sps:$4 sm:$0xff]  }
 0x125   :  { %v4528_v4 = vpop.f32.mrf.mxu0  ;;  %v4530_v5 = vpop.f32.mrf.mxu1 }
 0x126   :  { %5150 = vst [vmem:[#allocation12_spill] sm:$0xff] %v4530_v5 }
 0x127   :  { %v1562_v10 = vpop.f32.mrf.mxu0  ;;  %v1754_v11 = vpop.f32.mrf.mxu1 }
 0x128   :  { %v3914_v11 = vld [vmem:[%s5138_s0 + $0x3f0] ss:$20 sps:$4 sm:$0xff]  }
 0x129   :  { %v4544_v12 = vpop.f32.mrf.mxu0  ;;  %v4546_v13 = vpop.f32.mrf.mxu1  ;;  %1981 = vmatmul.mubr.bf16.gmra.mxu1 %v3894_v6  ;;  %3609 = vmatmul.mubr.bf16.gmra.mxu0 %v3898_v7 }
 0x12a   :  { %5151 = vst [vmem:[#allocation13_spill] sm:$0xff] %v4546_v13  ;;  %1988 = vmatprep.mubr.bf16.mxu1 %v3901_v8  ;;  %3612 = vmatprep.mubr.bf16.mxu0 %v3902_v9 }
 0x12b   :  { %v1567_v14 = vpop.f32.mrf.mxu0  ;;  %v1759_v15 = vpop.f32.mrf.mxu1 }
 0x12c   :  { %v3918_v14 = vld [vmem:[%s5138_s0 + $0x308] ss:$20 sps:$4 sm:$0xff]  }
 0x12d   :  { %v4548_v17 = vpop.f32.mrf.mxu0  ;;  %v4550_v18 = vpop.f32.mrf.mxu1 }
 0x12e   :  { %5152 = vst [vmem:[#allocation14_spill] sm:$0xff] %v4550_v18 }
 0x12f   :  { %v1570_v25 = vpop.f32.mrf.mxu0  ;;  %v1762_v26 = vpop.f32.mrf.mxu1 }
 0x131   :  { %v4564_v29 = vpop.f32.mrf.mxu0  ;;  %v4566_v30 = vpop.f32.mrf.mxu1  ;;  %1989 = vmatmul.mubr.bf16.gmra.mxu1 %v3899_v21  ;;  %3613 = vmatmul.mubr.bf16.gmra.mxu0 %v3903_v22  ;;  %v3922_v21 = vld [vmem:[%s5138_s0 + $0x330] ss:$20 sps:$4 sm:$0xff]  }
 0x132   :  { %5153 = vst [vmem:[#allocation15_spill] sm:$0xff] %v4566_v30  ;;  %1996 = vmatprep.mubr.bf16.mxu1 %v3906_v23  ;;  %3616 = vmatprep.mubr.bf16.mxu0 %v3907_v24 }
 0x133   :  { %v1575_v33 = vpop.f32.mrf.mxu0  ;;  %v1767_v34 = vpop.f32.mrf.mxu1 }
 0x135   :  { %v4568_v35 = vpop.f32.mrf.mxu0  ;;  %v4570_v36 = vpop.f32.mrf.mxu1 }
 0x136   :  { %5154 = vst [vmem:[#allocation16_spill] sm:$0xff] %v4570_v36 }
 0x137   :  { %v1578_v45 = vpop.f32.mrf.mxu0  ;;  %v1770_v46 = vpop.f32.mrf.mxu1 }
 0x138   :  { %v3927_v45 = vld [vmem:[%s5138_s0 + $0x380] ss:$20 sps:$4 sm:$0xff]  }
 0x139   :  { %v4584_v47 = vpop.f32.mrf.mxu0  ;;  %v4586_v48 = vpop.f32.mrf.mxu1  ;;  %1997 = vmatmul.mubr.bf16.gmra.mxu1 %v3904_v37  ;;  %3617 = vmatmul.mubr.bf16.gmra.mxu0 %v3908_v38  ;;  %v3919_v38 = vld [vmem:[%s5138_s0 + $0x418] ss:$20 sps:$4 sm:$0xff]  }
 0x13a   :  { %5155 = vst [vmem:[#allocation17_spill] sm:$0xff] %v4586_v48  ;;  %2004 = vmatprep.mubr.bf16.mxu1 %v3911_v41  ;;  %3620 = vmatprep.mubr.bf16.mxu0 %v3912_v42  ;;  %v3923_v41 = vld [vmem:[%s5138_s0 + $0x358] ss:$20 sps:$4 sm:$0xff]  }
 0x13b   :  { %v1583_v49 = vpop.f32.mrf.mxu0  ;;  %v1775_v50 = vpop.f32.mrf.mxu1 }
 0x13d   :  { %v4588_v53 = vpop.f32.mrf.mxu0  ;;  %v4590_v54 = vpop.f32.mrf.mxu1 }
 0x13e   :  { %5156 = vst [vmem:[#allocation18_spill] sm:$0xff] %v4590_v54 }
 0x13f   :  { %v1586_v61 = vpop.f32.mrf.mxu0  ;;  %v1778_v62 = vpop.f32.mrf.mxu1 }
 0x140   :  { %v3924_v62 = vld [vmem:[%s5138_s0 + $0x440] ss:$20 sps:$4 sm:$0xff]  }
 0x141   :  { %v4604_v2 = vpop.f32.mrf.mxu0  ;;  %v1814_v3 = vpop.f32.mrf.mxu1  ;;  %2005 = vmatmul.mubr.bf16.gmra.mxu1 %v3909_v57  ;;  %3621 = vmatmul.mubr.bf16.gmra.mxu0 %v3913_v58 }
 0x142   :  { %v4607_v6 = vadd.f32 %v1814_v3, %v4444_v0  ;;  %2012 = vmatprep.mubr.bf16.mxu1 %v3916_v59  ;;  %3624 = vmatprep.mubr.bf16.mxu0 %v3917_v60  ;;  %v3921_v0 = vld [vmem:[%s5138_s0 + $0x41c] ss:$20 sps:$4 sm:$0xff]  }
 0x143   :  { %v1591_v7 = vpop.f32.mrf.mxu0  ;;  %v1816_v8 = vpop.f32.mrf.mxu1  ;;  %v3928_v3 = vld [vmem:[%s5138_s0 + $0x3a8] ss:$20 sps:$4 sm:$0xff]  }
 0x144   :  { %v3932_v8 = vld [vmem:[%s5138_s0 + $0x3d0] ss:$20 sps:$4 sm:$0xff]  }
 0x145   :  { %v4609_v9 = vpop.f32.mrf.mxu0  ;;  %v1817_v10 = vpop.f32.mrf.mxu1 }
 0x146   :  { %v4618_v15 = vadd.f32 %v1817_v10, %v4448_v19 }
 0x147   :  { %v1594_v22 = vpop.f32.mrf.mxu0  ;;  %v1819_v23 = vpop.f32.mrf.mxu1 }
 0x149   :  { %v4626_v24 = vpop.f32.mrf.mxu0  ;;  %v1822_v25 = vpop.f32.mrf.mxu1  ;;  %2013 = vmatmul.mubr.bf16.gmra.mxu1 %v3914_v11  ;;  %3625 = vmatmul.mubr.bf16.gmra.mxu0 %v3918_v14 }
 0x14a   :  { %v4629_v26 = vadd.f32 %v1822_v25, %v4464_v27  ;;  %2020 = vmatprep.mubr.bf16.mxu1 %v3921_v0  ;;  %3628 = vmatprep.mubr.bf16.mxu0 %v3922_v21  ;;  %v3926_v27 = vld [vmem:[%s5138_s0 + $0x444] ss:$20 sps:$4 sm:$0xff]  }
 0x14b   :  { %v1599_v19 = vpop.f32.mrf.mxu0  ;;  %v1824_v33 = vpop.f32.mrf.mxu1 }
 0x14c   :  { %v3929_v19 = vld [vmem:[%s5138_s0 + $0x468] ss:$20 sps:$4 sm:$0xff]   ;;  %v3933_v33 = vld [vmem:[%s5138_s0 + $0x3f8] ss:$20 sps:$4 sm:$0xff]  }
 0x14d   :  { %v4631_v34 = vpop.f32.mrf.mxu0  ;;  %v1825_v37 = vpop.f32.mrf.mxu1 }
 0x14e   :  { %v4640_v42 = vadd.f32 %v1825_v37, %v4468_v31 }
 0x14f   :  { %v1602_v46 = vpop.f32.mrf.mxu0  ;;  %v1827_v49 = vpop.f32.mrf.mxu1 }
 0x151   :  { %v4648_v50 = vpop.f32.mrf.mxu0  ;;  %v1830_v57 = vpop.f32.mrf.mxu1  ;;  %2021 = vmatmul.mubr.bf16.gmra.mxu1 %v3919_v38  ;;  %3629 = vmatmul.mubr.bf16.gmra.mxu0 %v3923_v41  ;;  %v3937_v38 = vld [vmem:[%s5138_s0 + $0x420] ss:$20 sps:$4 sm:$0xff]  }
 0x152   :  { %v4651_v58 = vadd.f32 %v1830_v57, %v4484_v39  ;;  %2028 = vmatprep.mubr.bf16.mxu1 %v3926_v27  ;;  %3632 = vmatprep.mubr.bf16.mxu0 %v3927_v45  ;;  %v3931_v39 = vld [vmem:[%s5138_s0 + $0x46c] ss:$20 sps:$4 sm:$0xff]  }
 0x153   :  { %v1607_v31 = vpop.f32.mrf.mxu0  ;;  %v1832_v59 = vpop.f32.mrf.mxu1 }
 0x155   :  { %v4653_v60 = vpop.f32.mrf.mxu0  ;;  %v1833_v61 = vpop.f32.mrf.mxu1 }
 0x156   :  { %v4662_v7 = vadd.f32 %v1833_v61, %v4488_v43  ;;  %v3934_v61 = vld [vmem:[%s5138_s0 + $0x490] ss:$20 sps:$4 sm:$0xff]  }
 0x157   :  { %v1610_v10 = vpop.f32.mrf.mxu0  ;;  %v1835_v11 = vpop.f32.mrf.mxu1 }
 0x159   :  { %v4670_v14 = vpop.f32.mrf.mxu0  ;;  %v1838_v0 = vpop.f32.mrf.mxu1  ;;  %2029 = vmatmul.mubr.bf16.gmra.mxu1 %v3924_v62  ;;  %3633 = vmatmul.mubr.bf16.gmra.mxu0 %v3928_v3  ;;  %v3938_v62 = vld [vmem:[%s5138_s0 + $0x448] ss:$20 sps:$4 sm:$0xff]  }
 0x15a   :  { %v4673_v21 = vadd.f32 %v1838_v0, %v4504_v51  ;;  %2036 = vmatprep.mubr.bf16.mxu1 %v3931_v39  ;;  %3636 = vmatprep.mubr.bf16.mxu0 %v3932_v8  ;;  %v3936_v51 = vld [vmem:[%s5138_s0 + $0x494] ss:$20 sps:$4 sm:$0xff]   ;;  %v3942_v39 = vld [vmem:[%s5138_s0 + $0x470] ss:$20 sps:$4 sm:$0xff]  }
 0x15b   :  { %v1615_v43 = vpop.f32.mrf.mxu0  ;;  %v1840_v22 = vpop.f32.mrf.mxu1 }
 0x15d   :  { %v4675_v23 = vpop.f32.mrf.mxu0  ;;  %v1841_v25 = vpop.f32.mrf.mxu1 }
 0x15e   :  { %v4684_v37 = vadd.f32 %v1841_v25, %v4508_v55 }
 0x15f   :  { %v1618_v41 = vpop.f32.mrf.mxu0  ;;  %v1843_v27 = vpop.f32.mrf.mxu1 }
 0x160   :  { %v3947_v41 = vld [vmem:[%s5138_s0 + $0x4c0] ss:$20 sps:$4 sm:$0xff]  }
 0x161   :  { %v4692_v45 = vpop.f32.mrf.mxu0  ;;  %v1846_v46 = vpop.f32.mrf.mxu1  ;;  %2037 = vmatmul.mubr.bf16.gmra.mxu1 %v3929_v19  ;;  %3637 = vmatmul.mubr.bf16.gmra.mxu0 %v3933_v33  ;;  %v3939_v33 = vld [vmem:[%s5138_s0 + $0x4b8] ss:$20 sps:$4 sm:$0xff]  }
 0x162   :  { %v4695_v49 = vadd.f32 %v1846_v46, %v4524_v63  ;;  %2044 = vmatprep.mubr.bf16.mxu1 %v3936_v51  ;;  %3640 = vmatprep.mubr.bf16.mxu0 %v3937_v38  ;;  %v3941_v63 = vld [vmem:[%s5138_s0 + $0x4bc] ss:$20 sps:$4 sm:$0xff]   ;;  %v3943_v51 = vld [vmem:[%s5138_s0 + $0x498] ss:$20 sps:$4 sm:$0xff]  }
 0x163   :  { %v1623_v55 = vpop.f32.mrf.mxu0  ;;  %v1848_v57 = vpop.f32.mrf.mxu1 }
 0x165   :  { %v4697_v31 = vpop.f32.mrf.mxu0  ;;  %v1849_v59 = vpop.f32.mrf.mxu1 }
 0x166   :  { %v4706_v3 = vadd.f32 %v1849_v59, %v4528_v4 }
 0x167   :  { %v1626_v8 = vpop.f32.mrf.mxu0  ;;  %v1851_v10 = vpop.f32.mrf.mxu1 }
 0x168   :  { %v3948_v8 = vld [vmem:[%s5138_s0 + $0x4e8] ss:$20 sps:$4 sm:$0xff]  }
 0x169   :  { %v4714_v11 = vpop.f32.mrf.mxu0  ;;  %v1854_v0 = vpop.f32.mrf.mxu1  ;;  %2045 = vmatmul.mubr.bf16.gmra.mxu1 %v3934_v61  ;;  %3641 = vmatmul.mubr.bf16.gmra.mxu0 %v3938_v62 }
 0x16a   :  { %v4717_v43 = vadd.f32 %v1854_v0, %v4544_v12  ;;  %2052 = vmatprep.mubr.bf16.mxu1 %v3941_v63  ;;  %3644 = vmatprep.mubr.bf16.mxu0 %v3942_v39  ;;  %v3946_v12 = vld [vmem:[%s5138_s0 + $0x4e4] ss:$20 sps:$4 sm:$0xff]   ;;  %v3944_v39 = vld [vmem:[%s5138_s0 + $0x4e0] ss:$20 sps:$4 sm:$0xff]  }
 0x16b   :  { %v1631_v4 = vpop.f32.mrf.mxu0  ;;  %v1856_v22 = vpop.f32.mrf.mxu1 }
 0x16d   :  { %v4719_v25 = vpop.f32.mrf.mxu0  ;;  %v1857_v19 = vpop.f32.mrf.mxu1 }
 0x16e   :  { %v4728_v38 = vadd.f32 %v1857_v19, %v4548_v17 }
 0x16f   :  { %v1634_v27 = vpop.f32.mrf.mxu0  ;;  %v1859_v46 = vpop.f32.mrf.mxu1 }
 0x171   :  { %v4736_v55 = vpop.f32.mrf.mxu0  ;;  %v1862_v57 = vpop.f32.mrf.mxu1  ;;  %2053 = vmatmul.mubr.bf16.gmra.mxu1 %v3939_v33  ;;  %3645 = vmatmul.mubr.bf16.gmra.mxu0 %v3943_v51 }
 0x172   :  { %v4739_v59 = vadd.f32 %v1862_v57, %v4564_v29  ;;  %2060 = vmatprep.mubr.bf16.mxu1 %v3946_v12  ;;  %3648 = vmatprep.mubr.bf16.mxu0 %v3947_v41 }
 0x173   :  { %v1639_v17 = vpop.f32.mrf.mxu0  ;;  %v1864_v61 = vpop.f32.mrf.mxu1 }
 0x175   :  { %v4741_v62 = vpop.f32.mrf.mxu0  ;;  %v1865_v63 = vpop.f32.mrf.mxu1 }
 0x176   :  { %v4750_v10 = vadd.f32 %v1865_v63, %v4568_v35 }
 0x177   :  { %v1642_v29 = vpop.f32.mrf.mxu0  ;;  %v1867_v0 = vpop.f32.mrf.mxu1 }
 0x179   :  { %v4752_v4 = vpop.f32.mrf.mxu0  ;;  %v1870_v22 = vpop.f32.mrf.mxu1  ;;  %2061 = vmatmul.mubr.bf16.gmra.mxu1 %v3944_v39  ;;  %3649 = vmatmul.mubr.bf16.gmra.mxu0 %v3948_v8 }
 0x17a   :  { %v4755_v19 = vadd.f32 %v1870_v22, %v4584_v47 }
 0x17b   :  { %v1647_v33 = vpop.f32.mrf.mxu0  ;;  %v1872_v51 = vpop.f32.mrf.mxu1 }
 0x17d   :  { %v4757_v12 = vpop.f32.mrf.mxu0  ;;  %v1873_v41 = vpop.f32.mrf.mxu1 }
 0x17e   :  { %v4760_v27 = vadd.f32 %v1873_v41, %v4588_v53 }
 0x17f   :  { %v1650_v35 = vpop.f32.mrf.mxu0  ;;  %v1875_v46 = vpop.f32.mrf.mxu1 }
 0x181   :  { %v4762_v57 = vpop.f32.mrf.mxu0  ;;  %v1878_v17 = vpop.f32.mrf.mxu1 }
 0x182   :  { %v4765_v61 = vadd.f32 %v1878_v17, %v4604_v2 }
 0x183   :  { %v1655_v63 = vpop.f32.mrf.mxu0  ;;  %v1880_v39 = vpop.f32.mrf.mxu1 }
 0x185   :  { %v4767_v47 = vpop.f32.mrf.mxu0  ;;  %v1881_v8 = vpop.f32.mrf.mxu1 }
 0x186   :  { %v4770_v29 = vadd.f32 %v1881_v8, %v4609_v9 }
 0x187   :  { %v1658_v0 = vpop.f32.mrf.mxu0  ;;  %v1883_v22 = vpop.f32.mrf.mxu1 }
 0x189   :  { %v4772_v53 = vpop.f32.mrf.mxu0  ;;  %v1886_v33 = vpop.f32.mrf.mxu1 }
 0x18a   :  { %v4775_v51 = vadd.f32 %v1886_v33, %v4626_v24 }
 0x18b   :  { %v1663_v41 = vpop.f32.mrf.mxu0  ;;  %v1888_v35 = vpop.f32.mrf.mxu1 }
 0x18d   :  { %v4777_v2 = vpop.f32.mrf.mxu0  ;;  %v1889_v46 = vpop.f32.mrf.mxu1 }
 0x18e   :  { %v4780_v17 = vadd.f32 %v1889_v46, %v4631_v34 }
 0x18f   :  { %v1666_v63 = vpop.f32.mrf.mxu0  ;;  %v1891_v39 = vpop.f32.mrf.mxu1 }
 0x191   :  { %v4782_v9 = vpop.f32.mrf.mxu0  ;;  %v1894_v8 = vpop.f32.mrf.mxu1 }
 0x192   :  { %v4785_v0 = vadd.f32 %v1894_v8, %v4648_v50 }
 0x193   :  { %v1671_v22 = vpop.f32.mrf.mxu0  ;;  %v1896_v54 = vpop.f32.mrf.mxu1 }
 0x195   :  { %v4787_v24 = vpop.f32.mrf.mxu0  ;;  %v1897_v33 = vpop.f32.mrf.mxu1 }
 0x196   :  { %v4790_v41 = vadd.f32 %v1897_v33, %v4653_v60 }
 0x197   :  { %v1674_v35 = vpop.f32.mrf.mxu0  ;;  %v1899_v36 = vpop.f32.mrf.mxu1 }
 0x199   :  { %v4792_v34 = vpop.f32.mrf.mxu0  ;;  %v1902_v46 = vpop.f32.mrf.mxu1 }
 0x19a   :  { %v4795_v63 = vadd.f32 %v1902_v46, %v4670_v14 }
 0x19b   :  { %v1679_v39 = vpop.f32.mrf.mxu0  ;;  %v1904_v48 = vpop.f32.mrf.mxu1 }
 0x19d   :  { %v4797_v50 = vpop.f32.mrf.mxu0  ;;  %v1905_v8 = vpop.f32.mrf.mxu1 }
 0x19e   :  { %v4800_v54 = vadd.f32 %v1905_v8, %v4675_v23 }
 0x19f   :  { %v1682_v22 = vpop.f32.mrf.mxu0  ;;  %v1907_v30 = vpop.f32.mrf.mxu1 }
 0x1a1   :  { %v4802_v60 = vpop.f32.mrf.mxu0  ;;  %v1910_v33 = vpop.f32.mrf.mxu1 }
 0x1a2   :  { %v4805_v36 = vadd.f32 %v1910_v33, %v4692_v45 }
 0x1a3   :  { %v1687_v35 = vpop.f32.mrf.mxu0  ;;  %v1912_v5 = vpop.f32.mrf.mxu1 }
 0x1a5   :  { %v4807_v14 = vpop.f32.mrf.mxu0  ;;  %v1913_v46 = vpop.f32.mrf.mxu1 }
 0x1a6   :  { %v4810_v48 = vadd.f32 %v1913_v46, %v4697_v31 }
 0x1a7   :  { %v1690_v39 = vpop.f32.mrf.mxu0  ;;  %v1915_v18 = vpop.f32.mrf.mxu1 }
 0x1a9   :  { %v4812_v23 = vpop.f32.mrf.mxu0  ;;  %v1918_v8 = vpop.f32.mrf.mxu1 }
 0x1aa   :  { %v4815_v30 = vadd.f32 %v1918_v8, %v4714_v11 }
 0x1ab   :  { %v1695_v22 = vpop.f32.mrf.mxu0  ;;  %v1920_v1 = vpop.f32.mrf.mxu1 }
 0x1ad   :  { %v4817_v45 = vpop.f32.mrf.mxu0  ;;  %v1921_v33 = vpop.f32.mrf.mxu1 }
 0x1ae   :  { %v4820_v5 = vadd.f32 %v1921_v33, %v4719_v25 }
 0x1af   :  { %v1698_v35 = vpop.f32.mrf.mxu0  ;;  %v1923_v13 = vpop.f32.mrf.mxu1 }
 0x1b1   :  { %v4822_v31 = vpop.f32.mrf.mxu0  ;;  %v1926_v46 = vpop.f32.mrf.mxu1 }
 0x1b2   :  { %v4825_v18 = vadd.f32 %v1926_v46, %v4736_v55 }
 0x1b3   :  { %v1703_v39 = vpop.f32.mrf.mxu0  ;;  %v1928_v44 = vpop.f32.mrf.mxu1 }
 0x1b5   :  { %v4827_v11 = vpop.f32.mrf.mxu0  ;;  %v1929_v8 = vpop.f32.mrf.mxu1 }
 0x1b6   :  { %5157 = vst [vmem:[#allocation19_spill] sm:$0xff] %v4827_v11  ;;  %v4830_v1 = vadd.f32 %v1929_v8, %v4741_v62 }
 0x1b7   :  { %v1706_v22 = vpop.f32.mrf.mxu0  ;;  %v1931_v56 = vpop.f32.mrf.mxu1 }
 0x1b9   :  { %v4832_v25 = vpop.f32.mrf.mxu0  ;;  %v1934_v33 = vpop.f32.mrf.mxu1 }
 0x1ba   :  { %v4835_v13 = vadd.f32 %v1934_v33, %v4752_v4  ;;  %v4848_v4 = vld [vmem:[%s5139_s2] ss:$0 sm:$0xff] }
 0x1bb   :  { %v1711_v35 = vpop.f32.mrf.mxu0  ;;  %v1936_v40 = vpop.f32.mrf.mxu1 }
 0x1bd   :  { %v4837_v55 = vpop.f32.mrf.mxu0  ;;  %v4839_v46 = vpop.f32.mrf.mxu1 }
 0x1be   :  { %5158 = vst [vmem:[#allocation20_spill] sm:$0xff] %v4837_v55 }
 0x1bf   :  { %v1714_v44 = vpop.f32.mrf.mxu0  ;;  %v1939_v39 = vpop.f32.mrf.mxu1 }
 0x1c1   :  { %v1942_v52 = vpop.f32.mrf.mxu1  ;;  %v3590_v20 = vpop.f32.mrf.mxu0 }
 0x1c2   :  { %v4842_v62 = vadd.f32 %v1942_v52, %v4762_v57  ;;  %v2112_v56 = vadd.f32 %v3590_v20, %v4629_v26 }
 0x1c3   :  { %v1944_v8 = vpop.f32.mrf.mxu1  ;;  %v2103_v40 = vpop.f32.mrf.mxu0 }
 0x1c4   :  { %v2104_v22 = vadd.f32 %v2103_v40, %v4607_v6  ;;  %v2562_v44 = vadd.f32 %v4848_v4, %v2112_v56 }
 0x1c5   :  { %v1945_v33 = vpop.f32.mrf.mxu1  ;;  %v3591_v35 = vpop.f32.mrf.mxu0 }
 0x1c6   :  { %v4853_v39 = vadd.f32 %v1945_v33, %v4767_v47  ;;  %v2115_v52 = vadd.f32 %v3591_v35, %v4640_v42  ;;  %v2560_v26 = vadd.f32 %v4848_v4, %v2104_v22  ;;  %v2626_v40 = vmax.f32 %v2562_v44, 0.0 }
 0x1c7   :  { %v1947_v57 = vpop.f32.mrf.mxu1  ;;  %v2106_v20 = vpop.f32.mrf.mxu0 }
 0x1c8   :  { %v2563_v32 = vadd.f32 %v4848_v4, %v2115_v52  ;;  %v2107_v8 = vadd.f32 %v2106_v20, %v4618_v15  ;;  %v2624_v42 = vmax.f32 %v2560_v26, 0.0 }
 0x1c9   :  { %v4859_v16 = vpop.f32.mrf.mxu1  ;;  %v3594_v6 = vpop.f32.mrf.mxu0 }
 0x1ca   :  { %v2627_v28 = vmax.f32 %v2563_v32, 0.0  ;;  %v2561_v56 = vadd.f32 %v4848_v4, %v2107_v8  ;;  %v2128_v47 = vadd.f32 %v3594_v6, %v4673_v21 }
 0x1cb   :  { %v1952_v33 = vpop.f32.mrf.mxu1  ;;  %v2119_v11 = vpop.f32.mrf.mxu0 }
 0x1cc   :  { %v3349_v35 = vpack.c.bf16 %v2627_v28, %v2626_v40  ;;  %v2625_v57 = vmax.f32 %v2561_v56, 0.0  ;;  %v2120_v22 = vadd.f32 %v2119_v11, %v4651_v58  ;;  %v2566_v32 = vadd.f32 %v4848_v4, %v2128_v47 }
 0x1cd   :  { %v4864_v55 = vpop.f32.mrf.mxu1  ;;  %v3595_v52 = vpop.f32.mrf.mxu0 }
 0x1ce   :  { %3501 = vst [vmem:[%s5140_s3 + $0x8] sm:$0xff] %v3349_v35   ;;  %v3344_v15 = vpack.c.bf16 %v2625_v57, %v2624_v42  ;;  %v2131_v44 = vadd.f32 %v3595_v52, %v4684_v37  ;;  %v2564_v28 = vadd.f32 %v4848_v4, %v2120_v22  ;;  %v2630_v40 = vmax.f32 %v2566_v32, 0.0 }
 0x1cf   :  { %v1955_v21 = vpop.f32.mrf.mxu1  ;;  %v2122_v20 = vpop.f32.mrf.mxu0 }
 0x1d0   :  { %3345 = vst [vmem:[%s5140_s3] sm:$0xff] %v3344_v15   ;;  %v2123_v58 = vadd.f32 %v2122_v20, %v4662_v7  ;;  %v2567_v11 = vadd.f32 %v4848_v4, %v2131_v44  ;;  %v2628_v42 = vmax.f32 %v2564_v28, 0.0 }
 0x1d1   :  { %v4877_v26 = vpop.f32.mrf.mxu1  ;;  %v3598_v8 = vpop.f32.mrf.mxu0 }
 0x1d2   :  { %v2565_v6 = vadd.f32 %v4848_v4, %v2123_v58  ;;  %v2631_v56 = vmax.f32 %v2567_v11, 0.0  ;;  %v2144_v37 = vadd.f32 %v3598_v8, %v4717_v43 }
 0x1d3   :  { %v1960_v47 = vpop.f32.mrf.mxu1  ;;  %v2135_v33 = vpop.f32.mrf.mxu0 }
 0x1d4   :  { %v2629_v35 = vmax.f32 %v2565_v6, 0.0  ;;  %v2136_v57 = vadd.f32 %v2135_v33, %v4695_v49  ;;  %v3359_v22 = vpack.c.bf16 %v2631_v56, %v2630_v40  ;;  %v2570_v32 = vadd.f32 %v4848_v4, %v2144_v37 }
 0x1d5   :  { %v4882_v52 = vpop.f32.mrf.mxu1  ;;  %v3599_v7 = vpop.f32.mrf.mxu0 }
 0x1d6   :  { %v3354_v15 = vpack.c.bf16 %v2629_v35, %v2628_v42  ;;  %3503 = vst [vmem:[%s5140_s3 + $0x18] sm:$0xff] %v3359_v22   ;;  %v2147_v44 = vadd.f32 %v3599_v7, %v4728_v38  ;;  %v2568_v49 = vadd.f32 %v4848_v4, %v2136_v57  ;;  %v2634_v6 = vmax.f32 %v2570_v32, 0.0 }
 0x1d7   :  { %v1963_v43 = vpop.f32.mrf.mxu1  ;;  %v2138_v21 = vpop.f32.mrf.mxu0 }
 0x1d8   :  { %3502 = vst [vmem:[%s5140_s3 + $0x10] sm:$0xff] %v3354_v15   ;;  %v2139_v20 = vadd.f32 %v2138_v21, %v4706_v3  ;;  %v2571_v28 = vadd.f32 %v4848_v4, %v2147_v44  ;;  %v2632_v47 = vmax.f32 %v2568_v49, 0.0 }
 0x1d9   :  { %v4895_v58 = vpop.f32.mrf.mxu1  ;;  %v3602_v11 = vpop.f32.mrf.mxu0 }
 0x1da   :  { %v2569_v8 = vadd.f32 %v4848_v4, %v2139_v20  ;;  %v2635_v40 = vmax.f32 %v2571_v28, 0.0  ;;  %v2160_v38 = vadd.f32 %v3602_v11, %v4755_v19 }
 0x1db   :  { %v1968_v56 = vpop.f32.mrf.mxu1  ;;  %v2151_v37 = vpop.f32.mrf.mxu0 }
 0x1dc   :  { %v2633_v33 = vmax.f32 %v2569_v8, 0.0  ;;  %v2152_v42 = vadd.f32 %v2151_v37, %v4739_v59  ;;  %v3369_v35 = vpack.c.bf16 %v2635_v40, %v2634_v6  ;;  %v2574_v7 = vadd.f32 %v4848_v4, %v2160_v38 }
 0x1dd   :  { %v4900_v57 = vpop.f32.mrf.mxu1  ;;  %v3603_v3 = vpop.f32.mrf.mxu0 }
 0x1de   :  { %v3364_v22 = vpack.c.bf16 %v2633_v33, %v2632_v47  ;;  %3505 = vst [vmem:[%s5140_s3 + $0x28] sm:$0xff] %v3369_v35   ;;  %v2163_v15 = vadd.f32 %v3603_v3, %v4760_v27  ;;  %v2572_v59 = vadd.f32 %v4848_v4, %v2152_v42  ;;  %v2638_v28 = vmax.f32 %v2574_v7, 0.0 }
 0x1df   :  { %v1971_v19 = vpop.f32.mrf.mxu1  ;;  %v2154_v32 = vpop.f32.mrf.mxu0 }
 0x1e0   :  { %3504 = vst [vmem:[%s5140_s3 + $0x20] sm:$0xff] %v3364_v22   ;;  %v2155_v44 = vadd.f32 %v2154_v32, %v4750_v10  ;;  %v2575_v43 = vadd.f32 %v4848_v4, %v2163_v15  ;;  %v2636_v40 = vmax.f32 %v2572_v59, 0.0 }
 0x1e1   :  { %v4913_v21 = vpop.f32.mrf.mxu1  ;;  %v3606_v49 = vpop.f32.mrf.mxu0 }
 0x1e2   :  { %v2573_v20 = vadd.f32 %v4848_v4, %v2155_v44  ;;  %v2639_v11 = vmax.f32 %v2575_v43, 0.0  ;;  %v2176_v27 = vadd.f32 %v3606_v49, %v4775_v51 }
 0x1e3   :  { %v1976_v8 = vpop.f32.mrf.mxu1  ;;  %v2167_v6 = vpop.f32.mrf.mxu0 }
 0x1e4   :  { %v2637_v38 = vmax.f32 %v2573_v20, 0.0  ;;  %v2168_v56 = vadd.f32 %v2167_v6, %v4765_v61  ;;  %v3379_v37 = vpack.c.bf16 %v2639_v11, %v2638_v28  ;;  %v2578_v42 = vadd.f32 %v4848_v4, %v2176_v27 }
 0x1e5   :  { %v4918_v47 = vpop.f32.mrf.mxu1  ;;  %v3607_v10 = vpop.f32.mrf.mxu0 }
 0x1e6   :  { %v3374_v33 = vpack.c.bf16 %v2637_v38, %v2636_v40  ;;  %3507 = vst [vmem:[%s5140_s3 + $0x38] sm:$0xff] %v3379_v37   ;;  %v2179_v35 = vadd.f32 %v3607_v10, %v4780_v17  ;;  %v2576_v61 = vadd.f32 %v4848_v4, %v2168_v56  ;;  %v2642_v59 = vmax.f32 %v2578_v42, 0.0 }
 0x1e7   :  { %v1979_v51 = vpop.f32.mrf.mxu1  ;;  %v2170_v3 = vpop.f32.mrf.mxu0 }
 0x1e8   :  { %3506 = vst [vmem:[%s5140_s3 + $0x30] sm:$0xff] %v3374_v33   ;;  %v2171_v22 = vadd.f32 %v2170_v3, %v4770_v29  ;;  %v2579_v7 = vadd.f32 %v4848_v4, %v2179_v35  ;;  %v2640_v20 = vmax.f32 %v2576_v61, 0.0 }
 0x1e9   :  { %v4931_v15 = vpop.f32.mrf.mxu1  ;;  %v3610_v19 = vpop.f32.mrf.mxu0 }
 0x1ea   :  { %v2577_v32 = vadd.f32 %v4848_v4, %v2171_v22  ;;  %v2643_v44 = vmax.f32 %v2579_v7, 0.0  ;;  %v2192_v17 = vadd.f32 %v3610_v19, %v4795_v63 }
 0x1eb   :  { %v1984_v43 = vpop.f32.mrf.mxu1  ;;  %v2183_v49 = vpop.f32.mrf.mxu0 }
 0x1ec   :  { %v2641_v28 = vmax.f32 %v2577_v32, 0.0  ;;  %v2184_v11 = vadd.f32 %v2183_v49, %v4785_v0  ;;  %v3389_v27 = vpack.c.bf16 %v2643_v44, %v2642_v59  ;;  %v2582_v40 = vadd.f32 %v4848_v4, %v2192_v17 }
 0x1ed   :  { %v4936_v8 = vpop.f32.mrf.mxu1  ;;  %v3611_v29 = vpop.f32.mrf.mxu0 }
 0x1ee   :  { %v3384_v6 = vpack.c.bf16 %v2641_v28, %v2640_v20  ;;  %3509 = vst [vmem:[%s5140_s3 + $0x48] sm:$0xff] %v3389_v27   ;;  %v2195_v38 = vadd.f32 %v3611_v29, %v4800_v54  ;;  %v2580_v0 = vadd.f32 %v4848_v4, %v2184_v11  ;;  %v2646_v51 = vmax.f32 %v2582_v40, 0.0 }
 0x1ef   :  { %v1987_v63 = vpop.f32.mrf.mxu1  ;;  %v2186_v56 = vpop.f32.mrf.mxu0 }
 0x1f0   :  { %3508 = vst [vmem:[%s5140_s3 + $0x40] sm:$0xff] %v3384_v6   ;;  %v2187_v37 = vadd.f32 %v2186_v56, %v4790_v41  ;;  %v2583_v10 = vadd.f32 %v4848_v4, %v2195_v38  ;;  %v2644_v7 = vmax.f32 %v2580_v0, 0.0 }
 0x1f1   :  { %v4949_v33 = vpop.f32.mrf.mxu1  ;;  %v3614_v42 = vpop.f32.mrf.mxu0 }
 0x1f2   :  { %v2581_v35 = vadd.f32 %v4848_v4, %v2187_v37  ;;  %v2647_v3 = vmax.f32 %v2583_v10, 0.0  ;;  %v2208_v54 = vadd.f32 %v3614_v42, %v4815_v30 }
 0x1f3   :  { %v1992_v61 = vpop.f32.mrf.mxu1  ;;  %v2199_v22 = vpop.f32.mrf.mxu0 }
 0x1f4   :  { %v2645_v19 = vmax.f32 %v2581_v35, 0.0  ;;  %v2200_v32 = vadd.f32 %v2199_v22, %v4805_v36  ;;  %v3399_v59 = vpack.c.bf16 %v2647_v3, %v2646_v51  ;;  %v2586_v43 = vadd.f32 %v4848_v4, %v2208_v54 }
 0x1f5   :  { %v4954_v44 = vpop.f32.mrf.mxu1  ;;  %v3615_v41 = vpop.f32.mrf.mxu0 }
 0x1f6   :  { %v3394_v17 = vpack.c.bf16 %v2645_v19, %v2644_v7  ;;  %3511 = vst [vmem:[%s5140_s3 + $0x58] sm:$0xff] %v3399_v59   ;;  %v2211_v49 = vadd.f32 %v3615_v41, %v4820_v5  ;;  %v2584_v36 = vadd.f32 %v4848_v4, %v2200_v32  ;;  %v2650_v40 = vmax.f32 %v2586_v43, 0.0 }
 0x1f7   :  { %v1995_v30 = vpop.f32.mrf.mxu1  ;;  %v2202_v20 = vpop.f32.mrf.mxu0 }
 0x1f8   :  { %3510 = vst [vmem:[%s5140_s3 + $0x50] sm:$0xff] %v3394_v17   ;;  %v2203_v28 = vadd.f32 %v2202_v20, %v4810_v48  ;;  %v2587_v11 = vadd.f32 %v4848_v4, %v2211_v49  ;;  %v2648_v0 = vmax.f32 %v2584_v36, 0.0  ;;  %v1938_v48 = vadd.f32 %v4839_v46, %v4757_v12 }
 0x1f9   :  { %v4967_v27 = vpop.f32.mrf.mxu1  ;;  %v3618_v29 = vpop.f32.mrf.mxu0  ;;  %v1951_v46 = vadd.f32 %v4859_v16, %v4772_v53 }
 0x1fa   :  { %v2585_v6 = vadd.f32 %v4848_v4, %v2203_v28  ;;  %v2651_v38 = vmax.f32 %v2587_v11, 0.0  ;;  %v2224_v5 = vadd.f32 %v3618_v29, %v4835_v13 }
 0x1fb   :  { %v2000_v63 = vpop.f32.mrf.mxu1  ;;  %v2215_v56 = vpop.f32.mrf.mxu0 }
 0x1fc   :  { %v2649_v37 = vmax.f32 %v2585_v6, 0.0  ;;  %v2216_v10 = vadd.f32 %v2215_v56, %v4825_v18  ;;  %v3409_v42 = vpack.c.bf16 %v2651_v38, %v2650_v40  ;;  %v2590_v13 = vadd.f32 %v4848_v4, %v2224_v5 }
 0x1fd   :  { %v4974_v35 = vpop.f32.mrf.mxu1  ;;  %v3619_v51 = vpop.f32.mrf.mxu0 }
 0x1fe   :  { %v3404_v3 = vpack.c.bf16 %v2649_v37, %v2648_v0  ;;  %3513 = vst [vmem:[%s5140_s3 + $0x68] sm:$0xff] %v3409_v42   ;;  %v2227_v54 = vadd.f32 %v3619_v51, %v1938_v48  ;;  %v2588_v12 = vadd.f32 %v4848_v4, %v2216_v10  ;;  %v2654_v41 = vmax.f32 %v2590_v13, 0.0 }
 0x1ff   :  { %v2003_v61 = vpop.f32.mrf.mxu1  ;;  %v2218_v22 = vpop.f32.mrf.mxu0  ;;  %v1959_v37 = vadd.f32 %v4877_v26, %v4782_v9  ;;  %v1962_v9 = vadd.f32 %v4882_v52, %v4787_v24  ;;  %v1983_v24 = vadd.f32 %v4931_v15, %v4812_v23  ;;  %v1986_v23 = vadd.f32 %v4936_v8, %v4817_v45 }
 0x200   :  { %3512 = vst [vmem:[%s5140_s3 + $0x60] sm:$0xff] %v3404_v3   ;;  %v2219_v18 = vadd.f32 %v2218_v22, %v4830_v1  ;;  %v2591_v7 = vadd.f32 %v4848_v4, %v2227_v54  ;;  %v2652_v20 = vmax.f32 %v2588_v12, 0.0  ;;  %v1954_v1 = vadd.f32 %v4864_v55, %v4777_v2 }
 0x201   :  { %v4988_v19 = vpop.f32.mrf.mxu1  ;;  %v3622_v32 = vpop.f32.mrf.mxu0 }
 0x202   :  { %v2589_v59 = vadd.f32 %v4848_v4, %v2219_v18  ;;  %v2655_v17 = vmax.f32 %v2591_v7, 0.0  ;;  %v2240_v43 = vadd.f32 %v3622_v32, %v1951_v46 }
 0x203   :  { %v2008_v49 = vpop.f32.mrf.mxu1  ;;  %v2231_v30 = vpop.f32.mrf.mxu0 }
 0x204   :  { %v2653_v36 = vmax.f32 %v2589_v59, 0.0  ;;  %v2232_v28 = vadd.f32 %v2231_v30, %v4842_v62  ;;  %v3419_v16 = vpack.c.bf16 %v2655_v17, %v2654_v41  ;;  %v2594_v6 = vadd.f32 %v4848_v4, %v2240_v43 }
 0x205   :  { %v4994_v53 = vpop.f32.mrf.mxu1  ;;  %v3623_v11 = vpop.f32.mrf.mxu0  ;;  %v1967_v62 = vadd.f32 %v4895_v58, %v4792_v34  ;;  %v1970_v34 = vadd.f32 %v4900_v57, %v4797_v50  ;;  %v1975_v17 = vadd.f32 %v4913_v21, %v4802_v60  ;;  %v1978_v60 = vadd.f32 %v4918_v47, %v4807_v14 }
 0x206   :  { %v3414_v29 = vpack.c.bf16 %v2653_v36, %v2652_v20  ;;  %3515 = vst [vmem:[%s5140_s3 + $0x78] sm:$0xff] %v3419_v16   ;;  %v2243_v40 = vadd.f32 %v3623_v11, %v1954_v1  ;;  %v2592_v2 = vadd.f32 %v4848_v4, %v2232_v28  ;;  %v2658_v48 = vmax.f32 %v2594_v6, 0.0 }
 0x207   :  { %v2011_v38 = vpop.f32.mrf.mxu1  ;;  %v2234_v5 = vpop.f32.mrf.mxu0  ;;  %v1999_v14 = vadd.f32 %v4967_v27, %v4832_v25 }
 0x208   :  { %3514 = vst [vmem:[%s5140_s3 + $0x70] sm:$0xff] %v3414_v29   ;;  %v2235_v55 = vadd.f32 %v2234_v5, %v4853_v39  ;;  %v2595_v63 = vadd.f32 %v4848_v4, %v2243_v40  ;;  %v2656_v54 = vmax.f32 %v2592_v2, 0.0 }
 0x209   :  { %v5008_v56 = vpop.f32.mrf.mxu1  ;;  %v3626_v0 = vpop.f32.mrf.mxu0 }
 0x20a   :  { %v2593_v10 = vadd.f32 %v4848_v4, %v2235_v55  ;;  %v2659_v42 = vmax.f32 %v2595_v63, 0.0  ;;  %v2256_v51 = vadd.f32 %v3626_v0, %v1967_v62  ;;  %v1991_v63 = vadd.f32 %v4949_v33, %v4822_v31 }
 0x20b   :  { %v2016_v3 = vpop.f32.mrf.mxu1  ;;  %v2247_v13 = vpop.f32.mrf.mxu0 }
 0x20c   :  { %v2657_v39 = vmax.f32 %v2593_v10, 0.0  ;;  %v2248_v61 = vadd.f32 %v2247_v13, %v1959_v37  ;;  %v3429_v58 = vpack.c.bf16 %v2659_v42, %v2658_v48  ;;  %v2598_v18 = vadd.f32 %v4848_v4, %v2256_v51 }
 0x20d   :  { %v5015_v22 = vpop.f32.mrf.mxu1  ;;  %v3627_v12 = vpop.f32.mrf.mxu0 }
 0x20e   :  { %v3424_v26 = vpack.c.bf16 %v2657_v39, %v2656_v54  ;;  %3517 = vst [vmem:[%s5140_s3 + $0x88] sm:$0xff] %v3429_v58   ;;  %v2259_v46 = vadd.f32 %v3627_v12, %v1970_v34  ;;  %v2596_v50 = vadd.f32 %v4848_v4, %v2248_v61  ;;  %v2662_v49 = vmax.f32 %v2598_v18, 0.0  ;;  %v5159_v39 = vld [vmem:[#allocation20_spill] sm:$0xff]  ;;  %v5160_v58 = vld [vmem:[#allocation19_spill] sm:$0xff] }
 0x20f   :  { %v2019_v7 = vpop.f32.mrf.mxu1  ;;  %v2250_v32 = vpop.f32.mrf.mxu0  ;;  %v2002_v25 = vadd.f32 %v4974_v35, %v5159_v39  ;;  %v1994_v12 = vadd.f32 %v4954_v44, %v5160_v58  ;;  %v5167_v39 = vld [vmem:[#allocation10_spill] sm:$0xff]  ;;  %v5168_v58 = vld [vmem:[#allocation8_spill] sm:$0xff] }
 0x210   :  { %3516 = vst [vmem:[%s5140_s3 + $0x80] sm:$0xff] %v3424_v26   ;;  %v2251_v57 = vadd.f32 %v2250_v32, %v1962_v9  ;;  %v2599_v52 = vadd.f32 %v4848_v4, %v2259_v46  ;;  %v2660_v1 = vmax.f32 %v2596_v50, 0.0  ;;  %v5161_v7 = vld [vmem:[#allocation5_spill] sm:$0xff] }
 0x211   :  { %v5030_v59 = vpop.f32.mrf.mxu1  ;;  %v3630_v41 = vpop.f32.mrf.mxu0  ;;  %v2015_v44 = vadd.f32 %v5008_v56, %v5161_v7 }
 0x212   :  { %v2597_v43 = vadd.f32 %v4848_v4, %v2251_v57  ;;  %v2663_v30 = vmax.f32 %v2599_v52, 0.0  ;;  %v2272_v20 = vadd.f32 %v3630_v41, %v1983_v24  ;;  %v5162_v24 = vld [vmem:[#allocation3_spill] sm:$0xff] }
 0x213   :  { %v2024_v36 = vpop.f32.mrf.mxu1  ;;  %v2263_v28 = vpop.f32.mrf.mxu0  ;;  %v2007_v52 = vadd.f32 %v4988_v19, %v5162_v24 }
 0x214   :  { %v2661_v16 = vmax.f32 %v2597_v43, 0.0  ;;  %v2264_v11 = vadd.f32 %v2263_v28, %v1975_v17  ;;  %v3439_v15 = vpack.c.bf16 %v2663_v30, %v2662_v49  ;;  %v2602_v40 = vadd.f32 %v4848_v4, %v2272_v20 }
 0x215   :  { %v5037_v29 = vpop.f32.mrf.mxu1  ;;  %v3631_v6 = vpop.f32.mrf.mxu0 }
 0x216   :  { %v3434_v21 = vpack.c.bf16 %v2661_v16, %v2660_v1  ;;  %3519 = vst [vmem:[%s5140_s3 + $0x98] sm:$0xff] %v3439_v15   ;;  %v2275_v38 = vadd.f32 %v3631_v6, %v1986_v23  ;;  %v2600_v45 = vadd.f32 %v4848_v4, %v2264_v11  ;;  %v2666_v37 = vmax.f32 %v2602_v40, 0.0  ;;  %v5163_v16 = vld [vmem:[#allocation6_spill] sm:$0xff]  ;;  %v5164_v6 = vld [vmem:[#allocation4_spill] sm:$0xff] }
 0x217   :  { %v2027_v5 = vpop.f32.mrf.mxu1  ;;  %v2266_v2 = vpop.f32.mrf.mxu0  ;;  %v2018_v56 = vadd.f32 %v5015_v22, %v5163_v16 }
 0x218   :  { %3518 = vst [vmem:[%s5140_s3 + $0x90] sm:$0xff] %v3434_v21   ;;  %v2267_v8 = vadd.f32 %v2266_v2, %v1978_v60  ;;  %v2603_v47 = vadd.f32 %v4848_v4, %v2275_v38  ;;  %v2664_v3 = vmax.f32 %v2600_v45, 0.0  ;;  %v2010_v60 = vadd.f32 %v4994_v53, %v5164_v6  ;;  %v5165_v45 = vld [vmem:[#allocation9_spill] sm:$0xff] }
 0x219   :  { %v2030_v55 = vpop.f32.mrf.mxu1  ;;  %v3634_v62 = vpop.f32.mrf.mxu0 }
 0x21a   :  { %v2601_v0 = vadd.f32 %v4848_v4, %v2267_v8  ;;  %v2667_v10 = vmax.f32 %v2603_v47, 0.0  ;;  %v2288_v48 = vadd.f32 %v3634_v62, %v1999_v14  ;;  %v2031_v8 = vadd.f32 %v2030_v55, %v5165_v45  ;;  %v5166_v62 = vld [vmem:[#allocation7_spill] sm:$0xff] }
 0x21b   :  { %v2032_v42 = vpop.f32.mrf.mxu1  ;;  %v2279_v51 = vpop.f32.mrf.mxu0  ;;  %v5173_v45 = vld [vmem:[#allocation15_spill] sm:$0xff] }
 0x21c   :  { %v2665_v13 = vmax.f32 %v2601_v0, 0.0  ;;  %v2280_v54 = vadd.f32 %v2279_v51, %v1991_v63  ;;  %v3449_v27 = vpack.c.bf16 %v2667_v10, %v2666_v37  ;;  %v2606_v33 = vadd.f32 %v4848_v4, %v2288_v48 }
 0x21d   :  { %v2033_v61 = vpop.f32.mrf.mxu1  ;;  %v3635_v34 = vpop.f32.mrf.mxu0  ;;  %v2023_v63 = vadd.f32 %v5030_v59, %v5166_v62 }
 0x21e   :  { %v3444_v31 = vpack.c.bf16 %v2665_v13, %v2664_v3  ;;  %3521 = vst [vmem:[%s5140_s3 + $0xa8] sm:$0xff] %v3449_v27   ;;  %v2291_v9 = vadd.f32 %v3635_v34, %v2002_v25  ;;  %v2604_v35 = vadd.f32 %v4848_v4, %v2280_v54  ;;  %v2670_v17 = vmax.f32 %v2606_v33, 0.0 }
 0x21f   :  { %v2035_v26 = vpop.f32.mrf.mxu1  ;;  %v2282_v18 = vpop.f32.mrf.mxu0  ;;  %v2034_v25 = vadd.f32 %v2033_v61, %v5167_v39  ;;  %v5175_v39 = vld [vmem:[#allocation16_spill] sm:$0xff] }
 0x220   :  { %3520 = vst [vmem:[%s5140_s3 + $0xa0] sm:$0xff] %v3444_v31   ;;  %v2283_v46 = vadd.f32 %v2282_v18, %v1994_v12  ;;  %v2607_v32 = vadd.f32 %v4848_v4, %v2291_v9  ;;  %v2668_v36 = vmax.f32 %v2604_v35, 0.0  ;;  %v2026_v12 = vadd.f32 %v5037_v29, %v5168_v58  ;;  %v5169_v35 = vld [vmem:[#allocation13_spill] sm:$0xff] }
 0x221   :  { %v2038_v50 = vpop.f32.mrf.mxu1  ;;  %v3638_v57 = vpop.f32.mrf.mxu0 }
 0x222   :  { %v2605_v41 = vadd.f32 %v4848_v4, %v2283_v46  ;;  %v2671_v43 = vmax.f32 %v2607_v32, 0.0  ;;  %v2304_v49 = vadd.f32 %v3638_v57, %v2015_v44  ;;  %v5170_v32 = vld [vmem:[#allocation11_spill] sm:$0xff] }
 0x223   :  { %v2040_v30 = vpop.f32.mrf.mxu1  ;;  %v2295_v20 = vpop.f32.mrf.mxu0  ;;  %v2039_v57 = vadd.f32 %v2038_v50, %v5170_v32 }
 0x224   :  { %v2669_v28 = vmax.f32 %v2605_v41, 0.0  ;;  %v2296_v1 = vadd.f32 %v2295_v20, %v2007_v52  ;;  %v3459_v11 = vpack.c.bf16 %v2671_v43, %v2670_v17  ;;  %v2610_v21 = vadd.f32 %v4848_v4, %v2304_v49 }
 0x225   :  { %v2041_v23 = vpop.f32.mrf.mxu1  ;;  %v3639_v15 = vpop.f32.mrf.mxu0 }
 0x226   :  { %v3454_v19 = vpack.c.bf16 %v2669_v28, %v2668_v36  ;;  %3523 = vst [vmem:[%s5140_s3 + $0xb8] sm:$0xff] %v3459_v11   ;;  %v2307_v40 = vadd.f32 %v3639_v15, %v2018_v56  ;;  %v2608_v22 = vadd.f32 %v4848_v4, %v2296_v1  ;;  %v2674_v37 = vmax.f32 %v2610_v21, 0.0  ;;  %v5171_v28 = vld [vmem:[#allocation14_spill] sm:$0xff]  ;;  %v5172_v15 = vld [vmem:[#allocation12_spill] sm:$0xff] }
 0x227   :  { %v2043_v38 = vpop.f32.mrf.mxu1  ;;  %v2298_v5 = vpop.f32.mrf.mxu0  ;;  %v2042_v6 = vadd.f32 %v2041_v23, %v5172_v15 }
 0x228   :  { %3522 = vst [vmem:[%s5140_s3 + $0xb0] sm:$0xff] %v3454_v19   ;;  %v2299_v2 = vadd.f32 %v2298_v5, %v2010_v60  ;;  %v2611_v53 = vadd.f32 %v4848_v4, %v2307_v40  ;;  %v2672_v3 = vmax.f32 %v2608_v22, 0.0 }
 0x229   :  { %v2046_v14 = vpop.f32.mrf.mxu1  ;;  %v3642_v47 = vpop.f32.mrf.mxu0 }
 0x22a   :  { %v2609_v0 = vadd.f32 %v4848_v4, %v2299_v2  ;;  %v2675_v10 = vmax.f32 %v2611_v53, 0.0  ;;  %v2320_v48 = vadd.f32 %v3642_v47, %v2031_v8  ;;  %v2047_v46 = vadd.f32 %v2046_v14, %v5169_v35  ;;  %v5174_v14 = vld [vmem:[#allocation17_spill] sm:$0xff] }
 0x22b   :  { %v2048_v42 = vpop.f32.mrf.mxu1  ;;  %v2311_v51 = vpop.f32.mrf.mxu0 }
 0x22c   :  { %v2673_v13 = vmax.f32 %v2609_v0, 0.0  ;;  %v2312_v54 = vadd.f32 %v2311_v51, %v2023_v63  ;;  %v3469_v55 = vpack.c.bf16 %v2675_v10, %v2674_v37  ;;  %v2614_v59 = vadd.f32 %v4848_v4, %v2320_v48 }
 0x22d   :  { %v2049_v27 = vpop.f32.mrf.mxu1  ;;  %v3643_v34 = vpop.f32.mrf.mxu0 }
 0x22e   :  { %v3464_v31 = vpack.c.bf16 %v2673_v13, %v2672_v3  ;;  %3525 = vst [vmem:[%s5140_s3 + $0xc8] sm:$0xff] %v3469_v55   ;;  %v2323_v33 = vadd.f32 %v3643_v34, %v2034_v25  ;;  %v2612_v61 = vadd.f32 %v4848_v4, %v2312_v54  ;;  %v2678_v52 = vmax.f32 %v2614_v59, 0.0 }
 0x22f   :  { %v2051_v9 = vpop.f32.mrf.mxu1  ;;  %v2314_v26 = vpop.f32.mrf.mxu0  ;;  %v2050_v1 = vadd.f32 %v2049_v27, %v5171_v28  ;;  %v5176_v27 = vld [vmem:[#allocation18_spill] sm:$0xff] }
 0x230   :  { %3524 = vst [vmem:[%s5140_s3 + $0xc0] sm:$0xff] %v3464_v31   ;;  %v2315_v18 = vadd.f32 %v2314_v26, %v2026_v12  ;;  %v2615_v29 = vadd.f32 %v4848_v4, %v2323_v33  ;;  %v2676_v30 = vmax.f32 %v2612_v61, 0.0 }
 0x231   :  { %v2054_v7 = vpop.f32.mrf.mxu1  ;;  %v3646_v44 = vpop.f32.mrf.mxu0 }
 0x232   :  { %v2613_v24 = vadd.f32 %v4848_v4, %v2315_v18  ;;  %v2679_v41 = vmax.f32 %v2615_v29, 0.0  ;;  %v2336_v17 = vadd.f32 %v3646_v44, %v2047_v46  ;;  %v2055_v8 = vadd.f32 %v2054_v7, %v5173_v45 }
 0x233   :  { %v2056_v43 = vpop.f32.mrf.mxu1  ;;  %v2327_v49 = vpop.f32.mrf.mxu0 }
 0x234   :  { %v2677_v20 = vmax.f32 %v2613_v24, 0.0  ;;  %v2328_v36 = vadd.f32 %v2327_v49, %v2039_v57  ;;  %v3479_v16 = vpack.c.bf16 %v2679_v41, %v2678_v52  ;;  %v2618_v50 = vadd.f32 %v4848_v4, %v2336_v17 }
 0x235   :  { %v2057_v56 = vpop.f32.mrf.mxu1  ;;  %v3647_v11 = vpop.f32.mrf.mxu0 }
 0x236   :  { %v3474_v60 = vpack.c.bf16 %v2677_v20, %v2676_v30  ;;  %3527 = vst [vmem:[%s5140_s3 + $0xd8] sm:$0xff] %v3479_v16   ;;  %v2339_v19 = vadd.f32 %v3647_v11, %v2050_v1  ;;  %v2616_v38 = vadd.f32 %v4848_v4, %v2328_v36  ;;  %v2682_v62 = vmax.f32 %v2618_v50, 0.0 }
 0x237   :  { %v2059_v21 = vpop.f32.mrf.mxu1  ;;  %v2330_v40 = vpop.f32.mrf.mxu0  ;;  %v2058_v25 = vadd.f32 %v2057_v56, %v5175_v39 }
 0x238   :  { %3526 = vst [vmem:[%s5140_s3 + $0xd0] sm:$0xff] %v3474_v60   ;;  %v2331_v5 = vadd.f32 %v2330_v40, %v2042_v6  ;;  %v2619_v22 = vadd.f32 %v4848_v4, %v2339_v19  ;;  %v2680_v10 = vmax.f32 %v2616_v38, 0.0 }
 0x239   :  { %v2062_v23 = vpop.f32.mrf.mxu1  ;;  %v3650_v2 = vpop.f32.mrf.mxu0 }
 0x23a   :  { %v2617_v53 = vadd.f32 %v4848_v4, %v2331_v5  ;;  %v2063_v47 = vadd.f32 %v2062_v23, %v5174_v14  ;;  %v2683_v63 = vmax.f32 %v2619_v22, 0.0 }
 0x23b   :  { %v2064_v0 = vpop.f32.mrf.mxu1  ;;  %v2343_v37 = vpop.f32.mrf.mxu0 }
 0x23c   :  { %v2681_v48 = vmax.f32 %v2617_v53, 0.0  ;;  %v2352_v42 = vadd.f32 %v3650_v2, %v2063_v47  ;;  %v2344_v51 = vadd.f32 %v2343_v37, %v2055_v8  ;;  %v3489_v3 = vpack.c.bf16 %v2683_v63, %v2682_v62 }
 0x23d   :  { %v2065_v13 = vpop.f32.mrf.mxu1  ;;  %v3651_v54 = vpop.f32.mrf.mxu0 }
 0x23e   :  { %v3484_v55 = vpack.c.bf16 %v2681_v48, %v2680_v10  ;;  %v2066_v34 = vadd.f32 %v2065_v13, %v5176_v27  ;;  %3529 = vst [vmem:[%s5140_s3 + $0xe8] sm:$0xff] %v3489_v3   ;;  %v2622_v31 = vadd.f32 %v4848_v4, %v2352_v42  ;;  %v2620_v59 = vadd.f32 %v4848_v4, %v2344_v51 }
 0x23f   :  { %v2067_v58 = vpop.f32.mrf.mxu1  ;;  %v2346_v12 = vpop.f32.mrf.mxu0 }
 0x240   :  { %3528 = vst [vmem:[%s5140_s3 + $0xe0] sm:$0xff] %v3484_v55   ;;  %v2355_v33 = vadd.f32 %v3651_v54, %v2066_v34  ;;  %v2347_v9 = vadd.f32 %v2346_v12, %v2058_v25  ;;  %v2686_v18 = vmax.f32 %v2622_v31, 0.0  ;;  %v2684_v35 = vmax.f32 %v2620_v59, 0.0 }
 0x242   :  { %v2623_v26 = vadd.f32 %v4848_v4, %v2355_v33  ;;  %v2621_v61 = vadd.f32 %v4848_v4, %v2347_v9 }
 0x244   :  { %v2687_v46 = vmax.f32 %v2623_v26, 0.0  ;;  %v2685_v29 = vmax.f32 %v2621_v61, 0.0 }
 0x246   :  { %v3499_v7 = vpack.c.bf16 %v2687_v46, %v2686_v18  ;;  %v3494_v44 = vpack.c.bf16 %v2685_v29, %v2684_v35 }
 0x248   :  { %3531 = vst [vmem:[%s5140_s3 + $0xf8] sm:$0xff] %v3499_v7   ;;  %3530 = vst [vmem:[%s5140_s3 + $0xf0] sm:$0xff] %v3494_v44  }

// kernel: _lambda_.15
= control target key start
LH: loop header
LB: loop body
LE: loop exit
PB: predicated region body
PF: predicated region fallthrough
CT: control target
= control target key end

     0   :  { %v4304_v0 = vmov 0   ;;  %s5601_s1 = inlined_call_operand.vmem [shape: bf16[640,128], index: 1, kind: input, shape index: {}]   ;;  %s5602_s0 = inlined_call_operand.vmem [shape: bf16[512,640], index: 0, kind: input, shape index: {}]   ;;  %s5603_s2 = inlined_call_operand.vmem [shape: f32[1,128], index: 2, kind: input, shape index: {}]   ;;  %s5604_s3 = inlined_call_operand.vmem [shape: bf16[512,128], index: 3, kind: input, shape index: {}]   ;;  %s5605_s4 = inlined_call_operand.vmem [shape: bf16[512,128], index: 4, kind: output, shape index: {}]  }
   0x1   :  { %1494 = vmatprep.subr.bf16.mxu0 %v4304_v0  ;;  %4006 = vmatprep.subr.bf16.mxu1 %v4304_v0  ;;  %v4039_v1 = vld [vmem:[%s5601_s1 + $0x38] sm:$0xff]   ;;  %v4040_v2 = vld [vmem:[%s5601_s1 + $0x30] sm:$0xff]   ;;  %v4041_v3 = vld [vmem:[%s5601_s1 + $0x28] sm:$0xff]  }
   0x2   :  { %1495 = vmatpush1.bf16.msra.mxu0 %v4039_v1  ;;  %4022 = vmatpush1.bf16.msra.mxu1 %v4039_v1  ;;  %v4042_v4 = vld [vmem:[%s5601_s1 + $0x20] sm:$0xff]   ;;  %v4043_v5 = vld [vmem:[%s5601_s1 + $0x18] sm:$0xff]   ;;  %v4044_v7 = vld [vmem:[%s5601_s1 + $0x10] sm:$0xff]  }
   0x3   :  { %1496 = vmatprep.subr.bf16.mxu0 %v4304_v0  ;;  %4007 = vmatprep.subr.bf16.mxu1 %v4304_v0  ;;  %v4057_v6 = vld [vmem:[%s5602_s0 + $0x4] ss:$20 sps:$4 sm:$0xff]   ;;  %v4045_v9 = vld [vmem:[%s5601_s1 + $0x8] sm:$0xff]   ;;  %v4048_v12 = vld [vmem:[%s5601_s1 + $0x70] sm:$0xff]  }
   0x4   :  { %v4060_v8 = vld [vmem:[%s5602_s0 + $0x3c4] ss:$20 sps:$4 sm:$0xff]   ;;  %1526 = vmatprep.mubr.bf16.mxu0 %v4057_v6  ;;  %v4049_v13 = vld [vmem:[%s5601_s1 + $0x68] sm:$0xff]   ;;  %v4052_v16 = vld [vmem:[%s5601_s1 + $0x50] sm:$0xff]  }
   0x5   :  { %1718 = vmatprep.mubr.bf16.mxu1 %v4060_v8  ;;  %v4046_v10 = vld [vmem:[%s5601_s1] sm:$0xff]   ;;  %v4047_v11 = vld [vmem:[%s5601_s1 + $0x78] sm:$0xff]   ;;  %v4053_v17 = vld [vmem:[%s5601_s1 + $0x48] sm:$0xff]  }
   0x6   :  { %1497 = vmatpush1.bf16.msra.mxu0 %v4040_v2  ;;  %4023 = vmatpush1.bf16.msra.mxu1 %v4040_v2  ;;  %v4050_v14 = vld [vmem:[%s5601_s1 + $0x60] sm:$0xff]   ;;  %v4051_v15 = vld [vmem:[%s5601_s1 + $0x58] sm:$0xff]   ;;  %v4086_v25 = vld [vmem:[%s5601_s1 + $0x130] sm:$0xff]  }
   0x7   :  { %1498 = vmatprep.subr.bf16.mxu0 %v4304_v0  ;;  %4008 = vmatprep.subr.bf16.mxu1 %v4304_v0  ;;  %v4054_v18 = vld [vmem:[%s5601_s1 + $0x40] sm:$0xff]   ;;  %v4061_v19 = vld [vmem:[%s5601_s1 + $0x138] sm:$0xff]   ;;  %v4063_v26 = vld [vmem:[%s5601_s1 + $0xb0] sm:$0xff]  }
   0x8   :  { %v4055_v20 = vld [vmem:[%s5602_s0] ss:$20 sps:$4 sm:$0xff]   ;;  %v4062_v22 = vld [vmem:[%s5601_s1 + $0xb8] sm:$0xff]   ;;  %v4111_v27 = vld [vmem:[%s5601_s1 + $0x128] sm:$0xff]  }
   0x9   :  { %v4058_v21 = vld [vmem:[%s5602_s0 + $0x3c0] ss:$20 sps:$4 sm:$0xff]   ;;  %v4068_v28 = vld [vmem:[%s5602_s0 + $0x28] ss:$20 sps:$4 sm:$0xff]   ;;  %v4076_v35 = vld [vmem:[%s5602_s0 + $0x50] ss:$20 sps:$4 sm:$0xff]  }
   0xa   :  { %1499 = vmatpush1.bf16.msra.mxu0 %v4041_v3  ;;  %4024 = vmatpush1.bf16.msra.mxu1 %v4041_v3  ;;  %v4064_v23 = vld [vmem:[%s5602_s0 + $0x2c] ss:$20 sps:$4 sm:$0xff]   ;;  %v4069_v29 = vld [vmem:[%s5602_s0 + $0x3e8] ss:$20 sps:$4 sm:$0xff]   ;;  %v4077_v36 = vld [vmem:[%s5602_s0 + $0x410] ss:$20 sps:$4 sm:$0xff]  }
   0xb   :  { %1500 = vmatprep.subr.bf16.mxu0 %v4304_v0  ;;  %4009 = vmatprep.subr.bf16.mxu1 %v4304_v0  ;;  %v4066_v24 = vld [vmem:[%s5602_s0 + $0x3ec] ss:$20 sps:$4 sm:$0xff]   ;;  %v4072_v31 = vld [vmem:[%s5602_s0 + $0x54] ss:$20 sps:$4 sm:$0xff]   ;;  %v4078_v37 = vld [vmem:[%s5601_s1 + $0x98] sm:$0xff]  }
   0xc   :  { %v4070_v30 = vld [vmem:[%s5601_s1 + $0xa8] sm:$0xff]   ;;  %v4134_v33 = vld [vmem:[%s5601_s1 + $0x120] sm:$0xff]   ;;  %v4080_v38 = vld [vmem:[%s5602_s0 + $0x7c] ss:$20 sps:$4 sm:$0xff]  }
   0xd   :  { %v4074_v32 = vld [vmem:[%s5602_s0 + $0x414] ss:$20 sps:$4 sm:$0xff]   ;;  %v4071_v34 = vld [vmem:[%s5601_s1 + $0xa0] sm:$0xff]   ;;  %v4082_v39 = vld [vmem:[%s5602_s0 + $0x43c] ss:$20 sps:$4 sm:$0xff]  }
   0xe   :  { %1501 = vmatpush1.bf16.msra.mxu0 %v4042_v4  ;;  %4025 = vmatpush1.bf16.msra.mxu1 %v4042_v4  ;;  %v4153_v40 = vld [vmem:[%s5601_s1 + $0x118] sm:$0xff]   ;;  %v4079_v41 = vld [vmem:[%s5601_s1 + $0x90] sm:$0xff]   ;;  %v4087_v45 = vld [vmem:[%s5601_s1 + $0x88] sm:$0xff]  }
   0xf   :  { %1502 = vmatprep.subr.bf16.mxu0 %v4304_v0  ;;  %4010 = vmatprep.subr.bf16.mxu1 %v4304_v0  ;;  %v4172_v42 = vld [vmem:[%s5601_s1 + $0x110] sm:$0xff]   ;;  %v4084_v43 = vld [vmem:[%s5602_s0 + $0x78] ss:$20 sps:$4 sm:$0xff]   ;;  %v4088_v49 = vld [vmem:[%s5601_s1 + $0x80] sm:$0xff]  }
  0x10   :  { %v4085_v44 = vld [vmem:[%s5602_s0 + $0x438] ss:$20 sps:$4 sm:$0xff]   ;;  %v4093_v50 = vld [vmem:[%s5602_s0 + $0xa0] ss:$20 sps:$4 sm:$0xff]   ;;  %v4101_v56 = vld [vmem:[%s5602_s0 + $0xc8] ss:$20 sps:$4 sm:$0xff]  }
  0x11   :  { %v4089_v46 = vld [vmem:[%s5602_s0 + $0xa4] ss:$20 sps:$4 sm:$0xff]   ;;  %v4191_v48 = vld [vmem:[%s5601_s1 + $0x108] sm:$0xff]   ;;  %v4094_v51 = vld [vmem:[%s5602_s0 + $0x460] ss:$20 sps:$4 sm:$0xff]  }
  0x12   :  { %1503 = vmatpush1.bf16.msra.mxu0 %v4043_v5  ;;  %4026 = vmatpush1.bf16.msra.mxu1 %v4043_v5  ;;  %v4091_v47 = vld [vmem:[%s5602_s0 + $0x464] ss:$20 sps:$4 sm:$0xff]   ;;  %v4097_v53 = vld [vmem:[%s5602_s0 + $0xcc] ss:$20 sps:$4 sm:$0xff]   ;;  %v4096_v55 = vld [vmem:[%s5601_s1 + $0xf0] sm:$0xff]  }
  0x13   :  { %1504 = vmatprep.subr.bf16.mxu0 %v4304_v0  ;;  %4011 = vmatprep.subr.bf16.mxu1 %v4304_v0  ;;  %v4095_v52 = vld [vmem:[%s5601_s1 + $0xf8] sm:$0xff]   ;;  %v4099_v54 = vld [vmem:[%s5602_s0 + $0x48c] ss:$20 sps:$4 sm:$0xff]   ;;  %v4105_v59 = vld [vmem:[%s5602_s0 + $0xf4] ss:$20 sps:$4 sm:$0xff]  }
  0x14   :  { %v4102_v57 = vld [vmem:[%s5602_s0 + $0x488] ss:$20 sps:$4 sm:$0xff]   ;;  %v4210_v61 = vld [vmem:[%s5601_s1 + $0x100] sm:$0xff]   ;;  %v4113_v5 = vld [vmem:[%s5601_s1 + $0xd0] sm:$0xff]  }
  0x15   :  { %v4103_v58 = vld [vmem:[%s5601_s1 + $0xe8] sm:$0xff]   ;;  %v4104_v62 = vld [vmem:[%s5601_s1 + $0xe0] sm:$0xff]   ;;  %v4112_v2 = vld [vmem:[%s5601_s1 + $0xd8] sm:$0xff]  }
  0x16   :  { %1505 = vmatpush1.bf16.msra.mxu0 %v4044_v7  ;;  %4027 = vmatpush1.bf16.msra.mxu1 %v4044_v7  ;;  %v4107_v60 = vld [vmem:[%s5602_s0 + $0x4b4] ss:$20 sps:$4 sm:$0xff]   ;;  %v4109_v63 = vld [vmem:[%s5602_s0 + $0xf0] ss:$20 sps:$4 sm:$0xff]   ;;  %v4118_v6 = vld [vmem:[%s5602_s0 + $0x118] ss:$20 sps:$4 sm:$0xff]  }
  0x17   :  { %1506 = vmatprep.subr.bf16.mxu0 %v4304_v0  ;;  %4012 = vmatprep.subr.bf16.mxu1 %v4304_v0  ;;  %v4110_v1 = vld [vmem:[%s5602_s0 + $0x4b0] ss:$20 sps:$4 sm:$0xff]   ;;  %v4119_v7 = vld [vmem:[%s5602_s0 + $0x4d8] ss:$20 sps:$4 sm:$0xff]  }
  0x18   :  { %v4114_v3 = vld [vmem:[%s5602_s0 + $0x11c] ss:$20 sps:$4 sm:$0xff]   ;;  %v4120_v8 = vld [vmem:[%s5601_s1 + $0xc8] sm:$0xff]  }
  0x19   :  { %v4116_v4 = vld [vmem:[%s5602_s0 + $0x4dc] ss:$20 sps:$4 sm:$0xff]  }
  0x1a   :  { %1507 = vmatpush1.bf16.msra.mxu0 %v4045_v9  ;;  %4028 = vmatpush1.bf16.msra.mxu1 %v4045_v9  ;;  %v4122_v9 = vld [vmem:[%s5602_s0 + $0x144] ss:$20 sps:$4 sm:$0xff]  }
  0x1b   :  { %1508 = vmatprep.subr.bf16.mxu0 %v4304_v0  ;;  %4013 = vmatprep.subr.bf16.mxu1 %v4304_v0 }
  0x1e   :  { %1509 = vmatpush1.bf16.msra.mxu0 %v4046_v10  ;;  %4029 = vmatpush1.bf16.msra.mxu1 %v4046_v10  ;;  %v4126_v10 = vld [vmem:[%s5602_s0 + $0xc] ss:$20 sps:$4 sm:$0xff]  }
  0x1f   :  { %1510 = vmatprep.subr.bf16.mxu0 %v4304_v0  ;;  %4014 = vmatprep.subr.bf16.mxu1 %v4304_v0 }
  0x22   :  { %1511 = vmatpush2.bf16.msra.mxu0 %v4047_v11  ;;  %4030 = vmatpush2.bf16.msra.mxu1 %v4047_v11  ;;  %v4121_v11 = vld [vmem:[%s5601_s1 + $0xc0] sm:$0xff]  }
  0x23   :  { %1512 = vmatprep.subr.bf16.mxu0 %v4304_v0  ;;  %4015 = vmatprep.subr.bf16.mxu1 %v4304_v0 }
  0x26   :  { %1513 = vmatpush2.bf16.msra.mxu0 %v4048_v12  ;;  %4031 = vmatpush2.bf16.msra.mxu1 %v4048_v12  ;;  %v4124_v12 = vld [vmem:[%s5602_s0 + $0x8] ss:$20 sps:$4 sm:$0xff]  }
  0x27   :  { %1514 = vmatprep.subr.bf16.mxu0 %v4304_v0  ;;  %4016 = vmatprep.subr.bf16.mxu1 %v4304_v0 }
  0x2a   :  { %1515 = vmatpush2.bf16.msra.mxu0 %v4049_v13  ;;  %4032 = vmatpush2.bf16.msra.mxu1 %v4049_v13  ;;  %v4127_v13 = vld [vmem:[%s5602_s0 + $0x140] ss:$20 sps:$4 sm:$0xff]  }
  0x2b   :  { %1516 = vmatprep.subr.bf16.mxu0 %v4304_v0  ;;  %4017 = vmatprep.subr.bf16.mxu1 %v4304_v0 }
  0x2e   :  { %1517 = vmatpush2.bf16.msra.mxu0 %v4050_v14  ;;  %4033 = vmatpush2.bf16.msra.mxu1 %v4050_v14  ;;  %v4128_v14 = vld [vmem:[%s5602_s0 + $0x16c] ss:$20 sps:$4 sm:$0xff]  }
  0x2f   :  { %1518 = vmatprep.subr.bf16.mxu0 %v4304_v0  ;;  %4018 = vmatprep.subr.bf16.mxu1 %v4304_v0 }
  0x32   :  { %1519 = vmatpush2.bf16.msra.mxu0 %v4051_v15  ;;  %4034 = vmatpush2.bf16.msra.mxu1 %v4051_v15  ;;  %v4130_v15 = vld [vmem:[%s5602_s0 + $0x34] ss:$20 sps:$4 sm:$0xff]  }
  0x33   :  { %1520 = vmatprep.subr.bf16.mxu0 %v4304_v0  ;;  %4019 = vmatprep.subr.bf16.mxu1 %v4304_v0 }
  0x36   :  { %1521 = vmatpush2.bf16.msra.mxu0 %v4052_v16  ;;  %4035 = vmatpush2.bf16.msra.mxu1 %v4052_v16  ;;  %v4133_v16 = vld [vmem:[%s5602_s0 + $0x30] ss:$20 sps:$4 sm:$0xff]  }
  0x37   :  { %1522 = vmatprep.subr.bf16.mxu0 %v4304_v0  ;;  %4020 = vmatprep.subr.bf16.mxu1 %v4304_v0 }
  0x3a   :  { %1523 = vmatpush2.bf16.msra.mxu0 %v4053_v17  ;;  %4036 = vmatpush2.bf16.msra.mxu1 %v4053_v17  ;;  %v4135_v17 = vld [vmem:[%s5602_s0 + $0x194] ss:$20 sps:$4 sm:$0xff]  }
  0x3b   :  { %1524 = vmatprep.subr.bf16.mxu0 %v4304_v0  ;;  %4021 = vmatprep.subr.bf16.mxu1 %v4304_v0 }
  0x3e   :  { %1525 = vmatpush2.bf16.msra.mxu0 %v4054_v18  ;;  %4037 = vmatpush2.bf16.msra.mxu1 %v4054_v18  ;;  %v4137_v18 = vld [vmem:[%s5602_s0 + $0x5c] ss:$20 sps:$4 sm:$0xff]  }
  0x3f   :  { %1783 = vmatprep.subr.bf16.mxu1 %v4304_v0  ;;  %3926 = vmatprep.subr.bf16.mxu0 %v4061_v19 }
  0x41   :  { %1527 = vmatmul.mubr.bf16.vlgmr.msra.gmra.mxu0 %v4055_v20  ;;  %1719 = vmatmul.mubr.bf16.vlgmr.msra.gmra.mxu1 %v4058_v21  ;;  %v4140_v20 = vld [vmem:[%s5602_s0 + $0x58] ss:$20 sps:$4 sm:$0xff]   ;;  %v4141_v21 = vld [vmem:[%s5602_s0 + $0x1bc] ss:$20 sps:$4 sm:$0xff]  }
  0x42   :  { %1784 = vmatpush1.bf16.msra.mxu1 %v4062_v22  ;;  %3927 = vmatpush3.bf16.msra.mxu0 %v4061_v19  ;;  %v4139_v19 = vld [vmem:[%s5602_s0 + $0x190] ss:$20 sps:$4 sm:$0xff]  }
  0x43   :  { %1785 = vmatprep.subr.bf16.mxu1 %v4304_v0  ;;  %1534 = vmatprep.mubr.bf16.mxu0 %v4064_v23  ;;  %v4143_v22 = vld [vmem:[%s5602_s0 + $0x84] ss:$20 sps:$4 sm:$0xff]  }
  0x44   :  { %1726 = vmatprep.mubr.bf16.mxu1 %v4066_v24  ;;  %3928 = vmatprep.subr.bf16.mxu0 %v4086_v25  ;;  %v4145_v23 = vld [vmem:[%s5602_s0 + $0x1b8] ss:$20 sps:$4 sm:$0xff]   ;;  %v4146_v24 = vld [vmem:[%s5602_s0 + $0x80] ss:$20 sps:$4 sm:$0xff]  }
  0x46   :  { %1786 = vmatpush1.bf16.msra.mxu1 %v4063_v26  ;;  %3929 = vmatpush3.bf16.msra.mxu0 %v4086_v25  ;;  %v4147_v25 = vld [vmem:[%s5602_s0 + $0x1e4] ss:$20 sps:$4 sm:$0xff]   ;;  %v4149_v26 = vld [vmem:[%s5602_s0 + $0xac] ss:$20 sps:$4 sm:$0xff]  }
  0x47   :  { %1787 = vmatprep.subr.bf16.mxu1 %v4304_v0  ;;  %3930 = vmatprep.subr.bf16.mxu0 %v4111_v27 }
  0x49   :  { %1535 = vmatmul.mubr.bf16.gmra.mxu0 %v4068_v28  ;;  %1727 = vmatmul.mubr.bf16.gmra.mxu1 %v4069_v29  ;;  %v4152_v28 = vld [vmem:[%s5602_s0 + $0xa8] ss:$20 sps:$4 sm:$0xff]   ;;  %v4154_v29 = vld [vmem:[%s5602_s0 + $0x20c] ss:$20 sps:$4 sm:$0xff]  }
  0x4a   :  { %1788 = vmatpush1.bf16.msra.mxu1 %v4070_v30  ;;  %1542 = vmatprep.mubr.bf16.mxu0 %v4072_v31  ;;  %v4156_v30 = vld [vmem:[%s5602_s0 + $0xd4] ss:$20 sps:$4 sm:$0xff]  }
  0x4b   :  { %1789 = vmatprep.subr.bf16.mxu1 %v4304_v0  ;;  %1734 = vmatprep.mubr.bf16.mxu1 %v4074_v32  ;;  %v4158_v31 = vld [vmem:[%s5602_s0 + $0x208] ss:$20 sps:$4 sm:$0xff]   ;;  %v4159_v32 = vld [vmem:[%s5602_s0 + $0xd0] ss:$20 sps:$4 sm:$0xff]  }
  0x4c   :  { %3931 = vmatpush3.bf16.msra.mxu0 %v4111_v27  ;;  %v4151_v27 = vld [vmem:[%s5602_s0 + $0x1e0] ss:$20 sps:$4 sm:$0xff]  }
  0x4d   :  { %3932 = vmatprep.subr.bf16.mxu0 %v4134_v33 }
  0x4e   :  { %1790 = vmatpush1.bf16.msra.mxu1 %v4071_v34  ;;  %v4162_v34 = vld [vmem:[%s5602_s0 + $0xfc] ss:$20 sps:$4 sm:$0xff]  }
  0x4f   :  { %1791 = vmatprep.subr.bf16.mxu1 %v4304_v0 }
  0x50   :  { %3933 = vmatpush3.bf16.msra.mxu0 %v4134_v33  ;;  %v4160_v33 = vld [vmem:[%s5602_s0 + $0x234] ss:$20 sps:$4 sm:$0xff]  }
  0x51   :  { %1543 = vmatmul.mubr.bf16.gmra.mxu0 %v4076_v35  ;;  %1735 = vmatmul.mubr.bf16.gmra.mxu1 %v4077_v36  ;;  %v4164_v35 = vld [vmem:[%s5602_s0 + $0x230] ss:$20 sps:$4 sm:$0xff]   ;;  %v4165_v36 = vld [vmem:[%s5602_s0 + $0xf8] ss:$20 sps:$4 sm:$0xff]  }
  0x52   :  { %1792 = vmatpush1.bf16.msra.mxu1 %v4078_v37  ;;  %1550 = vmatprep.mubr.bf16.mxu0 %v4080_v38  ;;  %v4166_v37 = vld [vmem:[%s5602_s0 + $0x25c] ss:$20 sps:$4 sm:$0xff]   ;;  %v4168_v38 = vld [vmem:[%s5602_s0 + $0x124] ss:$20 sps:$4 sm:$0xff]  }
  0x53   :  { %1793 = vmatprep.subr.bf16.mxu1 %v4304_v0  ;;  %1742 = vmatprep.mubr.bf16.mxu1 %v4082_v39  ;;  %v4170_v39 = vld [vmem:[%s5602_s0 + $0x258] ss:$20 sps:$4 sm:$0xff]  }
  0x54   :  { %3934 = vmatprep.subr.bf16.mxu0 %v4153_v40 }
  0x55   :  { %3935 = vmatpush3.bf16.msra.mxu0 %v4153_v40  ;;  %v4171_v40 = vld [vmem:[%s5602_s0 + $0x120] ss:$20 sps:$4 sm:$0xff]  }
  0x56   :  { %1794 = vmatpush1.bf16.msra.mxu1 %v4079_v41  ;;  %3936 = vmatprep.subr.bf16.mxu0 %v4172_v42  ;;  %v4173_v41 = vld [vmem:[%s5602_s0 + $0x284] ss:$20 sps:$4 sm:$0xff]  }
  0x57   :  { %1795 = vmatprep.subr.bf16.mxu1 %v4304_v0 }
  0x59   :  { %1551 = vmatmul.mubr.bf16.gmra.mxu0 %v4084_v43  ;;  %1743 = vmatmul.mubr.bf16.gmra.mxu1 %v4085_v44  ;;  %v4177_v43 = vld [vmem:[%s5602_s0 + $0x280] ss:$20 sps:$4 sm:$0xff]   ;;  %v4178_v44 = vld [vmem:[%s5602_s0 + $0x148] ss:$20 sps:$4 sm:$0xff]  }
  0x5a   :  { %1796 = vmatpush1.bf16.msra.mxu1 %v4087_v45  ;;  %1558 = vmatprep.mubr.bf16.mxu0 %v4089_v46  ;;  %v4179_v45 = vld [vmem:[%s5602_s0 + $0x2ac] ss:$20 sps:$4 sm:$0xff]   ;;  %v4181_v46 = vld [vmem:[%s5602_s0 + $0x174] ss:$20 sps:$4 sm:$0xff]  }
  0x5b   :  { %1797 = vmatprep.subr.bf16.mxu1 %v4304_v0  ;;  %1750 = vmatprep.mubr.bf16.mxu1 %v4091_v47  ;;  %v4183_v47 = vld [vmem:[%s5602_s0 + $0x2a8] ss:$20 sps:$4 sm:$0xff]  }
  0x5c   :  { %3937 = vmatpush3.bf16.msra.mxu0 %v4172_v42  ;;  %v4175_v42 = vld [vmem:[%s5602_s0 + $0x14c] ss:$20 sps:$4 sm:$0xff]  }
  0x5d   :  { %3938 = vmatprep.subr.bf16.mxu0 %v4191_v48 }
  0x5e   :  { %1798 = vmatpush1.bf16.msra.mxu1 %v4088_v49  ;;  %v4185_v49 = vld [vmem:[%s5602_s0 + $0x2d4] ss:$20 sps:$4 sm:$0xff]  }
  0x5f   :  { %1799 = vmatprep.subr.bf16.mxu1 %v4304_v0 }
  0x60   :  { %3939 = vmatpush3.bf16.msra.mxu0 %v4191_v48  ;;  %v4184_v48 = vld [vmem:[%s5602_s0 + $0x170] ss:$20 sps:$4 sm:$0xff]  }
  0x61   :  { %1559 = vmatmul.mubr.bf16.gmra.mxu0 %v4093_v50  ;;  %1751 = vmatmul.mubr.bf16.gmra.mxu1 %v4094_v51  ;;  %v4187_v50 = vld [vmem:[%s5602_s0 + $0x19c] ss:$20 sps:$4 sm:$0xff]  }
  0x62   :  { %1800 = vmatpush2.bf16.msra.mxu1 %v4095_v52  ;;  %1566 = vmatprep.mubr.bf16.mxu0 %v4097_v53  ;;  %v4189_v51 = vld [vmem:[%s5602_s0 + $0x2d0] ss:$20 sps:$4 sm:$0xff]   ;;  %v4190_v52 = vld [vmem:[%s5602_s0 + $0x198] ss:$20 sps:$4 sm:$0xff]  }
  0x63   :  { %1801 = vmatprep.subr.bf16.mxu1 %v4304_v0  ;;  %1758 = vmatprep.mubr.bf16.mxu1 %v4099_v54  ;;  %v4192_v53 = vld [vmem:[%s5602_s0 + $0x2fc] ss:$20 sps:$4 sm:$0xff]   ;;  %v4194_v54 = vld [vmem:[%s5602_s0 + $0x1c4] ss:$20 sps:$4 sm:$0xff]  }
  0x64   :  { %3940 = vmatprep.subr.bf16.mxu0 %v4210_v61 }
  0x65   :  { %3941 = vmatpush3.bf16.msra.mxu0 %v4210_v61  ;;  %v4204_v61 = vld [vmem:[%s5602_s0 + $0x34c] ss:$20 sps:$4 sm:$0xff]  }
  0x66   :  { %1802 = vmatpush2.bf16.msra.mxu1 %v4096_v55  ;;  %v4196_v55 = vld [vmem:[%s5602_s0 + $0x2f8] ss:$20 sps:$4 sm:$0xff]  }
  0x67   :  { %1803 = vmatprep.subr.bf16.mxu1 %v4304_v0 }
  0x69   :  { %1567 = vmatmul.mubr.bf16.gmra.mxu0 %v4101_v56  ;;  %1759 = vmatmul.mubr.bf16.gmra.mxu1 %v4102_v57  ;;  %v4197_v56 = vld [vmem:[%s5602_s0 + $0x1c0] ss:$20 sps:$4 sm:$0xff]   ;;  %v4198_v57 = vld [vmem:[%s5602_s0 + $0x324] ss:$20 sps:$4 sm:$0xff]  }
  0x6a   :  { %1804 = vmatpush2.bf16.msra.mxu1 %v4103_v58  ;;  %1574 = vmatprep.mubr.bf16.mxu0 %v4105_v59  ;;  %v4200_v58 = vld [vmem:[%s5602_s0 + $0x1ec] ss:$20 sps:$4 sm:$0xff]  }
  0x6b   :  { %1805 = vmatprep.subr.bf16.mxu1 %v4304_v0  ;;  %1766 = vmatprep.mubr.bf16.mxu1 %v4107_v60  ;;  %v4202_v59 = vld [vmem:[%s5602_s0 + $0x320] ss:$20 sps:$4 sm:$0xff]   ;;  %v4203_v60 = vld [vmem:[%s5602_s0 + $0x1e8] ss:$20 sps:$4 sm:$0xff]  }
  0x6e   :  { %1806 = vmatpush2.bf16.msra.mxu1 %v4104_v62  ;;  %v4206_v62 = vld [vmem:[%s5602_s0 + $0x214] ss:$20 sps:$4 sm:$0xff]  }
  0x6f   :  { %1807 = vmatprep.subr.bf16.mxu1 %v4304_v0 }
  0x71   :  { %1575 = vmatmul.mubr.bf16.gmra.mxu0 %v4109_v63  ;;  %1767 = vmatmul.mubr.bf16.gmra.mxu1 %v4110_v1  ;;  %v4208_v63 = vld [vmem:[%s5602_s0 + $0x348] ss:$20 sps:$4 sm:$0xff]   ;;  %v4209_v1 = vld [vmem:[%s5602_s0 + $0x210] ss:$20 sps:$4 sm:$0xff]  }
  0x72   :  { %1808 = vmatpush2.bf16.msra.mxu1 %v4112_v2  ;;  %1582 = vmatprep.mubr.bf16.mxu0 %v4114_v3  ;;  %v4211_v2 = vld [vmem:[%s5602_s0 + $0x374] ss:$20 sps:$4 sm:$0xff]   ;;  %v4213_v3 = vld [vmem:[%s5602_s0 + $0x23c] ss:$20 sps:$4 sm:$0xff]  }
  0x73   :  { %1809 = vmatprep.subr.bf16.mxu1 %v4304_v0  ;;  %1774 = vmatprep.mubr.bf16.mxu1 %v4116_v4  ;;  %v4215_v4 = vld [vmem:[%s5602_s0 + $0x370] ss:$20 sps:$4 sm:$0xff]  }
  0x76   :  { %1810 = vmatpush2.bf16.msra.mxu1 %v4113_v5  ;;  %v4216_v5 = vld [vmem:[%s5602_s0 + $0x238] ss:$20 sps:$4 sm:$0xff]  }
  0x77   :  { %1811 = vmatprep.subr.bf16.mxu1 %v4304_v0 }
  0x79   :  { %1583 = vmatmul.mubr.bf16.gmra.mxu0 %v4118_v6  ;;  %1775 = vmatmul.mubr.bf16.gmra.mxu1 %v4119_v7  ;;  %v4217_v6 = vld [vmem:[%s5602_s0 + $0x39c] ss:$20 sps:$4 sm:$0xff]   ;;  %v4219_v7 = vld [vmem:[%s5602_s0 + $0x264] ss:$20 sps:$4 sm:$0xff]  }
  0x7a   :  { %1812 = vmatpush2.bf16.msra.mxu1 %v4120_v8  ;;  %1590 = vmatprep.mubr.bf16.mxu0 %v4122_v9  ;;  %v4221_v8 = vld [vmem:[%s5602_s0 + $0x398] ss:$20 sps:$4 sm:$0xff]   ;;  %v4222_v9 = vld [vmem:[%s5602_s0 + $0x260] ss:$20 sps:$4 sm:$0xff]  }
  0x7b   :  { %1813 = vmatprep.subr.bf16.mxu1 %v4304_v0  ;;  %1815 = vmatprep.mubr.bf16.mxu1 %v4126_v10  ;;  %v4132_v0 = vld [vmem:[%s5602_s0 + $0x168] ss:$20 sps:$4 sm:$0xff]   ;;  %v4223_v10 = vld [vmem:[%s5602_s0 + $0x28c] ss:$20 sps:$4 sm:$0xff]  }
  0x7e   :  { %1814 = vmatpush2.bf16.msra.mxu1 %v4121_v11  ;;  %v4225_v11 = vld [vmem:[%s5602_s0 + $0x10] ss:$20 sps:$4 sm:$0xff]  }
  0x81   :  { %1591 = vmatmul.mubr.bf16.gmra.mxu0 %v4127_v13  ;;  %1816 = vmatmul.mubr.bf16.vlgmr.msra.gmra.mxu1 %v4124_v12  ;;  %v4226_v12 = vld [vmem:[%s5602_s0 + $0x288] ss:$20 sps:$4 sm:$0xff]   ;;  %v4227_v13 = vld [vmem:[%s5602_s0 + $0x38] ss:$20 sps:$4 sm:$0xff]  }
  0x82   :  { %1598 = vmatprep.mubr.bf16.mxu0 %v4128_v14  ;;  %1823 = vmatprep.mubr.bf16.mxu1 %v4130_v15  ;;  %v4228_v14 = vld [vmem:[%s5602_s0 + $0x2b4] ss:$20 sps:$4 sm:$0xff]  }
  0x83   :  { %v4230_v15 = vld [vmem:[%s5602_s0 + $0x60] ss:$20 sps:$4 sm:$0xff]  }
  0x89   :  { %1599 = vmatmul.mubr.bf16.gmra.mxu0 %v4132_v0  ;;  %1824 = vmatmul.mubr.bf16.gmra.mxu1 %v4133_v16 }
  0x8a   :  { %1606 = vmatprep.mubr.bf16.mxu0 %v4135_v17  ;;  %1831 = vmatprep.mubr.bf16.mxu1 %v4137_v18 }
  0x91   :  { %1607 = vmatmul.mubr.bf16.gmra.mxu0 %v4139_v19  ;;  %1832 = vmatmul.mubr.bf16.gmra.mxu1 %v4140_v20 }
  0x92   :  { %1614 = vmatprep.mubr.bf16.mxu0 %v4141_v21  ;;  %1839 = vmatprep.mubr.bf16.mxu1 %v4143_v22  ;;  %v4231_v21 = vld [vmem:[%s5602_s0 + $0x2b0] ss:$20 sps:$4 sm:$0xff]   ;;  %v4232_v22 = vld [vmem:[%s5602_s0 + $0x88] ss:$20 sps:$4 sm:$0xff]  }
  0x99   :  { %1615 = vmatmul.mubr.bf16.gmra.mxu0 %v4145_v23  ;;  %1840 = vmatmul.mubr.bf16.gmra.mxu1 %v4146_v24  ;;  %v4233_v23 = vld [vmem:[%s5602_s0 + $0x2dc] ss:$20 sps:$4 sm:$0xff]  }
  0x9a   :  { %1622 = vmatprep.mubr.bf16.mxu0 %v4147_v25  ;;  %1847 = vmatprep.mubr.bf16.mxu1 %v4149_v26  ;;  %v4235_v24 = vld [vmem:[%s5602_s0 + $0xb0] ss:$20 sps:$4 sm:$0xff]  }
  0xa1   :  { %1623 = vmatmul.mubr.bf16.gmra.mxu0 %v4151_v27  ;;  %1848 = vmatmul.mubr.bf16.gmra.mxu1 %v4152_v28 }
  0xa2   :  { %1630 = vmatprep.mubr.bf16.mxu0 %v4154_v29  ;;  %1855 = vmatprep.mubr.bf16.mxu1 %v4156_v30 }
  0xa9   :  { %1631 = vmatmul.mubr.bf16.gmra.mxu0 %v4158_v31  ;;  %1856 = vmatmul.mubr.bf16.gmra.mxu1 %v4159_v32 }
  0xaa   :  { %1638 = vmatprep.mubr.bf16.mxu0 %v4160_v33  ;;  %1863 = vmatprep.mubr.bf16.mxu1 %v4162_v34  ;;  %v4236_v33 = vld [vmem:[%s5602_s0 + $0x2d8] ss:$20 sps:$4 sm:$0xff]  }
  0xab   :  { %v4237_v34 = vld [vmem:[%s5602_s0 + $0xd8] ss:$20 sps:$4 sm:$0xff]  }
  0xb1   :  { %1639 = vmatmul.mubr.bf16.gmra.mxu0 %v4164_v35  ;;  %1864 = vmatmul.mubr.bf16.gmra.mxu1 %v4165_v36  ;;  %v4238_v35 = vld [vmem:[%s5602_s0 + $0x304] ss:$20 sps:$4 sm:$0xff]   ;;  %v4240_v36 = vld [vmem:[%s5602_s0 + $0x100] ss:$20 sps:$4 sm:$0xff]  }
  0xb2   :  { %1646 = vmatprep.mubr.bf16.mxu0 %v4166_v37  ;;  %1871 = vmatprep.mubr.bf16.mxu1 %v4168_v38 }
  0xb9   :  { %1647 = vmatmul.mubr.bf16.gmra.mxu0 %v4170_v39  ;;  %1872 = vmatmul.mubr.bf16.gmra.mxu1 %v4171_v40 }
  0xba   :  { %1654 = vmatprep.mubr.bf16.mxu0 %v4173_v41  ;;  %1879 = vmatprep.mubr.bf16.mxu1 %v4175_v42 }
  0xc1   :  { %1655 = vmatmul.mubr.bf16.gmra.mxu0 %v4177_v43  ;;  %1880 = vmatmul.mubr.bf16.gmra.mxu1 %v4178_v44 }
  0xc2   :  { %1662 = vmatprep.mubr.bf16.mxu0 %v4179_v45  ;;  %1887 = vmatprep.mubr.bf16.mxu1 %v4181_v46  ;;  %v4241_v45 = vld [vmem:[%s5602_s0 + $0x300] ss:$20 sps:$4 sm:$0xff]   ;;  %v4242_v46 = vld [vmem:[%s5602_s0 + $0x128] ss:$20 sps:$4 sm:$0xff]  }
  0xc9   :  { %1663 = vmatmul.mubr.bf16.gmra.mxu0 %v4183_v47  ;;  %1888 = vmatmul.mubr.bf16.gmra.mxu1 %v4184_v48  ;;  %v4245_v47 = vld [vmem:[%s5602_s0 + $0x32c] ss:$20 sps:$4 sm:$0xff]   ;;  %v4246_v48 = vld [vmem:[%s5602_s0 + $0x150] ss:$20 sps:$4 sm:$0xff]  }
  0xca   :  { %1670 = vmatprep.mubr.bf16.mxu0 %v4185_v49  ;;  %1895 = vmatprep.mubr.bf16.mxu1 %v4187_v50 }
  0xd1   :  { %1671 = vmatmul.mubr.bf16.gmra.mxu0 %v4189_v51  ;;  %1896 = vmatmul.mubr.bf16.gmra.mxu1 %v4190_v52 }
  0xd2   :  { %1678 = vmatprep.mubr.bf16.mxu0 %v4192_v53  ;;  %1903 = vmatprep.mubr.bf16.mxu1 %v4194_v54 }
  0xd9   :  { %1679 = vmatmul.mubr.bf16.gmra.mxu0 %v4196_v55  ;;  %1904 = vmatmul.mubr.bf16.gmra.mxu1 %v4197_v56 }
  0xda   :  { %1686 = vmatprep.mubr.bf16.mxu0 %v4198_v57  ;;  %1911 = vmatprep.mubr.bf16.mxu1 %v4200_v58  ;;  %v4243_v57 = vld [vmem:[%s5602_s0 + $0x328] ss:$20 sps:$4 sm:$0xff]   ;;  %v4247_v58 = vld [vmem:[%s5602_s0 + $0x178] ss:$20 sps:$4 sm:$0xff]  }
  0xe1   :  { %1687 = vmatmul.mubr.bf16.gmra.mxu0 %v4202_v59  ;;  %1912 = vmatmul.mubr.bf16.gmra.mxu1 %v4203_v60  ;;  %v4250_v59 = vld [vmem:[%s5602_s0 + $0x354] ss:$20 sps:$4 sm:$0xff]  }
  0xe2   :  { %1694 = vmatprep.mubr.bf16.mxu0 %v4204_v61  ;;  %1919 = vmatprep.mubr.bf16.mxu1 %v4206_v62  ;;  %v4251_v60 = vld [vmem:[%s5602_s0 + $0x1a0] ss:$20 sps:$4 sm:$0xff]  }
  0xe9   :  { %1695 = vmatmul.mubr.bf16.gmra.mxu0 %v4208_v63  ;;  %1920 = vmatmul.mubr.bf16.gmra.mxu1 %v4209_v1 }
  0xea   :  { %1702 = vmatprep.mubr.bf16.mxu0 %v4211_v2  ;;  %1927 = vmatprep.mubr.bf16.mxu1 %v4213_v3 }
  0xf1   :  { %1703 = vmatmul.mubr.bf16.gmra.mxu0 %v4215_v4  ;;  %1928 = vmatmul.mubr.bf16.gmra.mxu1 %v4216_v5 }
  0xf2   :  { %1710 = vmatprep.mubr.bf16.mxu0 %v4217_v6  ;;  %1935 = vmatprep.mubr.bf16.mxu1 %v4219_v7  ;;  %v4248_v6 = vld [vmem:[%s5602_s0 + $0x350] ss:$20 sps:$4 sm:$0xff]   ;;  %v4252_v7 = vld [vmem:[%s5602_s0 + $0x1c8] ss:$20 sps:$4 sm:$0xff]  }
  0xf9   :  { %1711 = vmatmul.mubr.bf16.gmra.mxu0 %v4221_v8  ;;  %1936 = vmatmul.mubr.bf16.gmra.mxu1 %v4222_v9  ;;  %v4255_v8 = vld [vmem:[%s5602_s0 + $0x37c] ss:$20 sps:$4 sm:$0xff]  }
  0xfa   :  { %1943 = vmatprep.mubr.bf16.mxu1 %v4223_v10  ;;  %3942 = vmatprep.mubr.bf16.mxu0 %v4225_v11  ;;  %v4256_v9 = vld [vmem:[%s5602_s0 + $0x1f0] ss:$20 sps:$4 sm:$0xff]  }
 0x101   :  { %v4804_v0 = vpop.f32.mrf.mxu0  ;;  %v4806_v16 = vpop.f32.mrf.mxu1  ;;  %1944 = vmatmul.mubr.bf16.gmra.mxu1 %v4226_v12  ;;  %3943 = vmatmul.mubr.bf16.vlgmr.msra.gmra.mxu0 %v4227_v13 }
 0x102   :  { %5606 = vst [vmem:[#allocation3_spill] sm:$0xff] %v4806_v16  ;;  %1951 = vmatprep.mubr.bf16.mxu1 %v4228_v14  ;;  %3946 = vmatprep.mubr.bf16.mxu0 %v4230_v15 }
 0x103   :  { %v1530_v17 = vpop.f32.mrf.mxu0  ;;  %v1722_v18 = vpop.f32.mrf.mxu1 }
 0x105   :  { %v4808_v19 = vpop.f32.mrf.mxu0  ;;  %v4810_v20 = vpop.f32.mrf.mxu1 }
 0x106   :  { %5607 = vst [vmem:[#allocation4_spill] sm:$0xff] %v4810_v20 }
 0x107   :  { %v1533_v25 = vpop.f32.mrf.mxu0  ;;  %v1725_v26 = vpop.f32.mrf.mxu1 }
 0x109   :  { %v4824_v27 = vpop.f32.mrf.mxu0  ;;  %v4826_v28 = vpop.f32.mrf.mxu1  ;;  %1952 = vmatmul.mubr.bf16.gmra.mxu1 %v4231_v21  ;;  %3947 = vmatmul.mubr.bf16.gmra.mxu0 %v4232_v22  ;;  %v4253_v21 = vld [vmem:[%s5602_s0 + $0x378] ss:$20 sps:$4 sm:$0xff]  }
 0x10a   :  { %5608 = vst [vmem:[#allocation5_spill] sm:$0xff] %v4826_v28  ;;  %1959 = vmatprep.mubr.bf16.mxu1 %v4233_v23  ;;  %3950 = vmatprep.mubr.bf16.mxu0 %v4235_v24  ;;  %v4257_v22 = vld [vmem:[%s5602_s0 + $0x218] ss:$20 sps:$4 sm:$0xff]   ;;  %v4261_v24 = vld [vmem:[%s5602_s0 + $0x240] ss:$20 sps:$4 sm:$0xff]  }
 0x10b   :  { %v1538_v29 = vpop.f32.mrf.mxu0  ;;  %v1730_v30 = vpop.f32.mrf.mxu1  ;;  %v4260_v23 = vld [vmem:[%s5602_s0 + $0x3a4] ss:$20 sps:$4 sm:$0xff]  }
 0x10d   :  { %v4828_v31 = vpop.f32.mrf.mxu0  ;;  %v4830_v32 = vpop.f32.mrf.mxu1 }
 0x10e   :  { %5609 = vst [vmem:[#allocation6_spill] sm:$0xff] %v4830_v32 }
 0x10f   :  { %v1541_v37 = vpop.f32.mrf.mxu0  ;;  %v1733_v38 = vpop.f32.mrf.mxu1 }
 0x110   :  { %v4258_v37 = vld [vmem:[%s5602_s0 + $0x3a0] ss:$20 sps:$4 sm:$0xff]   ;;  %v4262_v38 = vld [vmem:[%s5602_s0 + $0x268] ss:$20 sps:$4 sm:$0xff]  }
 0x111   :  { %v4844_v39 = vpop.f32.mrf.mxu0  ;;  %v4846_v40 = vpop.f32.mrf.mxu1  ;;  %1960 = vmatmul.mubr.bf16.gmra.mxu1 %v4236_v33  ;;  %3951 = vmatmul.mubr.bf16.gmra.mxu0 %v4237_v34 }
 0x112   :  { %5610 = vst [vmem:[#allocation7_spill] sm:$0xff] %v4846_v40  ;;  %1967 = vmatprep.mubr.bf16.mxu1 %v4238_v35  ;;  %3954 = vmatprep.mubr.bf16.mxu0 %v4240_v36 }
 0x113   :  { %v1546_v41 = vpop.f32.mrf.mxu0  ;;  %v1738_v42 = vpop.f32.mrf.mxu1 }
 0x114   :  { %v4265_v41 = vld [vmem:[%s5602_s0 + $0x3cc] ss:$20 sps:$4 sm:$0xff]   ;;  %v4266_v42 = vld [vmem:[%s5602_s0 + $0x290] ss:$20 sps:$4 sm:$0xff]  }
 0x115   :  { %v4848_v43 = vpop.f32.mrf.mxu0  ;;  %v4850_v44 = vpop.f32.mrf.mxu1 }
 0x116   :  { %5611 = vst [vmem:[#allocation8_spill] sm:$0xff] %v4850_v44 }
 0x117   :  { %v1549_v49 = vpop.f32.mrf.mxu0  ;;  %v1741_v50 = vpop.f32.mrf.mxu1 }
 0x119   :  { %v4864_v51 = vpop.f32.mrf.mxu0  ;;  %v4866_v52 = vpop.f32.mrf.mxu1  ;;  %1968 = vmatmul.mubr.bf16.gmra.mxu1 %v4241_v45  ;;  %3955 = vmatmul.mubr.bf16.gmra.mxu0 %v4242_v46 }
 0x11a   :  { %5612 = vst [vmem:[#allocation9_spill] sm:$0xff] %v4866_v52  ;;  %1975 = vmatprep.mubr.bf16.mxu1 %v4245_v47  ;;  %3958 = vmatprep.mubr.bf16.mxu0 %v4246_v48 }
 0x11b   :  { %v1554_v53 = vpop.f32.mrf.mxu0  ;;  %v1746_v54 = vpop.f32.mrf.mxu1 }
 0x11d   :  { %v4868_v55 = vpop.f32.mrf.mxu0  ;;  %v4870_v56 = vpop.f32.mrf.mxu1 }
 0x11e   :  { %5613 = vst [vmem:[#allocation10_spill] sm:$0xff] %v4870_v56 }
 0x11f   :  { %v1557_v61 = vpop.f32.mrf.mxu0  ;;  %v1749_v62 = vpop.f32.mrf.mxu1 }
 0x121   :  { %v4884_v63 = vpop.f32.mrf.mxu0  ;;  %v4886_v1 = vpop.f32.mrf.mxu1  ;;  %1976 = vmatmul.mubr.bf16.gmra.mxu1 %v4243_v57  ;;  %3959 = vmatmul.mubr.bf16.gmra.mxu0 %v4247_v58  ;;  %v4263_v57 = vld [vmem:[%s5602_s0 + $0x3c8] ss:$20 sps:$4 sm:$0xff]   ;;  %v4267_v58 = vld [vmem:[%s5602_s0 + $0x2b8] ss:$20 sps:$4 sm:$0xff]  }
 0x122   :  { %5614 = vst [vmem:[#allocation11_spill] sm:$0xff] %v4886_v1  ;;  %1983 = vmatprep.mubr.bf16.mxu1 %v4250_v59  ;;  %3962 = vmatprep.mubr.bf16.mxu0 %v4251_v60  ;;  %v4270_v59 = vld [vmem:[%s5602_s0 + $0x3f4] ss:$20 sps:$4 sm:$0xff]  }
 0x123   :  { %v1562_v2 = vpop.f32.mrf.mxu0  ;;  %v1754_v3 = vpop.f32.mrf.mxu1  ;;  %v4271_v60 = vld [vmem:[%s5602_s0 + $0x2e0] ss:$20 sps:$4 sm:$0xff]  }
 0x125   :  { %v4888_v4 = vpop.f32.mrf.mxu0  ;;  %v4890_v5 = vpop.f32.mrf.mxu1 }
 0x126   :  { %5615 = vst [vmem:[#allocation12_spill] sm:$0xff] %v4890_v5 }
 0x127   :  { %v1565_v10 = vpop.f32.mrf.mxu0  ;;  %v1757_v11 = vpop.f32.mrf.mxu1 }
 0x128   :  { %v4268_v11 = vld [vmem:[%s5602_s0 + $0x3f0] ss:$20 sps:$4 sm:$0xff]  }
 0x129   :  { %v4904_v12 = vpop.f32.mrf.mxu0  ;;  %v4906_v13 = vpop.f32.mrf.mxu1  ;;  %1984 = vmatmul.mubr.bf16.gmra.mxu1 %v4248_v6  ;;  %3963 = vmatmul.mubr.bf16.gmra.mxu0 %v4252_v7 }
 0x12a   :  { %5616 = vst [vmem:[#allocation13_spill] sm:$0xff] %v4906_v13  ;;  %1991 = vmatprep.mubr.bf16.mxu1 %v4255_v8  ;;  %3966 = vmatprep.mubr.bf16.mxu0 %v4256_v9 }
 0x12b   :  { %v1570_v14 = vpop.f32.mrf.mxu0  ;;  %v1762_v15 = vpop.f32.mrf.mxu1 }
 0x12c   :  { %v4272_v14 = vld [vmem:[%s5602_s0 + $0x308] ss:$20 sps:$4 sm:$0xff]  }
 0x12d   :  { %v4908_v17 = vpop.f32.mrf.mxu0  ;;  %v4910_v18 = vpop.f32.mrf.mxu1 }
 0x12e   :  { %5617 = vst [vmem:[#allocation14_spill] sm:$0xff] %v4910_v18 }
 0x12f   :  { %v1573_v25 = vpop.f32.mrf.mxu0  ;;  %v1765_v26 = vpop.f32.mrf.mxu1 }
 0x131   :  { %v4924_v29 = vpop.f32.mrf.mxu0  ;;  %v4926_v30 = vpop.f32.mrf.mxu1  ;;  %1992 = vmatmul.mubr.bf16.gmra.mxu1 %v4253_v21  ;;  %3967 = vmatmul.mubr.bf16.gmra.mxu0 %v4257_v22  ;;  %v4276_v21 = vld [vmem:[%s5602_s0 + $0x330] ss:$20 sps:$4 sm:$0xff]  }
 0x132   :  { %5618 = vst [vmem:[#allocation15_spill] sm:$0xff] %v4926_v30  ;;  %1999 = vmatprep.mubr.bf16.mxu1 %v4260_v23  ;;  %3970 = vmatprep.mubr.bf16.mxu0 %v4261_v24 }
 0x133   :  { %v1578_v33 = vpop.f32.mrf.mxu0  ;;  %v1770_v34 = vpop.f32.mrf.mxu1 }
 0x135   :  { %v4928_v35 = vpop.f32.mrf.mxu0  ;;  %v4930_v36 = vpop.f32.mrf.mxu1 }
 0x136   :  { %5619 = vst [vmem:[#allocation16_spill] sm:$0xff] %v4930_v36 }
 0x137   :  { %v1581_v45 = vpop.f32.mrf.mxu0  ;;  %v1773_v46 = vpop.f32.mrf.mxu1 }
 0x138   :  { %v4281_v45 = vld [vmem:[%s5602_s0 + $0x380] ss:$20 sps:$4 sm:$0xff]  }
 0x139   :  { %v4944_v47 = vpop.f32.mrf.mxu0  ;;  %v4946_v48 = vpop.f32.mrf.mxu1  ;;  %2000 = vmatmul.mubr.bf16.gmra.mxu1 %v4258_v37  ;;  %3971 = vmatmul.mubr.bf16.gmra.mxu0 %v4262_v38  ;;  %v4273_v38 = vld [vmem:[%s5602_s0 + $0x418] ss:$20 sps:$4 sm:$0xff]  }
 0x13a   :  { %5620 = vst [vmem:[#allocation17_spill] sm:$0xff] %v4946_v48  ;;  %2007 = vmatprep.mubr.bf16.mxu1 %v4265_v41  ;;  %3974 = vmatprep.mubr.bf16.mxu0 %v4266_v42  ;;  %v4277_v41 = vld [vmem:[%s5602_s0 + $0x358] ss:$20 sps:$4 sm:$0xff]  }
 0x13b   :  { %v1586_v49 = vpop.f32.mrf.mxu0  ;;  %v1778_v50 = vpop.f32.mrf.mxu1 }
 0x13d   :  { %v4948_v53 = vpop.f32.mrf.mxu0  ;;  %v4950_v54 = vpop.f32.mrf.mxu1 }
 0x13e   :  { %5621 = vst [vmem:[#allocation18_spill] sm:$0xff] %v4950_v54 }
 0x13f   :  { %v1589_v61 = vpop.f32.mrf.mxu0  ;;  %v1781_v62 = vpop.f32.mrf.mxu1 }
 0x140   :  { %v4278_v62 = vld [vmem:[%s5602_s0 + $0x440] ss:$20 sps:$4 sm:$0xff]  }
 0x141   :  { %v4964_v2 = vpop.f32.mrf.mxu0  ;;  %v1817_v3 = vpop.f32.mrf.mxu1  ;;  %2008 = vmatmul.mubr.bf16.gmra.mxu1 %v4263_v57  ;;  %3975 = vmatmul.mubr.bf16.gmra.mxu0 %v4267_v58 }
 0x142   :  { %v4967_v6 = vadd.f32 %v1817_v3, %v4804_v0  ;;  %2015 = vmatprep.mubr.bf16.mxu1 %v4270_v59  ;;  %3978 = vmatprep.mubr.bf16.mxu0 %v4271_v60  ;;  %v4275_v0 = vld [vmem:[%s5602_s0 + $0x41c] ss:$20 sps:$4 sm:$0xff]  }
 0x143   :  { %v1594_v7 = vpop.f32.mrf.mxu0  ;;  %v1819_v8 = vpop.f32.mrf.mxu1  ;;  %v4282_v3 = vld [vmem:[%s5602_s0 + $0x3a8] ss:$20 sps:$4 sm:$0xff]  }
 0x144   :  { %v4286_v8 = vld [vmem:[%s5602_s0 + $0x3d0] ss:$20 sps:$4 sm:$0xff]  }
 0x145   :  { %v4969_v9 = vpop.f32.mrf.mxu0  ;;  %v1820_v10 = vpop.f32.mrf.mxu1 }
 0x146   :  { %v4978_v15 = vadd.f32 %v1820_v10, %v4808_v19 }
 0x147   :  { %v1597_v22 = vpop.f32.mrf.mxu0  ;;  %v1822_v23 = vpop.f32.mrf.mxu1 }
 0x149   :  { %v4986_v24 = vpop.f32.mrf.mxu0  ;;  %v1825_v25 = vpop.f32.mrf.mxu1  ;;  %2016 = vmatmul.mubr.bf16.gmra.mxu1 %v4268_v11  ;;  %3979 = vmatmul.mubr.bf16.gmra.mxu0 %v4272_v14 }
 0x14a   :  { %v4989_v26 = vadd.f32 %v1825_v25, %v4824_v27  ;;  %2023 = vmatprep.mubr.bf16.mxu1 %v4275_v0  ;;  %3982 = vmatprep.mubr.bf16.mxu0 %v4276_v21  ;;  %v4280_v27 = vld [vmem:[%s5602_s0 + $0x444] ss:$20 sps:$4 sm:$0xff]  }
 0x14b   :  { %v1602_v19 = vpop.f32.mrf.mxu0  ;;  %v1827_v33 = vpop.f32.mrf.mxu1 }
 0x14c   :  { %v4283_v19 = vld [vmem:[%s5602_s0 + $0x468] ss:$20 sps:$4 sm:$0xff]   ;;  %v4287_v33 = vld [vmem:[%s5602_s0 + $0x3f8] ss:$20 sps:$4 sm:$0xff]  }
 0x14d   :  { %v4991_v34 = vpop.f32.mrf.mxu0  ;;  %v1828_v37 = vpop.f32.mrf.mxu1 }
 0x14e   :  { %v5000_v42 = vadd.f32 %v1828_v37, %v4828_v31 }
 0x14f   :  { %v1605_v46 = vpop.f32.mrf.mxu0  ;;  %v1830_v49 = vpop.f32.mrf.mxu1 }
 0x151   :  { %v5008_v50 = vpop.f32.mrf.mxu0  ;;  %v1833_v57 = vpop.f32.mrf.mxu1  ;;  %2024 = vmatmul.mubr.bf16.gmra.mxu1 %v4273_v38  ;;  %3983 = vmatmul.mubr.bf16.gmra.mxu0 %v4277_v41  ;;  %v4291_v38 = vld [vmem:[%s5602_s0 + $0x420] ss:$20 sps:$4 sm:$0xff]  }
 0x152   :  { %v5011_v58 = vadd.f32 %v1833_v57, %v4844_v39  ;;  %2031 = vmatprep.mubr.bf16.mxu1 %v4280_v27  ;;  %3986 = vmatprep.mubr.bf16.mxu0 %v4281_v45  ;;  %v4285_v39 = vld [vmem:[%s5602_s0 + $0x46c] ss:$20 sps:$4 sm:$0xff]  }
 0x153   :  { %v1610_v31 = vpop.f32.mrf.mxu0  ;;  %v1835_v59 = vpop.f32.mrf.mxu1 }
 0x155   :  { %v5013_v60 = vpop.f32.mrf.mxu0  ;;  %v1836_v61 = vpop.f32.mrf.mxu1 }
 0x156   :  { %v5022_v7 = vadd.f32 %v1836_v61, %v4848_v43  ;;  %v4288_v61 = vld [vmem:[%s5602_s0 + $0x490] ss:$20 sps:$4 sm:$0xff]  }
 0x157   :  { %v1613_v10 = vpop.f32.mrf.mxu0  ;;  %v1838_v11 = vpop.f32.mrf.mxu1 }
 0x159   :  { %v5030_v14 = vpop.f32.mrf.mxu0  ;;  %v1841_v0 = vpop.f32.mrf.mxu1  ;;  %2032 = vmatmul.mubr.bf16.gmra.mxu1 %v4278_v62  ;;  %3987 = vmatmul.mubr.bf16.gmra.mxu0 %v4282_v3  ;;  %v4292_v62 = vld [vmem:[%s5602_s0 + $0x448] ss:$20 sps:$4 sm:$0xff]  }
 0x15a   :  { %v5033_v21 = vadd.f32 %v1841_v0, %v4864_v51  ;;  %2039 = vmatprep.mubr.bf16.mxu1 %v4285_v39  ;;  %3990 = vmatprep.mubr.bf16.mxu0 %v4286_v8  ;;  %v4290_v51 = vld [vmem:[%s5602_s0 + $0x494] ss:$20 sps:$4 sm:$0xff]   ;;  %v4296_v39 = vld [vmem:[%s5602_s0 + $0x470] ss:$20 sps:$4 sm:$0xff]  }
 0x15b   :  { %v1618_v43 = vpop.f32.mrf.mxu0  ;;  %v1843_v22 = vpop.f32.mrf.mxu1 }
 0x15d   :  { %v5035_v23 = vpop.f32.mrf.mxu0  ;;  %v1844_v25 = vpop.f32.mrf.mxu1 }
 0x15e   :  { %v5044_v37 = vadd.f32 %v1844_v25, %v4868_v55 }
 0x15f   :  { %v1621_v41 = vpop.f32.mrf.mxu0  ;;  %v1846_v27 = vpop.f32.mrf.mxu1 }
 0x160   :  { %v4301_v41 = vld [vmem:[%s5602_s0 + $0x4c0] ss:$20 sps:$4 sm:$0xff]  }
 0x161   :  { %v5052_v45 = vpop.f32.mrf.mxu0  ;;  %v1849_v46 = vpop.f32.mrf.mxu1  ;;  %2040 = vmatmul.mubr.bf16.gmra.mxu1 %v4283_v19  ;;  %3991 = vmatmul.mubr.bf16.gmra.mxu0 %v4287_v33  ;;  %v4293_v33 = vld [vmem:[%s5602_s0 + $0x4b8] ss:$20 sps:$4 sm:$0xff]  }
 0x162   :  { %v5055_v49 = vadd.f32 %v1849_v46, %v4884_v63  ;;  %2047 = vmatprep.mubr.bf16.mxu1 %v4290_v51  ;;  %3994 = vmatprep.mubr.bf16.mxu0 %v4291_v38  ;;  %v4295_v63 = vld [vmem:[%s5602_s0 + $0x4bc] ss:$20 sps:$4 sm:$0xff]   ;;  %v4297_v51 = vld [vmem:[%s5602_s0 + $0x498] ss:$20 sps:$4 sm:$0xff]  }
 0x163   :  { %v1626_v55 = vpop.f32.mrf.mxu0  ;;  %v1851_v57 = vpop.f32.mrf.mxu1 }
 0x165   :  { %v5057_v31 = vpop.f32.mrf.mxu0  ;;  %v1852_v59 = vpop.f32.mrf.mxu1 }
 0x166   :  { %v5066_v3 = vadd.f32 %v1852_v59, %v4888_v4 }
 0x167   :  { %v1629_v8 = vpop.f32.mrf.mxu0  ;;  %v1854_v10 = vpop.f32.mrf.mxu1 }
 0x168   :  { %v4302_v8 = vld [vmem:[%s5602_s0 + $0x4e8] ss:$20 sps:$4 sm:$0xff]  }
 0x169   :  { %v5074_v11 = vpop.f32.mrf.mxu0  ;;  %v1857_v0 = vpop.f32.mrf.mxu1  ;;  %2048 = vmatmul.mubr.bf16.gmra.mxu1 %v4288_v61  ;;  %3995 = vmatmul.mubr.bf16.gmra.mxu0 %v4292_v62 }
 0x16a   :  { %v5077_v43 = vadd.f32 %v1857_v0, %v4904_v12  ;;  %2055 = vmatprep.mubr.bf16.mxu1 %v4295_v63  ;;  %3998 = vmatprep.mubr.bf16.mxu0 %v4296_v39  ;;  %v4300_v12 = vld [vmem:[%s5602_s0 + $0x4e4] ss:$20 sps:$4 sm:$0xff]   ;;  %v4298_v39 = vld [vmem:[%s5602_s0 + $0x4e0] ss:$20 sps:$4 sm:$0xff]  }
 0x16b   :  { %v1634_v4 = vpop.f32.mrf.mxu0  ;;  %v1859_v22 = vpop.f32.mrf.mxu1 }
 0x16d   :  { %v5079_v25 = vpop.f32.mrf.mxu0  ;;  %v1860_v19 = vpop.f32.mrf.mxu1 }
 0x16e   :  { %v5088_v38 = vadd.f32 %v1860_v19, %v4908_v17 }
 0x16f   :  { %v1637_v27 = vpop.f32.mrf.mxu0  ;;  %v1862_v46 = vpop.f32.mrf.mxu1 }
 0x171   :  { %v5096_v55 = vpop.f32.mrf.mxu0  ;;  %v1865_v57 = vpop.f32.mrf.mxu1  ;;  %2056 = vmatmul.mubr.bf16.gmra.mxu1 %v4293_v33  ;;  %3999 = vmatmul.mubr.bf16.gmra.mxu0 %v4297_v51 }
 0x172   :  { %v5099_v59 = vadd.f32 %v1865_v57, %v4924_v29  ;;  %2063 = vmatprep.mubr.bf16.mxu1 %v4300_v12  ;;  %4002 = vmatprep.mubr.bf16.mxu0 %v4301_v41 }
 0x173   :  { %v1642_v17 = vpop.f32.mrf.mxu0  ;;  %v1867_v61 = vpop.f32.mrf.mxu1 }
 0x175   :  { %v5101_v62 = vpop.f32.mrf.mxu0  ;;  %v1868_v63 = vpop.f32.mrf.mxu1 }
 0x176   :  { %v5110_v10 = vadd.f32 %v1868_v63, %v4928_v35 }
 0x177   :  { %v1645_v29 = vpop.f32.mrf.mxu0  ;;  %v1870_v0 = vpop.f32.mrf.mxu1 }
 0x179   :  { %v5112_v4 = vpop.f32.mrf.mxu0  ;;  %v1873_v22 = vpop.f32.mrf.mxu1  ;;  %2064 = vmatmul.mubr.bf16.gmra.mxu1 %v4298_v39  ;;  %4003 = vmatmul.mubr.bf16.gmra.mxu0 %v4302_v8 }
 0x17a   :  { %v5115_v19 = vadd.f32 %v1873_v22, %v4944_v47 }
 0x17b   :  { %v1650_v33 = vpop.f32.mrf.mxu0  ;;  %v1875_v51 = vpop.f32.mrf.mxu1 }
 0x17d   :  { %v5117_v12 = vpop.f32.mrf.mxu0  ;;  %v1876_v41 = vpop.f32.mrf.mxu1 }
 0x17e   :  { %v5120_v27 = vadd.f32 %v1876_v41, %v4948_v53 }
 0x17f   :  { %v1653_v35 = vpop.f32.mrf.mxu0  ;;  %v1878_v46 = vpop.f32.mrf.mxu1 }
 0x181   :  { %v5122_v57 = vpop.f32.mrf.mxu0  ;;  %v1881_v17 = vpop.f32.mrf.mxu1 }
 0x182   :  { %v5125_v61 = vadd.f32 %v1881_v17, %v4964_v2 }
 0x183   :  { %v1658_v63 = vpop.f32.mrf.mxu0  ;;  %v1883_v39 = vpop.f32.mrf.mxu1 }
 0x185   :  { %v5127_v47 = vpop.f32.mrf.mxu0  ;;  %v1884_v8 = vpop.f32.mrf.mxu1 }
 0x186   :  { %v5130_v29 = vadd.f32 %v1884_v8, %v4969_v9 }
 0x187   :  { %v1661_v0 = vpop.f32.mrf.mxu0  ;;  %v1886_v22 = vpop.f32.mrf.mxu1 }
 0x189   :  { %v5132_v53 = vpop.f32.mrf.mxu0  ;;  %v1889_v33 = vpop.f32.mrf.mxu1 }
 0x18a   :  { %v5135_v51 = vadd.f32 %v1889_v33, %v4986_v24 }
 0x18b   :  { %v1666_v41 = vpop.f32.mrf.mxu0  ;;  %v1891_v35 = vpop.f32.mrf.mxu1 }
 0x18d   :  { %v5137_v2 = vpop.f32.mrf.mxu0  ;;  %v1892_v46 = vpop.f32.mrf.mxu1 }
 0x18e   :  { %v5140_v17 = vadd.f32 %v1892_v46, %v4991_v34 }
 0x18f   :  { %v1669_v63 = vpop.f32.mrf.mxu0  ;;  %v1894_v39 = vpop.f32.mrf.mxu1 }
 0x191   :  { %v5142_v9 = vpop.f32.mrf.mxu0  ;;  %v1897_v8 = vpop.f32.mrf.mxu1 }
 0x192   :  { %v5145_v0 = vadd.f32 %v1897_v8, %v5008_v50 }
 0x193   :  { %v1674_v22 = vpop.f32.mrf.mxu0  ;;  %v1899_v36 = vpop.f32.mrf.mxu1 }
 0x195   :  { %v5147_v24 = vpop.f32.mrf.mxu0  ;;  %v1900_v33 = vpop.f32.mrf.mxu1 }
 0x196   :  { %v5150_v41 = vadd.f32 %v1900_v33, %v5013_v60 }
 0x197   :  { %v1677_v35 = vpop.f32.mrf.mxu0  ;;  %v1902_v54 = vpop.f32.mrf.mxu1 }
 0x199   :  { %v5152_v34 = vpop.f32.mrf.mxu0  ;;  %v1905_v46 = vpop.f32.mrf.mxu1 }
 0x19a   :  { %v5155_v63 = vadd.f32 %v1905_v46, %v5030_v14 }
 0x19b   :  { %v1682_v39 = vpop.f32.mrf.mxu0  ;;  %v1907_v48 = vpop.f32.mrf.mxu1 }
 0x19d   :  { %v5157_v50 = vpop.f32.mrf.mxu0  ;;  %v1908_v8 = vpop.f32.mrf.mxu1 }
 0x19e   :  { %v5160_v36 = vadd.f32 %v1908_v8, %v5035_v23 }
 0x19f   :  { %v1685_v22 = vpop.f32.mrf.mxu0  ;;  %v1910_v30 = vpop.f32.mrf.mxu1 }
 0x1a1   :  { %v5162_v60 = vpop.f32.mrf.mxu0  ;;  %v1913_v33 = vpop.f32.mrf.mxu1 }
 0x1a2   :  { %5622 = vst [vmem:[#allocation19_spill] sm:$0xff] %v5162_v60  ;;  %v5165_v54 = vadd.f32 %v1913_v33, %v5052_v45 }
 0x1a3   :  { %v1690_v35 = vpop.f32.mrf.mxu0  ;;  %v1915_v5 = vpop.f32.mrf.mxu1 }
 0x1a5   :  { %v5167_v14 = vpop.f32.mrf.mxu0  ;;  %v1916_v46 = vpop.f32.mrf.mxu1 }
 0x1a6   :  { %5623 = vst [vmem:[#allocation20_spill] sm:$0xff] %v5167_v14  ;;  %v5170_v48 = vadd.f32 %v1916_v46, %v5057_v31 }
 0x1a7   :  { %v1693_v39 = vpop.f32.mrf.mxu0  ;;  %v1918_v18 = vpop.f32.mrf.mxu1 }
 0x1a9   :  { %v5172_v23 = vpop.f32.mrf.mxu0  ;;  %v1921_v8 = vpop.f32.mrf.mxu1 }
 0x1aa   :  { %v5175_v30 = vadd.f32 %v1921_v8, %v5074_v11 }
 0x1ab   :  { %v1698_v22 = vpop.f32.mrf.mxu0  ;;  %v1923_v1 = vpop.f32.mrf.mxu1 }
 0x1ad   :  { %v5177_v45 = vpop.f32.mrf.mxu0  ;;  %v1924_v33 = vpop.f32.mrf.mxu1 }
 0x1ae   :  { %5624 = vst [vmem:[#allocation21_spill] sm:$0xff] %v5177_v45  ;;  %v5180_v5 = vadd.f32 %v1924_v33, %v5079_v25 }
 0x1af   :  { %v1701_v35 = vpop.f32.mrf.mxu0  ;;  %v1926_v13 = vpop.f32.mrf.mxu1 }
 0x1b1   :  { %v5182_v31 = vpop.f32.mrf.mxu0  ;;  %v1929_v46 = vpop.f32.mrf.mxu1 }
 0x1b2   :  { %5625 = vst [vmem:[#allocation22_spill] sm:$0xff] %v5182_v31  ;;  %v5185_v18 = vadd.f32 %v1929_v46, %v5096_v55 }
 0x1b3   :  { %v1706_v39 = vpop.f32.mrf.mxu0  ;;  %v1931_v44 = vpop.f32.mrf.mxu1 }
 0x1b5   :  { %v5187_v11 = vpop.f32.mrf.mxu0  ;;  %v1932_v8 = vpop.f32.mrf.mxu1 }
 0x1b6   :  { %5626 = vst [vmem:[#allocation23_spill] sm:$0xff] %v5187_v11  ;;  %v5190_v1 = vadd.f32 %v1932_v8, %v5101_v62  ;;  %v3824_v62 = vld [vmem:[%s5604_s3 + $0x8] sm:$0xff]   ;;  %v3537_v8 = vld [vmem:[%s5604_s3] sm:$0xff]  }
 0x1b7   :  { %v1709_v22 = vpop.f32.mrf.mxu0  ;;  %v1934_v56 = vpop.f32.mrf.mxu1  ;;  %v3538_v32 = vunpack.c.l.bf16 %v3537_v8 }
 0x1b8   :  { %v5204_v56 = vld [vmem:[%s5603_s2] ss:$0 sm:$0xff] }
 0x1b9   :  { %v5192_v25 = vpop.f32.mrf.mxu0  ;;  %v1937_v33 = vpop.f32.mrf.mxu1 }
 0x1ba   :  { %5627 = vst [vmem:[#allocation24_spill] sm:$0xff] %v5192_v25  ;;  %v5195_v13 = vadd.f32 %v1937_v33, %v5112_v4  ;;  %v3539_v25 = vunpack.c.h.bf16 %v3537_v8 }
 0x1bb   :  { %v1714_v35 = vpop.f32.mrf.mxu0  ;;  %v1939_v40 = vpop.f32.mrf.mxu1 }
 0x1bd   :  { %v5197_v55 = vpop.f32.mrf.mxu0  ;;  %v5199_v46 = vpop.f32.mrf.mxu1 }
 0x1be   :  { %5628 = vst [vmem:[#allocation25_spill] sm:$0xff] %v5197_v55 }
 0x1bf   :  { %v1717_v44 = vpop.f32.mrf.mxu0  ;;  %v1942_v39 = vpop.f32.mrf.mxu1 }
 0x1c0   :  { %v3542_v44 = vunpack.c.l.bf16 %v3824_v62 }
 0x1c1   :  { %v1945_v52 = vpop.f32.mrf.mxu1  ;;  %v3944_v20 = vpop.f32.mrf.mxu0 }
 0x1c2   :  { %v5210_v4 = vadd.f32 %v1945_v52, %v5122_v57  ;;  %v2115_v40 = vadd.f32 %v3944_v20, %v4989_v26  ;;  %v3543_v26 = vunpack.c.h.bf16 %v3824_v62 }
 0x1c3   :  { %v1947_v22 = vpop.f32.mrf.mxu1  ;;  %v2106_v33 = vpop.f32.mrf.mxu0 }
 0x1c4   :  { %v2565_v35 = vadd.f32 %v5204_v56, %v2115_v40  ;;  %v2107_v39 = vadd.f32 %v2106_v33, %v4967_v6 }
 0x1c5   :  { %v1948_v16 = vpop.f32.mrf.mxu1  ;;  %v3945_v28 = vpop.f32.mrf.mxu0 }
 0x1c6   :  { %v2563_v11 = vadd.f32 %v5204_v56, %v2107_v39  ;;  %v5220_v52 = vadd.f32 %v1948_v16, %v5127_v47  ;;  %v2118_v20 = vadd.f32 %v3945_v28, %v5000_v42  ;;  %v2757_v22 = vadd.f32 %v3542_v44, %v2565_v35  ;;  %v3826_v16 = vld [vmem:[%s5604_s3 + $0x18] sm:$0xff]   ;;  %v3825_v28 = vld [vmem:[%s5604_s3 + $0x10] sm:$0xff]  }
 0x1c7   :  { %v1950_v57 = vpop.f32.mrf.mxu1  ;;  %v2109_v55 = vpop.f32.mrf.mxu0  ;;  %v3546_v35 = vunpack.c.l.bf16 %v3825_v28 }
 0x1c8   :  { %v2566_v31 = vadd.f32 %v5204_v56, %v2118_v20  ;;  %v2110_v40 = vadd.f32 %v2109_v55, %v4978_v15  ;;  %v2755_v14 = vadd.f32 %v3538_v32, %v2563_v11  ;;  %v2821_v55 = vmax.f32 %v2757_v22, 0.0 }
 0x1c9   :  { %v5225_v6 = vpop.f32.mrf.mxu1  ;;  %v3948_v33 = vpop.f32.mrf.mxu0  ;;  %v3550_v11 = vunpack.c.l.bf16 %v3826_v16 }
 0x1ca   :  { %v2758_v45 = vadd.f32 %v3543_v26, %v2566_v31  ;;  %v2564_v39 = vadd.f32 %v5204_v56, %v2110_v40  ;;  %v2131_v42 = vadd.f32 %v3948_v33, %v5033_v21  ;;  %v2819_v26 = vmax.f32 %v2755_v14, 0.0 }
 0x1cb   :  { %v1955_v47 = vpop.f32.mrf.mxu1  ;;  %v2122_v15 = vpop.f32.mrf.mxu0  ;;  %v3551_v33 = vunpack.c.h.bf16 %v3826_v16 }
 0x1cc   :  { %v2822_v62 = vmax.f32 %v2758_v45, 0.0  ;;  %v2756_v8 = vadd.f32 %v3539_v25, %v2564_v39  ;;  %v2123_v32 = vadd.f32 %v2122_v15, %v5011_v58  ;;  %v2569_v31 = vadd.f32 %v5204_v56, %v2131_v42 }
 0x1cd   :  { %v5237_v44 = vpop.f32.mrf.mxu1  ;;  %v3949_v20 = vpop.f32.mrf.mxu0  ;;  %v3547_v39 = vunpack.c.h.bf16 %v3825_v28 }
 0x1ce   :  { %v3672_v57 = vpack.c.bf16 %v2822_v62, %v2821_v55  ;;  %v2820_v40 = vmax.f32 %v2756_v8, 0.0  ;;  %v2567_v60 = vadd.f32 %v5204_v56, %v2123_v32  ;;  %v2134_v21 = vadd.f32 %v3949_v20, %v5044_v37  ;;  %v3827_v32 = vld [vmem:[%s5604_s3 + $0x20] sm:$0xff]  }
 0x1cf   :  { %v1958_v22 = vpop.f32.mrf.mxu1  ;;  %v2125_v45 = vpop.f32.mrf.mxu0  ;;  %v2761_v42 = vadd.f32 %v3550_v11, %v2569_v31 }
 0x1d0   :  { %3855 = vst [vmem:[%s5605_s4 + $0x8] sm:$0xff] %v3672_v57   ;;  %v3667_v58 = vpack.c.bf16 %v2820_v40, %v2819_v26  ;;  %v2126_v25 = vadd.f32 %v2125_v45, %v5022_v7  ;;  %v2570_v14 = vadd.f32 %v5204_v56, %v2134_v21  ;;  %v2759_v37 = vadd.f32 %v3546_v35, %v2567_v60  ;;  %v3828_v7 = vld [vmem:[%s5604_s3 + $0x28] sm:$0xff]  }
 0x1d1   :  { %v5246_v47 = vpop.f32.mrf.mxu1  ;;  %v3952_v15 = vpop.f32.mrf.mxu0  ;;  %v2825_v20 = vmax.f32 %v2761_v42, 0.0  ;;  %v3558_v26 = vunpack.c.l.bf16 %v3828_v7  ;;  %v3554_v22 = vunpack.c.l.bf16 %v3827_v32 }
 0x1d2   :  { %3668 = vst [vmem:[%s5605_s4] sm:$0xff] %v3667_v58   ;;  %v2568_v16 = vadd.f32 %v5204_v56, %v2126_v25  ;;  %v2147_v55 = vadd.f32 %v3952_v15, %v5077_v43  ;;  %v2762_v28 = vadd.f32 %v3551_v33, %v2570_v14  ;;  %v2823_v40 = vmax.f32 %v2759_v37, 0.0 }
 0x1d3   :  { %v1963_v62 = vpop.f32.mrf.mxu1  ;;  %v2138_v8 = vpop.f32.mrf.mxu0  ;;  %v3559_v25 = vunpack.c.h.bf16 %v3828_v7  ;;  %v3555_v15 = vunpack.c.h.bf16 %v3827_v32 }
 0x1d4   :  { %v2760_v31 = vadd.f32 %v3547_v39, %v2568_v16  ;;  %v2139_v11 = vadd.f32 %v2138_v8, %v5055_v49  ;;  %v2826_v60 = vmax.f32 %v2762_v28, 0.0  ;;  %v2573_v35 = vadd.f32 %v5204_v56, %v2147_v55  ;;  %v3830_v62 = vld [vmem:[%s5604_s3 + $0x38] sm:$0xff]  }
 0x1d5   :  { %v5261_v43 = vpop.f32.mrf.mxu1  ;;  %v3953_v57 = vpop.f32.mrf.mxu0 }
 0x1d6   :  { %v2824_v21 = vmax.f32 %v2760_v31, 0.0  ;;  %v2571_v33 = vadd.f32 %v5204_v56, %v2139_v11  ;;  %v3682_v45 = vpack.c.bf16 %v2826_v60, %v2825_v20  ;;  %v2150_v58 = vadd.f32 %v3953_v57, %v5088_v38  ;;  %v3829_v11 = vld [vmem:[%s5604_s3 + $0x30] sm:$0xff]  }
 0x1d7   :  { %v1966_v39 = vpop.f32.mrf.mxu1  ;;  %v2141_v14 = vpop.f32.mrf.mxu0  ;;  %v2765_v16 = vadd.f32 %v3558_v26, %v2573_v35 }
 0x1d8   :  { %v3677_v49 = vpack.c.bf16 %v2824_v21, %v2823_v40  ;;  %v2142_v42 = vadd.f32 %v2141_v14, %v5066_v3  ;;  %3857 = vst [vmem:[%s5605_s4 + $0x18] sm:$0xff] %v3682_v45   ;;  %v2574_v37 = vadd.f32 %v5204_v56, %v2150_v58  ;;  %v2763_v38 = vadd.f32 %v3554_v22, %v2571_v33 }
 0x1d9   :  { %v5270_v55 = vpop.f32.mrf.mxu1  ;;  %v3956_v28 = vpop.f32.mrf.mxu0  ;;  %v2829_v35 = vmax.f32 %v2765_v16, 0.0  ;;  %v3566_v40 = vunpack.c.l.bf16 %v3830_v62  ;;  %v3562_v58 = vunpack.c.l.bf16 %v3829_v11  ;;  %v3567_v14 = vunpack.c.h.bf16 %v3830_v62  ;;  %v3832_v62 = vld [vmem:[%s5604_s3 + $0x48] sm:$0xff]  }
 0x1da   :  { %3856 = vst [vmem:[%s5605_s4 + $0x10] sm:$0xff] %v3677_v49   ;;  %v2572_v7 = vadd.f32 %v5204_v56, %v2142_v42  ;;  %v2163_v3 = vadd.f32 %v3956_v28, %v5115_v19  ;;  %v2766_v8 = vadd.f32 %v3559_v25, %v2574_v37  ;;  %v2827_v33 = vmax.f32 %v2763_v38, 0.0 }
 0x1db   :  { %v1971_v32 = vpop.f32.mrf.mxu1  ;;  %v2154_v31 = vpop.f32.mrf.mxu0  ;;  %v3563_v16 = vunpack.c.h.bf16 %v3829_v11  ;;  %v3831_v11 = vld [vmem:[%s5604_s3 + $0x40] sm:$0xff]  }
 0x1dc   :  { %v2764_v20 = vadd.f32 %v3555_v15, %v2572_v7  ;;  %v2155_v60 = vadd.f32 %v2154_v31, %v5099_v59  ;;  %v2830_v26 = vmax.f32 %v2766_v8, 0.0  ;;  %v2577_v57 = vadd.f32 %v5204_v56, %v2163_v3 }
 0x1dd   :  { %v5285_v19 = vpop.f32.mrf.mxu1  ;;  %v3957_v21 = vpop.f32.mrf.mxu0 }
 0x1de   :  { %v2828_v22 = vmax.f32 %v2764_v20, 0.0  ;;  %v2575_v45 = vadd.f32 %v5204_v56, %v2155_v60  ;;  %v3692_v25 = vpack.c.bf16 %v2830_v26, %v2829_v35  ;;  %v2166_v39 = vadd.f32 %v3957_v21, %v5120_v27 }
 0x1df   :  { %v1974_v49 = vpop.f32.mrf.mxu1  ;;  %v2157_v42 = vpop.f32.mrf.mxu0  ;;  %v2769_v37 = vadd.f32 %v3566_v40, %v2577_v57  ;;  %v3574_v40 = vunpack.c.l.bf16 %v3832_v62 }
 0x1e0   :  { %v3687_v59 = vpack.c.bf16 %v2828_v22, %v2827_v33  ;;  %v2158_v15 = vadd.f32 %v2157_v42, %v5110_v10  ;;  %3859 = vst [vmem:[%s5605_s4 + $0x28] sm:$0xff] %v3692_v25   ;;  %v2578_v28 = vadd.f32 %v5204_v56, %v2166_v39  ;;  %v2767_v27 = vadd.f32 %v3562_v58, %v2575_v45 }
 0x1e1   :  { %v5294_v38 = vpop.f32.mrf.mxu1  ;;  %v3960_v7 = vpop.f32.mrf.mxu0  ;;  %v2833_v35 = vmax.f32 %v2769_v37, 0.0  ;;  %v3570_v58 = vunpack.c.l.bf16 %v3831_v11 }
 0x1e2   :  { %3858 = vst [vmem:[%s5605_s4 + $0x20] sm:$0xff] %v3687_v59   ;;  %v2576_v3 = vadd.f32 %v5204_v56, %v2158_v15  ;;  %v2179_v10 = vadd.f32 %v3960_v7, %v5135_v51  ;;  %v2770_v8 = vadd.f32 %v3567_v14, %v2578_v28  ;;  %v2831_v33 = vmax.f32 %v2767_v27, 0.0 }
 0x1e3   :  { %v1979_v32 = vpop.f32.mrf.mxu1  ;;  %v2170_v31 = vpop.f32.mrf.mxu0  ;;  %v3575_v14 = vunpack.c.h.bf16 %v3832_v62  ;;  %v3571_v15 = vunpack.c.h.bf16 %v3831_v11 }
 0x1e4   :  { %v2768_v20 = vadd.f32 %v3563_v16, %v2576_v3  ;;  %v2171_v60 = vadd.f32 %v2170_v31, %v5125_v61  ;;  %v2834_v26 = vmax.f32 %v2770_v8, 0.0  ;;  %v2581_v57 = vadd.f32 %v5204_v56, %v2179_v10  ;;  %v3834_v3 = vld [vmem:[%s5604_s3 + $0x58] sm:$0xff]   ;;  %v3833_v32 = vld [vmem:[%s5604_s3 + $0x50] sm:$0xff]  }
 0x1e5   :  { %v5309_v51 = vpop.f32.mrf.mxu1  ;;  %v3961_v21 = vpop.f32.mrf.mxu0 }
 0x1e6   :  { %v2832_v22 = vmax.f32 %v2768_v20, 0.0  ;;  %v2579_v45 = vadd.f32 %v5204_v56, %v2171_v60  ;;  %v3702_v25 = vpack.c.bf16 %v2834_v26, %v2833_v35  ;;  %v2182_v39 = vadd.f32 %v3961_v21, %v5140_v17 }
 0x1e7   :  { %v1982_v49 = vpop.f32.mrf.mxu1  ;;  %v2173_v42 = vpop.f32.mrf.mxu0  ;;  %v2773_v16 = vadd.f32 %v3574_v40, %v2581_v57  ;;  %v3582_v26 = vunpack.c.l.bf16 %v3834_v3 }
 0x1e8   :  { %v3697_v61 = vpack.c.bf16 %v2832_v22, %v2831_v33  ;;  %v2174_v59 = vadd.f32 %v2173_v42, %v5130_v29  ;;  %3861 = vst [vmem:[%s5605_s4 + $0x38] sm:$0xff] %v3702_v25   ;;  %v2582_v37 = vadd.f32 %v5204_v56, %v2182_v39  ;;  %v2771_v17 = vadd.f32 %v3570_v58, %v2579_v45 }
 0x1e9   :  { %v5318_v28 = vpop.f32.mrf.mxu1  ;;  %v3964_v7 = vpop.f32.mrf.mxu0  ;;  %v2837_v20 = vmax.f32 %v2773_v16, 0.0  ;;  %v3578_v22 = vunpack.c.l.bf16 %v3833_v32  ;;  %v3583_v25 = vunpack.c.h.bf16 %v3834_v3  ;;  %v3579_v42 = vunpack.c.h.bf16 %v3833_v32  ;;  %v3835_v3 = vld [vmem:[%s5604_s3 + $0x60] sm:$0xff]  }
 0x1ea   :  { %3860 = vst [vmem:[%s5605_s4 + $0x30] sm:$0xff] %v3697_v61   ;;  %v2580_v27 = vadd.f32 %v5204_v56, %v2174_v59  ;;  %v2195_v29 = vadd.f32 %v3964_v7, %v5155_v63  ;;  %v2774_v10 = vadd.f32 %v3575_v14, %v2582_v37  ;;  %v2835_v40 = vmax.f32 %v2771_v17, 0.0  ;;  %v3836_v7 = vld [vmem:[%s5604_s3 + $0x68] sm:$0xff]  }
 0x1eb   :  { %v1987_v62 = vpop.f32.mrf.mxu1  ;;  %v2186_v8 = vpop.f32.mrf.mxu0 }
 0x1ec   :  { %v2772_v31 = vadd.f32 %v3571_v15, %v2580_v27  ;;  %v2187_v11 = vadd.f32 %v2186_v8, %v5145_v0  ;;  %v2838_v60 = vmax.f32 %v2774_v10, 0.0  ;;  %v2585_v35 = vadd.f32 %v5204_v56, %v2195_v29 }
 0x1ed   :  { %v5333_v63 = vpop.f32.mrf.mxu1  ;;  %v3965_v57 = vpop.f32.mrf.mxu0 }
 0x1ee   :  { %v2836_v21 = vmax.f32 %v2772_v31, 0.0  ;;  %v2583_v33 = vadd.f32 %v5204_v56, %v2187_v11  ;;  %v3712_v45 = vpack.c.bf16 %v2838_v60, %v2837_v20  ;;  %v2198_v58 = vadd.f32 %v3965_v57, %v5160_v36 }
 0x1ef   :  { %v1990_v39 = vpop.f32.mrf.mxu1  ;;  %v2189_v14 = vpop.f32.mrf.mxu0  ;;  %v2777_v61 = vadd.f32 %v3582_v26, %v2585_v35  ;;  %v3590_v11 = vunpack.c.l.bf16 %v3836_v7  ;;  %v3586_v57 = vunpack.c.l.bf16 %v3835_v3 }
 0x1f0   :  { %v3707_v0 = vpack.c.bf16 %v2836_v21, %v2835_v40  ;;  %v2190_v49 = vadd.f32 %v2189_v14, %v5150_v41  ;;  %3863 = vst [vmem:[%s5605_s4 + $0x48] sm:$0xff] %v3712_v45   ;;  %v2586_v59 = vadd.f32 %v5204_v56, %v2198_v58  ;;  %v2775_v36 = vadd.f32 %v3578_v22, %v2583_v33 }
 0x1f1   :  { %v5342_v15 = vpop.f32.mrf.mxu1  ;;  %v3968_v16 = vpop.f32.mrf.mxu0  ;;  %v2841_v8 = vmax.f32 %v2777_v61, 0.0  ;;  %v3591_v33 = vunpack.c.h.bf16 %v3836_v7 }
 0x1f2   :  { %3862 = vst [vmem:[%s5605_s4 + $0x40] sm:$0xff] %v3707_v0   ;;  %v2584_v37 = vadd.f32 %v5204_v56, %v2190_v49  ;;  %v2211_v41 = vadd.f32 %v3968_v16, %v5175_v30  ;;  %v2778_v17 = vadd.f32 %v3583_v25, %v2586_v59  ;;  %v2839_v60 = vmax.f32 %v2775_v36, 0.0 }
 0x1f3   :  { %v1995_v27 = vpop.f32.mrf.mxu1  ;;  %v2202_v29 = vpop.f32.mrf.mxu0  ;;  %v3587_v25 = vunpack.c.h.bf16 %v3835_v3 }
 0x1f4   :  { %v2776_v10 = vadd.f32 %v3579_v42, %v2584_v37  ;;  %v2203_v62 = vadd.f32 %v2202_v29, %v5165_v54  ;;  %v2842_v32 = vmax.f32 %v2778_v17, 0.0  ;;  %v2589_v31 = vadd.f32 %v5204_v56, %v2211_v41  ;;  %v3837_v37 = vld [vmem:[%s5604_s3 + $0x70] sm:$0xff]  }
 0x1f5   :  { %v5357_v30 = vpop.f32.mrf.mxu1  ;;  %v3969_v20 = vpop.f32.mrf.mxu0  ;;  %v1941_v27 = vadd.f32 %v5199_v46, %v5117_v12  ;;  %v1954_v12 = vadd.f32 %v5225_v6, %v5132_v53 }
 0x1f6   :  { %v2840_v35 = vmax.f32 %v2776_v10, 0.0  ;;  %v2587_v26 = vadd.f32 %v5204_v56, %v2203_v62  ;;  %v3722_v40 = vpack.c.bf16 %v2842_v32, %v2841_v8  ;;  %v2214_v21 = vadd.f32 %v3969_v20, %v5180_v5  ;;  %v3838_v5 = vld [vmem:[%s5604_s3 + $0x78] sm:$0xff]  }
 0x1f7   :  { %v1998_v22 = vpop.f32.mrf.mxu1  ;;  %v2205_v45 = vpop.f32.mrf.mxu0  ;;  %v2781_v39 = vadd.f32 %v3590_v11, %v2589_v31  ;;  %v3598_v7 = vunpack.c.l.bf16 %v3838_v5  ;;  %v3594_v11 = vunpack.c.l.bf16 %v3837_v37 }
 0x1f8   :  { %v3717_v54 = vpack.c.bf16 %v2840_v35, %v2839_v60  ;;  %v2206_v58 = vadd.f32 %v2205_v45, %v5170_v48  ;;  %3865 = vst [vmem:[%s5605_s4 + $0x58] sm:$0xff] %v3722_v40   ;;  %v2590_v14 = vadd.f32 %v5204_v56, %v2214_v21  ;;  %v2779_v48 = vadd.f32 %v3586_v57, %v2587_v26 }
 0x1f9   :  { %v5366_v0 = vpop.f32.mrf.mxu1  ;;  %v3972_v49 = vpop.f32.mrf.mxu0  ;;  %v2845_v29 = vmax.f32 %v2781_v39, 0.0  ;;  %v3599_v35 = vunpack.c.h.bf16 %v3838_v5  ;;  %v3595_v40 = vunpack.c.h.bf16 %v3837_v37 }
 0x1fa   :  { %3864 = vst [vmem:[%s5605_s4 + $0x50] sm:$0xff] %v3717_v54   ;;  %v2588_v42 = vadd.f32 %v5204_v56, %v2206_v58  ;;  %v2227_v61 = vadd.f32 %v3972_v49, %v5195_v13  ;;  %v2782_v59 = vadd.f32 %v3591_v33, %v2590_v14  ;;  %v2843_v8 = vmax.f32 %v2779_v48, 0.0  ;;  %v3840_v54 = vld [vmem:[%s5604_s3 + $0x88] sm:$0xff]   ;;  %v3839_v14 = vld [vmem:[%s5604_s3 + $0x80] sm:$0xff]  }
 0x1fb   :  { %v2003_v16 = vpop.f32.mrf.mxu1  ;;  %v2218_v36 = vpop.f32.mrf.mxu0  ;;  %v3606_v5 = vunpack.c.l.bf16 %v3840_v54 }
 0x1fc   :  { %v2780_v41 = vadd.f32 %v3587_v25, %v2588_v42  ;;  %v2219_v17 = vadd.f32 %v2218_v36, %v5185_v18  ;;  %v2846_v3 = vmax.f32 %v2782_v59, 0.0  ;;  %v2593_v10 = vadd.f32 %v5204_v56, %v2227_v61 }
 0x1fd   :  { %v5383_v62 = vpop.f32.mrf.mxu1  ;;  %v3973_v13 = vpop.f32.mrf.mxu0  ;;  %v1957_v42 = vadd.f32 %v5237_v44, %v5137_v2  ;;  %v1970_v2 = vadd.f32 %v5270_v55, %v5152_v34  ;;  %v3841_v34 = vld [vmem:[%s5604_s3 + $0x90] sm:$0xff]  }
 0x1fe   :  { %v2844_v32 = vmax.f32 %v2780_v41, 0.0  ;;  %v2591_v31 = vadd.f32 %v5204_v56, %v2219_v17  ;;  %v3732_v20 = vpack.c.bf16 %v2846_v3, %v2845_v29  ;;  %v2230_v60 = vadd.f32 %v3973_v13, %v1941_v27 }
 0x1ff   :  { %v2006_v26 = vpop.f32.mrf.mxu1  ;;  %v2221_v18 = vpop.f32.mrf.mxu0  ;;  %v2785_v21 = vadd.f32 %v3598_v7, %v2593_v10  ;;  %v3602_v27 = vunpack.c.l.bf16 %v3839_v14  ;;  %v3607_v10 = vunpack.c.h.bf16 %v3840_v54  ;;  %v1973_v54 = vadd.f32 %v5285_v19, %v5157_v50 }
 0x200   :  { %v3727_v46 = vpack.c.bf16 %v2844_v32, %v2843_v8  ;;  %v2222_v57 = vadd.f32 %v2221_v18, %v5190_v1  ;;  %3867 = vst [vmem:[%s5605_s4 + $0x68] sm:$0xff] %v3732_v20   ;;  %v2594_v33 = vadd.f32 %v5204_v56, %v2230_v60  ;;  %v2783_v53 = vadd.f32 %v3594_v11, %v2591_v31 }
 0x201   :  { %v5393_v22 = vpop.f32.mrf.mxu1  ;;  %v3976_v45 = vpop.f32.mrf.mxu0  ;;  %v2849_v61 = vmax.f32 %v2785_v21, 0.0  ;;  %v3603_v32 = vunpack.c.h.bf16 %v3839_v14  ;;  %v1986_v50 = vadd.f32 %v5318_v28, %v5172_v23  ;;  %v3843_v23 = vld [vmem:[%s5604_s3 + $0xa0] sm:$0xff]  }
 0x202   :  { %3866 = vst [vmem:[%s5605_s4 + $0x60] sm:$0xff] %v3727_v46   ;;  %v2592_v1 = vadd.f32 %v5204_v56, %v2222_v57  ;;  %v2243_v6 = vadd.f32 %v3976_v45, %v1954_v12  ;;  %v2786_v58 = vadd.f32 %v3599_v35, %v2594_v33  ;;  %v2847_v41 = vmax.f32 %v2783_v53, 0.0  ;;  %v3842_v35 = vld [vmem:[%s5604_s3 + $0x98] sm:$0xff]   ;;  %v5629_v28 = vld [vmem:[#allocation19_spill] sm:$0xff] }
 0x203   :  { %v2011_v25 = vpop.f32.mrf.mxu1  ;;  %v2234_v39 = vpop.f32.mrf.mxu0  ;;  %v3614_v21 = vunpack.c.l.bf16 %v3842_v35  ;;  %v3610_v45 = vunpack.c.l.bf16 %v3841_v34 }
 0x204   :  { %v2784_v49 = vadd.f32 %v3595_v40, %v2592_v1  ;;  %v2235_v48 = vadd.f32 %v2234_v39, %v5210_v4  ;;  %v2850_v59 = vmax.f32 %v2786_v58, 0.0  ;;  %v2597_v16 = vadd.f32 %v5204_v56, %v2243_v6 }
 0x205   :  { %v5409_v36 = vpop.f32.mrf.mxu1  ;;  %v3977_v37 = vpop.f32.mrf.mxu0  ;;  %v1965_v58 = vadd.f32 %v5261_v43, %v5147_v24 }
 0x206   :  { %v2848_v7 = vmax.f32 %v2784_v49, 0.0  ;;  %v2595_v17 = vadd.f32 %v5204_v56, %v2235_v48  ;;  %v3742_v29 = vpack.c.bf16 %v2850_v59, %v2849_v61  ;;  %v2246_v3 = vadd.f32 %v3977_v37, %v1957_v42 }
 0x207   :  { %v2014_v13 = vpop.f32.mrf.mxu1  ;;  %v2237_v4 = vpop.f32.mrf.mxu0  ;;  %v2789_v31 = vadd.f32 %v3606_v5, %v2597_v16  ;;  %v3615_v48 = vunpack.c.h.bf16 %v3842_v35  ;;  %v3611_v16 = vunpack.c.h.bf16 %v3841_v34 }
 0x208   :  { %v3737_v44 = vpack.c.bf16 %v2848_v7, %v2847_v41  ;;  %v2238_v8 = vadd.f32 %v2237_v4, %v5220_v52  ;;  %3869 = vst [vmem:[%s5605_s4 + $0x78] sm:$0xff] %v3742_v29   ;;  %v2598_v11 = vadd.f32 %v5204_v56, %v2246_v3  ;;  %v1962_v52 = vadd.f32 %v5246_v47, %v5142_v9  ;;  %v3844_v7 = vld [vmem:[%s5604_s3 + $0xa8] sm:$0xff]  }
 0x209   :  { %v5419_v20 = vpop.f32.mrf.mxu1  ;;  %v3980_v60 = vpop.f32.mrf.mxu0  ;;  %v2787_v55 = vadd.f32 %v3602_v27, %v2595_v17  ;;  %v2853_v53 = vmax.f32 %v2789_v31, 0.0  ;;  %v1978_v17 = vadd.f32 %v5294_v38, %v5629_v28  ;;  %v5630_v31 = vld [vmem:[#allocation21_spill] sm:$0xff] }
 0x20a   :  { %3868 = vst [vmem:[%s5605_s4 + $0x70] sm:$0xff] %v3737_v44   ;;  %v2596_v26 = vadd.f32 %v5204_v56, %v2238_v8  ;;  %v2259_v18 = vadd.f32 %v3980_v60, %v1970_v2  ;;  %v2790_v12 = vadd.f32 %v3607_v10, %v2598_v11  ;;  %v3622_v44 = vunpack.c.l.bf16 %v3844_v7 }
 0x20b   :  { %v2019_v46 = vpop.f32.mrf.mxu1  ;;  %v2250_v57 = vpop.f32.mrf.mxu0  ;;  %v2851_v25 = vmax.f32 %v2787_v55, 0.0  ;;  %v1989_v11 = vadd.f32 %v5333_v63, %v5630_v31  ;;  %v5631_v55 = vld [vmem:[#allocation20_spill] sm:$0xff] }
 0x20c   :  { %v2788_v40 = vadd.f32 %v3603_v32, %v2596_v26  ;;  %v2251_v33 = vadd.f32 %v2250_v57, %v1962_v52  ;;  %v2854_v9 = vmax.f32 %v2790_v12, 0.0  ;;  %v2601_v47 = vadd.f32 %v5204_v56, %v2259_v18  ;;  %v5632_v63 = vld [vmem:[#allocation24_spill] sm:$0xff] }
 0x20d   :  { %v5436_v1 = vpop.f32.mrf.mxu1  ;;  %v3981_v6 = vpop.f32.mrf.mxu0  ;;  %v3618_v32 = vunpack.c.l.bf16 %v3843_v23  ;;  %v1981_v26 = vadd.f32 %v5309_v51, %v5631_v55 }
 0x20e   :  { %v2852_v39 = vmax.f32 %v2788_v40, 0.0  ;;  %v2599_v14 = vadd.f32 %v5204_v56, %v2251_v33  ;;  %v3752_v49 = vpack.c.bf16 %v2854_v9, %v2853_v53  ;;  %v2262_v5 = vadd.f32 %v3981_v6, %v1973_v54 }
 0x20f   :  { %v2022_v42 = vpop.f32.mrf.mxu1  ;;  %v2253_v61 = vpop.f32.mrf.mxu0  ;;  %v2793_v24 = vadd.f32 %v3614_v21, %v2601_v47  ;;  %v3623_v21 = vunpack.c.h.bf16 %v3844_v7  ;;  %v2002_v54 = vadd.f32 %v5366_v0, %v5632_v63  ;;  %v3619_v47 = vunpack.c.h.bf16 %v3843_v23  ;;  %v3845_v0 = vld [vmem:[%s5604_s3 + $0xb0] sm:$0xff]  }
 0x210   :  { %v3747_v19 = vpack.c.bf16 %v2852_v39, %v2851_v25  ;;  %v2254_v59 = vadd.f32 %v2253_v61, %v1965_v58  ;;  %3871 = vst [vmem:[%s5605_s4 + $0x88] sm:$0xff] %v3752_v49   ;;  %v2602_v43 = vadd.f32 %v5204_v56, %v2262_v5  ;;  %v2791_v27 = vadd.f32 %v3610_v45, %v2599_v14  ;;  %v3846_v39 = vld [vmem:[%s5604_s3 + $0xb8] sm:$0xff]  }
 0x211   :  { %v5447_v37 = vpop.f32.mrf.mxu1  ;;  %v3984_v41 = vpop.f32.mrf.mxu0  ;;  %v2857_v60 = vmax.f32 %v2793_v24, 0.0  ;;  %v5633_v14 = vld [vmem:[#allocation22_spill] sm:$0xff] }
 0x212   :  { %3870 = vst [vmem:[%s5605_s4 + $0x80] sm:$0xff] %v3747_v19   ;;  %v2600_v29 = vadd.f32 %v5204_v56, %v2254_v59  ;;  %v2275_v3 = vadd.f32 %v3984_v41, %v1986_v50  ;;  %v2794_v10 = vadd.f32 %v3615_v48, %v2602_v43  ;;  %v2855_v18 = vmax.f32 %v2791_v27, 0.0  ;;  %v5634_v41 = vld [vmem:[#allocation25_spill] sm:$0xff] }
 0x213   :  { %v2027_v13 = vpop.f32.mrf.mxu1  ;;  %v2266_v4 = vpop.f32.mrf.mxu0  ;;  %v1994_v49 = vadd.f32 %v5342_v15, %v5633_v14  ;;  %v3626_v43 = vunpack.c.l.bf16 %v3845_v0  ;;  %v2005_v7 = vadd.f32 %v5383_v62, %v5634_v41  ;;  %v5636_v62 = vld [vmem:[#allocation5_spill] sm:$0xff] }
 0x214   :  { %v2792_v2 = vadd.f32 %v3611_v16, %v2600_v29  ;;  %v2267_v8 = vadd.f32 %v2266_v4, %v1978_v17  ;;  %v2858_v38 = vmax.f32 %v2794_v10, 0.0  ;;  %v2605_v35 = vadd.f32 %v5204_v56, %v2275_v3  ;;  %v5635_v29 = vld [vmem:[#allocation23_spill] sm:$0xff] }
 0x215   :  { %v5464_v34 = vpop.f32.mrf.mxu1  ;;  %v3985_v52 = vpop.f32.mrf.mxu0  ;;  %v3630_v16 = vunpack.c.l.bf16 %v3846_v39  ;;  %v1997_v3 = vadd.f32 %v5357_v30, %v5635_v29  ;;  %v3850_v29 = vld [vmem:[%s5604_s3 + $0xd8] sm:$0xff]  }
 0x216   :  { %v2856_v12 = vmax.f32 %v2792_v2, 0.0  ;;  %v2603_v46 = vadd.f32 %v5204_v56, %v2267_v8  ;;  %v3762_v57 = vpack.c.bf16 %v2858_v38, %v2857_v60  ;;  %v2278_v40 = vadd.f32 %v3985_v52, %v1989_v11 }
 0x217   :  { %v2030_v33 = vpop.f32.mrf.mxu1  ;;  %v2269_v45 = vpop.f32.mrf.mxu0  ;;  %v2797_v51 = vadd.f32 %v3622_v44, %v2605_v35  ;;  %v3631_v8 = vunpack.c.h.bf16 %v3846_v39  ;;  %v2018_v11 = vadd.f32 %v5419_v20, %v5636_v62  ;;  %v3627_v35 = vunpack.c.h.bf16 %v3845_v0  ;;  %v3847_v20 = vld [vmem:[%s5604_s3 + $0xc0] sm:$0xff]  }
 0x218   :  { %v3757_v53 = vpack.c.bf16 %v2856_v12, %v2855_v18  ;;  %v2270_v9 = vadd.f32 %v2269_v45, %v1981_v26  ;;  %3873 = vst [vmem:[%s5605_s4 + $0x98] sm:$0xff] %v3762_v57   ;;  %v2606_v6 = vadd.f32 %v5204_v56, %v2278_v40  ;;  %v2795_v5 = vadd.f32 %v3618_v32, %v2603_v46  ;;  %v3848_v18 = vld [vmem:[%s5604_s3 + $0xc8] sm:$0xff]   ;;  %v5637_v12 = vld [vmem:[#allocation3_spill] sm:$0xff] }
 0x219   :  { %v5475_v58 = vpop.f32.mrf.mxu1  ;;  %v3988_v25 = vpop.f32.mrf.mxu0  ;;  %v2861_v23 = vmax.f32 %v2797_v51, 0.0  ;;  %v2010_v46 = vadd.f32 %v5393_v22, %v5637_v12  ;;  %v5638_v51 = vld [vmem:[#allocation6_spill] sm:$0xff]  ;;  %v3646_v62 = vunpack.c.l.bf16 %v3850_v29 }
 0x21a   :  { %3872 = vst [vmem:[%s5605_s4 + $0x90] sm:$0xff] %v3757_v53   ;;  %v2604_v48 = vadd.f32 %v5204_v56, %v2270_v9  ;;  %v2291_v42 = vadd.f32 %v3988_v25, %v2002_v54  ;;  %v2798_v61 = vadd.f32 %v3623_v21, %v2606_v6  ;;  %v2859_v10 = vmax.f32 %v2795_v5, 0.0 }
 0x21b   :  { %v2035_v50 = vpop.f32.mrf.mxu1  ;;  %v2282_v19 = vpop.f32.mrf.mxu0  ;;  %v3638_v53 = vunpack.c.l.bf16 %v3848_v18  ;;  %v2021_v6 = vadd.f32 %v5436_v1, %v5638_v51  ;;  %v5640_v1 = vld [vmem:[#allocation9_spill] sm:$0xff] }
 0x21c   :  { %v2796_v59 = vadd.f32 %v3619_v47, %v2604_v48  ;;  %v2283_v24 = vadd.f32 %v2282_v19, %v1994_v49  ;;  %v2862_v15 = vmax.f32 %v2798_v61, 0.0  ;;  %v2609_v28 = vadd.f32 %v5204_v56, %v2291_v42  ;;  %v5639_v49 = vld [vmem:[#allocation4_spill] sm:$0xff] }
 0x21d   :  { %v5492_v17 = vpop.f32.mrf.mxu1  ;;  %v3989_v27 = vpop.f32.mrf.mxu0  ;;  %v3634_v47 = vunpack.c.l.bf16 %v3847_v20  ;;  %v2013_v5 = vadd.f32 %v5409_v36, %v5639_v49  ;;  %v5645_v49 = vld [vmem:[#allocation11_spill] sm:$0xff] }
 0x21e   :  { %v2860_v13 = vmax.f32 %v2796_v59, 0.0  ;;  %v2607_v4 = vadd.f32 %v5204_v56, %v2283_v24  ;;  %v3772_v2 = vpack.c.bf16 %v2862_v15, %v2861_v23  ;;  %v2294_v44 = vadd.f32 %v3989_v27, %v2005_v7 }
 0x21f   :  { %v2038_v32 = vpop.f32.mrf.mxu1  ;;  %v2285_v31 = vpop.f32.mrf.mxu0  ;;  %v2801_v30 = vadd.f32 %v3630_v16, %v2609_v28  ;;  %v3639_v59 = vunpack.c.h.bf16 %v3848_v18  ;;  %v3635_v23 = vunpack.c.h.bf16 %v3847_v20  ;;  %v5643_v20 = vld [vmem:[#allocation8_spill] sm:$0xff] }
 0x220   :  { %v3767_v60 = vpack.c.bf16 %v2860_v13, %v2859_v10  ;;  %v2286_v38 = vadd.f32 %v2285_v31, %v1997_v3  ;;  %3875 = vst [vmem:[%s5605_s4 + $0xa8] sm:$0xff] %v3772_v2   ;;  %v2610_v52 = vadd.f32 %v5204_v56, %v2294_v44  ;;  %v2799_v57 = vadd.f32 %v3626_v43, %v2607_v4  ;;  %v5641_v3 = vld [vmem:[#allocation7_spill] sm:$0xff] }
 0x221   :  { %v5503_v55 = vpop.f32.mrf.mxu1  ;;  %v3992_v26 = vpop.f32.mrf.mxu0  ;;  %v2865_v25 = vmax.f32 %v2801_v30, 0.0  ;;  %v2034_v43 = vadd.f32 %v5475_v58, %v5640_v1  ;;  %v3849_v58 = vld [vmem:[%s5604_s3 + $0xd0] sm:$0xff]   ;;  %v2026_v10 = vadd.f32 %v5447_v37, %v5641_v3  ;;  %v2029_v12 = vadd.f32 %v5464_v34, %v5643_v20  ;;  %v3854_v20 = vld [vmem:[%s5604_s3 + $0xf8] sm:$0xff]  }
 0x222   :  { %3874 = vst [vmem:[%s5605_s4 + $0xa0] sm:$0xff] %v3767_v60   ;;  %v2608_v40 = vadd.f32 %v5204_v56, %v2286_v38  ;;  %v2307_v21 = vadd.f32 %v3992_v26, %v2018_v11  ;;  %v2802_v33 = vadd.f32 %v3631_v8, %v2610_v52  ;;  %v2863_v48 = vmax.f32 %v2799_v57, 0.0  ;;  %v5642_v38 = vld [vmem:[#allocation10_spill] sm:$0xff] }
 0x223   :  { %v2043_v45 = vpop.f32.mrf.mxu1  ;;  %v2298_v63 = vpop.f32.mrf.mxu0  ;;  %v3642_v60 = vunpack.c.l.bf16 %v3849_v58  ;;  %v3643_v51 = vunpack.c.h.bf16 %v3849_v58 }
 0x224   :  { %v2800_v54 = vadd.f32 %v3627_v35, %v2608_v40  ;;  %v2299_v9 = vadd.f32 %v2298_v63, %v2010_v46  ;;  %v2866_v22 = vmax.f32 %v2802_v33, 0.0  ;;  %v2613_v39 = vadd.f32 %v5204_v56, %v2307_v21 }
 0x225   :  { %v5520_v0 = vpop.f32.mrf.mxu1  ;;  %v3993_v14 = vpop.f32.mrf.mxu0  ;;  %v2037_v35 = vadd.f32 %v5492_v17, %v5642_v38  ;;  %v3647_v45 = vunpack.c.h.bf16 %v3850_v29  ;;  %v5644_v17 = vld [vmem:[#allocation13_spill] sm:$0xff] }
 0x226   :  { %v2864_v42 = vmax.f32 %v2800_v54, 0.0  ;;  %v2611_v61 = vadd.f32 %v5204_v56, %v2299_v9  ;;  %v3782_v50 = vpack.c.bf16 %v2866_v22, %v2865_v25  ;;  %v2310_v19 = vadd.f32 %v3993_v14, %v2021_v6  ;;  %v3851_v14 = vld [vmem:[%s5604_s3 + $0xe0] sm:$0xff]  }
 0x227   :  { %v2046_v16 = vpop.f32.mrf.mxu1  ;;  %v2301_v24 = vpop.f32.mrf.mxu0  ;;  %v2805_v36 = vadd.f32 %v3638_v53, %v2613_v39  ;;  %v3852_v39 = vld [vmem:[%s5604_s3 + $0xe8] sm:$0xff]  }
 0x228   :  { %v3777_v41 = vpack.c.bf16 %v2864_v42, %v2863_v48  ;;  %v2302_v7 = vadd.f32 %v2301_v24, %v2013_v5  ;;  %3877 = vst [vmem:[%s5605_s4 + $0xb8] sm:$0xff] %v3782_v50   ;;  %v2614_v15 = vadd.f32 %v5204_v56, %v2310_v19  ;;  %v2803_v13 = vadd.f32 %v3634_v47, %v2611_v61 }
 0x229   :  { %v2049_v28 = vpop.f32.mrf.mxu1  ;;  %v3996_v27 = vpop.f32.mrf.mxu0  ;;  %v2869_v30 = vmax.f32 %v2805_v36, 0.0  ;;  %v2042_v5 = vadd.f32 %v5503_v55, %v5645_v49  ;;  %v3654_v24 = vunpack.c.l.bf16 %v3852_v39 }
 0x22a   :  { %3876 = vst [vmem:[%s5605_s4 + $0xb0] sm:$0xff] %v3777_v41   ;;  %v2612_v4 = vadd.f32 %v5204_v56, %v2302_v7  ;;  %v2323_v2 = vadd.f32 %v3996_v27, %v2034_v43  ;;  %v2806_v44 = vadd.f32 %v3639_v59, %v2614_v15  ;;  %v2867_v46 = vmax.f32 %v2803_v13, 0.0  ;;  %v5646_v7 = vld [vmem:[#allocation14_spill] sm:$0xff]  ;;  %v5647_v27 = vld [vmem:[#allocation12_spill] sm:$0xff] }
 0x22b   :  { %v2051_v8 = vpop.f32.mrf.mxu1  ;;  %v2314_v32 = vpop.f32.mrf.mxu0  ;;  %v2050_v9 = vadd.f32 %v2049_v28, %v5644_v17  ;;  %v3650_v43 = vunpack.c.l.bf16 %v3851_v14  ;;  %v2045_v29 = vadd.f32 %v5520_v0, %v5647_v27 }
 0x22c   :  { %v2804_v31 = vadd.f32 %v3635_v23, %v2612_v4  ;;  %v2315_v11 = vadd.f32 %v2314_v32, %v2026_v10  ;;  %v2870_v37 = vmax.f32 %v2806_v44, 0.0  ;;  %v2617_v52 = vadd.f32 %v5204_v56, %v2323_v2  ;;  %v4303_v10 = vld [vmem:[%s5603_s2] ss:$0 sm:$0xff] }
 0x22d   :  { %v2052_v26 = vpop.f32.mrf.mxu1  ;;  %v3997_v18 = vpop.f32.mrf.mxu0  ;;  %v3655_v44 = vunpack.c.h.bf16 %v3852_v39 }
 0x22e   :  { %v2868_v57 = vmax.f32 %v2804_v31, 0.0  ;;  %v2615_v40 = vadd.f32 %v5204_v56, %v2315_v11  ;;  %v3792_v21 = vpack.c.bf16 %v2870_v37, %v2869_v30  ;;  %v2326_v33 = vadd.f32 %v3997_v18, %v2037_v35  ;;  %v5648_v35 = vld [vmem:[#allocation15_spill] sm:$0xff] }
 0x22f   :  { %v2054_v63 = vpop.f32.mrf.mxu1  ;;  %v2317_v54 = vpop.f32.mrf.mxu0  ;;  %v2809_v6 = vadd.f32 %v3646_v62, %v2617_v52  ;;  %v2053_v23 = vadd.f32 %v2052_v26, %v5646_v7  ;;  %v5649_v26 = vld [vmem:[#allocation17_spill] sm:$0xff] }
 0x230   :  { %v3787_v53 = vpack.c.bf16 %v2868_v57, %v2867_v46  ;;  %v2318_v47 = vadd.f32 %v2317_v54, %v2029_v12  ;;  %3879 = vst [vmem:[%s5605_s4 + $0xc8] sm:$0xff] %v3792_v21   ;;  %v2618_v34 = vadd.f32 %v5204_v56, %v2326_v33  ;;  %v2807_v48 = vadd.f32 %v3642_v60, %v2615_v40 }
 0x231   :  { %v2057_v25 = vpop.f32.mrf.mxu1  ;;  %v4000_v22 = vpop.f32.mrf.mxu0  ;;  %v2873_v41 = vmax.f32 %v2809_v6, 0.0 }
 0x232   :  { %3878 = vst [vmem:[%s5605_s4 + $0xc0] sm:$0xff] %v3787_v53   ;;  %v2616_v42 = vadd.f32 %v5204_v56, %v2318_v47  ;;  %v2339_v61 = vadd.f32 %v4000_v22, %v2050_v9  ;;  %v2810_v50 = vadd.f32 %v3647_v45, %v2618_v34  ;;  %v2871_v58 = vmax.f32 %v2807_v48, 0.0  ;;  %v3853_v45 = vld [vmem:[%s5604_s3 + $0xf0] sm:$0xff]   ;;  %v5650_v34 = vld [vmem:[#allocation18_spill] sm:$0xff]  ;;  %v5651_v22 = vld [vmem:[#allocation16_spill] sm:$0xff] }
 0x233   :  { %v2059_v19 = vpop.f32.mrf.mxu1  ;;  %v2330_v59 = vpop.f32.mrf.mxu0  ;;  %v2058_v30 = vadd.f32 %v2057_v25, %v5648_v35  ;;  %v3662_v53 = vunpack.c.l.bf16 %v3854_v20 }
 0x234   :  { %v2808_v16 = vadd.f32 %v3643_v51, %v2616_v42  ;;  %v2331_v1 = vadd.f32 %v2330_v59, %v2042_v5  ;;  %v2874_v36 = vmax.f32 %v2810_v50, 0.0  ;;  %v2621_v55 = vadd.f32 %v5204_v56, %v2339_v61 }
 0x235   :  { %v2060_v15 = vpop.f32.mrf.mxu1  ;;  %v4001_v28 = vpop.f32.mrf.mxu0  ;;  %v3651_v56 = vunpack.c.h.bf16 %v3851_v14  ;;  %v3658_v5 = vunpack.c.l.bf16 %v3853_v45  ;;  %v3663_v19 = vunpack.c.h.bf16 %v3854_v20 }
 0x236   :  { %v2872_v3 = vmax.f32 %v2808_v16, 0.0  ;;  %v2619_v13 = vadd.f32 %v4303_v10, %v2331_v1  ;;  %v3802_v4 = vpack.c.bf16 %v2874_v36, %v2873_v41  ;;  %v2342_v2 = vadd.f32 %v4001_v28, %v2053_v23 }
 0x237   :  { %v2062_v8 = vpop.f32.mrf.mxu1  ;;  %v2333_v32 = vpop.f32.mrf.mxu0  ;;  %v2813_v0 = vadd.f32 %v3654_v24, %v2621_v55  ;;  %v2061_v39 = vadd.f32 %v2060_v15, %v5651_v22  ;;  %v3659_v16 = vunpack.c.h.bf16 %v3853_v45 }
 0x238   :  { %v3797_v31 = vpack.c.bf16 %v2872_v3, %v2871_v58  ;;  %v2334_v62 = vadd.f32 %v2333_v32, %v2045_v29  ;;  %3881 = vst [vmem:[%s5605_s4 + $0xd8] sm:$0xff] %v3802_v4   ;;  %v2622_v11 = vadd.f32 %v4303_v10, %v2342_v2  ;;  %v2811_v37 = vadd.f32 %v3650_v43, %v2619_v13 }
 0x239   :  { %v2065_v60 = vpop.f32.mrf.mxu1  ;;  %v4004_v38 = vpop.f32.mrf.mxu0  ;;  %v2877_v63 = vmax.f32 %v2813_v0, 0.0 }
 0x23a   :  { %3880 = vst [vmem:[%s5605_s4 + $0xd0] sm:$0xff] %v3797_v31   ;;  %v2620_v52 = vadd.f32 %v4303_v10, %v2334_v62  ;;  %v2066_v18 = vadd.f32 %v2065_v60, %v5649_v26  ;;  %v2814_v12 = vadd.f32 %v3655_v44, %v2622_v11  ;;  %v2875_v47 = vmax.f32 %v2811_v37, 0.0 }
 0x23b   :  { %v2067_v46 = vpop.f32.mrf.mxu1  ;;  %v2346_v57 = vpop.f32.mrf.mxu0 }
 0x23c   :  { %v2812_v40 = vadd.f32 %v3651_v56, %v2620_v52  ;;  %v2355_v21 = vadd.f32 %v4004_v38, %v2066_v18  ;;  %v2347_v33 = vadd.f32 %v2346_v57, %v2058_v30  ;;  %v2878_v54 = vmax.f32 %v2814_v12, 0.0 }
 0x23d   :  { %v2068_v17 = vpop.f32.mrf.mxu1  ;;  %v4005_v9 = vpop.f32.mrf.mxu0 }
 0x23e   :  { %v2876_v51 = vmax.f32 %v2812_v40, 0.0  ;;  %v2625_v6 = vadd.f32 %v4303_v10, %v2355_v21  ;;  %v2069_v25 = vadd.f32 %v2068_v17, %v5650_v34  ;;  %v3812_v14 = vpack.c.bf16 %v2878_v54, %v2877_v63 }
 0x23f   :  { %v2623_v49 = vadd.f32 %v4303_v10, %v2347_v33  ;;  %v2070_v48 = vpop.f32.mrf.mxu1  ;;  %v2349_v42 = vpop.f32.mrf.mxu0 }
 0x240   :  { %v3807_v61 = vpack.c.bf16 %v2876_v51, %v2875_v47  ;;  %v2358_v50 = vadd.f32 %v4005_v9, %v2069_v25  ;;  %3883 = vst [vmem:[%s5605_s4 + $0xe8] sm:$0xff] %v3812_v14   ;;  %v2350_v59 = vadd.f32 %v2349_v42, %v2061_v39  ;;  %v2817_v24 = vadd.f32 %v3662_v53, %v2625_v6 }
 0x241   :  { %v2815_v43 = vadd.f32 %v3658_v5, %v2623_v49 }
 0x242   :  { %3882 = vst [vmem:[%s5605_s4 + $0xe0] sm:$0xff] %v3807_v61   ;;  %v2626_v1 = vadd.f32 %v4303_v10, %v2358_v50  ;;  %v2624_v41 = vadd.f32 %v4303_v10, %v2350_v59  ;;  %v2881_v36 = vmax.f32 %v2817_v24, 0.0 }
 0x243   :  { %v2879_v15 = vmax.f32 %v2815_v43, 0.0 }
 0x244   :  { %v2818_v7 = vadd.f32 %v3663_v19, %v2626_v1  ;;  %v2816_v23 = vadd.f32 %v3659_v16, %v2624_v41 }
 0x246   :  { %v2882_v55 = vmax.f32 %v2818_v7, 0.0  ;;  %v2880_v28 = vmax.f32 %v2816_v23, 0.0 }
 0x248   :  { %v3822_v27 = vpack.c.bf16 %v2882_v55, %v2881_v36  ;;  %v3817_v29 = vpack.c.bf16 %v2880_v28, %v2879_v15 }
 0x24a   :  { %3885 = vst [vmem:[%s5605_s4 + $0xf8] sm:$0xff] %v3822_v27   ;;  %3884 = vst [vmem:[%s5605_s4 + $0xf0] sm:$0xff] %v3817_v29  }

// kernel: _lambda_.17
= control target key start
LH: loop header
LB: loop body
LE: loop exit
PB: predicated region body
PF: predicated region fallthrough
CT: control target
= control target key end

     0   :  { %s705_s1 = inlined_call_operand.vmem [shape: bf16[128,128], index: 1, kind: input, shape index: {}]   ;;  %s706_s0 = inlined_call_operand.vmem [shape: bf16[128,128], index: 0, kind: input, shape index: {}]   ;;  %s707_s2 = inlined_call_operand.vmem [shape: f32[1,128], index: 2, kind: input, shape index: {}]   ;;  %s708_s3 = inlined_call_operand.vmem [shape: bf16[128,128], index: 3, kind: output, shape index: {}]  }
   0x1   :  { %v594_v0 = vld [vmem:[%s705_s1 + $0x38] sm:$0xff]   ;;  %v595_v1 = vld [vmem:[%s705_s1 + $0x30] sm:$0xff]   ;;  %v596_v2 = vld [vmem:[%s705_s1 + $0x28] sm:$0xff]  }
   0x2   :  { %546 = vmatprep.subr.bf16.mxu0 %v594_v0  ;;  %578 = vmatprep.subr.bf16.mxu1 %v594_v0  ;;  %v597_v3 = vld [vmem:[%s705_s1 + $0x20] sm:$0xff]   ;;  %v598_v6 = vld [vmem:[%s705_s1 + $0x18] sm:$0xff]   ;;  %v599_v7 = vld [vmem:[%s705_s1 + $0x10] sm:$0xff]  }
   0x3   :  { %547 = vmatpush3.bf16.msra.mxu0 %v594_v0  ;;  %586 = vmatpush3.bf16.msra.mxu1 %v594_v0  ;;  %v602_v4 = vld [vmem:[%s706_s0] sm:$0xff]   ;;  %v600_v8 = vld [vmem:[%s705_s1 + $0x8] sm:$0xff]   ;;  %v606_v12 = vld [vmem:[%s706_s0 + $0x10] sm:$0xff]  }
   0x4   :  { %548 = vmatprep.subr.bf16.mxu0 %v595_v1  ;;  %579 = vmatprep.subr.bf16.mxu1 %v595_v1  ;;  %v603_v5 = vld [vmem:[%s706_s0 + $0x20] sm:$0xff]   ;;  %v604_v10 = vld [vmem:[%s706_s0 + $0x8] sm:$0xff]   ;;  %v607_v13 = vld [vmem:[%s706_s0 + $0x30] sm:$0xff]  }
   0x5   :  { %562 = vmatprep.mubr.bf16.mxu0 %v602_v4  ;;  %570 = vmatprep.mubr.bf16.mxu1 %v603_v5  ;;  %v601_v9 = vld [vmem:[%s705_s1] sm:$0xff]   ;;  %v605_v11 = vld [vmem:[%s706_s0 + $0x28] sm:$0xff]   ;;  %v608_v14 = vld [vmem:[%s706_s0 + $0x18] sm:$0xff]  }
   0x6   :  { %v609_v15 = vld [vmem:[%s706_s0 + $0x38] sm:$0xff]   ;;  %v450_v18 = vld [vmem:[%s707_s2] ss:$0 sm:$0xff] }
   0x7   :  { %549 = vmatpush3.bf16.msra.mxu0 %v595_v1  ;;  %587 = vmatpush3.bf16.msra.mxu1 %v595_v1 }
   0x8   :  { %550 = vmatprep.subr.bf16.mxu0 %v596_v2  ;;  %580 = vmatprep.subr.bf16.mxu1 %v596_v2 }
   0xb   :  { %551 = vmatpush3.bf16.msra.mxu0 %v596_v2  ;;  %588 = vmatpush3.bf16.msra.mxu1 %v596_v2 }
   0xc   :  { %552 = vmatprep.subr.bf16.mxu0 %v597_v3  ;;  %581 = vmatprep.subr.bf16.mxu1 %v597_v3 }
   0xf   :  { %553 = vmatpush3.bf16.msra.mxu0 %v597_v3  ;;  %589 = vmatpush3.bf16.msra.mxu1 %v597_v3 }
  0x10   :  { %554 = vmatprep.subr.bf16.mxu0 %v598_v6  ;;  %582 = vmatprep.subr.bf16.mxu1 %v598_v6 }
  0x13   :  { %555 = vmatpush3.bf16.msra.mxu0 %v598_v6  ;;  %590 = vmatpush3.bf16.msra.mxu1 %v598_v6 }
  0x14   :  { %556 = vmatprep.subr.bf16.mxu0 %v599_v7  ;;  %583 = vmatprep.subr.bf16.mxu1 %v599_v7 }
  0x17   :  { %557 = vmatpush3.bf16.msra.mxu0 %v599_v7  ;;  %591 = vmatpush3.bf16.msra.mxu1 %v599_v7 }
  0x18   :  { %558 = vmatprep.subr.bf16.mxu0 %v600_v8  ;;  %584 = vmatprep.subr.bf16.mxu1 %v600_v8 }
  0x1b   :  { %559 = vmatpush3.bf16.msra.mxu0 %v600_v8  ;;  %592 = vmatpush3.bf16.msra.mxu1 %v600_v8 }
  0x1c   :  { %560 = vmatprep.subr.bf16.mxu0 %v601_v9  ;;  %585 = vmatprep.subr.bf16.mxu1 %v601_v9 }
  0x1f   :  { %561 = vmatpush3.bf16.msra.mxu0 %v601_v9  ;;  %593 = vmatpush3.bf16.msra.mxu1 %v601_v9 }
  0x22   :  { %563 = vmatmul.mubr.bf16.vlgmr.msra.gmra.mxu0 %v604_v10  ;;  %571 = vmatmul.mubr.bf16.vlgmr.msra.gmra.mxu1 %v605_v11 }
  0x23   :  { %566 = vmatprep.mubr.bf16.mxu0 %v606_v12  ;;  %574 = vmatprep.mubr.bf16.mxu1 %v607_v13 }
  0x2a   :  { %567 = vmatmul.mubr.bf16.gmra.mxu0 %v608_v14  ;;  %575 = vmatmul.mubr.bf16.gmra.mxu1 %v609_v15 }
  0xe2   :  { %v564_v16 = vpop.f32.mrf.mxu0  ;;  %v572_v17 = vpop.f32.mrf.mxu1 }
  0xe3   :  { %v336_v23 = vadd.f32 %v564_v16, %v450_v18  ;;  %v344_v24 = vadd.f32 %v572_v17, %v450_v18 }
  0xe4   :  { %v213_v19 = vpop.f32.mrf.mxu0  ;;  %v245_v20 = vpop.f32.mrf.mxu1 }
  0xe5   :  { %v334_v27 = vadd.f32 %v450_v18, %v213_v19  ;;  %v342_v28 = vadd.f32 %v450_v18, %v245_v20 }
  0xe6   :  { %v565_v21 = vpop.f32.mrf.mxu0  ;;  %v573_v22 = vpop.f32.mrf.mxu1 }
  0xe7   :  { %v337_v25 = vadd.f32 %v565_v21, %v450_v18  ;;  %v345_v26 = vadd.f32 %v573_v22, %v450_v18 }
  0xe8   :  { %v216_v29 = vpop.f32.mrf.mxu0  ;;  %v248_v30 = vpop.f32.mrf.mxu1 }
  0xe9   :  { %v491_v31 = vpack.c.bf16 %v337_v25, %v336_v23  ;;  %v511_v32 = vpack.c.bf16 %v345_v26, %v344_v24  ;;  %v335_v33 = vadd.f32 %v450_v18, %v216_v29  ;;  %v343_v34 = vadd.f32 %v450_v18, %v248_v30 }
  0xea   :  { %v568_v35 = vpop.f32.mrf.mxu0  ;;  %v576_v36 = vpop.f32.mrf.mxu1 }
  0xeb   :  { %523 = vst [vmem:[%s708_s3 + $0x8] sm:$0xff] %v491_v31   ;;  %527 = vst [vmem:[%s708_s3 + $0x28] sm:$0xff] %v511_v32   ;;  %v486_v37 = vpack.c.bf16 %v335_v33, %v334_v27  ;;  %v506_v38 = vpack.c.bf16 %v343_v34, %v342_v28  ;;  %v340_v43 = vadd.f32 %v568_v35, %v450_v18 }
  0xec   :  { %v229_v39 = vpop.f32.mrf.mxu0  ;;  %v261_v40 = vpop.f32.mrf.mxu1  ;;  %v348_v44 = vadd.f32 %v576_v36, %v450_v18 }
  0xed   :  { %487 = vst [vmem:[%s708_s3] sm:$0xff] %v486_v37   ;;  %526 = vst [vmem:[%s708_s3 + $0x20] sm:$0xff] %v506_v38   ;;  %v338_v47 = vadd.f32 %v450_v18, %v229_v39  ;;  %v346_v48 = vadd.f32 %v450_v18, %v261_v40 }
  0xee   :  { %v569_v41 = vpop.f32.mrf.mxu0  ;;  %v577_v42 = vpop.f32.mrf.mxu1 }
  0xef   :  { %v341_v45 = vadd.f32 %v569_v41, %v450_v18  ;;  %v349_v46 = vadd.f32 %v577_v42, %v450_v18 }
  0xf0   :  { %v232_v49 = vpop.f32.mrf.mxu0  ;;  %v264_v50 = vpop.f32.mrf.mxu1 }
  0xf1   :  { %v501_v51 = vpack.c.bf16 %v341_v45, %v340_v43  ;;  %v521_v52 = vpack.c.bf16 %v349_v46, %v348_v44  ;;  %v339_v53 = vadd.f32 %v450_v18, %v232_v49  ;;  %v347_v54 = vadd.f32 %v450_v18, %v264_v50 }
  0xf3   :  { %525 = vst [vmem:[%s708_s3 + $0x18] sm:$0xff] %v501_v51   ;;  %529 = vst [vmem:[%s708_s3 + $0x38] sm:$0xff] %v521_v52   ;;  %v496_v55 = vpack.c.bf16 %v339_v53, %v338_v47  ;;  %v516_v56 = vpack.c.bf16 %v347_v54, %v346_v48 }
  0xf5   :  { %524 = vst [vmem:[%s708_s3 + $0x10] sm:$0xff] %v496_v55   ;;  %528 = vst [vmem:[%s708_s3 + $0x30] sm:$0xff] %v516_v56  }

// kernel: _lambda_.16
= control target key start
LH: loop header
LB: loop body
LE: loop exit
PB: predicated region body
PF: predicated region fallthrough
CT: control target
= control target key end

     0   :  { %s1869_s1 = inlined_call_operand.vmem [shape: bf16[640,128], index: 1, kind: input, shape index: {}]   ;;  %s1870_s0 = inlined_call_operand.vmem [shape: bf16[128,640], index: 0, kind: input, shape index: {}]   ;;  %s1871_s2 = inlined_call_operand.vmem [shape: f32[1,128], index: 2, kind: input, shape index: {}]   ;;  %s1872_s3 = inlined_call_operand.vmem [shape: bf16[128,128], index: 3, kind: output, shape index: {}]  }
   0x1   :  { %v1444_v0 = vld [vmem:[%s1869_s1 + $0x78] sm:$0xff]   ;;  %v1448_v4 = vld [vmem:[%s1869_s1 + $0x70] sm:$0xff]   ;;  %v1452_v8 = vld [vmem:[%s1869_s1 + $0x68] sm:$0xff]  }
   0x2   :  { %v1445_v1 = vld [vmem:[%s1869_s1 + $0xf8] sm:$0xff]   ;;  %1252 = vmatprep.subr.bf16.mxu0 %v1444_v0  ;;  %v1449_v5 = vld [vmem:[%s1869_s1 + $0xf0] sm:$0xff]   ;;  %v1453_v9 = vld [vmem:[%s1869_s1 + $0xe8] sm:$0xff]  }
   0x3   :  { %v1446_v2 = vld [vmem:[%s1869_s1 + $0x38] sm:$0xff]   ;;  %1316 = vmatprep.subr.bf16.mxu1 %v1445_v1  ;;  %v1450_v6 = vld [vmem:[%s1869_s1 + $0x30] sm:$0xff]   ;;  %v1454_v10 = vld [vmem:[%s1869_s1 + $0x28] sm:$0xff]  }
   0x4   :  { %v1447_v3 = vld [vmem:[%s1869_s1 + $0xb8] sm:$0xff]   ;;  %1253 = vmatpush3.bf16.msra.mxu0 %v1446_v2  ;;  %v1451_v7 = vld [vmem:[%s1869_s1 + $0xb0] sm:$0xff]   ;;  %v1455_v11 = vld [vmem:[%s1869_s1 + $0xa8] sm:$0xff]  }
   0x5   :  { %1317 = vmatpush3.bf16.msra.mxu1 %v1447_v3  ;;  %1254 = vmatprep.subr.bf16.mxu0 %v1448_v4  ;;  %v1456_v12 = vld [vmem:[%s1869_s1 + $0x60] sm:$0xff]   ;;  %v1460_v16 = vld [vmem:[%s1869_s1 + $0x58] sm:$0xff]   ;;  %v1464_v20 = vld [vmem:[%s1869_s1 + $0x50] sm:$0xff]  }
   0x6   :  { %1318 = vmatprep.subr.bf16.mxu1 %v1449_v5  ;;  %v1457_v13 = vld [vmem:[%s1869_s1 + $0xe0] sm:$0xff]   ;;  %v1461_v17 = vld [vmem:[%s1869_s1 + $0xd8] sm:$0xff]   ;;  %v1465_v21 = vld [vmem:[%s1869_s1 + $0xd0] sm:$0xff]  }
   0x7   :  { %v1458_v14 = vld [vmem:[%s1869_s1 + $0x20] sm:$0xff]   ;;  %v1462_v18 = vld [vmem:[%s1869_s1 + $0x18] sm:$0xff]   ;;  %v1466_v22 = vld [vmem:[%s1869_s1 + $0x10] sm:$0xff]  }
   0x8   :  { %1255 = vmatpush3.bf16.msra.mxu0 %v1450_v6  ;;  %v1459_v15 = vld [vmem:[%s1869_s1 + $0xa0] sm:$0xff]   ;;  %v1463_v19 = vld [vmem:[%s1869_s1 + $0x98] sm:$0xff]   ;;  %v1467_v23 = vld [vmem:[%s1869_s1 + $0x90] sm:$0xff]  }
   0x9   :  { %1319 = vmatpush3.bf16.msra.mxu1 %v1451_v7  ;;  %1256 = vmatprep.subr.bf16.mxu0 %v1452_v8  ;;  %v1468_v24 = vld [vmem:[%s1869_s1 + $0x48] sm:$0xff]   ;;  %v1472_v28 = vld [vmem:[%s1869_s1 + $0x40] sm:$0xff]   ;;  %v1482_v36 = vld [vmem:[%s1869_s1 + $0x138] sm:$0xff]  }
   0xa   :  { %1320 = vmatprep.subr.bf16.mxu1 %v1453_v9  ;;  %v1469_v25 = vld [vmem:[%s1869_s1 + $0xc8] sm:$0xff]   ;;  %v1473_v29 = vld [vmem:[%s1869_s1 + $0xc0] sm:$0xff]   ;;  %v1489_v39 = vld [vmem:[%s1869_s1 + $0x130] sm:$0xff]  }
   0xb   :  { %v1470_v26 = vld [vmem:[%s1869_s1 + $0x8] sm:$0xff]   ;;  %v1474_v30 = vld [vmem:[%s1869_s1] sm:$0xff]   ;;  %v1492_v43 = vld [vmem:[%s1870_s0 + $0x5c] ss:$20 sps:$4 sm:$0xff]  }
   0xc   :  { %1257 = vmatpush3.bf16.msra.mxu0 %v1454_v10  ;;  %v1471_v27 = vld [vmem:[%s1869_s1 + $0x88] sm:$0xff]   ;;  %v1475_v31 = vld [vmem:[%s1869_s1 + $0x80] sm:$0xff]   ;;  %v1497_v48 = vld [vmem:[%s1870_s0 + $0x7c] ss:$20 sps:$4 sm:$0xff]  }
   0xd   :  { %1321 = vmatpush3.bf16.msra.mxu1 %v1455_v11  ;;  %1258 = vmatprep.subr.bf16.mxu0 %v1456_v12  ;;  %v1476_v32 = vld [vmem:[%s1870_s0] ss:$20 sps:$4 sm:$0xff]   ;;  %v1478_v33 = vld [vmem:[%s1870_s0 + $0x4] ss:$20 sps:$4 sm:$0xff]   ;;  %v1479_v34 = vld [vmem:[%s1870_s0 + $0x8] ss:$20 sps:$4 sm:$0xff]  }
   0xe   :  { %1322 = vmatprep.subr.bf16.mxu1 %v1457_v13  ;;  %v1481_v35 = vld [vmem:[%s1870_s0 + $0xc] ss:$20 sps:$4 sm:$0xff]   ;;  %659 = vmatprep.mubr.bf16.mxu0 %v1478_v33  ;;  %v1485_v38 = vld [vmem:[%s1870_s0 + $0x34] ss:$20 sps:$4 sm:$0xff]   ;;  %v1488_v41 = vld [vmem:[%s1870_s0 + $0x30] ss:$20 sps:$4 sm:$0xff]  }
   0xf   :  { %756 = vmatprep.mubr.bf16.mxu1 %v1481_v35  ;;  %v1483_v37 = vld [vmem:[%s1870_s0 + $0x2c] ss:$20 sps:$4 sm:$0xff]   ;;  %v1487_v40 = vld [vmem:[%s1870_s0 + $0x28] ss:$20 sps:$4 sm:$0xff]   ;;  %v1494_v46 = vld [vmem:[%s1870_s0 + $0x50] ss:$20 sps:$4 sm:$0xff]  }
  0x10   :  { %1259 = vmatpush3.bf16.msra.mxu0 %v1458_v14  ;;  %v1490_v42 = vld [vmem:[%s1870_s0 + $0x54] ss:$20 sps:$4 sm:$0xff]   ;;  %v1503_v45 = vld [vmem:[%s1869_s1 + $0x120] sm:$0xff]   ;;  %v1495_v47 = vld [vmem:[%s1870_s0 + $0x58] ss:$20 sps:$4 sm:$0xff]  }
  0x11   :  { %1323 = vmatpush3.bf16.msra.mxu1 %v1459_v15  ;;  %1260 = vmatprep.subr.bf16.mxu0 %v1460_v16  ;;  %v1496_v44 = vld [vmem:[%s1869_s1 + $0x128] sm:$0xff]   ;;  %v1499_v49 = vld [vmem:[%s1870_s0 + $0x84] ss:$20 sps:$4 sm:$0xff]   ;;  %v1517_v51 = vld [vmem:[%s1869_s1 + $0x110] sm:$0xff]  }
  0x12   :  { %1324 = vmatprep.subr.bf16.mxu1 %v1461_v17  ;;  %v1510_v50 = vld [vmem:[%s1869_s1 + $0x118] sm:$0xff]   ;;  %v1502_v53 = vld [vmem:[%s1870_s0 + $0x80] ss:$20 sps:$4 sm:$0xff]   ;;  %v1524_v55 = vld [vmem:[%s1869_s1 + $0x108] sm:$0xff]  }
  0x13   :  { %v1501_v52 = vld [vmem:[%s1870_s0 + $0x78] ss:$20 sps:$4 sm:$0xff]   ;;  %v1531_v57 = vld [vmem:[%s1869_s1 + $0x100] sm:$0xff]   ;;  %v1509_v59 = vld [vmem:[%s1870_s0 + $0xa8] ss:$20 sps:$4 sm:$0xff]  }
  0x14   :  { %1261 = vmatpush3.bf16.msra.mxu0 %v1462_v18  ;;  %v1504_v54 = vld [vmem:[%s1870_s0 + $0xa4] ss:$20 sps:$4 sm:$0xff]   ;;  %v1506_v56 = vld [vmem:[%s1870_s0 + $0xac] ss:$20 sps:$4 sm:$0xff]   ;;  %v1513_v61 = vld [vmem:[%s1870_s0 + $0xd4] ss:$20 sps:$4 sm:$0xff]  }
  0x15   :  { %1325 = vmatpush3.bf16.msra.mxu1 %v1463_v19  ;;  %1262 = vmatprep.subr.bf16.mxu0 %v1464_v20  ;;  %v1508_v58 = vld [vmem:[%s1870_s0 + $0xa0] ss:$20 sps:$4 sm:$0xff]   ;;  %v1515_v62 = vld [vmem:[%s1870_s0 + $0xc8] ss:$20 sps:$4 sm:$0xff]   ;;  %v1516_v63 = vld [vmem:[%s1870_s0 + $0xd0] ss:$20 sps:$4 sm:$0xff]  }
  0x16   :  { %1326 = vmatprep.subr.bf16.mxu1 %v1465_v21  ;;  %v1511_v60 = vld [vmem:[%s1870_s0 + $0xcc] ss:$20 sps:$4 sm:$0xff]   ;;  %v1518_v0 = vld [vmem:[%s1870_s0 + $0xf4] ss:$20 sps:$4 sm:$0xff]   ;;  %v1520_v1 = vld [vmem:[%s1870_s0 + $0xfc] ss:$20 sps:$4 sm:$0xff]  }
  0x17   :  { %v1522_v2 = vld [vmem:[%s1870_s0 + $0xf0] ss:$20 sps:$4 sm:$0xff]   ;;  %v1523_v3 = vld [vmem:[%s1870_s0 + $0xf8] ss:$20 sps:$4 sm:$0xff]   ;;  %v1530_v7 = vld [vmem:[%s1870_s0 + $0x120] ss:$20 sps:$4 sm:$0xff]  }
  0x18   :  { %1263 = vmatpush3.bf16.msra.mxu0 %v1466_v22  ;;  %v1525_v4 = vld [vmem:[%s1870_s0 + $0x11c] ss:$20 sps:$4 sm:$0xff]   ;;  %v1527_v5 = vld [vmem:[%s1870_s0 + $0x124] ss:$20 sps:$4 sm:$0xff]   ;;  %v1536_v12 = vld [vmem:[%s1870_s0 + $0x60] ss:$20 sps:$4 sm:$0xff]  }
  0x19   :  { %1327 = vmatpush3.bf16.msra.mxu1 %v1467_v23  ;;  %1264 = vmatprep.subr.bf16.mxu0 %v1468_v24  ;;  %v1529_v6 = vld [vmem:[%s1870_s0 + $0x118] ss:$20 sps:$4 sm:$0xff]   ;;  %v1532_v8 = vld [vmem:[%s1870_s0 + $0x10] ss:$20 sps:$4 sm:$0xff]   ;;  %v1537_v13 = vld [vmem:[%s1870_s0 + $0x100] ss:$20 sps:$4 sm:$0xff]  }
  0x1a   :  { %1328 = vmatprep.subr.bf16.mxu1 %v1469_v25  ;;  %v1533_v9 = vld [vmem:[%s1870_s0 + $0xb0] ss:$20 sps:$4 sm:$0xff]   ;;  %v1534_v10 = vld [vmem:[%s1870_s0 + $0x38] ss:$20 sps:$4 sm:$0xff]   ;;  %v1538_v14 = vld [vmem:[%s1870_s0 + $0x88] ss:$20 sps:$4 sm:$0xff]  }
  0x1b   :  { %v1535_v11 = vld [vmem:[%s1870_s0 + $0xd8] ss:$20 sps:$4 sm:$0xff]   ;;  %v1539_v15 = vld [vmem:[%s1870_s0 + $0x128] ss:$20 sps:$4 sm:$0xff]  }
  0x1c   :  { %1265 = vmatpush3.bf16.msra.mxu0 %v1470_v26 }
  0x1d   :  { %1329 = vmatpush3.bf16.msra.mxu1 %v1471_v27  ;;  %1266 = vmatprep.subr.bf16.mxu0 %v1472_v28 }
  0x1e   :  { %1330 = vmatprep.subr.bf16.mxu1 %v1473_v29 }
  0x20   :  { %1267 = vmatpush3.bf16.msra.mxu0 %v1474_v30 }
  0x21   :  { %1331 = vmatpush3.bf16.msra.mxu1 %v1475_v31  ;;  %1396 = vmatprep.subr.bf16.mxu0 %v1482_v36 }
  0x22   :  { %1428 = vmatprep.subr.bf16.mxu1 %v1482_v36 }
  0x23   :  { %660 = vmatmul.mubr.bf16.vlgmr.msra.gmra.mxu0 %v1476_v32 }
  0x24   :  { %757 = vmatmul.mubr.bf16.vlgmr.msra.gmra.mxu1 %v1479_v34  ;;  %1397 = vmatpush3.bf16.msra.mxu0 %v1482_v36 }
  0x25   :  { %1436 = vmatpush3.bf16.msra.mxu1 %v1482_v36  ;;  %667 = vmatprep.mubr.bf16.mxu0 %v1483_v37 }
  0x26   :  { %764 = vmatprep.mubr.bf16.mxu1 %v1485_v38  ;;  %1398 = vmatprep.subr.bf16.mxu0 %v1489_v39 }
  0x27   :  { %1429 = vmatprep.subr.bf16.mxu1 %v1489_v39 }
  0x28   :  { %1399 = vmatpush3.bf16.msra.mxu0 %v1489_v39 }
  0x29   :  { %1437 = vmatpush3.bf16.msra.mxu1 %v1489_v39  ;;  %1400 = vmatprep.subr.bf16.mxu0 %v1496_v44 }
  0x2a   :  { %1430 = vmatprep.subr.bf16.mxu1 %v1496_v44 }
  0x2b   :  { %668 = vmatmul.mubr.bf16.gmra.mxu0 %v1487_v40 }
  0x2c   :  { %765 = vmatmul.mubr.bf16.gmra.mxu1 %v1488_v41  ;;  %675 = vmatprep.mubr.bf16.mxu0 %v1490_v42 }
  0x2d   :  { %772 = vmatprep.mubr.bf16.mxu1 %v1492_v43  ;;  %1401 = vmatpush3.bf16.msra.mxu0 %v1496_v44 }
  0x2e   :  { %1438 = vmatpush3.bf16.msra.mxu1 %v1496_v44  ;;  %1402 = vmatprep.subr.bf16.mxu0 %v1503_v45 }
  0x2f   :  { %1431 = vmatprep.subr.bf16.mxu1 %v1503_v45 }
  0x31   :  { %1403 = vmatpush3.bf16.msra.mxu0 %v1503_v45 }
  0x32   :  { %1439 = vmatpush3.bf16.msra.mxu1 %v1503_v45  ;;  %1404 = vmatprep.subr.bf16.mxu0 %v1510_v50 }
  0x33   :  { %676 = vmatmul.mubr.bf16.gmra.mxu0 %v1494_v46  ;;  %1432 = vmatprep.subr.bf16.mxu1 %v1510_v50 }
  0x34   :  { %773 = vmatmul.mubr.bf16.gmra.mxu1 %v1495_v47  ;;  %683 = vmatprep.mubr.bf16.mxu0 %v1497_v48 }
  0x35   :  { %780 = vmatprep.mubr.bf16.mxu1 %v1499_v49  ;;  %1405 = vmatpush3.bf16.msra.mxu0 %v1510_v50 }
  0x36   :  { %1440 = vmatpush3.bf16.msra.mxu1 %v1510_v50  ;;  %1406 = vmatprep.subr.bf16.mxu0 %v1517_v51 }
  0x37   :  { %1433 = vmatprep.subr.bf16.mxu1 %v1517_v51 }
  0x39   :  { %1407 = vmatpush3.bf16.msra.mxu0 %v1517_v51 }
  0x3a   :  { %1441 = vmatpush3.bf16.msra.mxu1 %v1517_v51  ;;  %1408 = vmatprep.subr.bf16.mxu0 %v1524_v55 }
  0x3b   :  { %684 = vmatmul.mubr.bf16.gmra.mxu0 %v1501_v52  ;;  %1434 = vmatprep.subr.bf16.mxu1 %v1524_v55 }
  0x3c   :  { %781 = vmatmul.mubr.bf16.gmra.mxu1 %v1502_v53  ;;  %691 = vmatprep.mubr.bf16.mxu0 %v1504_v54 }
  0x3d   :  { %788 = vmatprep.mubr.bf16.mxu1 %v1506_v56  ;;  %1409 = vmatpush3.bf16.msra.mxu0 %v1524_v55 }
  0x3e   :  { %1442 = vmatpush3.bf16.msra.mxu1 %v1524_v55  ;;  %1410 = vmatprep.subr.bf16.mxu0 %v1531_v57 }
  0x3f   :  { %1435 = vmatprep.subr.bf16.mxu1 %v1531_v57 }
  0x41   :  { %1411 = vmatpush3.bf16.msra.mxu0 %v1531_v57 }
  0x42   :  { %1443 = vmatpush3.bf16.msra.mxu1 %v1531_v57 }
  0x43   :  { %692 = vmatmul.mubr.bf16.gmra.mxu0 %v1508_v58 }
  0x44   :  { %789 = vmatmul.mubr.bf16.gmra.mxu1 %v1509_v59  ;;  %699 = vmatprep.mubr.bf16.mxu0 %v1511_v60 }
  0x45   :  { %796 = vmatprep.mubr.bf16.mxu1 %v1513_v61 }
  0x4b   :  { %700 = vmatmul.mubr.bf16.gmra.mxu0 %v1515_v62 }
  0x4c   :  { %797 = vmatmul.mubr.bf16.gmra.mxu1 %v1516_v63  ;;  %707 = vmatprep.mubr.bf16.mxu0 %v1518_v0 }
  0x4d   :  { %804 = vmatprep.mubr.bf16.mxu1 %v1520_v1 }
  0x53   :  { %708 = vmatmul.mubr.bf16.gmra.mxu0 %v1522_v2 }
  0x54   :  { %805 = vmatmul.mubr.bf16.gmra.mxu1 %v1523_v3  ;;  %715 = vmatprep.mubr.bf16.mxu0 %v1525_v4 }
  0x55   :  { %812 = vmatprep.mubr.bf16.mxu1 %v1527_v5 }
  0x5b   :  { %716 = vmatmul.mubr.bf16.gmra.mxu0 %v1529_v6 }
  0x5c   :  { %813 = vmatmul.mubr.bf16.gmra.mxu1 %v1530_v7  ;;  %1412 = vmatprep.mubr.bf16.mxu0 %v1532_v8 }
  0x5d   :  { %1420 = vmatprep.mubr.bf16.mxu1 %v1533_v9 }
  0x63   :  { %1413 = vmatmul.mubr.bf16.vlgmr.msra.gmra.mxu0 %v1534_v10 }
  0x64   :  { %1421 = vmatmul.mubr.bf16.vlgmr.msra.gmra.mxu1 %v1535_v11  ;;  %1416 = vmatprep.mubr.bf16.mxu0 %v1536_v12 }
  0x65   :  { %1424 = vmatprep.mubr.bf16.mxu1 %v1537_v13 }
  0x6b   :  { %1417 = vmatmul.mubr.bf16.gmra.mxu0 %v1538_v14 }
  0x6c   :  { %1425 = vmatmul.mubr.bf16.gmra.mxu1 %v1539_v15 }
  0xe3   :  { %v1268_v16 = vpop.f32.mrf.mxu0 }
  0xe4   :  { %v1332_v17 = vpop.f32.mrf.mxu1 }
  0xe5   :  { %v1269_v18 = vpop.f32.mrf.mxu0 }
  0xe6   :  { %v1270_v19 = vadd.f32 %v1269_v18, %v1268_v16  ;;  %v1333_v20 = vpop.f32.mrf.mxu1 }
  0xe7   :  { %v1334_v21 = vadd.f32 %v1333_v20, %v1332_v17  ;;  %v1271_v22 = vpop.f32.mrf.mxu0 }
  0xe8   :  { %v1335_v23 = vpop.f32.mrf.mxu1 }
  0xe9   :  { %v1272_v24 = vpop.f32.mrf.mxu0  ;;  %v1800_v25 = vadd.f32 %v1334_v21, %v1270_v19 }
  0xea   :  { %v1336_v26 = vpop.f32.mrf.mxu1  ;;  %v1273_v11 = vadd.f32 %v1272_v24, %v1271_v22 }
  0xeb   :  { %1873 = vst [vmem:[#allocation3_spill] sm:$0xff] %v1800_v25  ;;  %v1274_v27 = vpop.f32.mrf.mxu0  ;;  %v1337_v12 = vadd.f32 %v1336_v26, %v1335_v23 }
  0xec   :  { %v1338_v28 = vpop.f32.mrf.mxu1 }
  0xed   :  { %v1275_v29 = vpop.f32.mrf.mxu0  ;;  %v762_v22 = vadd.f32 %v1337_v12, %v1273_v11 }
  0xee   :  { %v1339_v30 = vpop.f32.mrf.mxu1  ;;  %v1276_v14 = vadd.f32 %v1275_v29, %v1274_v27 }
  0xef   :  { %v1277_v31 = vpop.f32.mrf.mxu0  ;;  %v1340_v15 = vadd.f32 %v1339_v30, %v1338_v28 }
  0xf0   :  { %v1341_v32 = vpop.f32.mrf.mxu1 }
  0xf1   :  { %v1278_v33 = vpop.f32.mrf.mxu0 }
  0xf2   :  { %v1342_v34 = vpop.f32.mrf.mxu1  ;;  %v1279_v16 = vadd.f32 %v1278_v33, %v1277_v31 }
  0xf3   :  { %v1280_v35 = vpop.f32.mrf.mxu0  ;;  %v1343_v17 = vadd.f32 %v1342_v34, %v1341_v32 }
  0xf4   :  { %v1344_v36 = vpop.f32.mrf.mxu1 }
  0xf5   :  { %v1281_v37 = vpop.f32.mrf.mxu0 }
  0xf6   :  { %v1345_v38 = vpop.f32.mrf.mxu1  ;;  %v1282_v20 = vadd.f32 %v1281_v37, %v1280_v35 }
  0xf7   :  { %v1283_v39 = vpop.f32.mrf.mxu0  ;;  %v1346_v21 = vadd.f32 %v1345_v38, %v1344_v36 }
  0xf8   :  { %v1802_v40 = vpop.f32.mrf.mxu1 }
  0xf9   :  { %1874 = vst [vmem:[#allocation4_spill] sm:$0xff] %v1802_v40  ;;  %v1284_v41 = vpop.f32.mrf.mxu0  ;;  %v775_v33 = vadd.f32 %v1346_v21, %v1282_v20 }
  0xfa   :  { %v1804_v42 = vpop.f32.mrf.mxu1  ;;  %v1814_v28 = vadd.f32 %v1284_v41, %v1283_v39  ;;  %v1821_v39 = vld [vmem:[%s1871_s2] ss:$0 sm:$0xff] }
  0xfb   :  { %1875 = vst [vmem:[#allocation5_spill] sm:$0xff] %v1804_v42  ;;  %v1286_v43 = vpop.f32.mrf.mxu0 }
  0xfc   :  { %v1350_v44 = vpop.f32.mrf.mxu1 }
  0xfd   :  { %v1287_v45 = vpop.f32.mrf.mxu0 }
  0xfe   :  { %v1351_v46 = vpop.f32.mrf.mxu1  ;;  %v1288_v24 = vadd.f32 %v1287_v45, %v1286_v43 }
  0xff   :  { %v1289_v47 = vpop.f32.mrf.mxu0  ;;  %v1352_v23 = vadd.f32 %v1351_v46, %v1350_v44 }
 0x100   :  { %v1353_v48 = vpop.f32.mrf.mxu1  ;;  %v1880_v44 = vld [vmem:[#allocation4_spill] sm:$0xff] }
 0x101   :  { %v1290_v49 = vpop.f32.mrf.mxu0 }
 0x102   :  { %v1354_v50 = vpop.f32.mrf.mxu1  ;;  %v1291_v30 = vadd.f32 %v1290_v49, %v1289_v47  ;;  %v1881_v45 = vld [vmem:[#allocation5_spill] sm:$0xff]  ;;  %v783_v49 = vadd.f32 %v1352_v23, %v1288_v24 }
 0x103   :  { %v1292_v51 = vpop.f32.mrf.mxu0  ;;  %v1355_v31 = vadd.f32 %v1354_v50, %v1353_v48  ;;  %v1349_v46 = vadd.f32 %v1881_v45, %v1880_v44 }
 0x104   :  { %v1356_v52 = vpop.f32.mrf.mxu1 }
 0x105   :  { %v1293_v53 = vpop.f32.mrf.mxu0 }
 0x106   :  { %v1357_v54 = vpop.f32.mrf.mxu1  ;;  %v1294_v26 = vadd.f32 %v1293_v53, %v1292_v51 }
 0x107   :  { %v1295_v55 = vpop.f32.mrf.mxu0  ;;  %v1358_v27 = vadd.f32 %v1357_v54, %v1356_v52  ;;  %v786_v54 = vadd.f32 %v1355_v31, %v1291_v30 }
 0x108   :  { %v1359_v56 = vpop.f32.mrf.mxu1 }
 0x109   :  { %v1296_v57 = vpop.f32.mrf.mxu0  ;;  %v791_v48 = vadd.f32 %v1358_v27, %v1294_v26 }
 0x10a   :  { %v1360_v58 = vpop.f32.mrf.mxu1  ;;  %v1297_v34 = vadd.f32 %v1296_v57, %v1295_v55 }
 0x10b   :  { %v1298_v59 = vpop.f32.mrf.mxu0 }
 0x10c   :  { %v1362_v60 = vpop.f32.mrf.mxu1 }
 0x10d   :  { %v1299_v61 = vpop.f32.mrf.mxu0 }
 0x10e   :  { %v1363_v62 = vpop.f32.mrf.mxu1  ;;  %v1300_v42 = vadd.f32 %v1299_v61, %v1298_v59  ;;  %v1361_v59 = vadd.f32 %v1360_v58, %v1359_v56 }
 0x10f   :  { %v1301_v63 = vpop.f32.mrf.mxu0 }
 0x110   :  { %v1365_v0 = vpop.f32.mrf.mxu1 }
 0x111   :  { %v1302_v1 = vpop.f32.mrf.mxu0 }
 0x112   :  { %v1366_v2 = vpop.f32.mrf.mxu1  ;;  %v1303_v35 = vadd.f32 %v1302_v1, %v1301_v63 }
 0x113   :  { %v1304_v3 = vpop.f32.mrf.mxu0  ;;  %v1367_v36 = vadd.f32 %v1366_v2, %v1365_v0 }
 0x114   :  { %v1368_v4 = vpop.f32.mrf.mxu1 }
 0x115   :  { %v1305_v5 = vpop.f32.mrf.mxu0  ;;  %v802_v63 = vadd.f32 %v1367_v36, %v1303_v35 }
 0x116   :  { %v1369_v6 = vpop.f32.mrf.mxu1 }
 0x117   :  { %v1806_v7 = vpop.f32.mrf.mxu0  ;;  %v1370_v61 = vadd.f32 %v1369_v6, %v1368_v4 }
 0x118   :  { %1876 = vst [vmem:[#allocation6_spill] sm:$0xff] %v1806_v7  ;;  %v1808_v8 = vpop.f32.mrf.mxu1  ;;  %v1364_v7 = vadd.f32 %v1363_v62, %v1362_v60  ;;  %v1306_v60 = vadd.f32 %v1305_v5, %v1304_v3  ;;  %v794_v3 = vadd.f32 %v1361_v59, %v1297_v34 }
 0x119   :  { %1877 = vst [vmem:[#allocation7_spill] sm:$0xff] %v1808_v8  ;;  %v1810_v9 = vpop.f32.mrf.mxu0 }
 0x11a   :  { %1878 = vst [vmem:[#allocation8_spill] sm:$0xff] %v1810_v9  ;;  %v1812_v10 = vpop.f32.mrf.mxu1  ;;  %v767_v9 = vadd.f32 %v1340_v15, %v1276_v14  ;;  %v799_v38 = vadd.f32 %v1364_v7, %v1300_v42  ;;  %v1882_v42 = vld [vmem:[#allocation3_spill] sm:$0xff]  ;;  %v807_v4 = vadd.f32 %v1370_v61, %v1306_v60 }
 0x11b   :  { %1879 = vst [vmem:[#allocation9_spill] sm:$0xff] %v1812_v10  ;;  %v1310_v13 = vpop.f32.mrf.mxu0  ;;  %v770_v10 = vadd.f32 %v1343_v17, %v1279_v16 }
 0x11c   :  { %v1374_v18 = vpop.f32.mrf.mxu1 }
 0x11d   :  { %v1311_v19 = vpop.f32.mrf.mxu0 }
 0x11e   :  { %v1375_v25 = vpop.f32.mrf.mxu1  ;;  %v1312_v50 = vadd.f32 %v1311_v19, %v1310_v13 }
 0x11f   :  { %v1313_v40 = vpop.f32.mrf.mxu0  ;;  %v1376_v51 = vadd.f32 %v1375_v25, %v1374_v18  ;;  %v1883_v5 = vld [vmem:[#allocation6_spill] sm:$0xff] }
 0x120   :  { %v1377_v8 = vpop.f32.mrf.mxu1 }
 0x121   :  { %v1314_v29 = vpop.f32.mrf.mxu0  ;;  %v1884_v6 = vld [vmem:[#allocation8_spill] sm:$0xff] }
 0x122   :  { %v1378_v32 = vpop.f32.mrf.mxu1  ;;  %v1315_v55 = vadd.f32 %v1314_v29, %v1313_v40  ;;  %v1309_v7 = vadd.f32 %v1884_v6, %v1883_v5  ;;  %v1886_v25 = vld [vmem:[#allocation9_spill] sm:$0xff] }
 0x123   :  { %v1414_v37 = vpop.f32.mrf.mxu0  ;;  %v1379_v56 = vadd.f32 %v1378_v32, %v1377_v8 }
 0x124   :  { %v864_v62 = vadd.f32 %v1414_v37, %v767_v9  ;;  %v1422_v43 = vpop.f32.mrf.mxu1  ;;  %v1885_v9 = vld [vmem:[#allocation7_spill] sm:$0xff] }
 0x125   :  { %v896_v41 = vadd.f32 %v1422_v43, %v799_v38  ;;  %v855_v47 = vpop.f32.mrf.mxu0  ;;  %v1373_v11 = vadd.f32 %v1886_v25, %v1885_v9  ;;  %v818_v21 = vadd.f32 %v1379_v56, %v1315_v55 }
 0x126   :  { %v856_v52 = vadd.f32 %v855_v47, %v1882_v42  ;;  %v887_v53 = vpop.f32.mrf.mxu1  ;;  %v978_v0 = vadd.f32 %v1821_v39, %v864_v62 }
 0x127   :  { %v888_v57 = vadd.f32 %v887_v53, %v791_v48  ;;  %v1415_v58 = vpop.f32.mrf.mxu0  ;;  %v986_v12 = vadd.f32 %v1821_v39, %v896_v41 }
 0x128   :  { %v867_v1 = vadd.f32 %v1415_v58, %v770_v10  ;;  %v1423_v2 = vpop.f32.mrf.mxu1  ;;  %v976_v8 = vadd.f32 %v1821_v39, %v856_v52  ;;  %v815_v10 = vadd.f32 %v1376_v51, %v1312_v50  ;;  %v994_v24 = vmax.f32 %v978_v0, 0.0 }
 0x129   :  { %v899_v13 = vadd.f32 %v1423_v2, %v802_v63  ;;  %v858_v40 = vpop.f32.mrf.mxu0  ;;  %v984_v17 = vadd.f32 %v1821_v39, %v888_v57  ;;  %v1002_v30 = vmax.f32 %v986_v12, 0.0  ;;  %v810_v52 = vadd.f32 %v1373_v11, %v1309_v7 }
 0x12a   :  { %v979_v14 = vadd.f32 %v1821_v39, %v867_v1  ;;  %v859_v15 = vadd.f32 %v858_v40, %v762_v22  ;;  %v890_v16 = vpop.f32.mrf.mxu1  ;;  %v992_v35 = vmax.f32 %v976_v8, 0.0 }
 0x12b   :  { %v987_v18 = vadd.f32 %v1821_v39, %v899_v13  ;;  %v891_v19 = vadd.f32 %v890_v16, %v794_v3  ;;  %v1418_v20 = vpop.f32.mrf.mxu0  ;;  %v1000_v60 = vmax.f32 %v984_v17, 0.0 }
 0x12c   :  { %v995_v23 = vmax.f32 %v979_v14, 0.0  ;;  %v977_v26 = vadd.f32 %v1821_v39, %v859_v15  ;;  %v880_v27 = vadd.f32 %v1418_v20, %v783_v49  ;;  %v1426_v29 = vpop.f32.mrf.mxu1  ;;  %v778_v49 = vadd.f32 %v1349_v46, %v1814_v28 }
 0x12d   :  { %v1003_v31 = vmax.f32 %v987_v18, 0.0  ;;  %v985_v32 = vadd.f32 %v1821_v39, %v891_v19  ;;  %v912_v22 = vadd.f32 %v1426_v29, %v815_v10  ;;  %v871_v34 = vpop.f32.mrf.mxu0 }
 0x12e   :  { %v1213_v36 = vpack.c.bf16 %v995_v23, %v994_v24  ;;  %v993_v37 = vmax.f32 %v977_v26, 0.0  ;;  %v872_v38 = vadd.f32 %v871_v34, %v775_v33  ;;  %v903_v59 = vpop.f32.mrf.mxu1  ;;  %v982_v41 = vadd.f32 %v1821_v39, %v880_v27 }
 0x12f   :  { %v1233_v61 = vpack.c.bf16 %v1003_v31, %v1002_v30  ;;  %v1001_v62 = vmax.f32 %v985_v32, 0.0  ;;  %v904_v43 = vadd.f32 %v903_v59, %v807_v4  ;;  %v1419_v44 = vpop.f32.mrf.mxu0  ;;  %v990_v50 = vadd.f32 %v1821_v39, %v912_v22 }
 0x130   :  { %1245 = vst [vmem:[%s1872_s3 + $0x8] sm:$0xff] %v1213_v36   ;;  %v1208_v45 = vpack.c.bf16 %v993_v37, %v992_v35  ;;  %v883_v47 = vadd.f32 %v1419_v44, %v786_v54  ;;  %v1427_v48 = vpop.f32.mrf.mxu1  ;;  %v980_v53 = vadd.f32 %v1821_v39, %v872_v38  ;;  %v998_v58 = vmax.f32 %v982_v41, 0.0 }
 0x131   :  { %1249 = vst [vmem:[%s1872_s3 + $0x28] sm:$0xff] %v1233_v61   ;;  %v1228_v33 = vpack.c.bf16 %v1001_v62, %v1000_v60  ;;  %v915_v51 = vadd.f32 %v1427_v48, %v818_v21  ;;  %v874_v42 = vpop.f32.mrf.mxu0  ;;  %v988_v46 = vadd.f32 %v1821_v39, %v904_v43  ;;  %v1006_v1 = vmax.f32 %v990_v50, 0.0 }
 0x132   :  { %1209 = vst [vmem:[%s1872_s3] sm:$0xff] %v1208_v45   ;;  %v983_v54 = vadd.f32 %v1821_v39, %v883_v47  ;;  %v875_v55 = vadd.f32 %v874_v42, %v778_v49  ;;  %v906_v28 = vpop.f32.mrf.mxu1  ;;  %v996_v4 = vmax.f32 %v980_v53, 0.0 }
 0x133   :  { %1248 = vst [vmem:[%s1872_s3 + $0x20] sm:$0xff] %v1228_v33   ;;  %v991_v56 = vadd.f32 %v1821_v39, %v915_v51  ;;  %v907_v57 = vadd.f32 %v906_v28, %v810_v52  ;;  %v1004_v7 = vmax.f32 %v988_v46, 0.0 }
 0x134   :  { %v999_v63 = vmax.f32 %v983_v54, 0.0  ;;  %v981_v0 = vadd.f32 %v1821_v39, %v875_v55 }
 0x135   :  { %v1007_v2 = vmax.f32 %v991_v56, 0.0  ;;  %v989_v3 = vadd.f32 %v1821_v39, %v907_v57 }
 0x136   :  { %v1223_v5 = vpack.c.bf16 %v999_v63, %v998_v58  ;;  %v997_v6 = vmax.f32 %v981_v0, 0.0 }
 0x137   :  { %v1243_v9 = vpack.c.bf16 %v1007_v2, %v1006_v1  ;;  %v1005_v25 = vmax.f32 %v989_v3, 0.0 }
 0x138   :  { %1247 = vst [vmem:[%s1872_s3 + $0x18] sm:$0xff] %v1223_v5   ;;  %v1218_v11 = vpack.c.bf16 %v997_v6, %v996_v4 }
 0x139   :  { %1251 = vst [vmem:[%s1872_s3 + $0x38] sm:$0xff] %v1243_v9   ;;  %v1238_v12 = vpack.c.bf16 %v1005_v25, %v1004_v7 }
 0x13a   :  { %1246 = vst [vmem:[%s1872_s3 + $0x10] sm:$0xff] %v1218_v11  }
 0x13b   :  { %1250 = vst [vmem:[%s1872_s3 + $0x30] sm:$0xff] %v1238_v12  }

// kernel: _lambda_.20
= control target key start
LH: loop header
LB: loop body
LE: loop exit
PB: predicated region body
PF: predicated region fallthrough
CT: control target
= control target key end

     0   :  { %v348_v1 = vmov 0   ;;  %v229_v19 = vlaneseq  ;;  %s438_s1 = inlined_call_operand.vmem [shape: bf16[128,256], index: 1, kind: input, shape index: {}]   ;;  %s439_s0 = inlined_call_operand.vmem [shape: bf16[32,128], index: 0, kind: input, shape index: {}]   ;;  %s440_s2 = inlined_call_operand.vmem [shape: f32[1,256], index: 2, kind: input, shape index: {}]   ;;  %s441_s3 = inlined_call_operand.vmem [shape: bf16[32,256], index: 3, kind: output, shape index: {}]  }
   0x1   :  { %v322_v0 = vld [vmem:[%s438_s1 + $0x74] ss:$8 sps:$4 sm:$0xff]   ;;  %179 = vmatprep.mubr.bf16.mxu0 %v348_v1  ;;  %189 = vmatprep.mubr.bf16.mxu1 %v348_v1  ;;  %v324_v2 = vld [vmem:[%s438_s1 + $0x70] ss:$8 sps:$4 sm:$0xff]   ;;  %v325_v3 = vld [vmem:[%s438_s1 + $0x64] ss:$8 sps:$4 sm:$0xff]  }
   0x2   :  { %147 = vmatprep.subr.bf16.mxu0 %v322_v0  ;;  %305 = vmatprep.subr.bf16.mxu1 %v322_v0  ;;  %v327_v4 = vld [vmem:[%s438_s1 + $0x60] ss:$8 sps:$4 sm:$0xff]   ;;  %v328_v5 = vld [vmem:[%s438_s1 + $0x54] ss:$8 sps:$4 sm:$0xff]   ;;  %v330_v6 = vld [vmem:[%s438_s1 + $0x50] ss:$8 sps:$4 sm:$0xff]  }
   0x3   :  { %148 = vmatpush1.bf16.msra.mxu0 %v324_v2  ;;  %313 = vmatpush1.bf16.msra.mxu1 %v324_v2  ;;  %v331_v7 = vld [vmem:[%s438_s1 + $0x44] ss:$8 sps:$4 sm:$0xff]   ;;  %v333_v8 = vld [vmem:[%s438_s1 + $0x40] ss:$8 sps:$4 sm:$0xff]   ;;  %v334_v9 = vld [vmem:[%s438_s1 + $0x34] ss:$8 sps:$4 sm:$0xff]  }
   0x4   :  { %149 = vmatprep.subr.bf16.mxu0 %v325_v3  ;;  %306 = vmatprep.subr.bf16.mxu1 %v325_v3  ;;  %v336_v10 = vld [vmem:[%s438_s1 + $0x30] ss:$8 sps:$4 sm:$0xff]   ;;  %v337_v11 = vld [vmem:[%s438_s1 + $0x24] ss:$8 sps:$4 sm:$0xff]   ;;  %v339_v12 = vld [vmem:[%s438_s1 + $0x20] ss:$8 sps:$4 sm:$0xff]  }
   0x5   :  { %v340_v13 = vld [vmem:[%s438_s1 + $0x14] ss:$8 sps:$4 sm:$0xff]   ;;  %v342_v14 = vld [vmem:[%s438_s1 + $0x10] ss:$8 sps:$4 sm:$0xff]   ;;  %v343_v15 = vld [vmem:[%s438_s1 + $0x4] ss:$8 sps:$4 sm:$0xff]  }
   0x6   :  { %v345_v16 = vld [vmem:[%s438_s1] ss:$8 sps:$4 sm:$0xff]   ;;  %v230_v20 = vshrl.u32 %v229_v19, 7 }
   0x7   :  { %150 = vmatpush1.bf16.msra.mxu0 %v327_v4  ;;  %314 = vmatpush1.bf16.msra.mxu1 %v327_v4  ;;  %v346_v17 = vld [vmem:[%s439_s0] sm:$0xff]   ;;  %v347_v18 = vld [vmem:[%s439_s0 + $0x8] sm:$0xff]  }
   0x8   :  { %151 = vmatprep.subr.bf16.mxu0 %v328_v5  ;;  %307 = vmatprep.subr.bf16.mxu1 %v328_v5  ;;  %v231_v21 = vsub.s32 0, %v230_v20  ;;  %v235_v22 = vsub.s32 1, %v230_v20  ;;  %v227_v23 = vld [vmem:[%s440_s2] sm:$0x3] }
   0xa   :  { %v232_v24 = vrot.slane %v227_v23, %v231_v21  ;;  %v236_v25 = vrot.slane %v227_v23, %v235_v22 }
   0xb   :  { %152 = vmatpush1.bf16.msra.mxu0 %v330_v6  ;;  %315 = vmatpush1.bf16.msra.mxu1 %v330_v6 }
   0xc   :  { %153 = vmatprep.subr.bf16.mxu0 %v331_v7  ;;  %308 = vmatprep.subr.bf16.mxu1 %v331_v7 }
   0xf   :  { %154 = vmatpush1.bf16.msra.mxu0 %v333_v8  ;;  %316 = vmatpush1.bf16.msra.mxu1 %v333_v8 }
  0x10   :  { %155 = vmatprep.subr.bf16.mxu0 %v334_v9  ;;  %309 = vmatprep.subr.bf16.mxu1 %v334_v9 }
  0x13   :  { %156 = vmatpush1.bf16.msra.mxu0 %v336_v10  ;;  %317 = vmatpush1.bf16.msra.mxu1 %v336_v10 }
  0x14   :  { %157 = vmatprep.subr.bf16.mxu0 %v337_v11  ;;  %310 = vmatprep.subr.bf16.mxu1 %v337_v11 }
  0x17   :  { %158 = vmatpush1.bf16.msra.mxu0 %v339_v12  ;;  %318 = vmatpush1.bf16.msra.mxu1 %v339_v12 }
  0x18   :  { %159 = vmatprep.subr.bf16.mxu0 %v340_v13  ;;  %311 = vmatprep.subr.bf16.mxu1 %v340_v13 }
  0x1b   :  { %160 = vmatpush1.bf16.msra.mxu0 %v342_v14  ;;  %319 = vmatpush1.bf16.msra.mxu1 %v342_v14 }
  0x1c   :  { %161 = vmatprep.subr.bf16.mxu0 %v343_v15  ;;  %312 = vmatprep.subr.bf16.mxu1 %v343_v15 }
  0x1f   :  { %162 = vmatpush1.bf16.msra.mxu0 %v345_v16  ;;  %320 = vmatpush1.bf16.msra.mxu1 %v345_v16 }
  0x22   :  { %180 = vmatmul.mubr.bf16.vlgmr.msra.gmra.mxu0 %v346_v17  ;;  %190 = vmatmul.mubr.bf16.vlgmr.msra.gmra.mxu1 %v347_v18 }
  0xe2   :  { %v181_v26 = vpop.f32.mrf.mxu0  ;;  %v191_v27 = vpop.f32.mrf.mxu1 }
  0xe3   :  { %v239_v30 = vadd.f32 %v232_v24, %v181_v26  ;;  %v243_v31 = vadd.f32 %v232_v24, %v191_v27 }
  0xe4   :  { %v183_v28 = vpop.f32.mrf.mxu0  ;;  %v193_v29 = vpop.f32.mrf.mxu1 }
  0xe5   :  { %v240_v32 = vadd.f32 %v236_v25, %v183_v28  ;;  %v244_v33 = vadd.f32 %v236_v25, %v193_v29 }
  0xe6   :  { %v185_v34 = vpop.f32.mrf.mxu0  ;;  %v195_v35 = vpop.f32.mrf.mxu1 }
  0xe7   :  { %v301_v36 = vpack.c.bf16 %v240_v32, %v239_v30  ;;  %v303_v37 = vpack.c.bf16 %v244_v33, %v243_v31  ;;  %v241_v40 = vadd.f32 %v232_v24, %v185_v34  ;;  %v245_v41 = vadd.f32 %v232_v24, %v195_v35 }
  0xe8   :  { %v187_v38 = vpop.f32.mrf.mxu0  ;;  %v197_v39 = vpop.f32.mrf.mxu1 }
  0xe9   :  { %271 = vst [vmem:[%s441_s3] sm:$0xff] %v301_v36  ;;  %273 = vst [vmem:[%s441_s3 + $0x10] sm:$0xff] %v303_v37  ;;  %v242_v42 = vadd.f32 %v236_v25, %v187_v38  ;;  %v246_v43 = vadd.f32 %v236_v25, %v197_v39 }
  0xeb   :  { %v302_v44 = vpack.c.bf16 %v242_v42, %v241_v40  ;;  %v304_v45 = vpack.c.bf16 %v246_v43, %v245_v41 }
  0xed   :  { %272 = vst [vmem:[%s441_s3 + $0x8] sm:$0xff] %v302_v44  ;;  %274 = vst [vmem:[%s441_s3 + $0x18] sm:$0xff] %v304_v45 }

// kernel: _lambda_.18
= control target key start
LH: loop header
LB: loop body
LE: loop exit
PB: predicated region body
PF: predicated region fallthrough
CT: control target
= control target key end

     0   :  { %s1831_s15 = smov 0   ;;  %s1833_s16 = smov 0   ;;  %s2087_s0 = inlined_call_operand.vmem [shape: bf16[128,1152], index: 0, kind: input, shape index: {}]   ;;  %s2088_s1 = inlined_call_operand.vmem [shape: bf16[1152,128], index: 1, kind: input, shape index: {}]   ;;  %s2089_s2 = inlined_call_operand.vmem [shape: f32[1,128], index: 2, kind: input, shape index: {}]   ;;  %s2090_s3 = inlined_call_operand.vmem [shape: bf16[128,128], index: 3, kind: input, shape index: {}]   ;;  %s2091_s4 = inlined_call_operand.vmem [shape: bf16[128,128], index: 4, kind: output, shape index: {}]  }
   0x1   :  { %s1835_s17 = smov 0   ;;  %s1837_s18 = smov 0  }
   0x2   :  { %s1839_s19 = smov 0  }
   0x3 LB: > { %s26_s20 = sadd.s32 1, %s1799_s18  ;;  %p49_p1 = scmp.ne.s32.totalorder %s1791_s16, %s1787_s15  ;;  %s1803_s19 = sphi %s1839_s19, %s14_s19   ;;  %s1799_s18 = sphi %s1837_s18, %s2095_s18   ;;  %s1795_s17 = sphi %s1835_s17, %s2094_s17   ;;  %s1791_s16 = sphi %s1833_s16, %s2093_s16   ;;  %s1787_s15 = sphi %s1831_s15, %s2092_s15  }
   0x4   : > { %p27_p0 = scmp.ge.s32.totalorder %s26_s20, 3  ;;  %p50_p2 = scmp.eq.s32.totalorder %s1803_s19, 0 }
   0x5   : > { %s42_s22 = sadd.s32 1, %s1791_s16  ;;  %p1344_p5 = scmp.ge.s32.totalorder %s1803_s19, 3 }
   0x6   : > { %s2097_s20 = smov (%p27_p0, %s26_s20), 0  ;;  %p51_p3 = por %p50_p2, %p49_p1 }
   0x7   : > { %s38_s21 = ssub.s32 %s1799_s18, %s2097_s20  ;;  %203 = sbr.rel (%p1344_p5) target bundleno = 35 (0x23), region = 24 }
   0x8   : > { %p40_p4 = scmp.eq.s32.totalorder %s38_s21, 0 }
   0xa   : > { %s1866_s23 = scalar_select %p40_p4, %s1791_s16, %s42_s22  }
   0xc   : > { %206 = sbr.rel (!%p51_p3) target bundleno = 35 (0x23), region = 28  ;;  %s208_s24 = sand.u32 (%p51_p3), 1, %s1791_s16  }
   0xd   : > { %s1451_s25 = smul.u32 (%p51_p3), 12, %s1799_s18 }
   0xe   : > { %s1666_s26 = smul.u32 (%p51_p3), 192, %s208_s24 }
   0xf   : > { %s1874_s29 = scalar_lea.vmem (%p51_p3), %s2087_s0, %s1451_s25 }
  0x10   : > { %v231_v0 = vld [vmem:[%s1874_s29] sm:$0xff] (%p51_p3)  ;;  %v235_v2 = vld [vmem:[%s1874_s29 + $0x48] sm:$0xff] (%p51_p3)  ;;  %s1879_s30 = scalar_lea.vmem (%p51_p3), [#allocation3], %s1666_s26  ;;  %v239_v4 = vld [vmem:[%s1874_s29 + $0x90] sm:$0xff] (%p51_p3) }
  0x11   : > { %v233_v1 = vld [vmem:[%s1874_s29 + $0x24] sm:$0xff]  ;;  %232 = vst [vmem:[%s1879_s30] sm:$0xff] %v231_v0  ;;  %236 = vst [vmem:[%s1879_s30 + $0x18] sm:$0xff] %v235_v2  ;;  %v237_v3 = vld [vmem:[%s1874_s29 + $0x6c] sm:$0xff] }
  0x12   : > { %234 = vst [vmem:[%s1879_s30 + $0xc] sm:$0xff] %v233_v1  ;;  %v241_v5 = vld [vmem:[%s1874_s29 + $0xb4] sm:$0xff]  ;;  %238 = vst [vmem:[%s1879_s30 + $0x24] sm:$0xff] %v237_v3  ;;  %v245_v7 = vld [vmem:[%s1874_s29 + $0xfc] sm:$0xff] }
  0x13   : > { %240 = vst [vmem:[%s1879_s30 + $0x30] sm:$0xff] %v239_v4  ;;  %242 = vst [vmem:[%s1879_s30 + $0x3c] sm:$0xff] %v241_v5  ;;  %v243_v6 = vld [vmem:[%s1874_s29 + $0xd8] sm:$0xff]  ;;  %v247_v8 = vld [vmem:[%s1874_s29 + $0x120] sm:$0xff] }
  0x14   : > { %244 = vst [vmem:[%s1879_s30 + $0x48] sm:$0xff] %v243_v6  ;;  %246 = vst [vmem:[%s1879_s30 + $0x54] sm:$0xff] %v245_v7  ;;  %v249_v9 = vld [vmem:[%s1874_s29 + $0x144] sm:$0xff]  ;;  %v253_v11 = vld [vmem:[%s1874_s29 + $0x18c] sm:$0xff] }
  0x15   : > { %248 = vst [vmem:[%s1879_s30 + $0x60] sm:$0xff] %v247_v8  ;;  %v251_v10 = vld [vmem:[%s1874_s29 + $0x168] sm:$0xff]  ;;  %250 = vst [vmem:[%s1879_s30 + $0x6c] sm:$0xff] %v249_v9  ;;  %v255_v12 = vld [vmem:[%s1874_s29 + $0x1b0] sm:$0xff] }
  0x16   : > { %252 = vst [vmem:[%s1879_s30 + $0x78] sm:$0xff] %v251_v10  ;;  %254 = vst [vmem:[%s1879_s30 + $0x84] sm:$0xff] %v253_v11  ;;  %v257_v13 = vld [vmem:[%s1874_s29 + $0x1d4] sm:$0xff]  ;;  %v261_v15 = vld [vmem:[%s1874_s29 + $0x21c] sm:$0xff] }
  0x17   : > { %v259_v14 = vld [vmem:[%s1874_s29 + $0x1f8] sm:$0xff]  ;;  %256 = vst [vmem:[%s1879_s30 + $0x90] sm:$0xff] %v255_v12  ;;  %258 = vst [vmem:[%s1879_s30 + $0x9c] sm:$0xff] %v257_v13  ;;  %v1346_v16 = vld [vmem:[%s1874_s29 + $0x8] sm:$0xf] }
  0x18   : > { %260 = vst [vmem:[%s1879_s30 + $0xa8] sm:$0xff] %v259_v14  ;;  %v1348_v17 = vld [vmem:[%s1874_s29 + $0x2c] sm:$0xf]  ;;  %262 = vst [vmem:[%s1879_s30 + $0xb4] sm:$0xff] %v261_v15  ;;  %v1350_v18 = vld [vmem:[%s1874_s29 + $0x50] sm:$0xf] }
  0x19   : > { %1347 = vst [vmem:[%s1879_s30 + $0x8] sm:$0xf] %v1346_v16  ;;  %1349 = vst [vmem:[%s1879_s30 + $0x14] sm:$0xf] %v1348_v17  ;;  %v1352_v19 = vld [vmem:[%s1874_s29 + $0x74] sm:$0xf] }
  0x1a   : > { %v1354_v20 = vld [vmem:[%s1874_s29 + $0x98] sm:$0xf]  ;;  %1351 = vst [vmem:[%s1879_s30 + $0x20] sm:$0xf] %v1350_v18  ;;  %1353 = vst [vmem:[%s1879_s30 + $0x2c] sm:$0xf] %v1352_v19 }
  0x1b   : > { %1355 = vst [vmem:[%s1879_s30 + $0x38] sm:$0xf] %v1354_v20  ;;  %v1356_v21 = vld [vmem:[%s1874_s29 + $0xbc] sm:$0xf]  ;;  %v1358_v22 = vld [vmem:[%s1874_s29 + $0xe0] sm:$0xf] }
  0x1c   : > { %v1360_v23 = vld [vmem:[%s1874_s29 + $0x104] sm:$0xf]  ;;  %1357 = vst [vmem:[%s1879_s30 + $0x44] sm:$0xf] %v1356_v21  ;;  %1359 = vst [vmem:[%s1879_s30 + $0x50] sm:$0xf] %v1358_v22 }
  0x1d   : > { %1361 = vst [vmem:[%s1879_s30 + $0x5c] sm:$0xf] %v1360_v23  ;;  %v1362_v24 = vld [vmem:[%s1874_s29 + $0x128] sm:$0xf]  ;;  %v1364_v25 = vld [vmem:[%s1874_s29 + $0x14c] sm:$0xf] }
  0x1e   : > { %v1366_v26 = vld [vmem:[%s1874_s29 + $0x170] sm:$0xf]  ;;  %1363 = vst [vmem:[%s1879_s30 + $0x68] sm:$0xf] %v1362_v24  ;;  %1365 = vst [vmem:[%s1879_s30 + $0x74] sm:$0xf] %v1364_v25 }
  0x1f   : > { %1367 = vst [vmem:[%s1879_s30 + $0x80] sm:$0xf] %v1366_v26  ;;  %v1368_v27 = vld [vmem:[%s1874_s29 + $0x194] sm:$0xf]  ;;  %v1370_v28 = vld [vmem:[%s1874_s29 + $0x1b8] sm:$0xf] }
  0x20   : > { %v1372_v29 = vld [vmem:[%s1874_s29 + $0x1dc] sm:$0xf]  ;;  %1369 = vst [vmem:[%s1879_s30 + $0x8c] sm:$0xf] %v1368_v27  ;;  %1371 = vst [vmem:[%s1879_s30 + $0x98] sm:$0xf] %v1370_v28 }
  0x21   : > { %1373 = vst [vmem:[%s1879_s30 + $0xa4] sm:$0xf] %v1372_v29  ;;  %v1374_v30 = vld [vmem:[%s1874_s29 + $0x200] sm:$0xf]  ;;  %v1376_v31 = vld [vmem:[%s1874_s29 + $0x224] sm:$0xf] }
  0x22   : > { %1375 = vst [vmem:[%s1879_s30 + $0xb0] sm:$0xf] %v1374_v30  ;;  %1377 = vst [vmem:[%s1879_s30 + $0xbc] sm:$0xf] %v1376_v31 }
  0x23 PF: > { %p1378_p6 = scmp.ge.s32.totalorder %s1803_s19, 1  ;;  %p319_p7 = scmp.lt.s32.totalorder %s1803_s19, 4 }
  0x25   : > { %p320_p8 = pnand %p1378_p6, %p319_p7 }
  0x26   : > { %s326_s5 = sand.u32 (!%p320_p8), 1, %s1787_s15   ;;  %s375_s6 = smul.u32 (!%p320_p8), 48, %s1795_s17 }
  0x27   : > { %323 = sbr.rel (%p320_p8) target bundleno = 379 (0x17b), region = 58  ;;  %p1380_p10 = scmp.ne.s32.totalorder (!%p320_p8), %s1795_s17, 0 }
  0x28   : > { %s1667_s7 = smul.u32 (!%p320_p8), 192, %s326_s5  ;;  %p376_p9 = scmp.lt.s32.totalorder (!%p320_p8), %s375_s6, 143 }
  0x2a   : > { %s1951_s12 = scalar_lea.vmem (!%p320_p8), [#allocation3], %s1667_s7 }
  0x2c   : > { %s2099_s6 = smov (!%p376_p9, %s375_s6), 143  ;;  %409 = sbr.rel (%p1380_p10) target bundleno = 58 (0x3a), region = 66 }
  0x2d   : > { %s1379_s8 = sshll.u32 %s2099_s6, 2 }
  0x2e   : > { %s1949_s11 = scalar_lea.vmem %s2088_s1, %s1379_s8 }
  0x31   : > { %v1805_v32 = vmov 0.0  }
  0x32   : > { %410 = vst [vmem:[#allocation2 + $0x30] sm:$0xff] %v1805_v32  ;;  %411 = vst [vmem:[#allocation2] sm:$0xff] %v1805_v32 }
  0x33   : > { %412 = vst [vmem:[#allocation2 + $0x58] sm:$0xff] %v1805_v32  ;;  %413 = vst [vmem:[#allocation2 + $0x18] sm:$0xff] %v1805_v32 }
  0x34   : > { %414 = vst [vmem:[#allocation2 + $0x50] sm:$0xff] %v1805_v32  ;;  %415 = vst [vmem:[#allocation2 + $0x68] sm:$0xff] %v1805_v32 }
  0x35   : > { %416 = vst [vmem:[#allocation2 + $0x8] sm:$0xff] %v1805_v32  ;;  %417 = vst [vmem:[#allocation2 + $0x48] sm:$0xff] %v1805_v32 }
  0x36   : > { %418 = vst [vmem:[#allocation2 + $0x40] sm:$0xff] %v1805_v32  ;;  %419 = vst [vmem:[#allocation2 + $0x20] sm:$0xff] %v1805_v32 }
  0x37   : > { %420 = vst [vmem:[#allocation2 + $0x10] sm:$0xff] %v1805_v32  ;;  %421 = vst [vmem:[#allocation2 + $0x38] sm:$0xff] %v1805_v32 }
  0x38   : > { %422 = vst [vmem:[#allocation2 + $0x60] sm:$0xff] %v1805_v32  ;;  %423 = vst [vmem:[#allocation2 + $0x70] sm:$0xff] %v1805_v32 }
  0x39   : > { %424 = vst [vmem:[#allocation2 + $0x78] sm:$0xff] %v1805_v32  ;;  %425 = vst [vmem:[#allocation2 + $0x28] sm:$0xff] %v1805_v32 }
  0x3a PF: > { %v1709_v33 = vld [vmem:[%s1949_s11 + $0x78] sm:$0xff]   ;;  %v1712_v36 = vld [vmem:[%s1949_s11 + $0x70] sm:$0xff]   ;;  %v1715_v39 = vld [vmem:[%s1949_s11 + $0x68] sm:$0xff]   ;;  %p1429_p11 = scmp.ne.s32.totalorder %s1795_s17, 2 }
  0x3b   : > { %v1710_v34 = vld [vmem:[%s1949_s11 + $0x38] sm:$0xff]   ;;  %1554 = vmatprep.subr.bf16.mxu0 %v1709_v33  ;;  %v1713_v37 = vld [vmem:[%s1949_s11 + $0x30] sm:$0xff]   ;;  %v1716_v40 = vld [vmem:[%s1949_s11 + $0x28] sm:$0xff]  }
  0x3c   : > { %v1711_v35 = vld [vmem:[%s1949_s11 + $0xb8] sm:$0xff]   ;;  %1555 = vmatpush3.bf16.msra.mxu0 %v1710_v34  ;;  %v1714_v38 = vld [vmem:[%s1949_s11 + $0xb0] sm:$0xff]   ;;  %v1717_v41 = vld [vmem:[%s1949_s11 + $0xa8] sm:$0xff]  }
  0x3d   : > { %1634 = vmatprep.subr.bf16.mxu1 %v1711_v35  ;;  %1556 = vmatprep.subr.bf16.mxu0 %v1712_v36  ;;  %v1718_v42 = vld [vmem:[%s1949_s11 + $0x60] sm:$0xff]   ;;  %v1721_v45 = vld [vmem:[%s1949_s11 + $0x58] sm:$0xff]   ;;  %v1724_v48 = vld [vmem:[%s1949_s11 + $0x50] sm:$0xff]  }
  0x3e   : > { %1635 = vmatpush3.bf16.msra.mxu1 %v1711_v35  ;;  %v1719_v43 = vld [vmem:[%s1949_s11 + $0x20] sm:$0xff]   ;;  %v1723_v46 = vld [vmem:[%s1949_s11 + $0x98] sm:$0xff]   ;;  %v1726_v49 = vld [vmem:[%s1949_s11 + $0x90] sm:$0xff]  }
  0x3f   : > { %1636 = vmatprep.subr.bf16.mxu1 %v1714_v38  ;;  %v1720_v44 = vld [vmem:[%s1949_s11 + $0xa0] sm:$0xff]   ;;  %v1722_v47 = vld [vmem:[%s1949_s11 + $0x18] sm:$0xff]   ;;  %v1725_v50 = vld [vmem:[%s1949_s11 + $0x10] sm:$0xff]  }
  0x40   : > { %1557 = vmatpush3.bf16.msra.mxu0 %v1713_v37  ;;  %v1727_v51 = vld [vmem:[%s1949_s11 + $0x48] sm:$0xff]   ;;  %v1730_v54 = vld [vmem:[%s1949_s11 + $0x40] sm:$0xff]   ;;  %v1745_v1 = vld [vmem:[%s1951_s12 + $0x50] ss:$12 sps:$4 sm:$0xff]  }
  0x41   : > { %1558 = vmatprep.subr.bf16.mxu0 %v1715_v39  ;;  %v1728_v52 = vld [vmem:[%s1949_s11 + $0x8] sm:$0xff]   ;;  %v1732_v55 = vld [vmem:[%s1949_s11 + $0x80] sm:$0xff]   ;;  %v1743_v3 = vld [vmem:[%s1951_s12 + $0x30] ss:$12 sps:$4 sm:$0xff]  }
  0x42   : > { %1637 = vmatpush3.bf16.msra.mxu1 %v1714_v38  ;;  %v1729_v53 = vld [vmem:[%s1949_s11 + $0x88] sm:$0xff]   ;;  %v1735_v56 = vld [vmem:[%s1951_s12 + $0x4] ss:$12 sps:$4 sm:$0xff]   ;;  %v1741_v0 = vld [vmem:[%s1951_s12 + $0x34] ss:$12 sps:$4 sm:$0xff]  }
  0x43   : > { %1638 = vmatprep.subr.bf16.mxu1 %v1717_v41  ;;  %v1736_v57 = vld [vmem:[%s1951_s12 + $0x8] ss:$12 sps:$4 sm:$0xff]   ;;  %v1731_v58 = vld [vmem:[%s1949_s11] sm:$0xff]   ;;  %826 = vmatprep.mubr.bf16.mxu0 %v1735_v56  ;;  %v1746_v4 = vld [vmem:[%s1951_s12 + $0x4c] ss:$12 sps:$4 sm:$0xff]  }
  0x44   : > { %1559 = vmatpush3.bf16.msra.mxu0 %v1716_v40  ;;  %1650 = vmatprep.mubr.bf16.mxu1 %v1736_v57  ;;  %v1733_v59 = vld [vmem:[%s1951_s12] ss:$12 sps:$4 sm:$0xff]   ;;  %v1738_v60 = vld [vmem:[%s1951_s12 + $0x1c] ss:$12 sps:$4 sm:$0xff]   ;;  %v1744_v62 = vld [vmem:[%s1951_s12 + $0x38] ss:$12 sps:$4 sm:$0xff]  }
  0x45   : > { %1560 = vmatprep.subr.bf16.mxu0 %v1718_v42  ;;  %v1737_v61 = vld [vmem:[%s1951_s12 + $0x20] ss:$12 sps:$4 sm:$0xff]   ;;  %v1740_v63 = vld [vmem:[%s1951_s12 + $0x18] ss:$12 sps:$4 sm:$0xff]   ;;  %v1752_v2 = vld [vmem:[%s1951_s12 + $0x68] ss:$12 sps:$4 sm:$0xff]  }
  0x46   : > { %1639 = vmatpush3.bf16.msra.mxu1 %v1717_v41  ;;  %v1753_v5 = vld [vmem:[%s1951_s12 + $0x80] ss:$12 sps:$4 sm:$0xff]   ;;  %v1760_v6 = vld [vmem:[%s1951_s12 + $0x98] ss:$12 sps:$4 sm:$0xff]   ;;  %v1748_v7 = vld [vmem:[%s1951_s12 + $0x48] ss:$12 sps:$4 sm:$0xff]  }
  0x47   : > { %1640 = vmatprep.subr.bf16.mxu1 %v1720_v44  ;;  %v1749_v8 = vld [vmem:[%s1951_s12 + $0x64] ss:$12 sps:$4 sm:$0xff]   ;;  %v1751_v10 = vld [vmem:[%s1951_s12 + $0x60] ss:$12 sps:$4 sm:$0xff]   ;;  %v1754_v11 = vld [vmem:[%s1951_s12 + $0x7c] ss:$12 sps:$4 sm:$0xff]  }
  0x48   : > { %1561 = vmatpush3.bf16.msra.mxu0 %v1719_v43  ;;  %v1761_v9 = vld [vmem:[%s1951_s12 + $0xb0] ss:$12 sps:$4 sm:$0xff]   ;;  %v1756_v12 = vld [vmem:[%s1951_s12 + $0x78] ss:$12 sps:$4 sm:$0xff]   ;;  %v1757_v13 = vld [vmem:[%s1951_s12 + $0x94] ss:$12 sps:$4 sm:$0xff]  }
  0x49   : > { %1562 = vmatprep.subr.bf16.mxu0 %v1721_v45  ;;  %v1759_v14 = vld [vmem:[%s1951_s12 + $0x90] ss:$12 sps:$4 sm:$0xff]   ;;  %v1762_v15 = vld [vmem:[%s1951_s12 + $0xac] ss:$12 sps:$4 sm:$0xff]   ;;  %v1764_v16 = vld [vmem:[%s1951_s12 + $0xa8] ss:$12 sps:$4 sm:$0xff]  }
  0x4a   : > { %1641 = vmatpush3.bf16.msra.mxu1 %v1720_v44  ;;  %v426_v22 = vld [vmem:[#allocation2 + $0x30] sm:$0xff]  ;;  %v427_v30 = vld [vmem:[#allocation2] sm:$0xff]  ;;  %v428_v37 = vld [vmem:[#allocation2 + $0x58] sm:$0xff] }
  0x4b   : > { %1642 = vmatprep.subr.bf16.mxu1 %v1723_v46  ;;  %v429_v44 = vld [vmem:[#allocation2 + $0x18] sm:$0xff] }
  0x4c   : > { %1563 = vmatpush3.bf16.msra.mxu0 %v1722_v47 }
  0x4d   : > { %1564 = vmatprep.subr.bf16.mxu0 %v1724_v48 }
  0x4e   : > { %1643 = vmatpush3.bf16.msra.mxu1 %v1723_v46 }
  0x4f   : > { %1644 = vmatprep.subr.bf16.mxu1 %v1726_v49 }
  0x50   : > { %1565 = vmatpush3.bf16.msra.mxu0 %v1725_v50 }
  0x51   : > { %1566 = vmatprep.subr.bf16.mxu0 %v1727_v51 }
  0x52   : > { %1645 = vmatpush3.bf16.msra.mxu1 %v1726_v49 }
  0x53   : > { %1646 = vmatprep.subr.bf16.mxu1 %v1729_v53 }
  0x54   : > { %1567 = vmatpush3.bf16.msra.mxu0 %v1728_v52  ;;  %v430_v52 = vld [vmem:[#allocation2 + $0x50] sm:$0xff] }
  0x55   : > { %1568 = vmatprep.subr.bf16.mxu0 %v1730_v54 }
  0x56   : > { %1647 = vmatpush3.bf16.msra.mxu1 %v1729_v53 }
  0x57   : > { %1648 = vmatprep.subr.bf16.mxu1 %v1732_v55 }
  0x58   : > { %1569 = vmatpush3.bf16.msra.mxu0 %v1731_v58 }
  0x5a   : > { %1649 = vmatpush3.bf16.msra.mxu1 %v1732_v55 }
  0x5b   : > { %827 = vmatmul.mubr.bf16.vlgmr.msra.gmra.mxu0 %v1733_v59  ;;  %v431_v59 = vld [vmem:[#allocation2 + $0x68] sm:$0xff] }
  0x5c   : > { %834 = vmatprep.mubr.bf16.mxu0 %v1738_v60 }
  0x5d   : > { %1651 = vmatmul.mubr.bf16.vlgmr.msra.gmra.mxu1 %v1737_v61 }
  0x5e   : > { %1654 = vmatprep.mubr.bf16.mxu1 %v1744_v62 }
  0x63   : > { %835 = vmatmul.mubr.bf16.gmra.mxu0 %v1740_v63 }
  0x64   : > { %842 = vmatprep.mubr.bf16.mxu0 %v1741_v0 }
  0x65   : > { %1655 = vmatmul.mubr.bf16.gmra.mxu1 %v1745_v1  ;;  %v432_v1 = vld [vmem:[#allocation2 + $0x8] sm:$0xff] }
  0x66   : > { %1658 = vmatprep.mubr.bf16.mxu1 %v1752_v2 }
  0x6b   : > { %843 = vmatmul.mubr.bf16.gmra.mxu0 %v1743_v3 }
  0x6c   : > { %850 = vmatprep.mubr.bf16.mxu0 %v1746_v4 }
  0x6d   : > { %1659 = vmatmul.mubr.bf16.gmra.mxu1 %v1753_v5 }
  0x6e   : > { %1662 = vmatprep.mubr.bf16.mxu1 %v1760_v6 }
  0x73   : > { %851 = vmatmul.mubr.bf16.gmra.mxu0 %v1748_v7 }
  0x74   : > { %858 = vmatprep.mubr.bf16.mxu0 %v1749_v8  ;;  %v433_v8 = vld [vmem:[#allocation2 + $0x48] sm:$0xff] }
  0x75   : > { %1663 = vmatmul.mubr.bf16.gmra.mxu1 %v1761_v9 }
  0x7b   : > { %859 = vmatmul.mubr.bf16.gmra.mxu0 %v1751_v10 }
  0x7c   : > { %866 = vmatprep.mubr.bf16.mxu0 %v1754_v11 }
  0x83   : > { %867 = vmatmul.mubr.bf16.gmra.mxu0 %v1756_v12 }
  0x84   : > { %874 = vmatprep.mubr.bf16.mxu0 %v1757_v13 }
  0x8b   : > { %875 = vmatmul.mubr.bf16.gmra.mxu0 %v1759_v14 }
  0x8c   : > { %882 = vmatprep.mubr.bf16.mxu0 %v1762_v15 }
  0x93   : > { %883 = vmatmul.mubr.bf16.gmra.mxu0 %v1764_v16  ;;  %v434_v16 = vld [vmem:[#allocation2 + $0x40] sm:$0xff] }
 0x11b   : > { %v1570_v17 = vpop.f32.mrf.mxu0 }
 0x11d   : > { %v1571_v18 = vpop.f32.mrf.mxu0  ;;  %v1652_v19 = vpop.f32.mrf.mxu1 }
 0x11e   : > { %v1572_v20 = vadd.f32 %v1571_v18, %v1570_v17 }
 0x11f   : > { %v1573_v21 = vpop.f32.mrf.mxu0  ;;  %v925_v23 = vpop.f32.mrf.mxu1 }
 0x120   : > { %v926_v24 = vadd.f32 %v1572_v20, %v925_v23  ;;  %v435_v23 = vld [vmem:[#allocation2 + $0x20] sm:$0xff] }
 0x121   : > { %v1574_v25 = vpop.f32.mrf.mxu0  ;;  %v1653_v26 = vpop.f32.mrf.mxu1 }
 0x122   : > { %v988_v27 = vadd.f32 %v926_v24, %v426_v22  ;;  %v1575_v28 = vadd.f32 %v1574_v25, %v1573_v21 }
 0x123   : > { %v1576_v29 = vpop.f32.mrf.mxu0  ;;  %v928_v31 = vpop.f32.mrf.mxu1 }
 0x124   : > { %1004 = vst [vmem:[#allocation2 + $0x30] sm:$0xff] %v988_v27  ;;  %v929_v32 = vadd.f32 %v1575_v28, %v928_v31 }
 0x125   : > { %v1577_v33 = vpop.f32.mrf.mxu0  ;;  %v1656_v34 = vpop.f32.mrf.mxu1 }
 0x126   : > { %v989_v35 = vadd.f32 %v929_v32, %v427_v30  ;;  %v1578_v36 = vadd.f32 %v1577_v33, %v1576_v29  ;;  %v436_v29 = vld [vmem:[#allocation2 + $0x10] sm:$0xff] }
 0x127   : > { %v1579_v38 = vpop.f32.mrf.mxu0  ;;  %v941_v41 = vpop.f32.mrf.mxu1 }
 0x128   : > { %1005 = vst [vmem:[#allocation2] sm:$0xff] %v989_v35  ;;  %v934_v39 = vadd.f32 %v1652_v19, %v1578_v36  ;;  %v437_v36 = vld [vmem:[#allocation2 + $0x38] sm:$0xff] }
 0x129   : > { %v1580_v40 = vpop.f32.mrf.mxu0  ;;  %v1657_v48 = vpop.f32.mrf.mxu1 }
 0x12a   : > { %v990_v42 = vadd.f32 %v934_v39, %v428_v37  ;;  %v1581_v43 = vadd.f32 %v1580_v40, %v1579_v38 }
 0x12b   : > { %v1582_v45 = vpop.f32.mrf.mxu0  ;;  %v944_v55 = vpop.f32.mrf.mxu1 }
 0x12c   : > { %1006 = vst [vmem:[#allocation2 + $0x58] sm:$0xff] %v990_v42  ;;  %v937_v46 = vadd.f32 %v1653_v26, %v1581_v43 }
 0x12d   : > { %v1583_v47 = vpop.f32.mrf.mxu0  ;;  %v1660_v62 = vpop.f32.mrf.mxu1 }
 0x12e   : > { %v991_v49 = vadd.f32 %v937_v46, %v429_v44  ;;  %v1584_v50 = vadd.f32 %v1583_v47, %v1582_v45  ;;  %v438_v44 = vld [vmem:[#allocation2 + $0x60] sm:$0xff] }
 0x12f   : > { %v1585_v51 = vpop.f32.mrf.mxu0  ;;  %v957_v5 = vpop.f32.mrf.mxu1 }
 0x130   : > { %1007 = vst [vmem:[#allocation2 + $0x18] sm:$0xff] %v991_v49  ;;  %v942_v53 = vadd.f32 %v1584_v50, %v941_v41 }
 0x131   : > { %v1586_v54 = vpop.f32.mrf.mxu0  ;;  %v1661_v12 = vpop.f32.mrf.mxu1 }
 0x132   : > { %v992_v56 = vadd.f32 %v942_v53, %v430_v52  ;;  %v1587_v57 = vadd.f32 %v1586_v54, %v1585_v51  ;;  %v439_v51 = vld [vmem:[#allocation2 + $0x70] sm:$0xff] }
 0x133   : > { %v1588_v58 = vpop.f32.mrf.mxu0  ;;  %v960_v19 = vpop.f32.mrf.mxu1 }
 0x134   : > { %1008 = vst [vmem:[#allocation2 + $0x50] sm:$0xff] %v992_v56  ;;  %v945_v60 = vadd.f32 %v1587_v57, %v944_v55  ;;  %v440_v56 = vld [vmem:[#allocation2 + $0x78] sm:$0xff] }
 0x135   : > { %v1589_v61 = vpop.f32.mrf.mxu0  ;;  %v1664_v26 = vpop.f32.mrf.mxu1 }
 0x136   : > { %v993_v63 = vadd.f32 %v945_v60, %v431_v59  ;;  %v1590_v0 = vadd.f32 %v1589_v61, %v1588_v58 }
 0x137   : > { %v1591_v2 = vpop.f32.mrf.mxu0  ;;  %v973_v33 = vpop.f32.mrf.mxu1 }
 0x138   : > { %1009 = vst [vmem:[#allocation2 + $0x68] sm:$0xff] %v993_v63  ;;  %v950_v3 = vadd.f32 %v1656_v34, %v1590_v0 }
 0x139   : > { %v1592_v4 = vpop.f32.mrf.mxu0  ;;  %v1665_v40 = vpop.f32.mrf.mxu1 }
 0x13a   : > { %v994_v6 = vadd.f32 %v950_v3, %v432_v1  ;;  %v1593_v7 = vadd.f32 %v1592_v4, %v1591_v2 }
 0x13b   : > { %v1594_v9 = vpop.f32.mrf.mxu0  ;;  %v976_v47 = vpop.f32.mrf.mxu1 }
 0x13c   : > { %1010 = vst [vmem:[#allocation2 + $0x8] sm:$0xff] %v994_v6  ;;  %v953_v10 = vadd.f32 %v1657_v48, %v1593_v7 }
 0x13d   : > { %v1595_v11 = vpop.f32.mrf.mxu0 }
 0x13e   : > { %v995_v13 = vadd.f32 %v953_v10, %v433_v8  ;;  %v1596_v14 = vadd.f32 %v1595_v11, %v1594_v9 }
 0x13f   : > { %v1597_v15 = vpop.f32.mrf.mxu0 }
 0x140   : > { %1011 = vst [vmem:[#allocation2 + $0x48] sm:$0xff] %v995_v13  ;;  %v958_v17 = vadd.f32 %v1596_v14, %v957_v5 }
 0x141   : > { %v1598_v18 = vpop.f32.mrf.mxu0 }
 0x142   : > { %v996_v20 = vadd.f32 %v958_v17, %v434_v16  ;;  %v1599_v21 = vadd.f32 %v1598_v18, %v1597_v15 }
 0x143   : > { %v1600_v22 = vpop.f32.mrf.mxu0 }
 0x144   : > { %1012 = vst [vmem:[#allocation2 + $0x40] sm:$0xff] %v996_v20  ;;  %v961_v24 = vadd.f32 %v1599_v21, %v960_v19 }
 0x145   : > { %v1601_v25 = vpop.f32.mrf.mxu0 }
 0x146   : > { %v997_v27 = vadd.f32 %v961_v24, %v435_v23  ;;  %v1602_v28 = vadd.f32 %v1601_v25, %v1600_v22 }
 0x147   : > { %v1603_v30 = vpop.f32.mrf.mxu0 }
 0x148   : > { %1013 = vst [vmem:[#allocation2 + $0x20] sm:$0xff] %v997_v27  ;;  %v966_v31 = vadd.f32 %v1660_v62, %v1602_v28  ;;  %v441_v62 = vld [vmem:[#allocation2 + $0x28] sm:$0xff] }
 0x149   : > { %v1604_v32 = vpop.f32.mrf.mxu0 }
 0x14a   : > { %v998_v34 = vadd.f32 %v966_v31, %v436_v29  ;;  %v1605_v35 = vadd.f32 %v1604_v32, %v1603_v30 }
 0x14b   : > { %v1606_v37 = vpop.f32.mrf.mxu0 }
 0x14c   : > { %1014 = vst [vmem:[#allocation2 + $0x10] sm:$0xff] %v998_v34  ;;  %v969_v38 = vadd.f32 %v1661_v12, %v1605_v35 }
 0x14d   : > { %v1607_v39 = vpop.f32.mrf.mxu0 }
 0x14e   : > { %v999_v41 = vadd.f32 %v969_v38, %v437_v36  ;;  %v1608_v42 = vadd.f32 %v1607_v39, %v1606_v37 }
 0x14f   : > { %v1609_v43 = vpop.f32.mrf.mxu0 }
 0x150   : > { %1015 = vst [vmem:[#allocation2 + $0x38] sm:$0xff] %v999_v41  ;;  %v974_v45 = vadd.f32 %v1608_v42, %v973_v33 }
 0x151   : > { %v1610_v46 = vpop.f32.mrf.mxu0 }
 0x152   : > { %v1000_v48 = vadd.f32 %v974_v45, %v438_v44  ;;  %v1611_v49 = vadd.f32 %v1610_v46, %v1609_v43 }
 0x153   : > { %v1612_v50 = vpop.f32.mrf.mxu0 }
 0x154   : > { %1016 = vst [vmem:[#allocation2 + $0x60] sm:$0xff] %v1000_v48  ;;  %v977_v52 = vadd.f32 %v1611_v49, %v976_v47 }
 0x155   : > { %v1613_v53 = vpop.f32.mrf.mxu0 }
 0x156   : > { %v1001_v54 = vadd.f32 %v977_v52, %v439_v51  ;;  %v1614_v55 = vadd.f32 %v1613_v53, %v1612_v50 }
 0x157   : > { %v1615_v57 = vpop.f32.mrf.mxu0 }
 0x158   : > { %1017 = vst [vmem:[#allocation2 + $0x70] sm:$0xff] %v1001_v54  ;;  %v982_v58 = vadd.f32 %v1664_v26, %v1614_v55 }
 0x159   : > { %v1616_v59 = vpop.f32.mrf.mxu0 }
 0x15a   : > { %v1002_v60 = vadd.f32 %v982_v58, %v440_v56  ;;  %v1617_v61 = vadd.f32 %v1616_v59, %v1615_v57 }
 0x15c   : > { %1018 = vst [vmem:[#allocation2 + $0x78] sm:$0xff] %v1002_v60  ;;  %v985_v63 = vadd.f32 %v1665_v40, %v1617_v61  ;;  %1023 = sbr.rel (%p1429_p11) target bundleno = 379 (0x17b), region = 70 }
 0x15e   : > { %v1003_v0 = vadd.f32 %v985_v63, %v441_v62 }
 0x160   : > { %1019 = vst [vmem:[#allocation2 + $0x28] sm:$0xff] %v1003_v0 }
 0x161   : > { %v1024_v1 = vld [vmem:[#allocation2 + $0x30] sm:$0xff]  ;;  %v1025_v2 = vld [vmem:[#allocation2] sm:$0xff]  ;;  %v1026_v7 = vld [vmem:[#allocation2 + $0x58] sm:$0xff] }
 0x162   : > { %v2006_v3 = vld [vmem:[%s2089_s2] ss:$0 sm:$0xff]  ;;  %v1027_v8 = vld [vmem:[#allocation2 + $0x18] sm:$0xff]  ;;  %v1540_v13 = vld [vmem:[%s2090_s3 + $0x8] sm:$0xff]  }
 0x163   : > { %v1047_v4 = vadd.f32 %v2006_v3, %v1024_v1  ;;  %v1048_v5 = vadd.f32 %v2006_v3, %v1025_v2  ;;  %v1469_v6 = vld [vmem:[%s2090_s3] sm:$0xff]   ;;  %v1049_v11 = vadd.f32 %v2006_v3, %v1026_v7  ;;  %v1050_v12 = vadd.f32 %v2006_v3, %v1027_v8  ;;  %v1028_v14 = vld [vmem:[#allocation2 + $0x50] sm:$0xff]  ;;  %v1029_v15 = vld [vmem:[#allocation2 + $0x68] sm:$0xff] }
 0x164   : > { %v1470_v9 = vunpack.c.l.bf16 %v1469_v6  ;;  %v1471_v10 = vunpack.c.h.bf16 %v1469_v6  ;;  %v1474_v16 = vunpack.c.l.bf16 %v1540_v13  ;;  %v1475_v17 = vunpack.c.h.bf16 %v1540_v13  ;;  %v1541_v20 = vld [vmem:[%s2090_s3 + $0x10] sm:$0xff]   ;;  %v1030_v21 = vld [vmem:[#allocation2 + $0x8] sm:$0xff]  ;;  %v1542_v27 = vld [vmem:[%s2090_s3 + $0x18] sm:$0xff]  }
 0x165   : > { %v1051_v18 = vadd.f32 %v2006_v3, %v1028_v14  ;;  %v1052_v19 = vadd.f32 %v2006_v3, %v1029_v15  ;;  %v1031_v22 = vld [vmem:[#allocation2 + $0x48] sm:$0xff]  ;;  %v1478_v25 = vunpack.c.l.bf16 %v1541_v20  ;;  %v1479_v26 = vunpack.c.h.bf16 %v1541_v20  ;;  %v1032_v32 = vld [vmem:[#allocation2 + $0x40] sm:$0xff]  ;;  %v1034_v43 = vld [vmem:[#allocation2 + $0x10] sm:$0xff] }
 0x166   : > { %v1095_v23 = vadd.f32 %v1470_v9, %v1047_v4  ;;  %v1096_v24 = vadd.f32 %v1471_v10, %v1048_v5  ;;  %v1097_v28 = vadd.f32 %v1474_v16, %v1049_v11  ;;  %v1098_v29 = vadd.f32 %v1475_v17, %v1050_v12  ;;  %v1033_v37 = vld [vmem:[#allocation2 + $0x20] sm:$0xff]  ;;  %v1035_v48 = vld [vmem:[#allocation2 + $0x38] sm:$0xff]  ;;  %v1544_v49 = vld [vmem:[%s2090_s3 + $0x28] sm:$0xff]  }
 0x167   : > { %v1053_v30 = vadd.f32 %v2006_v3, %v1030_v21  ;;  %v1054_v31 = vadd.f32 %v2006_v3, %v1031_v22  ;;  %v1099_v35 = vadd.f32 %v1478_v25, %v1051_v18  ;;  %v1100_v36 = vadd.f32 %v1479_v26, %v1052_v19  ;;  %v1543_v42 = vld [vmem:[%s2090_s3 + $0x20] sm:$0xff]   ;;  %v1037_v59 = vld [vmem:[#allocation2 + $0x70] sm:$0xff]  ;;  %v1038_v6 = vld [vmem:[#allocation2 + $0x78] sm:$0xff] }
 0x168   : > { %v1111_v33 = vmax.f32 %v1095_v23, 0.0  ;;  %v1112_v34 = vmax.f32 %v1096_v24, 0.0  ;;  %v1113_v38 = vmax.f32 %v1097_v28, 0.0  ;;  %v1114_v39 = vmax.f32 %v1098_v29, 0.0  ;;  %v1036_v54 = vld [vmem:[#allocation2 + $0x60] sm:$0xff]  ;;  %v1545_v60 = vld [vmem:[%s2090_s3 + $0x30] sm:$0xff]  }
 0x169   : > { %v1482_v40 = vunpack.c.l.bf16 %v1542_v27  ;;  %v1483_v41 = vunpack.c.h.bf16 %v1542_v27  ;;  %v1115_v45 = vmax.f32 %v1099_v35, 0.0  ;;  %v1116_v46 = vmax.f32 %v1100_v36, 0.0  ;;  %v1039_v7 = vld [vmem:[#allocation2 + $0x28] sm:$0xff]  ;;  %v1546_v12 = vld [vmem:[%s2090_s3 + $0x38] sm:$0xff]  }
 0x16a   : > { %v1503_v44 = vpack.c.bf16 %v1112_v34, %v1111_v33  ;;  %v1055_v47 = vadd.f32 %v2006_v3, %v1032_v32  ;;  %v1508_v50 = vpack.c.bf16 %v1114_v39, %v1113_v38  ;;  %v1056_v53 = vadd.f32 %v2006_v3, %v1033_v37 }
 0x16b   : > { %v1101_v51 = vadd.f32 %v1482_v40, %v1053_v30  ;;  %v1102_v52 = vadd.f32 %v1483_v41, %v1054_v31  ;;  %v1513_v55 = vpack.c.bf16 %v1116_v46, %v1115_v45  ;;  %v1486_v56 = vunpack.c.l.bf16 %v1543_v42 }
 0x16c   : > { %1504 = vst [vmem:[%s2091_s4] sm:$0xff] %v1503_v44   ;;  %v1487_v57 = vunpack.c.h.bf16 %v1543_v42  ;;  %v1057_v58 = vadd.f32 %v2006_v3, %v1034_v43  ;;  %1547 = vst [vmem:[%s2091_s4 + $0x8] sm:$0xff] %v1508_v50   ;;  %v1058_v63 = vadd.f32 %v2006_v3, %v1035_v48  ;;  %v1490_v0 = vunpack.c.l.bf16 %v1544_v49 }
 0x16d   : > { %v1117_v61 = vmax.f32 %v1101_v51, 0.0  ;;  %v1118_v62 = vmax.f32 %v1102_v52, 0.0  ;;  %1548 = vst [vmem:[%s2091_s4 + $0x10] sm:$0xff] %v1513_v55   ;;  %v1103_v1 = vadd.f32 %v1486_v56, %v1055_v47  ;;  %v1491_v4 = vunpack.c.h.bf16 %v1544_v49 }
 0x16e   : > { %v1104_v2 = vadd.f32 %v1487_v57, %v1056_v53  ;;  %v1059_v5 = vadd.f32 %v2006_v3, %v1036_v54  ;;  %v1105_v9 = vadd.f32 %v1490_v0, %v1057_v58  ;;  %v1060_v10 = vadd.f32 %v2006_v3, %v1037_v59 }
 0x16f   : > { %v1518_v8 = vpack.c.bf16 %v1118_v62, %v1117_v61  ;;  %v1494_v11 = vunpack.c.l.bf16 %v1545_v60  ;;  %v1119_v13 = vmax.f32 %v1103_v1, 0.0  ;;  %v1106_v15 = vadd.f32 %v1491_v4, %v1058_v63 }
 0x170   : > { %v1120_v14 = vmax.f32 %v1104_v2, 0.0  ;;  %v1495_v16 = vunpack.c.h.bf16 %v1545_v60  ;;  %v1121_v17 = vmax.f32 %v1105_v9, 0.0  ;;  %v1061_v19 = vadd.f32 %v2006_v3, %v1038_v6 }
 0x171   : > { %1549 = vst [vmem:[%s2091_s4 + $0x18] sm:$0xff] %v1518_v8   ;;  %v1107_v18 = vadd.f32 %v1494_v11, %v1059_v5  ;;  %v1062_v20 = vadd.f32 %v2006_v3, %v1039_v7  ;;  %v1122_v22 = vmax.f32 %v1106_v15, 0.0  ;;  %v1498_v24 = vunpack.c.l.bf16 %v1546_v12 }
 0x172   : > { %v1523_v21 = vpack.c.bf16 %v1120_v14, %v1119_v13  ;;  %v1108_v23 = vadd.f32 %v1495_v16, %v1060_v10  ;;  %v1499_v26 = vunpack.c.h.bf16 %v1546_v12 }
 0x173   : > { %v1123_v25 = vmax.f32 %v1107_v18, 0.0  ;;  %v1528_v27 = vpack.c.bf16 %v1122_v22, %v1121_v17  ;;  %v1109_v29 = vadd.f32 %v1498_v24, %v1061_v19 }
 0x174   : > { %1550 = vst [vmem:[%s2091_s4 + $0x20] sm:$0xff] %v1523_v21   ;;  %v1124_v28 = vmax.f32 %v1108_v23, 0.0  ;;  %v1110_v30 = vadd.f32 %v1499_v26, %v1062_v20 }
 0x175   : > { %1551 = vst [vmem:[%s2091_s4 + $0x28] sm:$0xff] %v1528_v27   ;;  %v1125_v3 = vmax.f32 %v1109_v29, 0.0 }
 0x176   : > { %v1533_v31 = vpack.c.bf16 %v1124_v28, %v1123_v25  ;;  %v1126_v32 = vmax.f32 %v1110_v30, 0.0 }
 0x178   : > { %1552 = vst [vmem:[%s2091_s4 + $0x30] sm:$0xff] %v1533_v31   ;;  %v1538_v33 = vpack.c.bf16 %v1126_v32, %v1125_v3 }
 0x17a   : > { %1553 = vst [vmem:[%s2091_s4 + $0x38] sm:$0xff] %v1538_v33  }
 0x17b PF: > { %s14_s19 = sadd.s32 1, %s1803_s19   ;;  %s2092_s15 = smov %s1791_s16 }
 0x17c   : > { %p11_p12 = scmp.ge.s32.totalorder %s14_s19, 5   ;;  %s2093_s16 = smov %s1866_s23 }
 0x17d   : > { %s2094_s17 = smov %s1799_s18  ;;  %s2095_s18 = smov %s2097_s20 }
 0x17e   :  { %13 = sbr.rel (!%p11_p12) target bundleno = 3 (0x3), region = 120 }

// kernel: _lambda_.19
= control target key start
LH: loop header
LB: loop body
LE: loop exit
PB: predicated region body
PF: predicated region fallthrough
CT: control target
= control target key end

     0   :  { %s1253_s12 = smov 0   ;;  %s1255_s13 = smov 0   ;;  %s1395_s0 = inlined_call_operand.vmem [shape: bf16[32,1152], index: 0, kind: input, shape index: {}]   ;;  %s1396_s1 = inlined_call_operand.vmem [shape: bf16[1152,256], index: 1, kind: input, shape index: {}]   ;;  %s1397_s2 = inlined_call_operand.vmem [shape: f32[1,256], index: 2, kind: input, shape index: {}]   ;;  %s1398_s3 = inlined_call_operand.vmem [shape: bf16[32,256], index: 3, kind: output, shape index: {}]  }
   0x1   :  { %s1257_s14 = smov 0   ;;  %s1259_s15 = smov 0  }
   0x2   :  { %s1261_s16 = smov 0  }
   0x3 LB: > { %s25_s17 = sadd.s32 1, %s1225_s15  ;;  %p48_p1 = scmp.ne.s32.totalorder %s1217_s13, %s1213_s12  ;;  %s1229_s16 = sphi %s1261_s16, %s13_s16   ;;  %s1225_s15 = sphi %s1259_s15, %s1402_s15   ;;  %s1221_s14 = sphi %s1257_s14, %s1401_s14   ;;  %s1217_s13 = sphi %s1255_s13, %s1400_s13   ;;  %s1213_s12 = sphi %s1253_s12, %s1399_s12  }
   0x4   : > { %p26_p0 = scmp.ge.s32.totalorder %s25_s17, 3  ;;  %p49_p2 = scmp.eq.s32.totalorder %s1229_s16, 0 }
   0x5   : > { %s41_s19 = sadd.s32 1, %s1217_s13  ;;  %p984_p5 = scmp.ge.s32.totalorder %s1229_s16, 3 }
   0x6   : > { %s1404_s17 = smov (%p26_p0, %s25_s17), 0  ;;  %p50_p3 = por %p49_p2, %p48_p1 }
   0x7   : > { %s37_s18 = ssub.s32 %s1225_s15, %s1404_s17  ;;  %164 = sbr.rel (%p984_p5) target bundleno = 21 (0x15), region = 20 }
   0x8   : > { %p39_p4 = scmp.eq.s32.totalorder %s37_s18, 0 }
   0xa   : > { %s1288_s20 = scalar_select %p39_p4, %s1217_s13, %s41_s19  }
   0xc   : > { %167 = sbr.rel (!%p50_p3) target bundleno = 21 (0x15), region = 24  ;;  %s169_s21 = sand.u32 (%p50_p3), 1, %s1217_s13  }
   0xd   : > { %s1061_s22 = smul.u32 (%p50_p3), 12, %s1225_s15 }
   0xe   : > { %s1067_s23 = smul.u32 (%p50_p3), 48, %s169_s21 }
   0xf   : > { %s177_s26 = scalar_lea.vmem (%p50_p3), %s1395_s0, %s1061_s22 }
  0x10   : > { %v192_v0 = vld [vmem:[%s177_s26] sm:$0xff] (%p50_p3)  ;;  %v196_v2 = vld [vmem:[%s177_s26 + $0x48] sm:$0xff] (%p50_p3)  ;;  %s171_s27 = scalar_lea.vmem (%p50_p3), [#allocation3], %s1067_s23  ;;  %v990_v6 = vld [vmem:[%s177_s26 + $0x50] sm:$0xf] (%p50_p3) }
  0x11   : > { %v194_v1 = vld [vmem:[%s177_s26 + $0x24] sm:$0xff]  ;;  %193 = vst [vmem:[%s171_s27] sm:$0xff] %v192_v0  ;;  %197 = vst [vmem:[%s171_s27 + $0x18] sm:$0xff] %v196_v2  ;;  %v198_v3 = vld [vmem:[%s177_s26 + $0x6c] sm:$0xff] }
  0x12   : > { %195 = vst [vmem:[%s171_s27 + $0xc] sm:$0xff] %v194_v1  ;;  %v986_v4 = vld [vmem:[%s177_s26 + $0x8] sm:$0xf]  ;;  %v988_v5 = vld [vmem:[%s177_s26 + $0x2c] sm:$0xf]  ;;  %199 = vst [vmem:[%s171_s27 + $0x24] sm:$0xff] %v198_v3 }
  0x13   : > { %987 = vst [vmem:[%s171_s27 + $0x8] sm:$0xf] %v986_v4  ;;  %989 = vst [vmem:[%s171_s27 + $0x14] sm:$0xf] %v988_v5  ;;  %v992_v7 = vld [vmem:[%s177_s26 + $0x74] sm:$0xf] }
  0x14   : > { %991 = vst [vmem:[%s171_s27 + $0x20] sm:$0xf] %v990_v6  ;;  %993 = vst [vmem:[%s171_s27 + $0x2c] sm:$0xf] %v992_v7 }
  0x15 PF: > { %p994_p6 = scmp.ge.s32.totalorder %s1229_s16, 1  ;;  %p235_p7 = scmp.lt.s32.totalorder %s1229_s16, 4 }
  0x17   : > { %p236_p8 = pnand %p994_p6, %p235_p7 }
  0x18   : > { %s242_s28 = sand.u32 (!%p236_p8), 1, %s1213_s12   ;;  %s286_s29 = smul.u32 (!%p236_p8), 48, %s1221_s14 }
  0x19   : > { %239 = sbr.rel (%p236_p8) target bundleno = 333 (0x14d), region = 54  ;;  %p997_p10 = scmp.ne.s32.totalorder (!%p236_p8), %s1221_s14, 0 }
  0x1a   : > { %s1068_s30 = smul.u32 (!%p236_p8), 48, %s242_s28  ;;  %p288_p9 = scmp.lt.s32.totalorder (!%p236_p8), %s286_s29, 143 }
  0x1c   : > { %s1305_s8 = scalar_lea.vmem (!%p236_p8), [#allocation3], %s1068_s30 }
  0x1e   : > { %s1406_s29 = smov (!%p288_p9, %s286_s29), 143  ;;  %319 = sbr.rel (%p997_p10) target bundleno = 40 (0x28), region = 62 }
  0x1f   : > { %s1062_s4 = sshll.u32 %s1406_s29, 3 }
  0x20   : > { %s1303_s7 = scalar_lea.vmem %s1396_s1, %s1062_s4 }
  0x23   : > { %v1231_v8 = vmov 0.0  }
  0x24   : > { %320 = vst [vmem:[#allocation2 + $0x30] sm:$0xff] %v1231_v8  ;;  %321 = vst [vmem:[#allocation2] sm:$0xff] %v1231_v8 }
  0x25   : > { %322 = vst [vmem:[#allocation2 + $0x18] sm:$0xff] %v1231_v8  ;;  %323 = vst [vmem:[#allocation2 + $0x10] sm:$0xff] %v1231_v8 }
  0x26   : > { %324 = vst [vmem:[#allocation2 + $0x8] sm:$0xff] %v1231_v8  ;;  %325 = vst [vmem:[#allocation2 + $0x20] sm:$0xff] %v1231_v8 }
  0x27   : > { %326 = vst [vmem:[#allocation2 + $0x28] sm:$0xff] %v1231_v8  ;;  %327 = vst [vmem:[#allocation2 + $0x38] sm:$0xff] %v1231_v8 }
  0x28 PF: > { %v1111_v9 = vld [vmem:[%s1303_s7 + $0x74] ss:$8 sps:$4 sm:$0xff]   ;;  %v1113_v10 = vld [vmem:[%s1303_s7 + $0x70] ss:$8 sps:$4 sm:$0xff]   ;;  %v1232_v11 = vmov 0   ;;  %p1052_p11 = scmp.ne.s32.totalorder %s1221_s14, 2 }
  0x29   : > { %749 = vmatprep.mubr.bf16.mxu1 %v1232_v11  ;;  %664 = vmatprep.subr.bf16.mxu0 %v1111_v9  ;;  %v1114_v12 = vld [vmem:[%s1303_s7 + $0x64] ss:$8 sps:$4 sm:$0xff]   ;;  %v1116_v13 = vld [vmem:[%s1303_s7 + $0x60] ss:$8 sps:$4 sm:$0xff]   ;;  %v1117_v14 = vld [vmem:[%s1303_s7 + $0x54] ss:$8 sps:$4 sm:$0xff]  }
  0x2a   : > { %665 = vmatpush1.bf16.msra.mxu0 %v1113_v10  ;;  %v1119_v15 = vld [vmem:[%s1303_s7 + $0x50] ss:$8 sps:$4 sm:$0xff]   ;;  %v1120_v16 = vld [vmem:[%s1303_s7 + $0x44] ss:$8 sps:$4 sm:$0xff]   ;;  %v1132_v17 = vld [vmem:[%s1303_s7 + $0x174] ss:$8 sps:$4 sm:$0xff]  }
  0x2b   : > { %666 = vmatprep.subr.bf16.mxu0 %v1114_v12  ;;  %v1134_v18 = vld [vmem:[%s1303_s7 + $0x170] ss:$8 sps:$4 sm:$0xff]   ;;  %v1122_v19 = vld [vmem:[%s1303_s7 + $0x40] ss:$8 sps:$4 sm:$0xff]   ;;  %v1123_v20 = vld [vmem:[%s1303_s7 + $0x34] ss:$8 sps:$4 sm:$0xff]   ;;  %717 = vmatprep.subr.bf16.mxu1 %v1132_v17 }
  0x2c   : > { %v1138_v21 = vld [vmem:[%s1303_s7 + $0x164] ss:$8 sps:$4 sm:$0xff]   ;;  %718 = vmatpush1.bf16.msra.mxu1 %v1134_v18  ;;  %v1140_v22 = vld [vmem:[%s1303_s7 + $0x160] ss:$8 sps:$4 sm:$0xff]   ;;  %v1125_v23 = vld [vmem:[%s1303_s7 + $0x30] ss:$8 sps:$4 sm:$0xff]  }
  0x2d   : > { %719 = vmatprep.subr.bf16.mxu1 %v1138_v21  ;;  %v1144_v24 = vld [vmem:[%s1303_s7 + $0x154] ss:$8 sps:$4 sm:$0xff]   ;;  %v1126_v25 = vld [vmem:[%s1303_s7 + $0x24] ss:$8 sps:$4 sm:$0xff]   ;;  %v1146_v26 = vld [vmem:[%s1303_s7 + $0x150] ss:$8 sps:$4 sm:$0xff]  }
  0x2e   : > { %667 = vmatpush1.bf16.msra.mxu0 %v1116_v13  ;;  %v1150_v27 = vld [vmem:[%s1303_s7 + $0x144] ss:$8 sps:$4 sm:$0xff]   ;;  %v1128_v28 = vld [vmem:[%s1303_s7 + $0x20] ss:$8 sps:$4 sm:$0xff]   ;;  %v1129_v29 = vld [vmem:[%s1303_s7 + $0x14] ss:$8 sps:$4 sm:$0xff]  }
  0x2f   : > { %668 = vmatprep.subr.bf16.mxu0 %v1117_v14  ;;  %v1152_v30 = vld [vmem:[%s1303_s7 + $0x140] ss:$8 sps:$4 sm:$0xff]   ;;  %v1156_v31 = vld [vmem:[%s1303_s7 + $0x134] ss:$8 sps:$4 sm:$0xff]   ;;  %v1131_v32 = vld [vmem:[%s1303_s7 + $0x10] ss:$8 sps:$4 sm:$0xff]  }
  0x30   : > { %720 = vmatpush1.bf16.msra.mxu1 %v1140_v22  ;;  %v1135_v33 = vld [vmem:[%s1303_s7 + $0x4] ss:$8 sps:$4 sm:$0xff]   ;;  %v1158_v34 = vld [vmem:[%s1303_s7 + $0x130] ss:$8 sps:$4 sm:$0xff]   ;;  %v1137_v36 = vld [vmem:[%s1303_s7] ss:$8 sps:$4 sm:$0xff]  }
  0x31   : > { %721 = vmatprep.subr.bf16.mxu1 %v1144_v24  ;;  %v1162_v35 = vld [vmem:[%s1303_s7 + $0x124] ss:$8 sps:$4 sm:$0xff]   ;;  %v1141_v37 = vld [vmem:[%s1303_s7 + $0xf4] ss:$8 sps:$4 sm:$0xff]   ;;  %v1164_v38 = vld [vmem:[%s1303_s7 + $0x120] ss:$8 sps:$4 sm:$0xff]  }
  0x32   : > { %669 = vmatpush1.bf16.msra.mxu0 %v1119_v15  ;;  %v1168_v39 = vld [vmem:[%s1303_s7 + $0x114] ss:$8 sps:$4 sm:$0xff]   ;;  %v1143_v40 = vld [vmem:[%s1303_s7 + $0xf0] ss:$8 sps:$4 sm:$0xff]   ;;  %v1147_v41 = vld [vmem:[%s1303_s7 + $0xe4] ss:$8 sps:$4 sm:$0xff]  }
  0x33   : > { %670 = vmatprep.subr.bf16.mxu0 %v1120_v16  ;;  %v1170_v42 = vld [vmem:[%s1303_s7 + $0x110] ss:$8 sps:$4 sm:$0xff]   ;;  %v1174_v43 = vld [vmem:[%s1303_s7 + $0x104] ss:$8 sps:$4 sm:$0xff]   ;;  %v1149_v45 = vld [vmem:[%s1303_s7 + $0xe0] ss:$8 sps:$4 sm:$0xff]  }
  0x34   : > { %722 = vmatpush1.bf16.msra.mxu1 %v1146_v26  ;;  %v1186_v44 = vld [vmem:[%s1305_s8 + $0x4] ss:$12 sps:$4 sm:$0xff]   ;;  %v1180_v50 = vld [vmem:[%s1305_s8 + $0x8] ss:$12 sps:$4 sm:$0xff]   ;;  %v1187_v55 = vld [vmem:[%s1305_s8 + $0x20] ss:$12 sps:$4 sm:$0xff]  }
  0x35   : > { %723 = vmatprep.subr.bf16.mxu1 %v1150_v27  ;;  %v1153_v46 = vld [vmem:[%s1303_s7 + $0xd4] ss:$8 sps:$4 sm:$0xff]   ;;  %696 = vmatprep.mubr.bf16.mxu0 %v1186_v44  ;;  %v1176_v47 = vld [vmem:[%s1303_s7 + $0x100] ss:$8 sps:$4 sm:$0xff]   ;;  %v1155_v48 = vld [vmem:[%s1303_s7 + $0xd0] ss:$8 sps:$4 sm:$0xff]  }
  0x36   : > { %671 = vmatpush1.bf16.msra.mxu0 %v1122_v19  ;;  %v1159_v49 = vld [vmem:[%s1303_s7 + $0xc4] ss:$8 sps:$4 sm:$0xff]   ;;  %v1161_v51 = vld [vmem:[%s1303_s7 + $0xc0] ss:$8 sps:$4 sm:$0xff]   ;;  %v1165_v52 = vld [vmem:[%s1303_s7 + $0xb4] ss:$8 sps:$4 sm:$0xff]  }
  0x37   : > { %672 = vmatprep.subr.bf16.mxu0 %v1123_v20  ;;  %v1167_v53 = vld [vmem:[%s1303_s7 + $0xb0] ss:$8 sps:$4 sm:$0xff]   ;;  %v1171_v54 = vld [vmem:[%s1303_s7 + $0xa4] ss:$8 sps:$4 sm:$0xff]   ;;  %v1173_v56 = vld [vmem:[%s1303_s7 + $0xa0] ss:$8 sps:$4 sm:$0xff]  }
  0x38   : > { %724 = vmatpush1.bf16.msra.mxu1 %v1152_v30  ;;  %v1177_v57 = vld [vmem:[%s1303_s7 + $0x94] ss:$8 sps:$4 sm:$0xff]   ;;  %v1179_v58 = vld [vmem:[%s1303_s7 + $0x90] ss:$8 sps:$4 sm:$0xff]   ;;  %v1181_v59 = vld [vmem:[%s1303_s7 + $0x84] ss:$8 sps:$4 sm:$0xff]  }
  0x39   : > { %725 = vmatprep.subr.bf16.mxu1 %v1156_v31  ;;  %v1183_v60 = vld [vmem:[%s1303_s7 + $0x80] ss:$8 sps:$4 sm:$0xff]   ;;  %v328_v4 = vld [vmem:[#allocation2 + $0x30] sm:$0xff]  ;;  %v330_v12 = vld [vmem:[#allocation2 + $0x18] sm:$0xff] }
  0x3a   : > { %673 = vmatpush1.bf16.msra.mxu0 %v1125_v23  ;;  %v1184_v61 = vld [vmem:[%s1305_s8] ss:$12 sps:$4 sm:$0xff]   ;;  %v1188_v62 = vld [vmem:[%s1305_s8 + $0x1c] ss:$12 sps:$4 sm:$0xff]   ;;  %v1190_v63 = vld [vmem:[%s1305_s8 + $0x18] ss:$12 sps:$4 sm:$0xff]  }
  0x3b   : > { %674 = vmatprep.subr.bf16.mxu0 %v1126_v25  ;;  %v329_v7 = vld [vmem:[#allocation2] sm:$0xff]  ;;  %v331_v17 = vld [vmem:[#allocation2 + $0x10] sm:$0xff]  ;;  %v332_v21 = vld [vmem:[#allocation2 + $0x8] sm:$0xff] }
  0x3c   : > { %726 = vmatpush1.bf16.msra.mxu1 %v1158_v34  ;;  %v333_v26 = vld [vmem:[#allocation2 + $0x20] sm:$0xff]  ;;  %v334_v30 = vld [vmem:[#allocation2 + $0x28] sm:$0xff] }
  0x3d   : > { %727 = vmatprep.subr.bf16.mxu1 %v1162_v35  ;;  %v335_v35 = vld [vmem:[#allocation2 + $0x38] sm:$0xff] }
  0x3e   : > { %675 = vmatpush1.bf16.msra.mxu0 %v1128_v28 }
  0x3f   : > { %676 = vmatprep.subr.bf16.mxu0 %v1129_v29 }
  0x40   : > { %728 = vmatpush1.bf16.msra.mxu1 %v1164_v38 }
  0x41   : > { %729 = vmatprep.subr.bf16.mxu1 %v1168_v39 }
  0x42   : > { %677 = vmatpush1.bf16.msra.mxu0 %v1131_v32 }
  0x43   : > { %678 = vmatprep.subr.bf16.mxu0 %v1135_v33 }
  0x44   : > { %730 = vmatpush1.bf16.msra.mxu1 %v1170_v42 }
  0x45   : > { %731 = vmatprep.subr.bf16.mxu1 %v1174_v43 }
  0x46   : > { %679 = vmatpush1.bf16.msra.mxu0 %v1137_v36 }
  0x47   : > { %680 = vmatprep.subr.bf16.mxu0 %v1141_v37 }
  0x48   : > { %732 = vmatpush1.bf16.msra.mxu1 %v1176_v47 }
  0x4a   : > { %681 = vmatpush2.bf16.msra.mxu0 %v1143_v40 }
  0x4b   : > { %682 = vmatprep.subr.bf16.mxu0 %v1147_v41  ;;  %750 = vmatmul.mubr.bf16.vlgmr.msra.gmra.mxu1 %v1180_v50 }
  0x4c   : > { %759 = vmatprep.mubr.bf16.mxu1 %v1232_v11 }
  0x4e   : > { %683 = vmatpush2.bf16.msra.mxu0 %v1149_v45 }
  0x4f   : > { %684 = vmatprep.subr.bf16.mxu0 %v1153_v46 }
  0x52   : > { %685 = vmatpush2.bf16.msra.mxu0 %v1155_v48 }
  0x53   : > { %686 = vmatprep.subr.bf16.mxu0 %v1159_v49  ;;  %760 = vmatmul.mubr.bf16.gmra.mxu1 %v1187_v55 }
  0x56   : > { %687 = vmatpush2.bf16.msra.mxu0 %v1161_v51 }
  0x57   : > { %688 = vmatprep.subr.bf16.mxu0 %v1165_v52 }
  0x5a   : > { %689 = vmatpush2.bf16.msra.mxu0 %v1167_v53 }
  0x5b   : > { %690 = vmatprep.subr.bf16.mxu0 %v1171_v54 }
  0x5e   : > { %691 = vmatpush2.bf16.msra.mxu0 %v1173_v56 }
  0x5f   : > { %692 = vmatprep.subr.bf16.mxu0 %v1177_v57 }
  0x62   : > { %693 = vmatpush2.bf16.msra.mxu0 %v1179_v58 }
  0x63   : > { %694 = vmatprep.subr.bf16.mxu0 %v1181_v59 }
  0x66   : > { %695 = vmatpush2.bf16.msra.mxu0 %v1183_v60 }
  0x69   : > { %697 = vmatmul.mubr.bf16.vlgmr.msra.gmra.mxu0 %v1184_v61 }
  0x6a   : > { %706 = vmatprep.mubr.bf16.mxu0 %v1188_v62 }
  0x71   : > { %707 = vmatmul.mubr.bf16.gmra.mxu0 %v1190_v63 }
 0x10b   : > { %v751_v0 = vpop.f32.mrf.mxu1 }
 0x10d   : > { %v753_v1 = vpop.f32.mrf.mxu1 }
 0x10f   : > { %v755_v2 = vpop.f32.mrf.mxu1 }
 0x111   : > { %v757_v3 = vpop.f32.mrf.mxu1 }
 0x113   : > { %v761_v9 = vpop.f32.mrf.mxu1 }
 0x115   : > { %v763_v16 = vpop.f32.mrf.mxu1 }
 0x117   : > { %v765_v25 = vpop.f32.mrf.mxu1 }
 0x119   : > { %v767_v34 = vpop.f32.mrf.mxu1 }
 0x129   : > { %v698_v5 = vpop.f32.mrf.mxu0 }
 0x12a   : > { %v752_v6 = vadd.f32 %v751_v0, %v698_v5 }
 0x12b   : > { %v700_v8 = vpop.f32.mrf.mxu0 }
 0x12c   : > { %v770_v10 = vadd.f32 %v752_v6, %v328_v4  ;;  %v754_v11 = vadd.f32 %v753_v1, %v700_v8 }
 0x12d   : > { %v702_v13 = vpop.f32.mrf.mxu0 }
 0x12e   : > { %778 = vst [vmem:[#allocation2 + $0x30] sm:$0xff] %v770_v10  ;;  %v771_v14 = vadd.f32 %v754_v11, %v329_v7  ;;  %v756_v15 = vadd.f32 %v755_v2, %v702_v13 }
 0x12f   : > { %v704_v18 = vpop.f32.mrf.mxu0 }
 0x130   : > { %779 = vst [vmem:[#allocation2] sm:$0xff] %v771_v14  ;;  %v772_v19 = vadd.f32 %v756_v15, %v330_v12  ;;  %v758_v20 = vadd.f32 %v757_v3, %v704_v18 }
 0x131   : > { %v708_v22 = vpop.f32.mrf.mxu0 }
 0x132   : > { %780 = vst [vmem:[#allocation2 + $0x18] sm:$0xff] %v772_v19  ;;  %v773_v23 = vadd.f32 %v758_v20, %v331_v17  ;;  %v762_v24 = vadd.f32 %v761_v9, %v708_v22 }
 0x133   : > { %v710_v27 = vpop.f32.mrf.mxu0 }
 0x134   : > { %781 = vst [vmem:[#allocation2 + $0x10] sm:$0xff] %v773_v23  ;;  %v774_v28 = vadd.f32 %v762_v24, %v332_v21  ;;  %v764_v29 = vadd.f32 %v763_v16, %v710_v27 }
 0x135   : > { %v712_v31 = vpop.f32.mrf.mxu0 }
 0x136   : > { %782 = vst [vmem:[#allocation2 + $0x8] sm:$0xff] %v774_v28  ;;  %v775_v32 = vadd.f32 %v764_v29, %v333_v26  ;;  %v766_v33 = vadd.f32 %v765_v25, %v712_v31 }
 0x137   : > { %v714_v36 = vpop.f32.mrf.mxu0 }
 0x138   : > { %783 = vst [vmem:[#allocation2 + $0x20] sm:$0xff] %v775_v32  ;;  %v776_v37 = vadd.f32 %v766_v33, %v334_v30  ;;  %v768_v38 = vadd.f32 %v767_v34, %v714_v36  ;;  %789 = sbr.rel (%p1052_p11) target bundleno = 333 (0x14d), region = 66 }
 0x13a   : > { %784 = vst [vmem:[#allocation2 + $0x28] sm:$0xff] %v776_v37  ;;  %v777_v39 = vadd.f32 %v768_v38, %v335_v35 }
 0x13c   : > { %785 = vst [vmem:[#allocation2 + $0x38] sm:$0xff] %v777_v39 }
 0x13d   : > { %v800_v40 = vlaneseq  ;;  %v798_v42 = vld [vmem:[%s1397_s2] sm:$0x3]  ;;  %v790_v43 = vld [vmem:[#allocation2 + $0x30] sm:$0xff]  ;;  %v792_v47 = vld [vmem:[#allocation2 + $0x18] sm:$0xff] }
 0x13e   : > { %v791_v44 = vld [vmem:[#allocation2] sm:$0xff]  ;;  %v793_v48 = vld [vmem:[#allocation2 + $0x10] sm:$0xff]  ;;  %v794_v49 = vld [vmem:[#allocation2 + $0x8] sm:$0xff] }
 0x13f   : > { %v801_v41 = vshrl.u32 %v800_v40, 7  ;;  %v795_v52 = vld [vmem:[#allocation2 + $0x20] sm:$0xff] }
 0x141   : > { %v802_v45 = vsub.s32 0, %v801_v41  ;;  %v806_v46 = vsub.s32 1, %v801_v41  ;;  %v796_v53 = vld [vmem:[#allocation2 + $0x28] sm:$0xff] }
 0x143   : > { %v803_v50 = vrot.slane %v798_v42, %v802_v45  ;;  %v807_v51 = vrot.slane %v798_v42, %v806_v46  ;;  %v797_v54 = vld [vmem:[#allocation2 + $0x38] sm:$0xff] }
 0x145   : > { %v810_v55 = vadd.f32 %v803_v50, %v790_v43  ;;  %v811_v56 = vadd.f32 %v807_v51, %v791_v44  ;;  %v812_v57 = vadd.f32 %v803_v50, %v792_v47  ;;  %v813_v58 = vadd.f32 %v807_v51, %v793_v48 }
 0x146   : > { %v814_v59 = vadd.f32 %v803_v50, %v794_v49  ;;  %v815_v60 = vadd.f32 %v807_v51, %v795_v52  ;;  %v816_v61 = vadd.f32 %v803_v50, %v796_v53  ;;  %v817_v62 = vadd.f32 %v807_v51, %v797_v54 }
 0x147   : > { %v818_v63 = vmax.f32 %v810_v55, 0.0  ;;  %v819_v0 = vmax.f32 %v811_v56, 0.0  ;;  %v820_v1 = vmax.f32 %v812_v57, 0.0  ;;  %v821_v2 = vmax.f32 %v813_v58, 0.0 }
 0x148   : > { %v822_v3 = vmax.f32 %v814_v59, 0.0  ;;  %v823_v4 = vmax.f32 %v815_v60, 0.0  ;;  %v824_v5 = vmax.f32 %v816_v61, 0.0  ;;  %v825_v6 = vmax.f32 %v817_v62, 0.0 }
 0x149   : > { %v1063_v7 = vpack.c.bf16 %v819_v0, %v818_v63  ;;  %v1064_v8 = vpack.c.bf16 %v821_v2, %v820_v1 }
 0x14a   : > { %v1065_v9 = vpack.c.bf16 %v823_v4, %v822_v3  ;;  %v1066_v10 = vpack.c.bf16 %v825_v6, %v824_v5 }
 0x14b   : > { %850 = vst [vmem:[%s1398_s3] sm:$0xff] %v1063_v7  ;;  %851 = vst [vmem:[%s1398_s3 + $0x8] sm:$0xff] %v1064_v8 }
 0x14c   : > { %852 = vst [vmem:[%s1398_s3 + $0x10] sm:$0xff] %v1065_v9  ;;  %853 = vst [vmem:[%s1398_s3 + $0x18] sm:$0xff] %v1066_v10 }
 0x14d PF: > { %s13_s16 = sadd.s32 1, %s1229_s16   ;;  %s1399_s12 = smov %s1217_s13 }
 0x14e   : > { %p10_p12 = scmp.ge.s32.totalorder %s13_s16, 5   ;;  %s1400_s13 = smov %s1288_s20 }
 0x14f   : > { %s1401_s14 = smov %s1225_s15  ;;  %s1402_s15 = smov %s1404_s17 }
 0x150   :  { %12 = sbr.rel (!%p10_p12) target bundleno = 3 (0x3), region = 113 }

// kernel: _lambda_.21
= control target key start
LH: loop header
LB: loop body
LE: loop exit
PB: predicated region body
PF: predicated region fallthrough
CT: control target
= control target key end

     0   :  { %s1892_s15 = smov 0   ;;  %s1894_s16 = smov 0   ;;  %s2098_s0 = inlined_call_operand.vmem [shape: bf16[32,2304], index: 0, kind: input, shape index: {}]   ;;  %s2099_s1 = inlined_call_operand.vmem [shape: bf16[2304,256], index: 1, kind: input, shape index: {}]   ;;  %s2100_s2 = inlined_call_operand.vmem [shape: f32[1,256], index: 2, kind: input, shape index: {}]   ;;  %s2101_s3 = inlined_call_operand.vmem [shape: bf16[32,256], index: 3, kind: input, shape index: {}]   ;;  %s2102_s4 = inlined_call_operand.vmem [shape: bf16[32,256], index: 4, kind: output, shape index: {}]  }
   0x1   :  { %s1896_s17 = smov 0   ;;  %s1898_s18 = smov 0  }
   0x2   :  { %s1900_s19 = smov 0  }
   0x3 LB: > { %s26_s20 = sadd.s32 1, %s1860_s18  ;;  %p49_p1 = scmp.ne.s32.totalorder %s1852_s16, %s1848_s15  ;;  %s1864_s19 = sphi %s1900_s19, %s14_s19   ;;  %s1860_s18 = sphi %s1898_s18, %s2106_s18   ;;  %s1856_s17 = sphi %s1896_s17, %s2105_s17   ;;  %s1852_s16 = sphi %s1894_s16, %s2104_s16   ;;  %s1848_s15 = sphi %s1892_s15, %s2103_s15  }
   0x4   : > { %p27_p0 = scmp.ge.s32.totalorder %s26_s20, 3  ;;  %p50_p2 = scmp.eq.s32.totalorder %s1864_s19, 0 }
   0x5   : > { %s42_s22 = sadd.s32 1, %s1852_s16  ;;  %p1460_p5 = scmp.ge.s32.totalorder %s1864_s19, 3 }
   0x6   : > { %s2108_s20 = smov (%p27_p0, %s26_s20), 0  ;;  %p51_p3 = por %p50_p2, %p49_p1 }
   0x7   : > { %s38_s21 = ssub.s32 %s1860_s18, %s2108_s20  ;;  %208 = sbr.rel (%p1460_p5) target bundleno = 23 (0x17), region = 24 }
   0x8   : > { %p40_p4 = scmp.eq.s32.totalorder %s38_s21, 0 }
   0xa   : > { %s1927_s23 = scalar_select %p40_p4, %s1852_s16, %s42_s22  }
   0xc   : > { %211 = sbr.rel (!%p51_p3) target bundleno = 23 (0x17), region = 28  ;;  %s213_s24 = sand.u32 (%p51_p3), 1, %s1852_s16  }
   0xd   : > { %s1583_s25 = smul.u32 (%p51_p3), 24, %s1860_s18 }
   0xe   : > { %s1621_s26 = smul.u32 (%p51_p3), 96, %s213_s24 }
   0xf   : > { %s221_s29 = scalar_lea.vmem (%p51_p3), %s2098_s0, %s1583_s25 }
  0x10   : > { %v234_v0 = vld [vmem:[%s221_s29] sm:$0xff] (%p51_p3)  ;;  %v236_v1 = vld [vmem:[%s221_s29 + $0x8] sm:$0xff] (%p51_p3)  ;;  %v238_v2 = vld [vmem:[%s221_s29 + $0x10] sm:$0xff] (%p51_p3)  ;;  %s215_s30 = scalar_lea.vmem (%p51_p3), [#allocation3], %s1621_s26 }
  0x11   : > { %235 = vst [vmem:[%s215_s30] sm:$0xff] %v234_v0  ;;  %237 = vst [vmem:[%s215_s30 + $0x8] sm:$0xff] %v236_v1  ;;  %v240_v3 = vld [vmem:[%s221_s29 + $0x48] sm:$0xff]  ;;  %v242_v4 = vld [vmem:[%s221_s29 + $0x50] sm:$0xff] }
  0x12   : > { %239 = vst [vmem:[%s215_s30 + $0x10] sm:$0xff] %v238_v2  ;;  %v244_v5 = vld [vmem:[%s221_s29 + $0x58] sm:$0xff]  ;;  %241 = vst [vmem:[%s215_s30 + $0x18] sm:$0xff] %v240_v3  ;;  %v246_v6 = vld [vmem:[%s221_s29 + $0x90] sm:$0xff] }
  0x13   : > { %243 = vst [vmem:[%s215_s30 + $0x20] sm:$0xff] %v242_v4  ;;  %245 = vst [vmem:[%s215_s30 + $0x28] sm:$0xff] %v244_v5  ;;  %v248_v7 = vld [vmem:[%s221_s29 + $0x98] sm:$0xff]  ;;  %v250_v8 = vld [vmem:[%s221_s29 + $0xa0] sm:$0xff] }
  0x14   : > { %247 = vst [vmem:[%s215_s30 + $0x30] sm:$0xff] %v246_v6  ;;  %249 = vst [vmem:[%s215_s30 + $0x38] sm:$0xff] %v248_v7  ;;  %v252_v9 = vld [vmem:[%s221_s29 + $0xd8] sm:$0xff]  ;;  %v254_v10 = vld [vmem:[%s221_s29 + $0xe0] sm:$0xff] }
  0x15   : > { %251 = vst [vmem:[%s215_s30 + $0x40] sm:$0xff] %v250_v8  ;;  %v256_v11 = vld [vmem:[%s221_s29 + $0xe8] sm:$0xff]  ;;  %253 = vst [vmem:[%s215_s30 + $0x48] sm:$0xff] %v252_v9 }
  0x16   : > { %255 = vst [vmem:[%s215_s30 + $0x50] sm:$0xff] %v254_v10  ;;  %257 = vst [vmem:[%s215_s30 + $0x58] sm:$0xff] %v256_v11 }
  0x17 PF: > { %p1462_p6 = scmp.ge.s32.totalorder %s1864_s19, 1  ;;  %p277_p7 = scmp.lt.s32.totalorder %s1864_s19, 4 }
  0x19   : > { %p278_p8 = pnand %p1462_p6, %p277_p7 }
  0x1a   : > { %s284_s5 = sand.u32 (!%p278_p8), 1, %s1848_s15   ;;  %s340_s6 = smul.u32 (!%p278_p8), 96, %s1856_s17 }
  0x1b   : > { %281 = sbr.rel (%p278_p8) target bundleno = 394 (0x18a), region = 55  ;;  %p1465_p10 = scmp.ne.s32.totalorder (!%p278_p8), %s1856_s17, 0 }
  0x1c   : > { %s1622_s7 = smul.u32 (!%p278_p8), 96, %s284_s5  ;;  %p342_p9 = scmp.lt.s32.totalorder (!%p278_p8), %s340_s6, 287 }
  0x1e   : > { %s1944_s12 = scalar_lea.vmem (!%p278_p8), [#allocation3], %s1622_s7 }
  0x20   : > { %s2110_s6 = smov (!%p342_p9, %s340_s6), 287  ;;  %384 = sbr.rel (%p1465_p10) target bundleno = 42 (0x2a), region = 63 }
  0x21   : > { %s1584_s8 = sshll.u32 %s2110_s6, 3 }
  0x22   : > { %s1942_s11 = scalar_lea.vmem %s2099_s1, %s1584_s8 }
  0x25   : > { %v1866_v12 = vmov 0.0  }
  0x26   : > { %385 = vst [vmem:[#allocation2 + $0x30] sm:$0xff] %v1866_v12  ;;  %386 = vst [vmem:[#allocation2] sm:$0xff] %v1866_v12 }
  0x27   : > { %387 = vst [vmem:[#allocation2 + $0x18] sm:$0xff] %v1866_v12  ;;  %388 = vst [vmem:[#allocation2 + $0x10] sm:$0xff] %v1866_v12 }
  0x28   : > { %389 = vst [vmem:[#allocation2 + $0x8] sm:$0xff] %v1866_v12  ;;  %390 = vst [vmem:[#allocation2 + $0x20] sm:$0xff] %v1866_v12 }
  0x29   : > { %391 = vst [vmem:[#allocation2 + $0x28] sm:$0xff] %v1866_v12  ;;  %392 = vst [vmem:[#allocation2 + $0x38] sm:$0xff] %v1866_v12 }
  0x2a PF: > { %v1664_v13 = vld [vmem:[%s1942_s11 + $0x74] ss:$8 sps:$4 sm:$0xff]   ;;  %v1668_v15 = vld [vmem:[%s1942_s11 + $0x70] ss:$8 sps:$4 sm:$0xff]   ;;  %v1670_v17 = vld [vmem:[%s1942_s11 + $0x64] ss:$8 sps:$4 sm:$0xff]  }
  0x2b   : > { %v1666_v14 = vld [vmem:[%s1942_s11 + $0x174] ss:$8 sps:$4 sm:$0xff]   ;;  %1049 = vmatprep.subr.bf16.mxu0 %v1664_v13  ;;  %v1669_v16 = vld [vmem:[%s1942_s11 + $0x170] ss:$8 sps:$4 sm:$0xff]   ;;  %v1672_v18 = vld [vmem:[%s1942_s11 + $0x164] ss:$8 sps:$4 sm:$0xff]  }
  0x2c   : > { %1102 = vmatprep.subr.bf16.mxu1 %v1666_v14  ;;  %1050 = vmatpush1.bf16.msra.mxu0 %v1668_v15  ;;  %v1674_v19 = vld [vmem:[%s1942_s11 + $0x60] ss:$8 sps:$4 sm:$0xff]   ;;  %v1676_v21 = vld [vmem:[%s1942_s11 + $0x54] ss:$8 sps:$4 sm:$0xff]   ;;  %v1680_v23 = vld [vmem:[%s1942_s11 + $0x50] ss:$8 sps:$4 sm:$0xff]  }
  0x2d   : > { %1103 = vmatpush1.bf16.msra.mxu1 %v1669_v16  ;;  %1051 = vmatprep.subr.bf16.mxu0 %v1670_v17  ;;  %v1675_v20 = vld [vmem:[%s1942_s11 + $0x160] ss:$8 sps:$4 sm:$0xff]   ;;  %v1678_v22 = vld [vmem:[%s1942_s11 + $0x154] ss:$8 sps:$4 sm:$0xff]   ;;  %v1681_v24 = vld [vmem:[%s1942_s11 + $0x150] ss:$8 sps:$4 sm:$0xff]  }
  0x2e   : > { %1104 = vmatprep.subr.bf16.mxu1 %v1672_v18  ;;  %v1682_v25 = vld [vmem:[%s1942_s11 + $0x44] ss:$8 sps:$4 sm:$0xff]   ;;  %v1686_v27 = vld [vmem:[%s1942_s11 + $0x40] ss:$8 sps:$4 sm:$0xff]   ;;  %v1688_v29 = vld [vmem:[%s1942_s11 + $0x34] ss:$8 sps:$4 sm:$0xff]  }
  0x2f   : > { %v1684_v26 = vld [vmem:[%s1942_s11 + $0x144] ss:$8 sps:$4 sm:$0xff]   ;;  %v1687_v28 = vld [vmem:[%s1942_s11 + $0x140] ss:$8 sps:$4 sm:$0xff]   ;;  %v1690_v30 = vld [vmem:[%s1942_s11 + $0x134] ss:$8 sps:$4 sm:$0xff]  }
  0x30   : > { %1052 = vmatpush1.bf16.msra.mxu0 %v1674_v19  ;;  %v1692_v31 = vld [vmem:[%s1942_s11 + $0x30] ss:$8 sps:$4 sm:$0xff]   ;;  %v1694_v33 = vld [vmem:[%s1942_s11 + $0x24] ss:$8 sps:$4 sm:$0xff]   ;;  %v1698_v35 = vld [vmem:[%s1942_s11 + $0x20] ss:$8 sps:$4 sm:$0xff]  }
  0x31   : > { %1105 = vmatpush1.bf16.msra.mxu1 %v1675_v20  ;;  %1053 = vmatprep.subr.bf16.mxu0 %v1676_v21  ;;  %v1693_v32 = vld [vmem:[%s1942_s11 + $0x130] ss:$8 sps:$4 sm:$0xff]   ;;  %v1696_v34 = vld [vmem:[%s1942_s11 + $0x124] ss:$8 sps:$4 sm:$0xff]   ;;  %v1699_v36 = vld [vmem:[%s1942_s11 + $0x120] ss:$8 sps:$4 sm:$0xff]  }
  0x32   : > { %1106 = vmatprep.subr.bf16.mxu1 %v1678_v22  ;;  %v1700_v37 = vld [vmem:[%s1942_s11 + $0x14] ss:$8 sps:$4 sm:$0xff]   ;;  %v1704_v39 = vld [vmem:[%s1942_s11 + $0x10] ss:$8 sps:$4 sm:$0xff]   ;;  %v1706_v41 = vld [vmem:[%s1942_s11 + $0x4] ss:$8 sps:$4 sm:$0xff]  }
  0x33   : > { %v1702_v38 = vld [vmem:[%s1942_s11 + $0x114] ss:$8 sps:$4 sm:$0xff]   ;;  %v1705_v40 = vld [vmem:[%s1942_s11 + $0x110] ss:$8 sps:$4 sm:$0xff]   ;;  %v1708_v42 = vld [vmem:[%s1942_s11 + $0x104] ss:$8 sps:$4 sm:$0xff]  }
  0x34   : > { %1054 = vmatpush1.bf16.msra.mxu0 %v1680_v23  ;;  %v1710_v43 = vld [vmem:[%s1942_s11] ss:$8 sps:$4 sm:$0xff]   ;;  %v1712_v45 = vld [vmem:[%s1942_s11 + $0xf4] ss:$8 sps:$4 sm:$0xff]   ;;  %v1716_v47 = vld [vmem:[%s1942_s11 + $0xf0] ss:$8 sps:$4 sm:$0xff]  }
  0x35   : > { %1107 = vmatpush1.bf16.msra.mxu1 %v1681_v24  ;;  %1055 = vmatprep.subr.bf16.mxu0 %v1682_v25  ;;  %v1711_v44 = vld [vmem:[%s1942_s11 + $0x100] ss:$8 sps:$4 sm:$0xff]   ;;  %v1714_v46 = vld [vmem:[%s1942_s11 + $0x1f4] ss:$8 sps:$4 sm:$0xff]   ;;  %v1717_v48 = vld [vmem:[%s1942_s11 + $0x1f0] ss:$8 sps:$4 sm:$0xff]  }
  0x36   : > { %1108 = vmatprep.subr.bf16.mxu1 %v1684_v26  ;;  %v1718_v49 = vld [vmem:[%s1942_s11 + $0xe4] ss:$8 sps:$4 sm:$0xff]   ;;  %v1722_v51 = vld [vmem:[%s1942_s11 + $0xe0] ss:$8 sps:$4 sm:$0xff]   ;;  %v1724_v53 = vld [vmem:[%s1942_s11 + $0xd4] ss:$8 sps:$4 sm:$0xff]  }
  0x37   : > { %v1720_v50 = vld [vmem:[%s1942_s11 + $0x1e4] ss:$8 sps:$4 sm:$0xff]   ;;  %v1723_v52 = vld [vmem:[%s1942_s11 + $0x1e0] ss:$8 sps:$4 sm:$0xff]   ;;  %v1726_v54 = vld [vmem:[%s1942_s11 + $0x1d4] ss:$8 sps:$4 sm:$0xff]  }
  0x38   : > { %1056 = vmatpush1.bf16.msra.mxu0 %v1686_v27  ;;  %v1728_v55 = vld [vmem:[%s1942_s11 + $0xd0] ss:$8 sps:$4 sm:$0xff]   ;;  %v1730_v57 = vld [vmem:[%s1942_s11 + $0xc4] ss:$8 sps:$4 sm:$0xff]   ;;  %v1734_v59 = vld [vmem:[%s1942_s11 + $0xc0] ss:$8 sps:$4 sm:$0xff]  }
  0x39   : > { %1109 = vmatpush1.bf16.msra.mxu1 %v1687_v28  ;;  %1057 = vmatprep.subr.bf16.mxu0 %v1688_v29  ;;  %v1729_v56 = vld [vmem:[%s1942_s11 + $0x1d0] ss:$8 sps:$4 sm:$0xff]   ;;  %v1732_v58 = vld [vmem:[%s1942_s11 + $0x1c4] ss:$8 sps:$4 sm:$0xff]   ;;  %v1735_v60 = vld [vmem:[%s1942_s11 + $0x1c0] ss:$8 sps:$4 sm:$0xff]  }
  0x3a   : > { %1110 = vmatprep.subr.bf16.mxu1 %v1690_v30  ;;  %v1736_v61 = vld [vmem:[%s1942_s11 + $0xb4] ss:$8 sps:$4 sm:$0xff]   ;;  %v1765_v0 = vld [vmem:[%s1944_s12 + $0xc] ss:$24 sps:$4 sm:$0xff]   ;;  %v1740_v1 = vld [vmem:[%s1942_s11 + $0xb0] ss:$8 sps:$4 sm:$0xff]  }
  0x3b   : > { %v1762_v62 = vld [vmem:[%s1944_s12 + $0x4] ss:$24 sps:$4 sm:$0xff]   ;;  %v1741_v2 = vld [vmem:[%s1942_s11 + $0x1b0] ss:$8 sps:$4 sm:$0xff]   ;;  %1134 = vmatprep.mubr.bf16.mxu1 %v1765_v0  ;;  %v1746_v5 = vld [vmem:[%s1942_s11 + $0xa0] ss:$8 sps:$4 sm:$0xff]  }
  0x3c   : > { %1058 = vmatpush1.bf16.msra.mxu0 %v1692_v31  ;;  %v1738_v63 = vld [vmem:[%s1942_s11 + $0x1b4] ss:$8 sps:$4 sm:$0xff]   ;;  %1081 = vmatprep.mubr.bf16.mxu0 %v1762_v62  ;;  %v1742_v3 = vld [vmem:[%s1942_s11 + $0xa4] ss:$8 sps:$4 sm:$0xff]   ;;  %v1747_v6 = vld [vmem:[%s1942_s11 + $0x1a0] ss:$8 sps:$4 sm:$0xff]  }
  0x3d   : > { %1111 = vmatpush1.bf16.msra.mxu1 %v1693_v32  ;;  %1059 = vmatprep.subr.bf16.mxu0 %v1694_v33  ;;  %v1744_v4 = vld [vmem:[%s1942_s11 + $0x1a4] ss:$8 sps:$4 sm:$0xff]   ;;  %v1748_v7 = vld [vmem:[%s1942_s11 + $0x94] ss:$8 sps:$4 sm:$0xff]   ;;  %v1752_v9 = vld [vmem:[%s1942_s11 + $0x90] ss:$8 sps:$4 sm:$0xff]  }
  0x3e   : > { %1112 = vmatprep.subr.bf16.mxu1 %v1696_v34  ;;  %v1750_v8 = vld [vmem:[%s1942_s11 + $0x194] ss:$8 sps:$4 sm:$0xff]   ;;  %v1753_v10 = vld [vmem:[%s1942_s11 + $0x190] ss:$8 sps:$4 sm:$0xff]   ;;  %v1754_v11 = vld [vmem:[%s1942_s11 + $0x84] ss:$8 sps:$4 sm:$0xff]  }
  0x3f   : > { %v1756_v12 = vld [vmem:[%s1942_s11 + $0x184] ss:$8 sps:$4 sm:$0xff]   ;;  %v1758_v13 = vld [vmem:[%s1942_s11 + $0x80] ss:$8 sps:$4 sm:$0xff]   ;;  %v1768_v15 = vld [vmem:[%s1942_s11 + $0x274] ss:$8 sps:$4 sm:$0xff]  }
  0x40   : > { %1060 = vmatpush1.bf16.msra.mxu0 %v1698_v35  ;;  %v1759_v14 = vld [vmem:[%s1942_s11 + $0x180] ss:$8 sps:$4 sm:$0xff]   ;;  %v1766_v18 = vld [vmem:[%s1942_s11 + $0x270] ss:$8 sps:$4 sm:$0xff]   ;;  %v1771_v19 = vld [vmem:[%s1942_s11 + $0x264] ss:$8 sps:$4 sm:$0xff]  }
  0x41   : > { %1113 = vmatpush1.bf16.msra.mxu1 %v1699_v36  ;;  %1061 = vmatprep.subr.bf16.mxu0 %v1700_v37  ;;  %v1760_v16 = vld [vmem:[%s1944_s12] ss:$24 sps:$4 sm:$0xff]   ;;  %v1805_v20 = vld [vmem:[%s1944_s12 + $0x34] ss:$24 sps:$4 sm:$0xff]   ;;  %v1809_v24 = vld [vmem:[%s1944_s12 + $0x30] ss:$24 sps:$4 sm:$0xff]  }
  0x42   : > { %1114 = vmatprep.subr.bf16.mxu1 %v1702_v38  ;;  %v1763_v17 = vld [vmem:[%s1944_s12 + $0x8] ss:$24 sps:$4 sm:$0xff]   ;;  %v1807_v21 = vld [vmem:[%s1944_s12 + $0x3c] ss:$24 sps:$4 sm:$0xff]   ;;  %v1810_v25 = vld [vmem:[%s1944_s12 + $0x38] ss:$24 sps:$4 sm:$0xff]  }
  0x43   : > { %v1769_v22 = vld [vmem:[%s1942_s11 + $0x260] ss:$8 sps:$4 sm:$0xff]   ;;  %v1774_v23 = vld [vmem:[%s1942_s11 + $0x254] ss:$8 sps:$4 sm:$0xff]   ;;  %v1772_v26 = vld [vmem:[%s1942_s11 + $0x250] ss:$8 sps:$4 sm:$0xff]  }
  0x44   : > { %1062 = vmatpush1.bf16.msra.mxu0 %v1704_v39  ;;  %v1777_v27 = vld [vmem:[%s1942_s11 + $0x244] ss:$8 sps:$4 sm:$0xff]   ;;  %v1775_v30 = vld [vmem:[%s1942_s11 + $0x240] ss:$8 sps:$4 sm:$0xff]   ;;  %v1780_v31 = vld [vmem:[%s1942_s11 + $0x234] ss:$8 sps:$4 sm:$0xff]  }
  0x45   : > { %1115 = vmatpush1.bf16.msra.mxu1 %v1705_v40  ;;  %1063 = vmatprep.subr.bf16.mxu0 %v1706_v41  ;;  %v1822_v28 = vld [vmem:[%s1944_s12 + $0x14] ss:$24 sps:$4 sm:$0xff]   ;;  %v1825_v29 = vld [vmem:[%s1944_s12 + $0x44] ss:$24 sps:$4 sm:$0xff]   ;;  %v1778_v32 = vld [vmem:[%s1942_s11 + $0x230] ss:$8 sps:$4 sm:$0xff]  }
  0x46   : > { %1116 = vmatprep.subr.bf16.mxu1 %v1708_v42  ;;  %v1783_v33 = vld [vmem:[%s1942_s11 + $0x224] ss:$8 sps:$4 sm:$0xff]   ;;  %v1781_v34 = vld [vmem:[%s1942_s11 + $0x220] ss:$8 sps:$4 sm:$0xff]   ;;  %v1786_v35 = vld [vmem:[%s1942_s11 + $0x214] ss:$8 sps:$4 sm:$0xff]  }
  0x47   : > { %v1784_v36 = vld [vmem:[%s1942_s11 + $0x210] ss:$8 sps:$4 sm:$0xff]   ;;  %v1789_v37 = vld [vmem:[%s1942_s11 + $0x204] ss:$8 sps:$4 sm:$0xff]   ;;  %v1787_v38 = vld [vmem:[%s1942_s11 + $0x200] ss:$8 sps:$4 sm:$0xff]  }
  0x48   : > { %1064 = vmatpush1.bf16.msra.mxu0 %v1710_v43  ;;  %v1792_v39 = vld [vmem:[%s1942_s11 + $0x2f4] ss:$8 sps:$4 sm:$0xff]   ;;  %v1790_v40 = vld [vmem:[%s1942_s11 + $0x2f0] ss:$8 sps:$4 sm:$0xff]   ;;  %v1795_v41 = vld [vmem:[%s1942_s11 + $0x2e4] ss:$8 sps:$4 sm:$0xff]  }
  0x49   : > { %1117 = vmatpush1.bf16.msra.mxu1 %v1711_v44  ;;  %1065 = vmatprep.subr.bf16.mxu0 %v1712_v45  ;;  %v1793_v42 = vld [vmem:[%s1942_s11 + $0x2e0] ss:$8 sps:$4 sm:$0xff]   ;;  %v1798_v43 = vld [vmem:[%s1942_s11 + $0x2d4] ss:$8 sps:$4 sm:$0xff]   ;;  %v1796_v44 = vld [vmem:[%s1942_s11 + $0x2d0] ss:$8 sps:$4 sm:$0xff]  }
  0x4a   : > { %1118 = vmatprep.subr.bf16.mxu1 %v1714_v46  ;;  %v1801_v45 = vld [vmem:[%s1942_s11 + $0x2c4] ss:$8 sps:$4 sm:$0xff]   ;;  %v1799_v46 = vld [vmem:[%s1942_s11 + $0x2c0] ss:$8 sps:$4 sm:$0xff]   ;;  %p1574_p11 = scmp.ne.s32.totalorder %s1856_s17, 2 }
  0x4c   : > { %1066 = vmatpush2.bf16.msra.mxu0 %v1716_v47  ;;  %v1804_v47 = vld [vmem:[%s1942_s11 + $0x2b4] ss:$8 sps:$4 sm:$0xff]  }
  0x4d   : > { %1119 = vmatpush2.bf16.msra.mxu1 %v1717_v48  ;;  %1067 = vmatprep.subr.bf16.mxu0 %v1718_v49  ;;  %v1802_v48 = vld [vmem:[%s1942_s11 + $0x2b0] ss:$8 sps:$4 sm:$0xff]   ;;  %v1813_v49 = vld [vmem:[%s1942_s11 + $0x2a4] ss:$8 sps:$4 sm:$0xff]  }
  0x4e   : > { %1120 = vmatprep.subr.bf16.mxu1 %v1720_v50  ;;  %v1811_v50 = vld [vmem:[%s1942_s11 + $0x2a0] ss:$8 sps:$4 sm:$0xff]  }
  0x50   : > { %1068 = vmatpush2.bf16.msra.mxu0 %v1722_v51  ;;  %v1816_v51 = vld [vmem:[%s1942_s11 + $0x294] ss:$8 sps:$4 sm:$0xff]  }
  0x51   : > { %1121 = vmatpush2.bf16.msra.mxu1 %v1723_v52  ;;  %1069 = vmatprep.subr.bf16.mxu0 %v1724_v53  ;;  %v1814_v52 = vld [vmem:[%s1942_s11 + $0x290] ss:$8 sps:$4 sm:$0xff]   ;;  %v1819_v53 = vld [vmem:[%s1942_s11 + $0x284] ss:$8 sps:$4 sm:$0xff]  }
  0x52   : > { %1122 = vmatprep.subr.bf16.mxu1 %v1726_v54  ;;  %v1817_v54 = vld [vmem:[%s1942_s11 + $0x280] ss:$8 sps:$4 sm:$0xff]  }
  0x54   : > { %1070 = vmatpush2.bf16.msra.mxu0 %v1728_v55  ;;  %v1820_v55 = vld [vmem:[%s1944_s12 + $0x10] ss:$24 sps:$4 sm:$0xff]  }
  0x55   : > { %1123 = vmatpush2.bf16.msra.mxu1 %v1729_v56  ;;  %1071 = vmatprep.subr.bf16.mxu0 %v1730_v57  ;;  %v1823_v56 = vld [vmem:[%s1944_s12 + $0x40] ss:$24 sps:$4 sm:$0xff]  }
  0x56   : > { %1124 = vmatprep.subr.bf16.mxu1 %v1732_v58 }
  0x58   : > { %1072 = vmatpush2.bf16.msra.mxu0 %v1734_v59 }
  0x59   : > { %1125 = vmatpush2.bf16.msra.mxu1 %v1735_v60  ;;  %1073 = vmatprep.subr.bf16.mxu0 %v1736_v61 }
  0x5a   : > { %1126 = vmatprep.subr.bf16.mxu1 %v1738_v63 }
  0x5c   : > { %1074 = vmatpush2.bf16.msra.mxu0 %v1740_v1 }
  0x5d   : > { %1127 = vmatpush2.bf16.msra.mxu1 %v1741_v2  ;;  %1075 = vmatprep.subr.bf16.mxu0 %v1742_v3 }
  0x5e   : > { %1128 = vmatprep.subr.bf16.mxu1 %v1744_v4 }
  0x60   : > { %1076 = vmatpush2.bf16.msra.mxu0 %v1746_v5 }
  0x61   : > { %1129 = vmatpush2.bf16.msra.mxu1 %v1747_v6  ;;  %1077 = vmatprep.subr.bf16.mxu0 %v1748_v7 }
  0x62   : > { %1130 = vmatprep.subr.bf16.mxu1 %v1750_v8 }
  0x64   : > { %1078 = vmatpush2.bf16.msra.mxu0 %v1752_v9 }
  0x65   : > { %1131 = vmatpush2.bf16.msra.mxu1 %v1753_v10  ;;  %1079 = vmatprep.subr.bf16.mxu0 %v1754_v11  ;;  %v393_v11 = vld [vmem:[#allocation2 + $0x30] sm:$0xff] }
  0x66   : > { %1132 = vmatprep.subr.bf16.mxu1 %v1756_v12 }
  0x68   : > { %1080 = vmatpush2.bf16.msra.mxu0 %v1758_v13  ;;  %v397_v13 = vld [vmem:[#allocation2 + $0x8] sm:$0xff] }
  0x69   : > { %1133 = vmatpush2.bf16.msra.mxu1 %v1759_v14  ;;  %1155 = vmatprep.subr.bf16.mxu0 %v1768_v15 }
  0x6a   : > { %1589 = vmatprep.subr.bf16.mxu1 %v1768_v15 }
  0x6b   : > { %1082 = vmatmul.mubr.bf16.vlgmr.msra.gmra.mxu0 %v1760_v16 }
  0x6c   : > { %1135 = vmatmul.mubr.bf16.vlgmr.msra.gmra.mxu1 %v1763_v17  ;;  %1156 = vmatpush1.bf16.msra.mxu0 %v1766_v18 }
  0x6d   : > { %1605 = vmatpush1.bf16.msra.mxu1 %v1766_v18  ;;  %1157 = vmatprep.subr.bf16.mxu0 %v1771_v19 }
  0x6e   : > { %1590 = vmatprep.subr.bf16.mxu1 %v1771_v19  ;;  %1091 = vmatprep.mubr.bf16.mxu0 %v1805_v20 }
  0x6f   : > { %1144 = vmatprep.mubr.bf16.mxu1 %v1807_v21  ;;  %v394_v21 = vld [vmem:[#allocation2] sm:$0xff] }
  0x70   : > { %1158 = vmatpush1.bf16.msra.mxu0 %v1769_v22 }
  0x71   : > { %1606 = vmatpush1.bf16.msra.mxu1 %v1769_v22  ;;  %1159 = vmatprep.subr.bf16.mxu0 %v1774_v23 }
  0x72   : > { %1591 = vmatprep.subr.bf16.mxu1 %v1774_v23  ;;  %v398_v23 = vld [vmem:[#allocation2 + $0x20] sm:$0xff] }
  0x73   : > { %1092 = vmatmul.mubr.bf16.gmra.mxu0 %v1809_v24 }
  0x74   : > { %1145 = vmatmul.mubr.bf16.gmra.mxu1 %v1810_v25  ;;  %1160 = vmatpush1.bf16.msra.mxu0 %v1772_v26 }
  0x75   : > { %1607 = vmatpush1.bf16.msra.mxu1 %v1772_v26  ;;  %1161 = vmatprep.subr.bf16.mxu0 %v1777_v27 }
  0x76   : > { %1592 = vmatprep.subr.bf16.mxu1 %v1777_v27  ;;  %1187 = vmatprep.mubr.bf16.mxu0 %v1822_v28 }
  0x77   : > { %1197 = vmatprep.mubr.bf16.mxu1 %v1825_v29 }
  0x78   : > { %1162 = vmatpush1.bf16.msra.mxu0 %v1775_v30 }
  0x79   : > { %1608 = vmatpush1.bf16.msra.mxu1 %v1775_v30  ;;  %1163 = vmatprep.subr.bf16.mxu0 %v1780_v31 }
  0x7a   : > { %1593 = vmatprep.subr.bf16.mxu1 %v1780_v31  ;;  %v395_v31 = vld [vmem:[#allocation2 + $0x18] sm:$0xff] }
  0x7c   : > { %1164 = vmatpush1.bf16.msra.mxu0 %v1778_v32 }
  0x7d   : > { %1609 = vmatpush1.bf16.msra.mxu1 %v1778_v32  ;;  %1165 = vmatprep.subr.bf16.mxu0 %v1783_v33 }
  0x7e   : > { %1594 = vmatprep.subr.bf16.mxu1 %v1783_v33  ;;  %v399_v33 = vld [vmem:[#allocation2 + $0x28] sm:$0xff] }
  0x80   : > { %1166 = vmatpush1.bf16.msra.mxu0 %v1781_v34 }
  0x81   : > { %1610 = vmatpush1.bf16.msra.mxu1 %v1781_v34  ;;  %1167 = vmatprep.subr.bf16.mxu0 %v1786_v35 }
  0x82   : > { %1595 = vmatprep.subr.bf16.mxu1 %v1786_v35 }
  0x84   : > { %1168 = vmatpush1.bf16.msra.mxu0 %v1784_v36 }
  0x85   : > { %1611 = vmatpush1.bf16.msra.mxu1 %v1784_v36  ;;  %1169 = vmatprep.subr.bf16.mxu0 %v1789_v37 }
  0x86   : > { %1596 = vmatprep.subr.bf16.mxu1 %v1789_v37 }
  0x88   : > { %1170 = vmatpush1.bf16.msra.mxu0 %v1787_v38 }
  0x89   : > { %1612 = vmatpush1.bf16.msra.mxu1 %v1787_v38  ;;  %1171 = vmatprep.subr.bf16.mxu0 %v1792_v39 }
  0x8a   : > { %1597 = vmatprep.subr.bf16.mxu1 %v1792_v39  ;;  %v396_v39 = vld [vmem:[#allocation2 + $0x10] sm:$0xff] }
  0x8c   : > { %1172 = vmatpush2.bf16.msra.mxu0 %v1790_v40 }
  0x8d   : > { %1613 = vmatpush2.bf16.msra.mxu1 %v1790_v40  ;;  %1173 = vmatprep.subr.bf16.mxu0 %v1795_v41 }
  0x8e   : > { %1598 = vmatprep.subr.bf16.mxu1 %v1795_v41  ;;  %v400_v41 = vld [vmem:[#allocation2 + $0x38] sm:$0xff] }
  0x90   : > { %1174 = vmatpush2.bf16.msra.mxu0 %v1793_v42 }
  0x91   : > { %1614 = vmatpush2.bf16.msra.mxu1 %v1793_v42  ;;  %1175 = vmatprep.subr.bf16.mxu0 %v1798_v43 }
  0x92   : > { %1599 = vmatprep.subr.bf16.mxu1 %v1798_v43 }
  0x94   : > { %1176 = vmatpush2.bf16.msra.mxu0 %v1796_v44 }
  0x95   : > { %1615 = vmatpush2.bf16.msra.mxu1 %v1796_v44  ;;  %1177 = vmatprep.subr.bf16.mxu0 %v1801_v45 }
  0x96   : > { %1600 = vmatprep.subr.bf16.mxu1 %v1801_v45 }
  0x98   : > { %1178 = vmatpush2.bf16.msra.mxu0 %v1799_v46 }
  0x99   : > { %1616 = vmatpush2.bf16.msra.mxu1 %v1799_v46  ;;  %1179 = vmatprep.subr.bf16.mxu0 %v1804_v47 }
  0x9a   : > { %1601 = vmatprep.subr.bf16.mxu1 %v1804_v47 }
  0x9c   : > { %1180 = vmatpush2.bf16.msra.mxu0 %v1802_v48 }
  0x9d   : > { %1617 = vmatpush2.bf16.msra.mxu1 %v1802_v48  ;;  %1181 = vmatprep.subr.bf16.mxu0 %v1813_v49 }
  0x9e   : > { %1602 = vmatprep.subr.bf16.mxu1 %v1813_v49 }
  0xa0   : > { %1182 = vmatpush2.bf16.msra.mxu0 %v1811_v50 }
  0xa1   : > { %1618 = vmatpush2.bf16.msra.mxu1 %v1811_v50  ;;  %1183 = vmatprep.subr.bf16.mxu0 %v1816_v51 }
  0xa2   : > { %1603 = vmatprep.subr.bf16.mxu1 %v1816_v51 }
  0xa4   : > { %1184 = vmatpush2.bf16.msra.mxu0 %v1814_v52 }
  0xa5   : > { %1619 = vmatpush2.bf16.msra.mxu1 %v1814_v52  ;;  %1185 = vmatprep.subr.bf16.mxu0 %v1819_v53 }
  0xa6   : > { %1604 = vmatprep.subr.bf16.mxu1 %v1819_v53 }
  0xa8   : > { %1186 = vmatpush2.bf16.msra.mxu0 %v1817_v54 }
  0xa9   : > { %1620 = vmatpush2.bf16.msra.mxu1 %v1817_v54 }
  0xab   : > { %1188 = vmatmul.mubr.bf16.vlgmr.msra.gmra.mxu0 %v1820_v55 }
  0xac   : > { %1198 = vmatmul.mubr.bf16.vlgmr.msra.gmra.mxu1 %v1823_v56 }
 0x12b   : > { %v1083_v57 = vpop.f32.mrf.mxu0 }
 0x12c   : > { %v1136_v58 = vpop.f32.mrf.mxu1 }
 0x12d   : > { %v1085_v59 = vpop.f32.mrf.mxu0  ;;  %v1137_v9 = vadd.f32 %v1136_v58, %v1083_v57 }
 0x12e   : > { %v1138_v60 = vpop.f32.mrf.mxu1 }
 0x12f   : > { %v1087_v61 = vpop.f32.mrf.mxu0  ;;  %v1139_v15 = vadd.f32 %v1138_v60, %v1085_v59 }
 0x130   : > { %v1140_v62 = vpop.f32.mrf.mxu1 }
 0x131   : > { %v1089_v63 = vpop.f32.mrf.mxu0  ;;  %v1141_v19 = vadd.f32 %v1140_v62, %v1087_v61 }
 0x132   : > { %v1142_v0 = vpop.f32.mrf.mxu1 }
 0x133   : > { %v1093_v1 = vpop.f32.mrf.mxu0  ;;  %v1143_v29 = vadd.f32 %v1142_v0, %v1089_v63 }
 0x134   : > { %v1146_v2 = vpop.f32.mrf.mxu1 }
 0x135   : > { %v1095_v3 = vpop.f32.mrf.mxu0  ;;  %v1147_v10 = vadd.f32 %v1146_v2, %v1093_v1 }
 0x136   : > { %v1148_v4 = vpop.f32.mrf.mxu1 }
 0x137   : > { %v1097_v5 = vpop.f32.mrf.mxu0  ;;  %v1149_v16 = vadd.f32 %v1148_v4, %v1095_v3 }
 0x138   : > { %v1150_v6 = vpop.f32.mrf.mxu1 }
 0x139   : > { %v1099_v7 = vpop.f32.mrf.mxu0  ;;  %v1151_v20 = vadd.f32 %v1150_v6, %v1097_v5 }
 0x13a   : > { %v1152_v8 = vpop.f32.mrf.mxu1 }
 0x13b   : > { %v1153_v30 = vadd.f32 %v1152_v8, %v1099_v7 }
 0x16b   : > { %v1189_v12 = vpop.f32.mrf.mxu0 }
 0x16c   : > { %v1199_v14 = vpop.f32.mrf.mxu1  ;;  %v1190_v17 = vadd.f32 %v1189_v12, %v1137_v9 }
 0x16d   : > { %v1200_v18 = vadd.f32 %v1199_v14, %v1147_v10  ;;  %v1191_v22 = vpop.f32.mrf.mxu0 }
 0x16e   : > { %v1201_v24 = vpop.f32.mrf.mxu1  ;;  %v1208_v25 = vadd.f32 %v1190_v17, %v393_v11  ;;  %v1192_v27 = vadd.f32 %v1191_v22, %v1139_v15 }
 0x16f   : > { %v1212_v26 = vadd.f32 %v1200_v18, %v397_v13  ;;  %v1202_v28 = vadd.f32 %v1201_v24, %v1149_v16  ;;  %v1193_v32 = vpop.f32.mrf.mxu0 }
 0x170   : > { %v1203_v34 = vpop.f32.mrf.mxu1  ;;  %1216 = vst [vmem:[#allocation2 + $0x30] sm:$0xff] %v1208_v25  ;;  %v1209_v35 = vadd.f32 %v1192_v27, %v394_v21  ;;  %v1194_v37 = vadd.f32 %v1193_v32, %v1141_v19 }
 0x171   : > { %1220 = vst [vmem:[#allocation2 + $0x8] sm:$0xff] %v1212_v26  ;;  %v1213_v36 = vadd.f32 %v1202_v28, %v398_v23  ;;  %v1204_v38 = vadd.f32 %v1203_v34, %v1151_v20  ;;  %v1195_v40 = vpop.f32.mrf.mxu0 }
 0x172   : > { %v1205_v42 = vpop.f32.mrf.mxu1  ;;  %1217 = vst [vmem:[#allocation2] sm:$0xff] %v1209_v35  ;;  %v1210_v43 = vadd.f32 %v1194_v37, %v395_v31  ;;  %v1196_v45 = vadd.f32 %v1195_v40, %v1143_v29 }
 0x173   : > { %1221 = vst [vmem:[#allocation2 + $0x20] sm:$0xff] %v1213_v36  ;;  %v1214_v44 = vadd.f32 %v1204_v38, %v399_v33  ;;  %v1206_v46 = vadd.f32 %v1205_v42, %v1153_v30  ;;  %1227 = sbr.rel (%p1574_p11) target bundleno = 394 (0x18a), region = 67 }
 0x174   : > { %1218 = vst [vmem:[#allocation2 + $0x18] sm:$0xff] %v1210_v43  ;;  %v1211_v47 = vadd.f32 %v1196_v45, %v396_v39 }
 0x175   : > { %1222 = vst [vmem:[#allocation2 + $0x28] sm:$0xff] %v1214_v44  ;;  %v1215_v48 = vadd.f32 %v1206_v46, %v400_v41 }
 0x176   : > { %1219 = vst [vmem:[#allocation2 + $0x10] sm:$0xff] %v1211_v47 }
 0x177   : > { %1223 = vst [vmem:[#allocation2 + $0x38] sm:$0xff] %v1215_v48 }
 0x178   : > { %v1238_v49 = vlaneseq  ;;  %v1256_v51 = vld [vmem:[%s2101_s3] sm:$0xff]  ;;  %v1228_v52 = vld [vmem:[#allocation2 + $0x30] sm:$0xff]  ;;  %v1257_v54 = vld [vmem:[%s2101_s3 + $0x8] sm:$0xff] }
 0x179   : > { %v1236_v53 = vld [vmem:[%s2100_s2] sm:$0x3]  ;;  %v1258_v58 = vld [vmem:[%s2101_s3 + $0x10] sm:$0xff]  ;;  %v1259_v59 = vld [vmem:[%s2101_s3 + $0x18] sm:$0xff]  ;;  %v1260_v60 = vunpack.c.l.bf16 %v1256_v51  ;;  %v1261_v61 = vunpack.c.h.bf16 %v1256_v51  ;;  %v1262_v3 = vunpack.c.l.bf16 %v1257_v54  ;;  %v1263_v4 = vunpack.c.h.bf16 %v1257_v54 }
 0x17a   : > { %v1239_v50 = vshrl.u32 %v1238_v49, 7  ;;  %v1229_v55 = vld [vmem:[#allocation2] sm:$0xff]  ;;  %v1232_v0 = vld [vmem:[#allocation2 + $0x8] sm:$0xff]  ;;  %v1264_v8 = vunpack.c.l.bf16 %v1258_v58  ;;  %v1265_v9 = vunpack.c.h.bf16 %v1258_v58  ;;  %v1266_v10 = vunpack.c.l.bf16 %v1259_v59 }
 0x17b   : > { %v1230_v62 = vld [vmem:[#allocation2 + $0x18] sm:$0xff]  ;;  %v1233_v5 = vld [vmem:[#allocation2 + $0x20] sm:$0xff]  ;;  %v1267_v11 = vunpack.c.h.bf16 %v1259_v59 }
 0x17c   : > { %v1240_v56 = vsub.s32 0, %v1239_v50  ;;  %v1244_v57 = vsub.s32 1, %v1239_v50  ;;  %v1234_v6 = vld [vmem:[#allocation2 + $0x28] sm:$0xff] }
 0x17d   : > { %v1231_v63 = vld [vmem:[#allocation2 + $0x10] sm:$0xff] }
 0x17e   : > { %v1241_v1 = vrot.slane %v1236_v53, %v1240_v56  ;;  %v1245_v2 = vrot.slane %v1236_v53, %v1244_v57  ;;  %v1235_v7 = vld [vmem:[#allocation2 + $0x38] sm:$0xff] }
 0x180   : > { %v1248_v12 = vadd.f32 %v1241_v1, %v1228_v52  ;;  %v1249_v13 = vadd.f32 %v1245_v2, %v1229_v55  ;;  %v1250_v14 = vadd.f32 %v1241_v1, %v1230_v62  ;;  %v1251_v15 = vadd.f32 %v1245_v2, %v1231_v63 }
 0x181   : > { %v1252_v16 = vadd.f32 %v1241_v1, %v1232_v0  ;;  %v1253_v17 = vadd.f32 %v1245_v2, %v1233_v5  ;;  %v1254_v18 = vadd.f32 %v1241_v1, %v1234_v6  ;;  %v1255_v19 = vadd.f32 %v1245_v2, %v1235_v7 }
 0x182   : > { %v1268_v20 = vadd.f32 %v1260_v60, %v1248_v12  ;;  %v1269_v21 = vadd.f32 %v1261_v61, %v1249_v13  ;;  %v1270_v22 = vadd.f32 %v1262_v3, %v1250_v14  ;;  %v1271_v23 = vadd.f32 %v1263_v4, %v1251_v15 }
 0x183   : > { %v1272_v24 = vadd.f32 %v1264_v8, %v1252_v16  ;;  %v1273_v25 = vadd.f32 %v1265_v9, %v1253_v17  ;;  %v1274_v26 = vadd.f32 %v1266_v10, %v1254_v18  ;;  %v1275_v27 = vadd.f32 %v1267_v11, %v1255_v19 }
 0x184   : > { %v1276_v28 = vmax.f32 %v1268_v20, 0.0  ;;  %v1277_v29 = vmax.f32 %v1269_v21, 0.0  ;;  %v1278_v30 = vmax.f32 %v1270_v22, 0.0  ;;  %v1279_v31 = vmax.f32 %v1271_v23, 0.0 }
 0x185   : > { %v1280_v32 = vmax.f32 %v1272_v24, 0.0  ;;  %v1281_v33 = vmax.f32 %v1273_v25, 0.0  ;;  %v1282_v34 = vmax.f32 %v1274_v26, 0.0  ;;  %v1283_v35 = vmax.f32 %v1275_v27, 0.0 }
 0x186   : > { %v1585_v36 = vpack.c.bf16 %v1277_v29, %v1276_v28  ;;  %v1586_v37 = vpack.c.bf16 %v1279_v31, %v1278_v30 }
 0x187   : > { %v1587_v38 = vpack.c.bf16 %v1281_v33, %v1280_v32  ;;  %v1588_v39 = vpack.c.bf16 %v1283_v35, %v1282_v34 }
 0x188   : > { %1308 = vst [vmem:[%s2102_s4] sm:$0xff] %v1585_v36  ;;  %1309 = vst [vmem:[%s2102_s4 + $0x8] sm:$0xff] %v1586_v37 }
 0x189   : > { %1310 = vst [vmem:[%s2102_s4 + $0x10] sm:$0xff] %v1587_v38  ;;  %1311 = vst [vmem:[%s2102_s4 + $0x18] sm:$0xff] %v1588_v39 }
 0x18a PF: > { %s14_s19 = sadd.s32 1, %s1864_s19   ;;  %s2103_s15 = smov %s1852_s16 }
 0x18b   : > { %p11_p12 = scmp.ge.s32.totalorder %s14_s19, 5   ;;  %s2104_s16 = smov %s1927_s23 }
 0x18c   : > { %s2105_s17 = smov %s1860_s18  ;;  %s2106_s18 = smov %s2108_s20 }
 0x18d   :  { %13 = sbr.rel (!%p11_p12) target bundleno = 3 (0x3), region = 111 }

// kernel: _lambda_.23
= control target key start
LH: loop header
LB: loop body
LE: loop exit
PB: predicated region body
PF: predicated region fallthrough
CT: control target
= control target key end

     0   :  { %s1029_s12 = smov 0   ;;  %s1031_s13 = smov 0   ;;  %s1208_s0 = inlined_call_operand.vmem [shape: bf16[8,256], index: 0, kind: input, shape index: {}]   ;;  %s1209_s1 = inlined_call_operand.vmem [shape: bf16[256,512], index: 1, kind: input, shape index: {}]   ;;  %s1210_s2 = inlined_call_operand.vmem [shape: f32[1,512], index: 2, kind: input, shape index: {}]   ;;  %s1211_s3 = inlined_call_operand.vmem [shape: bf16[8,512], index: 3, kind: output, shape index: {}]  }
   0x1   :  { %s1033_s14 = smov 0   ;;  %s1035_s15 = smov 0  }
   0x2   :  { %s1037_s16 = smov 0  }
   0x3 LB: > { %s28_s17 = sadd.s32 1, %s1003_s15  ;;  %p76_p1 = scmp.ne.s32.totalorder %s995_s13, %s991_s12  ;;  %s1007_s16 = sphi %s1037_s16, %s13_s16   ;;  %s1003_s15 = sphi %s1035_s15, %s1215_s15   ;;  %s999_s14 = sphi %s1033_s14, %s1214_s14   ;;  %s995_s13 = sphi %s1031_s13, %s1213_s13   ;;  %s991_s12 = sphi %s1029_s12, %s1212_s12  }
   0x4   : > { %p30_p0 = scmp.ge.s32.totalorder %s28_s17, 2  ;;  %p77_p2 = scmp.eq.s32.totalorder %s1007_s16, 0 }
   0x5   : > { %s69_s19 = sadd.s32 1, %s995_s13  ;;  %p831_p5 = scmp.ge.s32.totalorder %s1007_s16, 2 }
   0x6   : > { %s1217_s17 = smov (%p30_p0, %s28_s17), 0  ;;  %p78_p3 = por %p77_p2, %p76_p1 }
   0x7   : > { %s65_s18 = ssub.s32 %s1003_s15, %s1217_s17  ;;  %169 = sbr.rel (%p831_p5) target bundleno = 32 (0x20), region = 20 }
   0x8   : > { %p67_p4 = scmp.eq.s32.totalorder %s65_s18, 0 }
   0xa   : > { %s1064_s20 = scalar_select %p67_p4, %s995_s13, %s69_s19  }
   0xc   : > { %172 = sbr.rel (!%p78_p3) target bundleno = 32 (0x20), region = 24  ;;  %s174_s21 = sand.u32 (%p78_p3), 1, %s995_s13  }
   0xd   : > { %s877_s22 = sshll.u32 (%p78_p3), %s1003_s15, 3  ;;  %s832_s23 = sshll.u32 (%p78_p3), %s174_s21, 8 }
   0xe   : > { %s1072_s26 = scalar_lea.vmem (%p78_p3), %s1209_s1, %s877_s22  ;;  %s1077_s27 = scalar_lea.vmem (%p78_p3), [#allocation3], %s832_s23 }
   0xf   : > { %v273_v0 = vld [vmem:[%s1072_s26] sm:$0xff] (%p78_p3)  ;;  %v275_v1 = vld [vmem:[%s1072_s26 + $0x10] sm:$0xff] (%p78_p3) }
  0x10   : > { %v277_v2 = vld [vmem:[%s1072_s26 + $0x20] sm:$0xff] (%p78_p3)  ;;  %274 = vst [vmem:[%s1077_s27] sm:$0xff] (%p78_p3), %v273_v0  ;;  %276 = vst [vmem:[%s1077_s27 + $0x8] sm:$0xff] (%p78_p3), %v275_v1  ;;  %v279_v3 = vld [vmem:[%s1072_s26 + $0x30] sm:$0xff] (%p78_p3) }
  0x11   : > { %278 = vst [vmem:[%s1077_s27 + $0x10] sm:$0xff] %v277_v2  ;;  %v281_v4 = vld [vmem:[%s1072_s26 + $0x40] sm:$0xff]  ;;  %v283_v5 = vld [vmem:[%s1072_s26 + $0x50] sm:$0xff]  ;;  %280 = vst [vmem:[%s1077_s27 + $0x18] sm:$0xff] %v279_v3 }
  0x12   : > { %282 = vst [vmem:[%s1077_s27 + $0x20] sm:$0xff] %v281_v4  ;;  %284 = vst [vmem:[%s1077_s27 + $0x28] sm:$0xff] %v283_v5  ;;  %v285_v6 = vld [vmem:[%s1072_s26 + $0x60] sm:$0xff]  ;;  %v287_v7 = vld [vmem:[%s1072_s26 + $0x70] sm:$0xff] }
  0x13   : > { %v289_v8 = vld [vmem:[%s1072_s26 + $0x80] sm:$0xff]  ;;  %286 = vst [vmem:[%s1077_s27 + $0x30] sm:$0xff] %v285_v6  ;;  %288 = vst [vmem:[%s1077_s27 + $0x38] sm:$0xff] %v287_v7  ;;  %v291_v9 = vld [vmem:[%s1072_s26 + $0x90] sm:$0xff] }
  0x14   : > { %290 = vst [vmem:[%s1077_s27 + $0x40] sm:$0xff] %v289_v8  ;;  %v293_v10 = vld [vmem:[%s1072_s26 + $0xa0] sm:$0xff]  ;;  %v295_v11 = vld [vmem:[%s1072_s26 + $0xb0] sm:$0xff]  ;;  %292 = vst [vmem:[%s1077_s27 + $0x48] sm:$0xff] %v291_v9 }
  0x15   : > { %294 = vst [vmem:[%s1077_s27 + $0x50] sm:$0xff] %v293_v10  ;;  %296 = vst [vmem:[%s1077_s27 + $0x58] sm:$0xff] %v295_v11  ;;  %v297_v12 = vld [vmem:[%s1072_s26 + $0xc0] sm:$0xff]  ;;  %v299_v13 = vld [vmem:[%s1072_s26 + $0xd0] sm:$0xff] }
  0x16   : > { %v301_v14 = vld [vmem:[%s1072_s26 + $0xe0] sm:$0xff]  ;;  %298 = vst [vmem:[%s1077_s27 + $0x60] sm:$0xff] %v297_v12  ;;  %300 = vst [vmem:[%s1077_s27 + $0x68] sm:$0xff] %v299_v13  ;;  %v303_v15 = vld [vmem:[%s1072_s26 + $0xf0] sm:$0xff] }
  0x17   : > { %302 = vst [vmem:[%s1077_s27 + $0x70] sm:$0xff] %v301_v14  ;;  %v305_v16 = vld [vmem:[%s1072_s26 + $0x100] sm:$0xff]  ;;  %v307_v17 = vld [vmem:[%s1072_s26 + $0x110] sm:$0xff]  ;;  %304 = vst [vmem:[%s1077_s27 + $0x78] sm:$0xff] %v303_v15 }
  0x18   : > { %306 = vst [vmem:[%s1077_s27 + $0x80] sm:$0xff] %v305_v16  ;;  %308 = vst [vmem:[%s1077_s27 + $0x88] sm:$0xff] %v307_v17  ;;  %v309_v18 = vld [vmem:[%s1072_s26 + $0x120] sm:$0xff]  ;;  %v311_v19 = vld [vmem:[%s1072_s26 + $0x130] sm:$0xff] }
  0x19   : > { %v313_v20 = vld [vmem:[%s1072_s26 + $0x140] sm:$0xff]  ;;  %310 = vst [vmem:[%s1077_s27 + $0x90] sm:$0xff] %v309_v18  ;;  %312 = vst [vmem:[%s1077_s27 + $0x98] sm:$0xff] %v311_v19  ;;  %v315_v21 = vld [vmem:[%s1072_s26 + $0x150] sm:$0xff] }
  0x1a   : > { %314 = vst [vmem:[%s1077_s27 + $0xa0] sm:$0xff] %v313_v20  ;;  %v317_v22 = vld [vmem:[%s1072_s26 + $0x160] sm:$0xff]  ;;  %v319_v23 = vld [vmem:[%s1072_s26 + $0x170] sm:$0xff]  ;;  %316 = vst [vmem:[%s1077_s27 + $0xa8] sm:$0xff] %v315_v21 }
  0x1b   : > { %318 = vst [vmem:[%s1077_s27 + $0xb0] sm:$0xff] %v317_v22  ;;  %320 = vst [vmem:[%s1077_s27 + $0xb8] sm:$0xff] %v319_v23  ;;  %v321_v24 = vld [vmem:[%s1072_s26 + $0x180] sm:$0xff]  ;;  %v323_v25 = vld [vmem:[%s1072_s26 + $0x190] sm:$0xff] }
  0x1c   : > { %v325_v26 = vld [vmem:[%s1072_s26 + $0x1a0] sm:$0xff]  ;;  %322 = vst [vmem:[%s1077_s27 + $0xc0] sm:$0xff] %v321_v24  ;;  %324 = vst [vmem:[%s1077_s27 + $0xc8] sm:$0xff] %v323_v25  ;;  %v327_v27 = vld [vmem:[%s1072_s26 + $0x1b0] sm:$0xff] }
  0x1d   : > { %326 = vst [vmem:[%s1077_s27 + $0xd0] sm:$0xff] %v325_v26  ;;  %v329_v28 = vld [vmem:[%s1072_s26 + $0x1c0] sm:$0xff]  ;;  %v331_v29 = vld [vmem:[%s1072_s26 + $0x1d0] sm:$0xff]  ;;  %328 = vst [vmem:[%s1077_s27 + $0xd8] sm:$0xff] %v327_v27 }
  0x1e   : > { %330 = vst [vmem:[%s1077_s27 + $0xe0] sm:$0xff] %v329_v28  ;;  %332 = vst [vmem:[%s1077_s27 + $0xe8] sm:$0xff] %v331_v29  ;;  %v333_v30 = vld [vmem:[%s1072_s26 + $0x1e0] sm:$0xff]  ;;  %v335_v31 = vld [vmem:[%s1072_s26 + $0x1f0] sm:$0xff] }
  0x1f   : > { %334 = vst [vmem:[%s1077_s27 + $0xf0] sm:$0xff] %v333_v30  ;;  %336 = vst [vmem:[%s1077_s27 + $0xf8] sm:$0xff] %v335_v31 }
  0x20 PF: > { %p835_p6 = scmp.ge.s32.totalorder %s1007_s16, 1  ;;  %p349_p7 = scmp.lt.s32.totalorder %s1007_s16, 3 }
  0x22   : > { %p350_p8 = pnand %p835_p6, %p349_p7 }
  0x23   : > { %s356_s28 = sand.u32 (!%p350_p8), 1, %s991_s12   ;;  %s837_s6 = sshll.u32 (!%p350_p8), %s999_s14, 1 }
  0x24   : > { %353 = sbr.rel (%p350_p8) target bundleno = 306 (0x132), region = 66  ;;  %s836_s4 = sshll.u32 (!%p350_p8), %s356_s28, 8 }
  0x25   : > { %s1150_s5 = scalar_lea.vmem (!%p350_p8), [#allocation3], %s836_s4  ;;  %p409_p9 = scmp.lt.s32.totalorder (!%p350_p8), %s837_s6, 3 }
  0x29   : > { %v1146_v32 = vld [vmem:[%s1208_s0] sm:$0xff]  ;;  %v919_v34 = vld [vmem:[%s1150_s5 + $0x74] ss:$8 sps:$4 sm:$0xff]   ;;  %v921_v35 = vld [vmem:[%s1150_s5 + $0x70] ss:$8 sps:$4 sm:$0xff]   ;;  %v683_v3 = vlaneseq  ;;  %s1219_s6 = smov (!%p409_p9, %s837_s6), 3 }
  0x2a   : > { %v841_v33 = vcombine.high %v1146_v32, %v1146_v32  ;;  %631 = vmatprep.subr.bf16.mxu0 %v919_v34  ;;  %v922_v36 = vld [vmem:[%s1150_s5 + $0x64] ss:$8 sps:$4 sm:$0xff]   ;;  %v924_v37 = vld [vmem:[%s1150_s5 + $0x60] ss:$8 sps:$4 sm:$0xff]   ;;  %v925_v38 = vld [vmem:[%s1150_s5 + $0x54] ss:$8 sps:$4 sm:$0xff]   ;;  %v840_v2 = vcombine.low %v1146_v32, %v1146_v32  ;;  %s411_s9 = scalar_lea.vmem %s1210_s2, %s1219_s6 }
  0x2b   : > { %632 = vmatpush1.bf16.msra.mxu0 %v921_v35  ;;  %v927_v39 = vld [vmem:[%s1150_s5 + $0x50] ss:$8 sps:$4 sm:$0xff]   ;;  %v928_v40 = vld [vmem:[%s1150_s5 + $0x44] ss:$8 sps:$4 sm:$0xff]   ;;  %v930_v41 = vld [vmem:[%s1150_s5 + $0x40] ss:$8 sps:$4 sm:$0xff]  }
  0x2c   : > { %663 = vmatprep.mubr.bf16.mxu0 %v841_v33  ;;  %633 = vmatprep.subr.bf16.mxu0 %v922_v36  ;;  %v931_v42 = vld [vmem:[%s1150_s5 + $0x34] ss:$8 sps:$4 sm:$0xff]   ;;  %v933_v43 = vld [vmem:[%s1150_s5 + $0x30] ss:$8 sps:$4 sm:$0xff]   ;;  %v934_v44 = vld [vmem:[%s1150_s5 + $0x24] ss:$8 sps:$4 sm:$0xff]  }
  0x2d   : > { %v936_v45 = vld [vmem:[%s1150_s5 + $0x20] ss:$8 sps:$4 sm:$0xff]   ;;  %v937_v46 = vld [vmem:[%s1150_s5 + $0x14] ss:$8 sps:$4 sm:$0xff]   ;;  %v939_v47 = vld [vmem:[%s1150_s5 + $0x10] ss:$8 sps:$4 sm:$0xff]  }
  0x2e   : > { %v940_v48 = vld [vmem:[%s1150_s5 + $0x4] ss:$8 sps:$4 sm:$0xff]   ;;  %v942_v49 = vld [vmem:[%s1150_s5] ss:$8 sps:$4 sm:$0xff]   ;;  %v943_v50 = vld [vmem:[%s1150_s5 + $0xf4] ss:$8 sps:$4 sm:$0xff]  }
  0x2f   : > { %634 = vmatpush1.bf16.msra.mxu0 %v924_v37  ;;  %v945_v51 = vld [vmem:[%s1150_s5 + $0xf0] ss:$8 sps:$4 sm:$0xff]   ;;  %v946_v52 = vld [vmem:[%s1150_s5 + $0xe4] ss:$8 sps:$4 sm:$0xff]   ;;  %v948_v53 = vld [vmem:[%s1150_s5 + $0xe0] ss:$8 sps:$4 sm:$0xff]  }
  0x30   : > { %635 = vmatprep.subr.bf16.mxu0 %v925_v38  ;;  %v949_v54 = vld [vmem:[%s1150_s5 + $0xd4] ss:$8 sps:$4 sm:$0xff]   ;;  %v951_v55 = vld [vmem:[%s1150_s5 + $0xd0] ss:$8 sps:$4 sm:$0xff]   ;;  %v952_v56 = vld [vmem:[%s1150_s5 + $0xc4] ss:$8 sps:$4 sm:$0xff]  }
  0x31   : > { %v954_v57 = vld [vmem:[%s1150_s5 + $0xc0] ss:$8 sps:$4 sm:$0xff]   ;;  %v955_v58 = vld [vmem:[%s1150_s5 + $0xb4] ss:$8 sps:$4 sm:$0xff]   ;;  %v957_v59 = vld [vmem:[%s1150_s5 + $0xb0] ss:$8 sps:$4 sm:$0xff]  }
  0x32   : > { %v958_v60 = vld [vmem:[%s1150_s5 + $0xa4] ss:$8 sps:$4 sm:$0xff]   ;;  %v960_v61 = vld [vmem:[%s1150_s5 + $0xa0] ss:$8 sps:$4 sm:$0xff]   ;;  %v961_v62 = vld [vmem:[%s1150_s5 + $0x94] ss:$8 sps:$4 sm:$0xff]  }
  0x33   : > { %636 = vmatpush1.bf16.msra.mxu0 %v927_v39  ;;  %v963_v63 = vld [vmem:[%s1150_s5 + $0x90] ss:$8 sps:$4 sm:$0xff]   ;;  %v964_v0 = vld [vmem:[%s1150_s5 + $0x84] ss:$8 sps:$4 sm:$0xff]   ;;  %v966_v1 = vld [vmem:[%s1150_s5 + $0x80] ss:$8 sps:$4 sm:$0xff]  }
  0x34   : > { %637 = vmatprep.subr.bf16.mxu0 %v928_v40  ;;  %v684_v4 = vshrl.u32 %v683_v3, 7  ;;  %v681_v7 = vld [vmem:[%s411_s9] sm:$0x3]  ;;  %s839_s10 = sshll.u32 %s1219_s6, 2 }
  0x35   : > { %s421_s14 = scalar_lea.vmem %s1211_s3, %s839_s10 }
  0x36   : > { %v685_v5 = vsub.s32 0, %v684_v4  ;;  %v689_v6 = vsub.s32 1, %v684_v4 }
  0x37   : > { %638 = vmatpush1.bf16.msra.mxu0 %v930_v41 }
  0x38   : > { %639 = vmatprep.subr.bf16.mxu0 %v931_v42  ;;  %v686_v8 = vrot.slane %v681_v7, %v685_v5  ;;  %v690_v9 = vrot.slane %v681_v7, %v689_v6 }
  0x3b   : > { %640 = vmatpush1.bf16.msra.mxu0 %v933_v43 }
  0x3c   : > { %641 = vmatprep.subr.bf16.mxu0 %v934_v44 }
  0x3f   : > { %642 = vmatpush1.bf16.msra.mxu0 %v936_v45 }
  0x40   : > { %643 = vmatprep.subr.bf16.mxu0 %v937_v46 }
  0x43   : > { %644 = vmatpush1.bf16.msra.mxu0 %v939_v47 }
  0x44   : > { %645 = vmatprep.subr.bf16.mxu0 %v940_v48 }
  0x47   : > { %646 = vmatpush1.bf16.msra.mxu0 %v942_v49 }
  0x48   : > { %647 = vmatprep.subr.bf16.mxu0 %v943_v50 }
  0x4b   : > { %648 = vmatpush2.bf16.msra.mxu0 %v945_v51 }
  0x4c   : > { %649 = vmatprep.subr.bf16.mxu0 %v946_v52 }
  0x4f   : > { %650 = vmatpush2.bf16.msra.mxu0 %v948_v53 }
  0x50   : > { %651 = vmatprep.subr.bf16.mxu0 %v949_v54 }
  0x53   : > { %652 = vmatpush2.bf16.msra.mxu0 %v951_v55 }
  0x54   : > { %653 = vmatprep.subr.bf16.mxu0 %v952_v56 }
  0x57   : > { %654 = vmatpush2.bf16.msra.mxu0 %v954_v57 }
  0x58   : > { %655 = vmatprep.subr.bf16.mxu0 %v955_v58 }
  0x5b   : > { %656 = vmatpush2.bf16.msra.mxu0 %v957_v59 }
  0x5c   : > { %657 = vmatprep.subr.bf16.mxu0 %v958_v60 }
  0x5f   : > { %658 = vmatpush2.bf16.msra.mxu0 %v960_v61 }
  0x60   : > { %659 = vmatprep.subr.bf16.mxu0 %v961_v62 }
  0x63   : > { %660 = vmatpush2.bf16.msra.mxu0 %v963_v63 }
  0x64   : > { %661 = vmatprep.subr.bf16.mxu0 %v964_v0 }
  0x67   : > { %662 = vmatpush2.bf16.msra.mxu0 %v966_v1 }
  0x6a   : > { %664 = vmatmul.mubr.bf16.vlgmr.msra.gmra.mxu0 %v840_v2 }
 0x12a   : > { %v665_v10 = vpop.f32.mrf.mxu0 }
 0x12b   : > { %v693_v12 = vadd.f32 %v686_v8, %v665_v10 }
 0x12c   : > { %v667_v11 = vpop.f32.mrf.mxu0 }
 0x12d   : > { %v694_v13 = vadd.f32 %v690_v9, %v667_v11 }
 0x12e   : > { %v669_v14 = vpop.f32.mrf.mxu0 }
 0x12f   : > { %v878_v15 = vpack.c.bf16 %v694_v13, %v693_v12 }
 0x130   : > { %v670_v16 = vpop.f32.mrf.mxu0 }
 0x131   : > { %703 = vst [vmem:[%s421_s14] sm:$0xff] %v878_v15 }
 0x132 PF: > { %s13_s16 = sadd.s32 1, %s1007_s16   ;;  %s1212_s12 = smov %s995_s13 }
 0x133   : > { %p10_p10 = scmp.ge.s32.totalorder %s13_s16, 4   ;;  %s1213_s13 = smov %s1064_s20 }
 0x134   : > { %s1214_s14 = smov %s1003_s15  ;;  %s1215_s15 = smov %s1217_s17 }
 0x135   :  { %12 = sbr.rel (!%p10_p10) target bundleno = 3 (0x3), region = 119 }

// kernel: _lambda_.22
= control target key start
LH: loop header
LB: loop body
LE: loop exit
PB: predicated region body
PF: predicated region fallthrough
CT: control target
= control target key end

     0   :  { %s1975_s12 = smov 0   ;;  %s1977_s13 = smov 0   ;;  %s2389_s0 = inlined_call_operand.vmem [shape: bf16[8,2304], index: 0, kind: input, shape index: {}]   ;;  %s2390_s1 = inlined_call_operand.vmem [shape: bf16[2304,512], index: 1, kind: input, shape index: {}]   ;;  %s2391_s2 = inlined_call_operand.vmem [shape: f32[1,512], index: 2, kind: input, shape index: {}]   ;;  %s2392_s3 = inlined_call_operand.vmem [shape: bf16[8,512], index: 3, kind: output, shape index: {}]  }
   0x1   :  { %s1979_s14 = smov 0   ;;  %s1981_s15 = smov 0  }
   0x2   :  { %s1983_s16 = smov 0   ;;  %s1985_s17 = smov 0  }
   0x3   :  { %s1987_s18 = smov 0  }
   0x4 LB: > { %s25_s19 = sadd.s32 1, %s1944_s16  ;;  %s28_s20 = sadd.s32 1, %s1948_s17  ;;  %s1952_s18 = sphi %s1987_s18, %s13_s18   ;;  %s1948_s17 = sphi %s1985_s17, %s2398_s17   ;;  %s1944_s16 = sphi %s1983_s16, %s2397_s16   ;;  %s1940_s15 = sphi %s1981_s15, %s2396_s15   ;;  %s1936_s14 = sphi %s1979_s14, %s2395_s14   ;;  %s1932_s13 = sphi %s1977_s13, %s2394_s13   ;;  %s1928_s12 = sphi %s1975_s12, %s2393_s12  }
   0x5   : > { %p26_p0 = scmp.ge.s32.totalorder %s25_s19, 3  ;;  %p76_p1 = scmp.ne.s32.totalorder %s1932_s13, %s1928_s12 }
   0x6   : > { %p77_p2 = scmp.eq.s32.totalorder %s1952_s18, 0  ;;  %s69_s24 = sadd.s32 1, %s1932_s13 }
   0x7   : > { %s2400_s19 = smov (%p26_p0, %s25_s19), 0  ;;  %s2402_s20 = smov (!%p26_p0, %s28_s20), %s1948_s17 }
   0x8   : > { %p78_p3 = por %p77_p2, %p76_p1  ;;  %p30_p4 = scmp.ge.s32.totalorder %s2402_s20, 2 }
   0x9   : > { %s64_s21 = ssub.s32 %s1944_s16, %s2400_s19  ;;  %p1571_p6 = scmp.ge.s32.totalorder %s1952_s18, 6 }
   0xa   : > { %s2404_s20 = smov (%p30_p4, %s2402_s20), 0 }
   0xb   : > { %s65_s22 = ssub.s32 %s1948_s17, %s2404_s20  ;;  %156 = sbr.rel (%p1571_p6) target bundleno = 72 (0x48), region = 16 }
   0xc   : > { %s66_s23 = sor.u32 %s65_s22, %s64_s21 }
   0xd   : > { %p67_p5 = scmp.eq.s32.totalorder %s66_s23, 0 }
   0xf   : > { %s2026_s25 = scalar_select %p67_p5, %s1932_s13, %s69_s24  }
  0x10   : > { %172 = sbr.rel (!%p78_p3) target bundleno = 72 (0x48), region = 24  ;;  %s174_s26 = sand.u32 (%p78_p3), 1, %s1932_s13  }
  0x11   : > { %s1689_s27 = smul.u32 (%p78_p3), 768, %s174_s26  ;;  %s1572_s28 = sshll.u32 (%p78_p3), %s1948_s17, 1 }
  0x12   : > { %s1687_s29 = smul.u32 (%p78_p3), 384, %s1944_s16 }
  0x13   : > { %s2040_s8 = scalar_lea.vmem (%p78_p3), [#allocation3], %s1689_s27 }
  0x14   : > { %s180_s30 = sadd.s32 (%p78_p3), %s1687_s29, %s1572_s28 }
  0x15   : > { %s1574_s4 = sshll.u32 %s180_s30, 2 }
  0x16   : > { %s2035_s7 = scalar_lea.vmem %s2390_s1, %s1574_s4 }
  0x17   : > { %v401_v0 = vld [vmem:[%s2035_s7] sm:$0xff]  ;;  %v403_v1 = vld [vmem:[%s2035_s7 + $0x10] sm:$0xff] }
  0x18   : > { %v405_v2 = vld [vmem:[%s2035_s7 + $0x20] sm:$0xff]  ;;  %402 = vst [vmem:[%s2040_s8] sm:$0xff] %v401_v0  ;;  %404 = vst [vmem:[%s2040_s8 + $0x8] sm:$0xff] %v403_v1  ;;  %v407_v3 = vld [vmem:[%s2035_s7 + $0x30] sm:$0xff] }
  0x19   : > { %406 = vst [vmem:[%s2040_s8 + $0x10] sm:$0xff] %v405_v2  ;;  %v409_v4 = vld [vmem:[%s2035_s7 + $0x40] sm:$0xff]  ;;  %v411_v5 = vld [vmem:[%s2035_s7 + $0x50] sm:$0xff]  ;;  %408 = vst [vmem:[%s2040_s8 + $0x18] sm:$0xff] %v407_v3 }
  0x1a   : > { %410 = vst [vmem:[%s2040_s8 + $0x20] sm:$0xff] %v409_v4  ;;  %412 = vst [vmem:[%s2040_s8 + $0x28] sm:$0xff] %v411_v5  ;;  %v413_v6 = vld [vmem:[%s2035_s7 + $0x60] sm:$0xff]  ;;  %v415_v7 = vld [vmem:[%s2035_s7 + $0x70] sm:$0xff] }
  0x1b   : > { %v417_v8 = vld [vmem:[%s2035_s7 + $0x80] sm:$0xff]  ;;  %414 = vst [vmem:[%s2040_s8 + $0x30] sm:$0xff] %v413_v6  ;;  %416 = vst [vmem:[%s2040_s8 + $0x38] sm:$0xff] %v415_v7  ;;  %v419_v9 = vld [vmem:[%s2035_s7 + $0x90] sm:$0xff] }
  0x1c   : > { %418 = vst [vmem:[%s2040_s8 + $0x40] sm:$0xff] %v417_v8  ;;  %v421_v10 = vld [vmem:[%s2035_s7 + $0xa0] sm:$0xff]  ;;  %v423_v11 = vld [vmem:[%s2035_s7 + $0xb0] sm:$0xff]  ;;  %420 = vst [vmem:[%s2040_s8 + $0x48] sm:$0xff] %v419_v9 }
  0x1d   : > { %422 = vst [vmem:[%s2040_s8 + $0x50] sm:$0xff] %v421_v10  ;;  %424 = vst [vmem:[%s2040_s8 + $0x58] sm:$0xff] %v423_v11  ;;  %v425_v12 = vld [vmem:[%s2035_s7 + $0xc0] sm:$0xff]  ;;  %v427_v13 = vld [vmem:[%s2035_s7 + $0xd0] sm:$0xff] }
  0x1e   : > { %v429_v14 = vld [vmem:[%s2035_s7 + $0xe0] sm:$0xff]  ;;  %426 = vst [vmem:[%s2040_s8 + $0x60] sm:$0xff] %v425_v12  ;;  %428 = vst [vmem:[%s2040_s8 + $0x68] sm:$0xff] %v427_v13  ;;  %v431_v15 = vld [vmem:[%s2035_s7 + $0xf0] sm:$0xff] }
  0x1f   : > { %430 = vst [vmem:[%s2040_s8 + $0x70] sm:$0xff] %v429_v14  ;;  %v433_v16 = vld [vmem:[%s2035_s7 + $0x100] sm:$0xff]  ;;  %v435_v17 = vld [vmem:[%s2035_s7 + $0x110] sm:$0xff]  ;;  %432 = vst [vmem:[%s2040_s8 + $0x78] sm:$0xff] %v431_v15 }
  0x20   : > { %434 = vst [vmem:[%s2040_s8 + $0x80] sm:$0xff] %v433_v16  ;;  %436 = vst [vmem:[%s2040_s8 + $0x88] sm:$0xff] %v435_v17  ;;  %v437_v18 = vld [vmem:[%s2035_s7 + $0x120] sm:$0xff]  ;;  %v439_v19 = vld [vmem:[%s2035_s7 + $0x130] sm:$0xff] }
  0x21   : > { %v441_v20 = vld [vmem:[%s2035_s7 + $0x140] sm:$0xff]  ;;  %438 = vst [vmem:[%s2040_s8 + $0x90] sm:$0xff] %v437_v18  ;;  %440 = vst [vmem:[%s2040_s8 + $0x98] sm:$0xff] %v439_v19  ;;  %v443_v21 = vld [vmem:[%s2035_s7 + $0x150] sm:$0xff] }
  0x22   : > { %442 = vst [vmem:[%s2040_s8 + $0xa0] sm:$0xff] %v441_v20  ;;  %v445_v22 = vld [vmem:[%s2035_s7 + $0x160] sm:$0xff]  ;;  %v447_v23 = vld [vmem:[%s2035_s7 + $0x170] sm:$0xff]  ;;  %444 = vst [vmem:[%s2040_s8 + $0xa8] sm:$0xff] %v443_v21 }
  0x23   : > { %446 = vst [vmem:[%s2040_s8 + $0xb0] sm:$0xff] %v445_v22  ;;  %448 = vst [vmem:[%s2040_s8 + $0xb8] sm:$0xff] %v447_v23  ;;  %v449_v24 = vld [vmem:[%s2035_s7 + $0x180] sm:$0xff]  ;;  %v451_v25 = vld [vmem:[%s2035_s7 + $0x190] sm:$0xff] }
  0x24   : > { %v453_v26 = vld [vmem:[%s2035_s7 + $0x1a0] sm:$0xff]  ;;  %450 = vst [vmem:[%s2040_s8 + $0xc0] sm:$0xff] %v449_v24  ;;  %452 = vst [vmem:[%s2040_s8 + $0xc8] sm:$0xff] %v451_v25  ;;  %v455_v27 = vld [vmem:[%s2035_s7 + $0x1b0] sm:$0xff] }
  0x25   : > { %454 = vst [vmem:[%s2040_s8 + $0xd0] sm:$0xff] %v453_v26  ;;  %v457_v28 = vld [vmem:[%s2035_s7 + $0x1c0] sm:$0xff]  ;;  %v459_v29 = vld [vmem:[%s2035_s7 + $0x1d0] sm:$0xff]  ;;  %456 = vst [vmem:[%s2040_s8 + $0xd8] sm:$0xff] %v455_v27 }
  0x26   : > { %458 = vst [vmem:[%s2040_s8 + $0xe0] sm:$0xff] %v457_v28  ;;  %460 = vst [vmem:[%s2040_s8 + $0xe8] sm:$0xff] %v459_v29  ;;  %v461_v30 = vld [vmem:[%s2035_s7 + $0x1e0] sm:$0xff]  ;;  %v463_v31 = vld [vmem:[%s2035_s7 + $0x1f0] sm:$0xff] }
  0x27   : > { %v465_v32 = vld [vmem:[%s2035_s7 + $0x200] sm:$0xff]  ;;  %462 = vst [vmem:[%s2040_s8 + $0xf0] sm:$0xff] %v461_v30  ;;  %464 = vst [vmem:[%s2040_s8 + $0xf8] sm:$0xff] %v463_v31  ;;  %v467_v33 = vld [vmem:[%s2035_s7 + $0x210] sm:$0xff] }
  0x28   : > { %466 = vst [vmem:[%s2040_s8 + $0x100] sm:$0xff] %v465_v32  ;;  %v469_v34 = vld [vmem:[%s2035_s7 + $0x220] sm:$0xff]  ;;  %v471_v35 = vld [vmem:[%s2035_s7 + $0x230] sm:$0xff]  ;;  %468 = vst [vmem:[%s2040_s8 + $0x108] sm:$0xff] %v467_v33 }
  0x29   : > { %470 = vst [vmem:[%s2040_s8 + $0x110] sm:$0xff] %v469_v34  ;;  %472 = vst [vmem:[%s2040_s8 + $0x118] sm:$0xff] %v471_v35  ;;  %v473_v36 = vld [vmem:[%s2035_s7 + $0x240] sm:$0xff]  ;;  %v475_v37 = vld [vmem:[%s2035_s7 + $0x250] sm:$0xff] }
  0x2a   : > { %v477_v38 = vld [vmem:[%s2035_s7 + $0x260] sm:$0xff]  ;;  %474 = vst [vmem:[%s2040_s8 + $0x120] sm:$0xff] %v473_v36  ;;  %476 = vst [vmem:[%s2040_s8 + $0x128] sm:$0xff] %v475_v37  ;;  %v479_v39 = vld [vmem:[%s2035_s7 + $0x270] sm:$0xff] }
  0x2b   : > { %478 = vst [vmem:[%s2040_s8 + $0x130] sm:$0xff] %v477_v38  ;;  %v481_v40 = vld [vmem:[%s2035_s7 + $0x280] sm:$0xff]  ;;  %v483_v41 = vld [vmem:[%s2035_s7 + $0x290] sm:$0xff]  ;;  %480 = vst [vmem:[%s2040_s8 + $0x138] sm:$0xff] %v479_v39 }
  0x2c   : > { %482 = vst [vmem:[%s2040_s8 + $0x140] sm:$0xff] %v481_v40  ;;  %484 = vst [vmem:[%s2040_s8 + $0x148] sm:$0xff] %v483_v41  ;;  %v485_v42 = vld [vmem:[%s2035_s7 + $0x2a0] sm:$0xff]  ;;  %v487_v43 = vld [vmem:[%s2035_s7 + $0x2b0] sm:$0xff] }
  0x2d   : > { %v489_v44 = vld [vmem:[%s2035_s7 + $0x2c0] sm:$0xff]  ;;  %486 = vst [vmem:[%s2040_s8 + $0x150] sm:$0xff] %v485_v42  ;;  %488 = vst [vmem:[%s2040_s8 + $0x158] sm:$0xff] %v487_v43  ;;  %v491_v45 = vld [vmem:[%s2035_s7 + $0x2d0] sm:$0xff] }
  0x2e   : > { %490 = vst [vmem:[%s2040_s8 + $0x160] sm:$0xff] %v489_v44  ;;  %v493_v46 = vld [vmem:[%s2035_s7 + $0x2e0] sm:$0xff]  ;;  %v495_v47 = vld [vmem:[%s2035_s7 + $0x2f0] sm:$0xff]  ;;  %492 = vst [vmem:[%s2040_s8 + $0x168] sm:$0xff] %v491_v45 }
  0x2f   : > { %494 = vst [vmem:[%s2040_s8 + $0x170] sm:$0xff] %v493_v46  ;;  %496 = vst [vmem:[%s2040_s8 + $0x178] sm:$0xff] %v495_v47  ;;  %v497_v48 = vld [vmem:[%s2035_s7 + $0x300] sm:$0xff]  ;;  %v499_v49 = vld [vmem:[%s2035_s7 + $0x310] sm:$0xff] }
  0x30   : > { %v501_v50 = vld [vmem:[%s2035_s7 + $0x320] sm:$0xff]  ;;  %498 = vst [vmem:[%s2040_s8 + $0x180] sm:$0xff] %v497_v48  ;;  %500 = vst [vmem:[%s2040_s8 + $0x188] sm:$0xff] %v499_v49  ;;  %v503_v51 = vld [vmem:[%s2035_s7 + $0x330] sm:$0xff] }
  0x31   : > { %502 = vst [vmem:[%s2040_s8 + $0x190] sm:$0xff] %v501_v50  ;;  %v505_v52 = vld [vmem:[%s2035_s7 + $0x340] sm:$0xff]  ;;  %v507_v53 = vld [vmem:[%s2035_s7 + $0x350] sm:$0xff]  ;;  %504 = vst [vmem:[%s2040_s8 + $0x198] sm:$0xff] %v503_v51 }
  0x32   : > { %506 = vst [vmem:[%s2040_s8 + $0x1a0] sm:$0xff] %v505_v52  ;;  %508 = vst [vmem:[%s2040_s8 + $0x1a8] sm:$0xff] %v507_v53  ;;  %v509_v54 = vld [vmem:[%s2035_s7 + $0x360] sm:$0xff]  ;;  %v511_v55 = vld [vmem:[%s2035_s7 + $0x370] sm:$0xff] }
  0x33   : > { %v513_v56 = vld [vmem:[%s2035_s7 + $0x380] sm:$0xff]  ;;  %510 = vst [vmem:[%s2040_s8 + $0x1b0] sm:$0xff] %v509_v54  ;;  %512 = vst [vmem:[%s2040_s8 + $0x1b8] sm:$0xff] %v511_v55  ;;  %v515_v57 = vld [vmem:[%s2035_s7 + $0x390] sm:$0xff] }
  0x34   : > { %514 = vst [vmem:[%s2040_s8 + $0x1c0] sm:$0xff] %v513_v56  ;;  %v517_v58 = vld [vmem:[%s2035_s7 + $0x3a0] sm:$0xff]  ;;  %v519_v59 = vld [vmem:[%s2035_s7 + $0x3b0] sm:$0xff]  ;;  %516 = vst [vmem:[%s2040_s8 + $0x1c8] sm:$0xff] %v515_v57 }
  0x35   : > { %518 = vst [vmem:[%s2040_s8 + $0x1d0] sm:$0xff] %v517_v58  ;;  %520 = vst [vmem:[%s2040_s8 + $0x1d8] sm:$0xff] %v519_v59  ;;  %v521_v60 = vld [vmem:[%s2035_s7 + $0x3c0] sm:$0xff]  ;;  %v523_v61 = vld [vmem:[%s2035_s7 + $0x3d0] sm:$0xff] }
  0x36   : > { %v525_v62 = vld [vmem:[%s2035_s7 + $0x3e0] sm:$0xff]  ;;  %522 = vst [vmem:[%s2040_s8 + $0x1e0] sm:$0xff] %v521_v60  ;;  %524 = vst [vmem:[%s2040_s8 + $0x1e8] sm:$0xff] %v523_v61  ;;  %v527_v63 = vld [vmem:[%s2035_s7 + $0x3f0] sm:$0xff] }
  0x37   : > { %526 = vst [vmem:[%s2040_s8 + $0x1f0] sm:$0xff] %v525_v62  ;;  %v529_v0 = vld [vmem:[%s2035_s7 + $0x400] sm:$0xff]  ;;  %v531_v1 = vld [vmem:[%s2035_s7 + $0x410] sm:$0xff]  ;;  %528 = vst [vmem:[%s2040_s8 + $0x1f8] sm:$0xff] %v527_v63 }
  0x38   : > { %530 = vst [vmem:[%s2040_s8 + $0x200] sm:$0xff] %v529_v0  ;;  %532 = vst [vmem:[%s2040_s8 + $0x208] sm:$0xff] %v531_v1  ;;  %v533_v2 = vld [vmem:[%s2035_s7 + $0x420] sm:$0xff]  ;;  %v535_v3 = vld [vmem:[%s2035_s7 + $0x430] sm:$0xff] }
  0x39   : > { %v537_v4 = vld [vmem:[%s2035_s7 + $0x440] sm:$0xff]  ;;  %534 = vst [vmem:[%s2040_s8 + $0x210] sm:$0xff] %v533_v2  ;;  %536 = vst [vmem:[%s2040_s8 + $0x218] sm:$0xff] %v535_v3  ;;  %v539_v5 = vld [vmem:[%s2035_s7 + $0x450] sm:$0xff] }
  0x3a   : > { %538 = vst [vmem:[%s2040_s8 + $0x220] sm:$0xff] %v537_v4  ;;  %v541_v6 = vld [vmem:[%s2035_s7 + $0x460] sm:$0xff]  ;;  %v543_v7 = vld [vmem:[%s2035_s7 + $0x470] sm:$0xff]  ;;  %540 = vst [vmem:[%s2040_s8 + $0x228] sm:$0xff] %v539_v5 }
  0x3b   : > { %542 = vst [vmem:[%s2040_s8 + $0x230] sm:$0xff] %v541_v6  ;;  %544 = vst [vmem:[%s2040_s8 + $0x238] sm:$0xff] %v543_v7  ;;  %v545_v8 = vld [vmem:[%s2035_s7 + $0x480] sm:$0xff]  ;;  %v547_v9 = vld [vmem:[%s2035_s7 + $0x490] sm:$0xff] }
  0x3c   : > { %v549_v10 = vld [vmem:[%s2035_s7 + $0x4a0] sm:$0xff]  ;;  %546 = vst [vmem:[%s2040_s8 + $0x240] sm:$0xff] %v545_v8  ;;  %548 = vst [vmem:[%s2040_s8 + $0x248] sm:$0xff] %v547_v9  ;;  %v551_v11 = vld [vmem:[%s2035_s7 + $0x4b0] sm:$0xff] }
  0x3d   : > { %550 = vst [vmem:[%s2040_s8 + $0x250] sm:$0xff] %v549_v10  ;;  %v553_v12 = vld [vmem:[%s2035_s7 + $0x4c0] sm:$0xff]  ;;  %v555_v13 = vld [vmem:[%s2035_s7 + $0x4d0] sm:$0xff]  ;;  %552 = vst [vmem:[%s2040_s8 + $0x258] sm:$0xff] %v551_v11 }
  0x3e   : > { %554 = vst [vmem:[%s2040_s8 + $0x260] sm:$0xff] %v553_v12  ;;  %556 = vst [vmem:[%s2040_s8 + $0x268] sm:$0xff] %v555_v13  ;;  %v557_v14 = vld [vmem:[%s2035_s7 + $0x4e0] sm:$0xff]  ;;  %v559_v15 = vld [vmem:[%s2035_s7 + $0x4f0] sm:$0xff] }
  0x3f   : > { %v561_v16 = vld [vmem:[%s2035_s7 + $0x500] sm:$0xff]  ;;  %558 = vst [vmem:[%s2040_s8 + $0x270] sm:$0xff] %v557_v14  ;;  %560 = vst [vmem:[%s2040_s8 + $0x278] sm:$0xff] %v559_v15  ;;  %v563_v17 = vld [vmem:[%s2035_s7 + $0x510] sm:$0xff] }
  0x40   : > { %562 = vst [vmem:[%s2040_s8 + $0x280] sm:$0xff] %v561_v16  ;;  %v565_v18 = vld [vmem:[%s2035_s7 + $0x520] sm:$0xff]  ;;  %v567_v19 = vld [vmem:[%s2035_s7 + $0x530] sm:$0xff]  ;;  %564 = vst [vmem:[%s2040_s8 + $0x288] sm:$0xff] %v563_v17 }
  0x41   : > { %566 = vst [vmem:[%s2040_s8 + $0x290] sm:$0xff] %v565_v18  ;;  %568 = vst [vmem:[%s2040_s8 + $0x298] sm:$0xff] %v567_v19  ;;  %v569_v20 = vld [vmem:[%s2035_s7 + $0x540] sm:$0xff]  ;;  %v571_v21 = vld [vmem:[%s2035_s7 + $0x550] sm:$0xff] }
  0x42   : > { %v573_v22 = vld [vmem:[%s2035_s7 + $0x560] sm:$0xff]  ;;  %570 = vst [vmem:[%s2040_s8 + $0x2a0] sm:$0xff] %v569_v20  ;;  %572 = vst [vmem:[%s2040_s8 + $0x2a8] sm:$0xff] %v571_v21  ;;  %v575_v23 = vld [vmem:[%s2035_s7 + $0x570] sm:$0xff] }
  0x43   : > { %574 = vst [vmem:[%s2040_s8 + $0x2b0] sm:$0xff] %v573_v22  ;;  %v577_v24 = vld [vmem:[%s2035_s7 + $0x580] sm:$0xff]  ;;  %v579_v25 = vld [vmem:[%s2035_s7 + $0x590] sm:$0xff]  ;;  %576 = vst [vmem:[%s2040_s8 + $0x2b8] sm:$0xff] %v575_v23 }
  0x44   : > { %578 = vst [vmem:[%s2040_s8 + $0x2c0] sm:$0xff] %v577_v24  ;;  %580 = vst [vmem:[%s2040_s8 + $0x2c8] sm:$0xff] %v579_v25  ;;  %v581_v26 = vld [vmem:[%s2035_s7 + $0x5a0] sm:$0xff]  ;;  %v583_v27 = vld [vmem:[%s2035_s7 + $0x5b0] sm:$0xff] }
  0x45   : > { %v585_v28 = vld [vmem:[%s2035_s7 + $0x5c0] sm:$0xff]  ;;  %582 = vst [vmem:[%s2040_s8 + $0x2d0] sm:$0xff] %v581_v26  ;;  %584 = vst [vmem:[%s2040_s8 + $0x2d8] sm:$0xff] %v583_v27  ;;  %v587_v29 = vld [vmem:[%s2035_s7 + $0x5d0] sm:$0xff] }
  0x46   : > { %586 = vst [vmem:[%s2040_s8 + $0x2e0] sm:$0xff] %v585_v28  ;;  %v589_v30 = vld [vmem:[%s2035_s7 + $0x5e0] sm:$0xff]  ;;  %v591_v31 = vld [vmem:[%s2035_s7 + $0x5f0] sm:$0xff]  ;;  %588 = vst [vmem:[%s2040_s8 + $0x2e8] sm:$0xff] %v587_v29 }
  0x47   : > { %590 = vst [vmem:[%s2040_s8 + $0x2f0] sm:$0xff] %v589_v30  ;;  %592 = vst [vmem:[%s2040_s8 + $0x2f8] sm:$0xff] %v591_v31 }
  0x48 PF: > { %p1575_p7 = scmp.ge.s32.totalorder %s1952_s18, 1  ;;  %p605_p8 = scmp.lt.s32.totalorder %s1952_s18, 7 }
  0x4a   : > { %p606_p9 = pnand %p1575_p7, %p605_p8 }
  0x4b   : > { %s612_s9 = sand.u32 (!%p606_p9), 1, %s1928_s12   ;;  %s652_s10 = smul.u32 (!%p606_p9), 6, %s1936_s14 }
  0x4c   : > { %609 = sbr.rel (%p606_p9) target bundleno = 435 (0x1b3), region = 66  ;;  %s1577_s21 = sshll.u32 (!%p606_p9), %s1940_s15, 1 }
  0x4d   : > { %s1690_s11 = smul.u32 (!%p606_p9), 768, %s612_s9  ;;  %p655_p10 = scmp.lt.s32.totalorder (!%p606_p9), %s652_s10, 17 }
  0x4e   : > { %p665_p11 = scmp.lt.s32.totalorder (!%p606_p9), %s1577_s21, 3  ;;  %p1580_p12 = scmp.ne.s32.totalorder (!%p606_p9), %s1936_s14, 0 }
  0x4f   : > { %s2253_s5 = scalar_lea.vmem (!%p606_p9), [#allocation3], %s1690_s11 }
  0x51   : > { %s2406_s10 = smov (!%p655_p10, %s652_s10), 17  ;;  %s2408_s21 = smov (!%p665_p11, %s1577_s21), 3 }
  0x52   : > { %s1576_s22 = sshll.u32 %s2406_s10, 2  ;;  %s667_s12 = scalar_lea.vmem %s2391_s2, %s2408_s21 }
  0x53   : > { %s2241_s26 = scalar_lea.vmem %s2389_s0, %s1576_s22  ;;  %s1579_s29 = sshll.u32 %s2408_s21, 2 }
  0x54   : > { %s2251_s4 = scalar_lea.vmem %s2392_s3, %s1579_s29  ;;  %682 = sbr.rel (%p1580_p12) target bundleno = 91 (0x5b), region = 74 }
  0x59   : > { %v1954_v32 = vmov 0.0  }
  0x5a   : > { %683 = vst [vmem:[#allocation2] sm:$0xff] %v1954_v32  ;;  %684 = vst [vmem:[#allocation2 + $0x8] sm:$0xff] %v1954_v32 }
  0x5b PF: > { %v1748_v33 = vld [vmem:[%s2253_s5 + $0x74] ss:$8 sps:$4 sm:$0xff]   ;;  %v1752_v35 = vld [vmem:[%s2253_s5 + $0x70] ss:$8 sps:$4 sm:$0xff]   ;;  %v1754_v37 = vld [vmem:[%s2253_s5 + $0x64] ss:$8 sps:$4 sm:$0xff]  }
  0x5c   : > { %v1750_v34 = vld [vmem:[%s2253_s5 + $0x174] ss:$8 sps:$4 sm:$0xff]   ;;  %1287 = vmatprep.subr.bf16.mxu0 %v1748_v33  ;;  %v1753_v36 = vld [vmem:[%s2253_s5 + $0x170] ss:$8 sps:$4 sm:$0xff]   ;;  %v1756_v38 = vld [vmem:[%s2253_s5 + $0x164] ss:$8 sps:$4 sm:$0xff]  }
  0x5d   : > { %1328 = vmatprep.subr.bf16.mxu1 %v1750_v34  ;;  %1288 = vmatpush1.bf16.msra.mxu0 %v1752_v35  ;;  %v1758_v39 = vld [vmem:[%s2253_s5 + $0x60] ss:$8 sps:$4 sm:$0xff]   ;;  %v1760_v41 = vld [vmem:[%s2253_s5 + $0x54] ss:$8 sps:$4 sm:$0xff]   ;;  %v1764_v43 = vld [vmem:[%s2253_s5 + $0x50] ss:$8 sps:$4 sm:$0xff]  }
  0x5e   : > { %1329 = vmatpush1.bf16.msra.mxu1 %v1753_v36  ;;  %1289 = vmatprep.subr.bf16.mxu0 %v1754_v37  ;;  %v1759_v40 = vld [vmem:[%s2253_s5 + $0x160] ss:$8 sps:$4 sm:$0xff]   ;;  %v1762_v42 = vld [vmem:[%s2253_s5 + $0x154] ss:$8 sps:$4 sm:$0xff]   ;;  %v1765_v44 = vld [vmem:[%s2253_s5 + $0x150] ss:$8 sps:$4 sm:$0xff]  }
  0x5f   : > { %1330 = vmatprep.subr.bf16.mxu1 %v1756_v38  ;;  %v1766_v45 = vld [vmem:[%s2253_s5 + $0x44] ss:$8 sps:$4 sm:$0xff]   ;;  %v1770_v47 = vld [vmem:[%s2253_s5 + $0x40] ss:$8 sps:$4 sm:$0xff]   ;;  %v1772_v49 = vld [vmem:[%s2253_s5 + $0x34] ss:$8 sps:$4 sm:$0xff]  }
  0x60   : > { %v1768_v46 = vld [vmem:[%s2253_s5 + $0x144] ss:$8 sps:$4 sm:$0xff]   ;;  %v1771_v48 = vld [vmem:[%s2253_s5 + $0x140] ss:$8 sps:$4 sm:$0xff]   ;;  %v1774_v50 = vld [vmem:[%s2253_s5 + $0x134] ss:$8 sps:$4 sm:$0xff]  }
  0x61   : > { %1290 = vmatpush1.bf16.msra.mxu0 %v1758_v39  ;;  %v1776_v51 = vld [vmem:[%s2253_s5 + $0x30] ss:$8 sps:$4 sm:$0xff]   ;;  %v1778_v53 = vld [vmem:[%s2253_s5 + $0x24] ss:$8 sps:$4 sm:$0xff]   ;;  %v1782_v55 = vld [vmem:[%s2253_s5 + $0x20] ss:$8 sps:$4 sm:$0xff]  }
  0x62   : > { %1331 = vmatpush1.bf16.msra.mxu1 %v1759_v40  ;;  %1291 = vmatprep.subr.bf16.mxu0 %v1760_v41  ;;  %v1777_v52 = vld [vmem:[%s2253_s5 + $0x130] ss:$8 sps:$4 sm:$0xff]   ;;  %v1780_v54 = vld [vmem:[%s2253_s5 + $0x124] ss:$8 sps:$4 sm:$0xff]   ;;  %v1783_v56 = vld [vmem:[%s2253_s5 + $0x120] ss:$8 sps:$4 sm:$0xff]  }
  0x63   : > { %1332 = vmatprep.subr.bf16.mxu1 %v1762_v42  ;;  %v1784_v57 = vld [vmem:[%s2253_s5 + $0x14] ss:$8 sps:$4 sm:$0xff]   ;;  %v1788_v59 = vld [vmem:[%s2253_s5 + $0x10] ss:$8 sps:$4 sm:$0xff]   ;;  %v1790_v61 = vld [vmem:[%s2253_s5 + $0x4] ss:$8 sps:$4 sm:$0xff]  }
  0x64   : > { %v1786_v58 = vld [vmem:[%s2253_s5 + $0x114] ss:$8 sps:$4 sm:$0xff]   ;;  %v1789_v60 = vld [vmem:[%s2253_s5 + $0x110] ss:$8 sps:$4 sm:$0xff]   ;;  %v1792_v62 = vld [vmem:[%s2253_s5 + $0x104] ss:$8 sps:$4 sm:$0xff]  }
  0x65   : > { %1292 = vmatpush1.bf16.msra.mxu0 %v1764_v43  ;;  %v1794_v63 = vld [vmem:[%s2253_s5] ss:$8 sps:$4 sm:$0xff]   ;;  %v1796_v1 = vld [vmem:[%s2253_s5 + $0xf4] ss:$8 sps:$4 sm:$0xff]   ;;  %v1800_v3 = vld [vmem:[%s2253_s5 + $0xf0] ss:$8 sps:$4 sm:$0xff]  }
  0x66   : > { %1333 = vmatpush1.bf16.msra.mxu1 %v1765_v44  ;;  %1293 = vmatprep.subr.bf16.mxu0 %v1766_v45  ;;  %v1795_v0 = vld [vmem:[%s2253_s5 + $0x100] ss:$8 sps:$4 sm:$0xff]   ;;  %v1798_v2 = vld [vmem:[%s2253_s5 + $0x1f4] ss:$8 sps:$4 sm:$0xff]   ;;  %v1801_v4 = vld [vmem:[%s2253_s5 + $0x1f0] ss:$8 sps:$4 sm:$0xff]  }
  0x67   : > { %1334 = vmatprep.subr.bf16.mxu1 %v1768_v46  ;;  %v1802_v5 = vld [vmem:[%s2253_s5 + $0xe4] ss:$8 sps:$4 sm:$0xff]   ;;  %v1806_v7 = vld [vmem:[%s2253_s5 + $0xe0] ss:$8 sps:$4 sm:$0xff]   ;;  %v1808_v9 = vld [vmem:[%s2253_s5 + $0xd4] ss:$8 sps:$4 sm:$0xff]  }
  0x68   : > { %v1804_v6 = vld [vmem:[%s2253_s5 + $0x1e4] ss:$8 sps:$4 sm:$0xff]   ;;  %v1807_v8 = vld [vmem:[%s2253_s5 + $0x1e0] ss:$8 sps:$4 sm:$0xff]   ;;  %v1810_v10 = vld [vmem:[%s2253_s5 + $0x1d4] ss:$8 sps:$4 sm:$0xff]  }
  0x69   : > { %1294 = vmatpush1.bf16.msra.mxu0 %v1770_v47  ;;  %v1812_v11 = vld [vmem:[%s2253_s5 + $0xd0] ss:$8 sps:$4 sm:$0xff]   ;;  %v1814_v13 = vld [vmem:[%s2253_s5 + $0xc4] ss:$8 sps:$4 sm:$0xff]   ;;  %v1818_v18 = vld [vmem:[%s2253_s5 + $0xc0] ss:$8 sps:$4 sm:$0xff]  }
  0x6a   : > { %1335 = vmatpush1.bf16.msra.mxu1 %v1771_v48  ;;  %1295 = vmatprep.subr.bf16.mxu0 %v1772_v49  ;;  %v1813_v12 = vld [vmem:[%s2253_s5 + $0x1d0] ss:$8 sps:$4 sm:$0xff]   ;;  %v1816_v14 = vld [vmem:[%s2253_s5 + $0x1c4] ss:$8 sps:$4 sm:$0xff]   ;;  %v1819_v19 = vld [vmem:[%s2253_s5 + $0x1c0] ss:$8 sps:$4 sm:$0xff]  }
  0x6b   : > { %1336 = vmatprep.subr.bf16.mxu1 %v1774_v50  ;;  %v687_v15 = vld [vmem:[%s2241_s26] sm:$0xff]  ;;  %v688_v17 = vld [vmem:[%s2241_s26 + $0x8] sm:$0xff]  ;;  %v1826_v25 = vld [vmem:[%s2253_s5 + $0xa4] ss:$8 sps:$4 sm:$0xff]   ;;  %p1683_p13 = scmp.ne.s32.totalorder %s1936_s14, 2 }
  0x6c   : > { %v1582_v16 = vcombine.high %v687_v15, %v687_v15  ;;  %v1584_v20 = vcombine.high %v688_v17, %v688_v17  ;;  %v1820_v21 = vld [vmem:[%s2253_s5 + $0xb4] ss:$8 sps:$4 sm:$0xff]   ;;  %v1824_v23 = vld [vmem:[%s2253_s5 + $0xb0] ss:$8 sps:$4 sm:$0xff]   ;;  %v1828_v26 = vld [vmem:[%s2253_s5 + $0x1a4] ss:$8 sps:$4 sm:$0xff]   ;;  %v1581_v38 = vcombine.low %v687_v15, %v687_v15  ;;  %v1583_v39 = vcombine.low %v688_v17, %v688_v17 }
  0x6d   : > { %1296 = vmatpush1.bf16.msra.mxu0 %v1776_v51  ;;  %v1822_v22 = vld [vmem:[%s2253_s5 + $0x1b4] ss:$8 sps:$4 sm:$0xff]   ;;  %v1825_v24 = vld [vmem:[%s2253_s5 + $0x1b0] ss:$8 sps:$4 sm:$0xff]   ;;  %v1830_v27 = vld [vmem:[%s2253_s5 + $0xa0] ss:$8 sps:$4 sm:$0xff]  }
  0x6e   : > { %1337 = vmatpush1.bf16.msra.mxu1 %v1777_v52  ;;  %1297 = vmatprep.subr.bf16.mxu0 %v1778_v53  ;;  %v1831_v28 = vld [vmem:[%s2253_s5 + $0x1a0] ss:$8 sps:$4 sm:$0xff]   ;;  %v1832_v29 = vld [vmem:[%s2253_s5 + $0x94] ss:$8 sps:$4 sm:$0xff]   ;;  %v1836_v31 = vld [vmem:[%s2253_s5 + $0x90] ss:$8 sps:$4 sm:$0xff]  }
  0x6f   : > { %1338 = vmatprep.subr.bf16.mxu1 %v1780_v54  ;;  %1319 = vmatprep.mubr.bf16.mxu0 %v1582_v16  ;;  %v1834_v30 = vld [vmem:[%s2253_s5 + $0x194] ss:$8 sps:$4 sm:$0xff]   ;;  %v1837_v32 = vld [vmem:[%s2253_s5 + $0x190] ss:$8 sps:$4 sm:$0xff]   ;;  %v1838_v33 = vld [vmem:[%s2253_s5 + $0x84] ss:$8 sps:$4 sm:$0xff]  }
  0x70   : > { %1360 = vmatprep.mubr.bf16.mxu1 %v1584_v20  ;;  %v1840_v34 = vld [vmem:[%s2253_s5 + $0x184] ss:$8 sps:$4 sm:$0xff]   ;;  %v1842_v35 = vld [vmem:[%s2253_s5 + $0x80] ss:$8 sps:$4 sm:$0xff]   ;;  %v1850_v37 = vld [vmem:[%s2253_s5 + $0x274] ss:$8 sps:$4 sm:$0xff]  }
  0x71   : > { %1298 = vmatpush1.bf16.msra.mxu0 %v1782_v55  ;;  %v1843_v36 = vld [vmem:[%s2253_s5 + $0x180] ss:$8 sps:$4 sm:$0xff]   ;;  %v1848_v40 = vld [vmem:[%s2253_s5 + $0x270] ss:$8 sps:$4 sm:$0xff]   ;;  %v1853_v42 = vld [vmem:[%s2253_s5 + $0x264] ss:$8 sps:$4 sm:$0xff]  }
  0x72   : > { %1339 = vmatpush1.bf16.msra.mxu1 %v1783_v56  ;;  %1299 = vmatprep.subr.bf16.mxu0 %v1784_v57  ;;  %v2325_v41 = vld [vmem:[%s2241_s26 + $0x10] sm:$0xff]  ;;  %v1856_v45 = vld [vmem:[%s2253_s5 + $0x254] ss:$8 sps:$4 sm:$0xff]   ;;  %v1854_v46 = vld [vmem:[%s2253_s5 + $0x250] ss:$8 sps:$4 sm:$0xff]  }
  0x73   : > { %1340 = vmatprep.subr.bf16.mxu1 %v1786_v58  ;;  %v1586_v43 = vcombine.high %v2325_v41, %v2325_v41  ;;  %v1851_v44 = vld [vmem:[%s2253_s5 + $0x260] ss:$8 sps:$4 sm:$0xff]   ;;  %v1859_v47 = vld [vmem:[%s2253_s5 + $0x244] ss:$8 sps:$4 sm:$0xff]   ;;  %v1862_v49 = vld [vmem:[%s2253_s5 + $0x234] ss:$8 sps:$4 sm:$0xff]  }
  0x74   : > { %v1857_v48 = vld [vmem:[%s2253_s5 + $0x240] ss:$8 sps:$4 sm:$0xff]   ;;  %v1860_v50 = vld [vmem:[%s2253_s5 + $0x230] ss:$8 sps:$4 sm:$0xff]   ;;  %v1865_v51 = vld [vmem:[%s2253_s5 + $0x224] ss:$8 sps:$4 sm:$0xff]  }
  0x75   : > { %1300 = vmatpush1.bf16.msra.mxu0 %v1788_v59  ;;  %v1863_v52 = vld [vmem:[%s2253_s5 + $0x220] ss:$8 sps:$4 sm:$0xff]   ;;  %v1868_v53 = vld [vmem:[%s2253_s5 + $0x214] ss:$8 sps:$4 sm:$0xff]   ;;  %v1866_v54 = vld [vmem:[%s2253_s5 + $0x210] ss:$8 sps:$4 sm:$0xff]  }
  0x76   : > { %1341 = vmatpush1.bf16.msra.mxu1 %v1789_v60  ;;  %1301 = vmatprep.subr.bf16.mxu0 %v1790_v61  ;;  %v1871_v55 = vld [vmem:[%s2253_s5 + $0x204] ss:$8 sps:$4 sm:$0xff]   ;;  %v1869_v56 = vld [vmem:[%s2253_s5 + $0x200] ss:$8 sps:$4 sm:$0xff]   ;;  %v1874_v57 = vld [vmem:[%s2253_s5 + $0x2f4] ss:$8 sps:$4 sm:$0xff]  }
  0x77   : > { %1342 = vmatprep.subr.bf16.mxu1 %v1792_v62  ;;  %v1872_v58 = vld [vmem:[%s2253_s5 + $0x2f0] ss:$8 sps:$4 sm:$0xff]   ;;  %v1877_v59 = vld [vmem:[%s2253_s5 + $0x2e4] ss:$8 sps:$4 sm:$0xff]   ;;  %v1875_v60 = vld [vmem:[%s2253_s5 + $0x2e0] ss:$8 sps:$4 sm:$0xff]  }
  0x78   : > { %v1880_v61 = vld [vmem:[%s2253_s5 + $0x2d4] ss:$8 sps:$4 sm:$0xff]   ;;  %v1878_v62 = vld [vmem:[%s2253_s5 + $0x2d0] ss:$8 sps:$4 sm:$0xff]  }
  0x79   : > { %1302 = vmatpush1.bf16.msra.mxu0 %v1794_v63  ;;  %v1883_v63 = vld [vmem:[%s2253_s5 + $0x2c4] ss:$8 sps:$4 sm:$0xff]  }
  0x7a   : > { %1343 = vmatpush1.bf16.msra.mxu1 %v1795_v0  ;;  %1303 = vmatprep.subr.bf16.mxu0 %v1796_v1  ;;  %v1881_v0 = vld [vmem:[%s2253_s5 + $0x2c0] ss:$8 sps:$4 sm:$0xff]   ;;  %v1886_v1 = vld [vmem:[%s2253_s5 + $0x2b4] ss:$8 sps:$4 sm:$0xff]  }
  0x7b   : > { %1344 = vmatprep.subr.bf16.mxu1 %v1798_v2  ;;  %v1884_v2 = vld [vmem:[%s2253_s5 + $0x2b0] ss:$8 sps:$4 sm:$0xff]  }
  0x7d   : > { %1304 = vmatpush2.bf16.msra.mxu0 %v1800_v3  ;;  %v1889_v3 = vld [vmem:[%s2253_s5 + $0x2a4] ss:$8 sps:$4 sm:$0xff]  }
  0x7e   : > { %1345 = vmatpush2.bf16.msra.mxu1 %v1801_v4  ;;  %1305 = vmatprep.subr.bf16.mxu0 %v1802_v5  ;;  %v1887_v4 = vld [vmem:[%s2253_s5 + $0x2a0] ss:$8 sps:$4 sm:$0xff]   ;;  %v1892_v5 = vld [vmem:[%s2253_s5 + $0x294] ss:$8 sps:$4 sm:$0xff]  }
  0x7f   : > { %1346 = vmatprep.subr.bf16.mxu1 %v1804_v6  ;;  %v1890_v6 = vld [vmem:[%s2253_s5 + $0x290] ss:$8 sps:$4 sm:$0xff]  }
  0x81   : > { %1306 = vmatpush2.bf16.msra.mxu0 %v1806_v7  ;;  %v1895_v7 = vld [vmem:[%s2253_s5 + $0x284] ss:$8 sps:$4 sm:$0xff]  }
  0x82   : > { %1347 = vmatpush2.bf16.msra.mxu1 %v1807_v8  ;;  %1307 = vmatprep.subr.bf16.mxu0 %v1808_v9  ;;  %v1893_v8 = vld [vmem:[%s2253_s5 + $0x280] ss:$8 sps:$4 sm:$0xff]   ;;  %v1585_v9 = vcombine.low %v2325_v41, %v2325_v41 }
  0x83   : > { %1348 = vmatprep.subr.bf16.mxu1 %v1810_v10 }
  0x85   : > { %1308 = vmatpush2.bf16.msra.mxu0 %v1812_v11 }
  0x86   : > { %1349 = vmatpush2.bf16.msra.mxu1 %v1813_v12  ;;  %1309 = vmatprep.subr.bf16.mxu0 %v1814_v13 }
  0x87   : > { %1350 = vmatprep.subr.bf16.mxu1 %v1816_v14 }
  0x89   : > { %1310 = vmatpush2.bf16.msra.mxu0 %v1818_v18 }
  0x8a   : > { %1351 = vmatpush2.bf16.msra.mxu1 %v1819_v19  ;;  %1311 = vmatprep.subr.bf16.mxu0 %v1820_v21  ;;  %v685_v19 = vld [vmem:[#allocation2] sm:$0xff] }
  0x8b   : > { %1352 = vmatprep.subr.bf16.mxu1 %v1822_v22 }
  0x8d   : > { %1312 = vmatpush2.bf16.msra.mxu0 %v1824_v23  ;;  %v686_v23 = vld [vmem:[#allocation2 + $0x8] sm:$0xff] }
  0x8e   : > { %1353 = vmatpush2.bf16.msra.mxu1 %v1825_v24  ;;  %1313 = vmatprep.subr.bf16.mxu0 %v1826_v25 }
  0x8f   : > { %1354 = vmatprep.subr.bf16.mxu1 %v1828_v26 }
  0x91   : > { %1314 = vmatpush2.bf16.msra.mxu0 %v1830_v27 }
  0x92   : > { %1355 = vmatpush2.bf16.msra.mxu1 %v1831_v28  ;;  %1315 = vmatprep.subr.bf16.mxu0 %v1832_v29 }
  0x93   : > { %1356 = vmatprep.subr.bf16.mxu1 %v1834_v30 }
  0x95   : > { %1316 = vmatpush2.bf16.msra.mxu0 %v1836_v31 }
  0x96   : > { %1357 = vmatpush2.bf16.msra.mxu1 %v1837_v32  ;;  %1317 = vmatprep.subr.bf16.mxu0 %v1838_v33 }
  0x97   : > { %1358 = vmatprep.subr.bf16.mxu1 %v1840_v34 }
  0x99   : > { %1318 = vmatpush2.bf16.msra.mxu0 %v1842_v35 }
  0x9a   : > { %1359 = vmatpush2.bf16.msra.mxu1 %v1843_v36  ;;  %1369 = vmatprep.subr.bf16.mxu0 %v1850_v37 }
  0x9c   : > { %1320 = vmatmul.mubr.bf16.vlgmr.msra.gmra.mxu0 %v1581_v38 }
  0x9d   : > { %1361 = vmatmul.mubr.bf16.vlgmr.msra.gmra.mxu1 %v1583_v39  ;;  %1370 = vmatpush1.bf16.msra.mxu0 %v1848_v40 }
  0x9e   : > { %1401 = vmatprep.mubr.bf16.mxu0 %v1586_v43  ;;  %1371 = vmatprep.subr.bf16.mxu0 %v1853_v42 }
  0xa1   : > { %1372 = vmatpush1.bf16.msra.mxu0 %v1851_v44 }
  0xa2   : > { %1373 = vmatprep.subr.bf16.mxu0 %v1856_v45 }
  0xa5   : > { %1374 = vmatpush1.bf16.msra.mxu0 %v1854_v46 }
  0xa6   : > { %1375 = vmatprep.subr.bf16.mxu0 %v1859_v47 }
  0xa9   : > { %1376 = vmatpush1.bf16.msra.mxu0 %v1857_v48 }
  0xaa   : > { %1377 = vmatprep.subr.bf16.mxu0 %v1862_v49 }
  0xad   : > { %1378 = vmatpush1.bf16.msra.mxu0 %v1860_v50 }
  0xae   : > { %1379 = vmatprep.subr.bf16.mxu0 %v1865_v51 }
  0xb1   : > { %1380 = vmatpush1.bf16.msra.mxu0 %v1863_v52 }
  0xb2   : > { %1381 = vmatprep.subr.bf16.mxu0 %v1868_v53 }
  0xb5   : > { %1382 = vmatpush1.bf16.msra.mxu0 %v1866_v54 }
  0xb6   : > { %1383 = vmatprep.subr.bf16.mxu0 %v1871_v55 }
  0xb9   : > { %1384 = vmatpush1.bf16.msra.mxu0 %v1869_v56 }
  0xba   : > { %1385 = vmatprep.subr.bf16.mxu0 %v1874_v57 }
  0xbd   : > { %1386 = vmatpush2.bf16.msra.mxu0 %v1872_v58 }
  0xbe   : > { %1387 = vmatprep.subr.bf16.mxu0 %v1877_v59 }
  0xc1   : > { %1388 = vmatpush2.bf16.msra.mxu0 %v1875_v60 }
  0xc2   : > { %1389 = vmatprep.subr.bf16.mxu0 %v1880_v61 }
  0xc5   : > { %1390 = vmatpush2.bf16.msra.mxu0 %v1878_v62 }
  0xc6   : > { %1391 = vmatprep.subr.bf16.mxu0 %v1883_v63 }
  0xc9   : > { %1392 = vmatpush2.bf16.msra.mxu0 %v1881_v0 }
  0xca   : > { %1393 = vmatprep.subr.bf16.mxu0 %v1886_v1 }
  0xcd   : > { %1394 = vmatpush2.bf16.msra.mxu0 %v1884_v2 }
  0xce   : > { %1395 = vmatprep.subr.bf16.mxu0 %v1889_v3 }
  0xd1   : > { %1396 = vmatpush2.bf16.msra.mxu0 %v1887_v4 }
  0xd2   : > { %1397 = vmatprep.subr.bf16.mxu0 %v1892_v5 }
  0xd5   : > { %1398 = vmatpush2.bf16.msra.mxu0 %v1890_v6 }
  0xd6   : > { %1399 = vmatprep.subr.bf16.mxu0 %v1895_v7 }
  0xd9   : > { %1400 = vmatpush2.bf16.msra.mxu0 %v1893_v8 }
  0xdc   : > { %1402 = vmatmul.mubr.bf16.vlgmr.msra.gmra.mxu0 %v1585_v9 }
 0x15c   : > { %v1321_v10 = vpop.f32.mrf.mxu0 }
 0x15d   : > { %v1362_v11 = vpop.f32.mrf.mxu1 }
 0x15e   : > { %v1323_v12 = vpop.f32.mrf.mxu0  ;;  %v1363_v18 = vadd.f32 %v1362_v11, %v1321_v10 }
 0x15f   : > { %v1364_v13 = vpop.f32.mrf.mxu1 }
 0x160   : > { %v1325_v14 = vpop.f32.mrf.mxu0  ;;  %v1365_v21 = vadd.f32 %v1364_v13, %v1323_v12 }
 0x161   : > { %v1366_v15 = vpop.f32.mrf.mxu1 }
 0x162   : > { %v1326_v16 = vpop.f32.mrf.mxu0 }
 0x163   : > { %v1367_v17 = vpop.f32.mrf.mxu1 }
 0x19c   : > { %v1403_v20 = vpop.f32.mrf.mxu0 }
 0x19d   : > { %v1404_v22 = vadd.f32 %v1403_v20, %v1363_v18 }
 0x19e   : > { %v1405_v24 = vpop.f32.mrf.mxu0 }
 0x19f   : > { %v1410_v25 = vadd.f32 %v1404_v22, %v685_v19  ;;  %v1406_v26 = vadd.f32 %v1405_v24, %v1365_v21  ;;  %1417 = sbr.rel (%p1683_p13) target bundleno = 435 (0x1b3), region = 78 }
 0x1a0   : > { %v1407_v27 = vpop.f32.mrf.mxu0 }
 0x1a1   : > { %1412 = vst [vmem:[#allocation2] sm:$0xff] %v1410_v25  ;;  %v1411_v28 = vadd.f32 %v1406_v26, %v686_v23 }
 0x1a2   : > { %v1408_v29 = vpop.f32.mrf.mxu0 }
 0x1a3   : > { %1413 = vst [vmem:[#allocation2 + $0x8] sm:$0xff] %v1411_v28 }
 0x1a4   : > { %v1422_v30 = vlaneseq  ;;  %v1420_v32 = vld [vmem:[%s667_s12] sm:$0x3] }
 0x1a6   : > { %v1423_v31 = vshrl.u32 %v1422_v30, 7 }
 0x1a8   : > { %v1424_v33 = vsub.s32 0, %v1423_v31  ;;  %v1428_v34 = vsub.s32 1, %v1423_v31  ;;  %v1418_v35 = vld [vmem:[#allocation2] sm:$0xff] }
 0x1aa   : > { %v1419_v36 = vld [vmem:[#allocation2 + $0x8] sm:$0xff]  ;;  %v1425_v37 = vrot.slane %v1420_v32, %v1424_v33  ;;  %v1429_v38 = vrot.slane %v1420_v32, %v1428_v34 }
 0x1ac   : > { %v1432_v39 = vadd.f32 %v1425_v37, %v1418_v35  ;;  %v1433_v40 = vadd.f32 %v1429_v38, %v1419_v36 }
 0x1ae   : > { %v1434_v41 = vmax.f32 %v1432_v39, 0.0  ;;  %v1435_v42 = vmax.f32 %v1433_v40, 0.0 }
 0x1b0   : > { %v1688_v43 = vpack.c.bf16 %v1435_v42, %v1434_v41 }
 0x1b2   : > { %1444 = vst [vmem:[%s2251_s4] sm:$0xff] %v1688_v43 }
 0x1b3 PF: > { %s13_s18 = sadd.s32 1, %s1952_s18   ;;  %s2393_s12 = smov %s1932_s13 }
 0x1b4   : > { %p10_p0 = scmp.ge.s32.totalorder %s13_s18, 8   ;;  %s2394_s13 = smov %s2026_s25 }
 0x1b5   : > { %s2395_s14 = smov %s1944_s16  ;;  %s2396_s15 = smov %s1948_s17 }
 0x1b6   : > { %s2397_s16 = smov %s2400_s19  ;;  %s2398_s17 = smov %s2404_s20 }
 0x1b7   :  { %12 = sbr.rel (!%p10_p0) target bundleno = 4 (0x4), region = 119 }

// kernel: _lambda_.25
= control target key start
LH: loop header
LB: loop body
LE: loop exit
PB: predicated region body
PF: predicated region fallthrough
CT: control target
= control target key end

     0   :  { %vm33_vm0 = vcmask 1043456   ;;  %s665_s0 = inlined_call_operand.vmem [shape: bf16[2,4,512], index: 0, kind: input, shape index: {}]   ;;  %s666_s1 = inlined_call_operand.vmem [shape: f32[512,10], index: 1, kind: input, shape index: {}]   ;;  %s667_s2 = inlined_call_operand.vmem [shape: f32[1,10], index: 2, kind: input, shape index: {}]   ;;  %s668_s3 = inlined_call_operand.hbm [shape: f32[2,10], index: 3, kind: output, shape index: {}]  }
   0x1   :  { %v121_v0 = vld [vmem:[%s666_s1 + $0xf8] sm:$0xff]  ;;  %v120_v4 = vld [vmem:[%s666_s1 + $0xf0] sm:$0xff]  ;;  %v119_v8 = vld [vmem:[%s666_s1 + $0xe8] sm:$0xff] }
   0x2   :  { %v153_v1 = vld [vmem:[%s666_s1 + $0x1f8] sm:$0xff]  ;;  %335 = vmatprep.subr.mxu0 %v121_v0  ;;  %v152_v5 = vld [vmem:[%s666_s1 + $0x1f0] sm:$0xff]  ;;  %v151_v9 = vld [vmem:[%s666_s1 + $0x1e8] sm:$0xff] }
   0x3   :  { %v105_v2 = vld [vmem:[%s666_s1 + $0x78] sm:$0xff]  ;;  %370 = vmatprep.subr.mxu1 %v153_v1  ;;  %v104_v6 = vld [vmem:[%s666_s1 + $0x70] sm:$0xff]  ;;  %v103_v10 = vld [vmem:[%s666_s1 + $0x68] sm:$0xff] }
   0x4   :  { %v137_v3 = vld [vmem:[%s666_s1 + $0x178] sm:$0xff]  ;;  %336 = vmatpush3.msra.mxu0 %v105_v2  ;;  %v136_v7 = vld [vmem:[%s666_s1 + $0x170] sm:$0xff]  ;;  %v135_v11 = vld [vmem:[%s666_s1 + $0x168] sm:$0xff] }
   0x5   :  { %371 = vmatpush3.msra.mxu1 %v137_v3  ;;  %337 = vmatprep.subr.mxu0 %v120_v4  ;;  %v118_v12 = vld [vmem:[%s666_s1 + $0xe0] sm:$0xff]  ;;  %v117_v16 = vld [vmem:[%s666_s1 + $0xd8] sm:$0xff]  ;;  %v116_v20 = vld [vmem:[%s666_s1 + $0xd0] sm:$0xff] }
   0x6   :  { %372 = vmatprep.subr.mxu1 %v152_v5  ;;  %338 = vmatpush3.msra.mxu0 %v104_v6  ;;  %v150_v13 = vld [vmem:[%s666_s1 + $0x1e0] sm:$0xff]  ;;  %v149_v17 = vld [vmem:[%s666_s1 + $0x1d8] sm:$0xff]  ;;  %v148_v21 = vld [vmem:[%s666_s1 + $0x1d0] sm:$0xff] }
   0x7   :  { %373 = vmatpush3.msra.mxu1 %v136_v7  ;;  %339 = vmatprep.subr.mxu0 %v119_v8  ;;  %v102_v14 = vld [vmem:[%s666_s1 + $0x60] sm:$0xff]  ;;  %v101_v18 = vld [vmem:[%s666_s1 + $0x58] sm:$0xff]  ;;  %v100_v22 = vld [vmem:[%s666_s1 + $0x50] sm:$0xff] }
   0x8   :  { %374 = vmatprep.subr.mxu1 %v151_v9  ;;  %v134_v15 = vld [vmem:[%s666_s1 + $0x160] sm:$0xff]  ;;  %340 = vmatpush3.msra.mxu0 %v103_v10  ;;  %v133_v19 = vld [vmem:[%s666_s1 + $0x158] sm:$0xff]  ;;  %v132_v23 = vld [vmem:[%s666_s1 + $0x150] sm:$0xff] }
   0x9   :  { %375 = vmatpush3.msra.mxu1 %v135_v11  ;;  %341 = vmatprep.subr.mxu0 %v118_v12  ;;  %v115_v24 = vld [vmem:[%s666_s1 + $0xc8] sm:$0xff]  ;;  %v114_v28 = vld [vmem:[%s666_s1 + $0xc0] sm:$0xff]  ;;  %v113_v32 = vld [vmem:[%s666_s1 + $0xb8] sm:$0xff] }
   0xa   :  { %376 = vmatprep.subr.mxu1 %v150_v13  ;;  %342 = vmatpush3.msra.mxu0 %v102_v14  ;;  %v147_v25 = vld [vmem:[%s666_s1 + $0x1c8] sm:$0xff]  ;;  %v146_v29 = vld [vmem:[%s666_s1 + $0x1c0] sm:$0xff]  ;;  %v145_v33 = vld [vmem:[%s666_s1 + $0x1b8] sm:$0xff] }
   0xb   :  { %377 = vmatpush3.msra.mxu1 %v134_v15  ;;  %343 = vmatprep.subr.mxu0 %v117_v16  ;;  %v99_v26 = vld [vmem:[%s666_s1 + $0x48] sm:$0xff]  ;;  %v98_v30 = vld [vmem:[%s666_s1 + $0x40] sm:$0xff]  ;;  %v97_v34 = vld [vmem:[%s666_s1 + $0x38] sm:$0xff] }
   0xc   :  { %378 = vmatprep.subr.mxu1 %v149_v17  ;;  %344 = vmatpush3.msra.mxu0 %v101_v18  ;;  %v131_v27 = vld [vmem:[%s666_s1 + $0x148] sm:$0xff]  ;;  %v130_v31 = vld [vmem:[%s666_s1 + $0x140] sm:$0xff]  ;;  %v129_v35 = vld [vmem:[%s666_s1 + $0x138] sm:$0xff] }
   0xd   :  { %379 = vmatpush3.msra.mxu1 %v133_v19  ;;  %345 = vmatprep.subr.mxu0 %v116_v20  ;;  %v112_v36 = vld [vmem:[%s666_s1 + $0xb0] sm:$0xff]  ;;  %v111_v40 = vld [vmem:[%s666_s1 + $0xa8] sm:$0xff]  ;;  %v110_v44 = vld [vmem:[%s666_s1 + $0xa0] sm:$0xff] }
   0xe   :  { %380 = vmatprep.subr.mxu1 %v148_v21  ;;  %346 = vmatpush3.msra.mxu0 %v100_v22  ;;  %v144_v37 = vld [vmem:[%s666_s1 + $0x1b0] sm:$0xff]  ;;  %v143_v41 = vld [vmem:[%s666_s1 + $0x1a8] sm:$0xff]  ;;  %v142_v45 = vld [vmem:[%s666_s1 + $0x1a0] sm:$0xff] }
   0xf   :  { %381 = vmatpush3.msra.mxu1 %v132_v23  ;;  %347 = vmatprep.subr.mxu0 %v115_v24  ;;  %v96_v38 = vld [vmem:[%s666_s1 + $0x30] sm:$0xff]  ;;  %v95_v42 = vld [vmem:[%s666_s1 + $0x28] sm:$0xff]  ;;  %v94_v46 = vld [vmem:[%s666_s1 + $0x20] sm:$0xff] }
  0x10   :  { %382 = vmatprep.subr.mxu1 %v147_v25  ;;  %348 = vmatpush3.msra.mxu0 %v99_v26  ;;  %v128_v39 = vld [vmem:[%s666_s1 + $0x130] sm:$0xff]  ;;  %v127_v43 = vld [vmem:[%s666_s1 + $0x128] sm:$0xff]  ;;  %v126_v47 = vld [vmem:[%s666_s1 + $0x120] sm:$0xff] }
  0x11   :  { %383 = vmatpush3.msra.mxu1 %v131_v27  ;;  %349 = vmatprep.subr.mxu0 %v114_v28  ;;  %v15_v48 = vld [vmem:[%s665_s0] sm:$0xff]  ;;  %v16_v49 = vld [vmem:[%s665_s0 + $0x8] sm:$0xff]  ;;  %v109_v50 = vld [vmem:[%s666_s1 + $0x98] sm:$0xff] }
  0x12   :  { %384 = vmatprep.subr.mxu1 %v146_v29  ;;  %350 = vmatpush3.msra.mxu0 %v98_v30  ;;  %v141_v51 = vld [vmem:[%s666_s1 + $0x198] sm:$0xff]  ;;  %v17_v52 = vunpack.c.l.bf16 %v15_v48  ;;  %v19_v53 = vunpack.c.l.bf16 %v16_v49  ;;  %v18_v54 = vunpack.c.h.bf16 %v15_v48  ;;  %v20_v55 = vunpack.c.h.bf16 %v16_v49 }
  0x13   :  { %385 = vmatpush3.msra.mxu1 %v130_v31  ;;  %351 = vmatprep.subr.mxu0 %v113_v32 }
  0x14   :  { %386 = vmatprep.subr.mxu1 %v145_v33  ;;  %352 = vmatpush3.msra.mxu0 %v97_v34 }
  0x15   :  { %387 = vmatpush3.msra.mxu1 %v129_v35  ;;  %353 = vmatprep.subr.mxu0 %v112_v36 }
  0x16   :  { %388 = vmatprep.subr.mxu1 %v144_v37  ;;  %354 = vmatpush3.msra.mxu0 %v96_v38 }
  0x17   :  { %389 = vmatpush3.msra.mxu1 %v128_v39  ;;  %355 = vmatprep.subr.mxu0 %v111_v40 }
  0x18   :  { %390 = vmatprep.subr.mxu1 %v143_v41  ;;  %356 = vmatpush3.msra.mxu0 %v95_v42 }
  0x19   :  { %391 = vmatpush3.msra.mxu1 %v127_v43 }
  0x1a   :  { %8 = vsyncpa [#allocation3], 0  ;;  %357 = vmatprep.subr.mxu0 %v110_v44  ;;  %392 = vmatprep.subr.mxu1 %v142_v45  ;;  %v93_v56 = vld [vmem:[%s666_s1 + $0x18] sm:$0xff]  ;;  %v108_v58 = vld [vmem:[%s666_s1 + $0x90] sm:$0xff]  ;;  %v25_v60 = vcombine.high %v17_v52, %v17_v52  ;;  %v27_v61 = vcombine.high %v19_v53, %v19_v53  ;;  %v26_v62 = vcombine.high %v18_v54, %v18_v54  ;;  %v34_v63 = vsel %vm33_vm0, %v17_v52, 0.0  ;;  %s428_s0 = smov [#allocation2]  }
  0x1b   :  { %v125_v57 = vld [vmem:[%s666_s1 + $0x118] sm:$0xff]  ;;  %358 = vmatpush3.msra.mxu0 %v94_v46  ;;  %393 = vmatpush3.msra.mxu1 %v126_v47  ;;  %v140_v59 = vld [vmem:[%s666_s1 + $0x190] sm:$0xff]  ;;  %v28_v2 = vcombine.high %v20_v55, %v20_v55  ;;  %v35_v3 = vrot.slane %v34_v63, 4  ;;  %v62_v4 = vsel %vm33_vm0, %v19_v53, 0.0  ;;  %v48_v5 = vsel %vm33_vm0, %v18_v54, 0.0  ;;  %v107_v6 = vld [vmem:[%s666_s1 + $0x88] sm:$0xff] }
  0x1c   :  { %359 = vmatprep.subr.mxu0 %v109_v50  ;;  %394 = vmatprep.subr.mxu1 %v141_v51  ;;  %v92_v0 = vld [vmem:[%s666_s1 + $0x10] sm:$0xff]  ;;  %v139_v7 = vld [vmem:[%s666_s1 + $0x188] sm:$0xff]  ;;  %v41_v8 = vsel %vm33_vm0, %v25_v60, 0.0  ;;  %v69_v9 = vsel %vm33_vm0, %v27_v61, 0.0  ;;  %v55_v10 = vsel %vm33_vm0, %v26_v62, 0.0  ;;  %v63_v11 = vrot.slane %v62_v4, 4 }
  0x1d   :  { %v124_v1 = vld [vmem:[%s666_s1 + $0x110] sm:$0xff]  ;;  %360 = vmatpush3.msra.mxu0 %v93_v56  ;;  %395 = vmatpush3.msra.mxu1 %v125_v57  ;;  %v91_v12 = vld [vmem:[%s666_s1 + $0x8] sm:$0xff]  ;;  %v42_v14 = vrot.slane %v41_v8, 4  ;;  %v70_v15 = vrot.slane %v69_v9, 4  ;;  %vm169_vm1 = vcmask 1041409   ;;  %v56_v16 = vrot.slane %v55_v10, 4 }
  0x1e   :  { %361 = vmatprep.subr.mxu0 %v108_v58  ;;  %396 = vmatprep.subr.mxu1 %v140_v59  ;;  %v123_v13 = vld [vmem:[%s666_s1 + $0x108] sm:$0xff]  ;;  %v83_v17 = vsel %vm33_vm0, %v28_v2, 0.0  ;;  %v106_v18 = vld [vmem:[%s666_s1 + $0x80] sm:$0xff]  ;;  %v36_v21 = vadd.f32 %v35_v3, %v34_v63  ;;  %v64_v22 = vadd.f32 %v63_v11, %v62_v4  ;;  %v49_v23 = vrot.slane %v48_v5, 4  ;;  %s326_s9 = sshll.u32 %s428_s0, 4  ;;  %s327_s9 = int_to_ptr.vmem [resolvable:$true] %s326_s9 }
  0x1f   :  { %362 = vmatpush3.msra.mxu0 %v92_v0  ;;  %397 = vmatpush3.msra.mxu1 %v124_v1  ;;  %v138_v19 = vld [vmem:[%s666_s1 + $0x180] sm:$0xff]  ;;  %v84_v20 = vrot.slane %v83_v17, 4  ;;  %v43_v25 = vadd.f32 %v42_v14, %v41_v8  ;;  %v71_v26 = vadd.f32 %v70_v15, %v69_v9  ;;  %v57_v28 = vadd.f32 %v56_v16, %v55_v10  ;;  %s406_s10 = scalar_lea.vmem %s327_s9, 32  ;;  %p411_p1 = scmp.lt.s32.totalorder %s327_s9, %s327_s9 }
  0x20   :  { %363 = vmatprep.subr.mxu0 %v107_v6  ;;  %398 = vmatprep.subr.mxu1 %v139_v7  ;;  %v90_v24 = vld [vmem:[%s666_s1] sm:$0xff]  ;;  %v76_v29 = vsel %vm33_vm0, %v20_v55, 0.0  ;;  %v37_v31 = vrot.slane %v36_v21, 2  ;;  %v65_v32 = vrot.slane %v64_v22, 2  ;;  %v50_v33 = vadd.f32 %v49_v23, %v48_v5  ;;  %p407_p0 = scmp.ne.s32.totalorder %s327_s9, %s406_s10  ;;  %p412_p2 = scmp.lt.s32.totalorder %s406_s10, %s406_s10 }
  0x21   :  { %v122_v27 = vld [vmem:[%s666_s1 + $0x100] sm:$0xff]  ;;  %364 = vmatpush3.msra.mxu0 %v91_v12  ;;  %399 = vmatpush3.msra.mxu1 %v123_v13  ;;  %v85_v30 = vadd.f32 %v84_v20, %v83_v17  ;;  %v44_v34 = vrot.slane %v43_v25, 2  ;;  %v72_v35 = vrot.slane %v71_v26, 2  ;;  %v58_v36 = vrot.slane %v57_v28, 2 }
  0x22   :  { %365 = vmatprep.subr.mxu0 %v106_v18  ;;  %400 = vmatprep.subr.mxu1 %v138_v19  ;;  %v77_v37 = vrot.slane %v76_v29, 4  ;;  %v38_v39 = vadd.f32 %v37_v31, %v36_v21  ;;  %v66_v40 = vadd.f32 %v65_v32, %v64_v22  ;;  %v51_v41 = vrot.slane %v50_v33, 2  ;;  %v334_v7 = vld [vmem:[%s667_s2] ss:$0 sm:$0xff]  ;;  %p413_p3 = por %p412_p2, %p411_p1 }
  0x23   :  { %366 = vmatpush3.msra.mxu0 %v90_v24  ;;  %401 = vmatpush3.msra.mxu1 %v122_v27  ;;  %v86_v38 = vrot.slane %v85_v30, 2  ;;  %v45_v42 = vadd.f32 %v44_v34, %v43_v25  ;;  %v73_v43 = vadd.f32 %v72_v35, %v71_v26  ;;  %v59_v44 = vadd.f32 %v58_v36, %v57_v28 }
  0x24   :  { %v78_v45 = vadd.f32 %v77_v37, %v76_v29  ;;  %v39_v47 = vrot.slane %v38_v39, 1  ;;  %v67_v48 = vrot.slane %v66_v40, 1  ;;  %v52_v49 = vadd.f32 %v51_v41, %v50_v33  ;;  %p414_p4 = pnand %p413_p3, %p407_p0 }
  0x25   :  { %v87_v46 = vadd.f32 %v86_v38, %v85_v30  ;;  %v46_v50 = vrot.slane %v45_v42, 1  ;;  %v74_v51 = vrot.slane %v73_v43, 1  ;;  %v60_v52 = vrot.slane %v59_v44, 1 }
  0x26   :  { %v79_v53 = vrot.slane %v78_v45, 2  ;;  %v40_v55 = vadd.f32 %v39_v47, %v38_v39  ;;  %v68_v56 = vadd.f32 %v67_v48, %v66_v40  ;;  %v53_v57 = vrot.slane %v52_v49, 1 }
  0x27   :  { %v88_v54 = vrot.slane %v87_v46, 1  ;;  %v47_v58 = vadd.f32 %v46_v50, %v45_v42  ;;  %v75_v59 = vadd.f32 %v74_v51, %v73_v43  ;;  %v61_v60 = vadd.f32 %v60_v52, %v59_v44 }
  0x28   :  { %v80_v61 = vadd.f32 %v79_v53, %v78_v45  ;;  %v170_v63 = vsel %vm169_vm1, %v68_v56, %v40_v55  ;;  %v54_v1 = vadd.f32 %v53_v57, %v52_v49  ;;  %vm318_vm2 = vcmask 74752  }
  0x29   :  { %v89_v62 = vadd.f32 %v88_v54, %v87_v46  ;;  %v171_v0 = vsel %vm169_vm1, %v75_v59, %v47_v58 }
  0x2a   :  { %v81_v2 = vrot.slane %v80_v61, 1  ;;  %242 = vmatprep.mubr.f32.mxu0 %v171_v0 }
  0x2b   :  { %v173_v3 = vsel %vm169_vm1, %v89_v62, %v61_v60  ;;  %243 = vmatmul.mubr.f32.vlgmr.msra.gmra.mxu0 %v170_v63 }
  0x2c   :  { %312 = vmatprep.mubr.f32.mxu1 %v173_v3  ;;  %v82_v4 = vadd.f32 %v81_v2, %v80_v61 }
  0x2e   :  { %v172_v5 = vsel %vm169_vm1, %v82_v4, %v54_v1 }
  0x2f   :  { %313 = vmatmul.mubr.f32.vlgmr.msra.gmra.mxu1 %v172_v5 }
  0xeb   :  { %v367_v6 = vpop.f32.mrf.mxu0 }
  0xed   :  { %v368_v8 = vpop.f32.mrf.mxu0 }
  0xee   :  { %v369_v10 = vadd.f32 %v368_v8, %v367_v6 }
  0xef   :  { %v402_v9 = vpop.f32.mrf.mxu1 }
  0xf0   :  { %v245_v11 = vadd.f32 %v369_v10, %v334_v7 }
  0xf1   :  { %v403_v12 = vpop.f32.mrf.mxu1 }
  0xf2   :  { %v404_v13 = vadd.f32 %v403_v12, %v402_v9 }
  0xf4   :  { %v315_v14 = vadd.f32 %v404_v13, %v245_v11 }
  0xf6   :  { %319 = vst.msk [vmem:[#allocation2] sm:$0x3] %vm318_vm2, %v315_v14 }
  0xf7   :  { %417 = shalt.err (!%p414_p4)
}
  0xf8   :  { %329 = dma.vmem_to_hbm [thread:$0]  %s327_s9, 32, %s668_s3, [#allocation3]  }
  0xf9   :  { %426 = dma.done.wait [#allocation3], 32  }
  0xfa   :  { %427 = vsyncadd [#allocation3], 4294967264 }
  0xfb   :  { %333 = vsyncpa [#allocation3], 1 }

// kernel: _lambda_.24
= control target key start
LH: loop header
LB: loop body
LE: loop exit
PB: predicated region body
PF: predicated region fallthrough
CT: control target
= control target key end

     0   :  { %s2068_s15 = smov 0   ;;  %s2070_s16 = smov 0   ;;  %s2488_s0 = inlined_call_operand.vmem [shape: bf16[8,4608], index: 0, kind: input, shape index: {}]   ;;  %s2489_s1 = inlined_call_operand.vmem [shape: bf16[4608,512], index: 1, kind: input, shape index: {}]   ;;  %s2490_s2 = inlined_call_operand.vmem [shape: f32[1,512], index: 2, kind: input, shape index: {}]   ;;  %s2491_s3 = inlined_call_operand.vmem [shape: bf16[8,512], index: 3, kind: input, shape index: {}]   ;;  %s2492_s4 = inlined_call_operand.vmem [shape: bf16[8,512], index: 4, kind: output, shape index: {}]  }
   0x1   :  { %s2072_s17 = smov 0   ;;  %s2074_s18 = smov 0  }
   0x2   :  { %s2076_s19 = smov 0   ;;  %s2078_s20 = smov 0  }
   0x3   :  { %s2080_s21 = smov 0  }
   0x4 LB: > { %s26_s22 = sadd.s32 1, %s2032_s19  ;;  %s29_s23 = sadd.s32 1, %s2036_s20  ;;  %s2040_s21 = sphi %s2080_s21, %s14_s21   ;;  %s2036_s20 = sphi %s2078_s20, %s2498_s20   ;;  %s2032_s19 = sphi %s2076_s19, %s2497_s19   ;;  %s2028_s18 = sphi %s2074_s18, %s2496_s18   ;;  %s2024_s17 = sphi %s2072_s17, %s2495_s17   ;;  %s2020_s16 = sphi %s2070_s16, %s2494_s16   ;;  %s2016_s15 = sphi %s2068_s15, %s2493_s15  }
   0x5   : > { %p27_p0 = scmp.ge.s32.totalorder %s26_s22, 6  ;;  %p77_p1 = scmp.ne.s32.totalorder %s2020_s16, %s2016_s15 }
   0x6   : > { %p78_p2 = scmp.eq.s32.totalorder %s2040_s21, 0  ;;  %s70_s27 = sadd.s32 1, %s2020_s16 }
   0x7   : > { %s2500_s22 = smov (%p27_p0, %s26_s22), 0  ;;  %s2502_s23 = smov (!%p27_p0, %s29_s23), %s2036_s20 }
   0x8   : > { %p79_p3 = por %p78_p2, %p77_p1  ;;  %p31_p4 = scmp.ge.s32.totalorder %s2502_s23, 2 }
   0x9   : > { %s65_s24 = ssub.s32 %s2032_s19, %s2500_s22  ;;  %p1657_p6 = scmp.ge.s32.totalorder %s2040_s21, 12 }
   0xa   : > { %s2504_s23 = smov (%p31_p4, %s2502_s23), 0 }
   0xb   : > { %s66_s25 = ssub.s32 %s2036_s20, %s2504_s23  ;;  %185 = sbr.rel (%p1657_p6) target bundleno = 72 (0x48), region = 16 }
   0xc   : > { %s67_s26 = sor.u32 %s66_s25, %s65_s24 }
   0xd   : > { %p68_p5 = scmp.eq.s32.totalorder %s67_s26, 0 }
   0xf   : > { %s2119_s28 = scalar_select %p68_p5, %s2020_s16, %s70_s27  }
  0x10   : > { %201 = sbr.rel (!%p79_p3) target bundleno = 72 (0x48), region = 24  ;;  %s203_s29 = sand.u32 (%p79_p3), 1, %s2020_s16  }
  0x11   : > { %s1777_s30 = smul.u32 (%p79_p3), 768, %s203_s29  ;;  %s1658_s5 = sshll.u32 (%p79_p3), %s2036_s20, 1 }
  0x12   : > { %s1775_s6 = smul.u32 (%p79_p3), 384, %s2032_s19 }
  0x13   : > { %s2133_s12 = scalar_lea.vmem (%p79_p3), [#allocation3], %s1777_s30 }
  0x14   : > { %s209_s7 = sadd.s32 (%p79_p3), %s1775_s6, %s1658_s5 }
  0x15   : > { %s1660_s8 = sshll.u32 %s209_s7, 2 }
  0x16   : > { %s2128_s11 = scalar_lea.vmem %s2489_s1, %s1660_s8 }
  0x17   : > { %v430_v0 = vld [vmem:[%s2128_s11] sm:$0xff]  ;;  %v432_v1 = vld [vmem:[%s2128_s11 + $0x10] sm:$0xff] }
  0x18   : > { %v434_v2 = vld [vmem:[%s2128_s11 + $0x20] sm:$0xff]  ;;  %431 = vst [vmem:[%s2133_s12] sm:$0xff] %v430_v0  ;;  %433 = vst [vmem:[%s2133_s12 + $0x8] sm:$0xff] %v432_v1  ;;  %v436_v3 = vld [vmem:[%s2128_s11 + $0x30] sm:$0xff] }
  0x19   : > { %435 = vst [vmem:[%s2133_s12 + $0x10] sm:$0xff] %v434_v2  ;;  %v438_v4 = vld [vmem:[%s2128_s11 + $0x40] sm:$0xff]  ;;  %v440_v5 = vld [vmem:[%s2128_s11 + $0x50] sm:$0xff]  ;;  %437 = vst [vmem:[%s2133_s12 + $0x18] sm:$0xff] %v436_v3 }
  0x1a   : > { %439 = vst [vmem:[%s2133_s12 + $0x20] sm:$0xff] %v438_v4  ;;  %441 = vst [vmem:[%s2133_s12 + $0x28] sm:$0xff] %v440_v5  ;;  %v442_v6 = vld [vmem:[%s2128_s11 + $0x60] sm:$0xff]  ;;  %v444_v7 = vld [vmem:[%s2128_s11 + $0x70] sm:$0xff] }
  0x1b   : > { %v446_v8 = vld [vmem:[%s2128_s11 + $0x80] sm:$0xff]  ;;  %443 = vst [vmem:[%s2133_s12 + $0x30] sm:$0xff] %v442_v6  ;;  %445 = vst [vmem:[%s2133_s12 + $0x38] sm:$0xff] %v444_v7  ;;  %v448_v9 = vld [vmem:[%s2128_s11 + $0x90] sm:$0xff] }
  0x1c   : > { %447 = vst [vmem:[%s2133_s12 + $0x40] sm:$0xff] %v446_v8  ;;  %v450_v10 = vld [vmem:[%s2128_s11 + $0xa0] sm:$0xff]  ;;  %v452_v11 = vld [vmem:[%s2128_s11 + $0xb0] sm:$0xff]  ;;  %449 = vst [vmem:[%s2133_s12 + $0x48] sm:$0xff] %v448_v9 }
  0x1d   : > { %451 = vst [vmem:[%s2133_s12 + $0x50] sm:$0xff] %v450_v10  ;;  %453 = vst [vmem:[%s2133_s12 + $0x58] sm:$0xff] %v452_v11  ;;  %v454_v12 = vld [vmem:[%s2128_s11 + $0xc0] sm:$0xff]  ;;  %v456_v13 = vld [vmem:[%s2128_s11 + $0xd0] sm:$0xff] }
  0x1e   : > { %v458_v14 = vld [vmem:[%s2128_s11 + $0xe0] sm:$0xff]  ;;  %455 = vst [vmem:[%s2133_s12 + $0x60] sm:$0xff] %v454_v12  ;;  %457 = vst [vmem:[%s2133_s12 + $0x68] sm:$0xff] %v456_v13  ;;  %v460_v15 = vld [vmem:[%s2128_s11 + $0xf0] sm:$0xff] }
  0x1f   : > { %459 = vst [vmem:[%s2133_s12 + $0x70] sm:$0xff] %v458_v14  ;;  %v462_v16 = vld [vmem:[%s2128_s11 + $0x100] sm:$0xff]  ;;  %v464_v17 = vld [vmem:[%s2128_s11 + $0x110] sm:$0xff]  ;;  %461 = vst [vmem:[%s2133_s12 + $0x78] sm:$0xff] %v460_v15 }
  0x20   : > { %463 = vst [vmem:[%s2133_s12 + $0x80] sm:$0xff] %v462_v16  ;;  %465 = vst [vmem:[%s2133_s12 + $0x88] sm:$0xff] %v464_v17  ;;  %v466_v18 = vld [vmem:[%s2128_s11 + $0x120] sm:$0xff]  ;;  %v468_v19 = vld [vmem:[%s2128_s11 + $0x130] sm:$0xff] }
  0x21   : > { %v470_v20 = vld [vmem:[%s2128_s11 + $0x140] sm:$0xff]  ;;  %467 = vst [vmem:[%s2133_s12 + $0x90] sm:$0xff] %v466_v18  ;;  %469 = vst [vmem:[%s2133_s12 + $0x98] sm:$0xff] %v468_v19  ;;  %v472_v21 = vld [vmem:[%s2128_s11 + $0x150] sm:$0xff] }
  0x22   : > { %471 = vst [vmem:[%s2133_s12 + $0xa0] sm:$0xff] %v470_v20  ;;  %v474_v22 = vld [vmem:[%s2128_s11 + $0x160] sm:$0xff]  ;;  %v476_v23 = vld [vmem:[%s2128_s11 + $0x170] sm:$0xff]  ;;  %473 = vst [vmem:[%s2133_s12 + $0xa8] sm:$0xff] %v472_v21 }
  0x23   : > { %475 = vst [vmem:[%s2133_s12 + $0xb0] sm:$0xff] %v474_v22  ;;  %477 = vst [vmem:[%s2133_s12 + $0xb8] sm:$0xff] %v476_v23  ;;  %v478_v24 = vld [vmem:[%s2128_s11 + $0x180] sm:$0xff]  ;;  %v480_v25 = vld [vmem:[%s2128_s11 + $0x190] sm:$0xff] }
  0x24   : > { %v482_v26 = vld [vmem:[%s2128_s11 + $0x1a0] sm:$0xff]  ;;  %479 = vst [vmem:[%s2133_s12 + $0xc0] sm:$0xff] %v478_v24  ;;  %481 = vst [vmem:[%s2133_s12 + $0xc8] sm:$0xff] %v480_v25  ;;  %v484_v27 = vld [vmem:[%s2128_s11 + $0x1b0] sm:$0xff] }
  0x25   : > { %483 = vst [vmem:[%s2133_s12 + $0xd0] sm:$0xff] %v482_v26  ;;  %v486_v28 = vld [vmem:[%s2128_s11 + $0x1c0] sm:$0xff]  ;;  %v488_v29 = vld [vmem:[%s2128_s11 + $0x1d0] sm:$0xff]  ;;  %485 = vst [vmem:[%s2133_s12 + $0xd8] sm:$0xff] %v484_v27 }
  0x26   : > { %487 = vst [vmem:[%s2133_s12 + $0xe0] sm:$0xff] %v486_v28  ;;  %489 = vst [vmem:[%s2133_s12 + $0xe8] sm:$0xff] %v488_v29  ;;  %v490_v30 = vld [vmem:[%s2128_s11 + $0x1e0] sm:$0xff]  ;;  %v492_v31 = vld [vmem:[%s2128_s11 + $0x1f0] sm:$0xff] }
  0x27   : > { %v494_v32 = vld [vmem:[%s2128_s11 + $0x200] sm:$0xff]  ;;  %491 = vst [vmem:[%s2133_s12 + $0xf0] sm:$0xff] %v490_v30  ;;  %493 = vst [vmem:[%s2133_s12 + $0xf8] sm:$0xff] %v492_v31  ;;  %v496_v33 = vld [vmem:[%s2128_s11 + $0x210] sm:$0xff] }
  0x28   : > { %495 = vst [vmem:[%s2133_s12 + $0x100] sm:$0xff] %v494_v32  ;;  %v498_v34 = vld [vmem:[%s2128_s11 + $0x220] sm:$0xff]  ;;  %v500_v35 = vld [vmem:[%s2128_s11 + $0x230] sm:$0xff]  ;;  %497 = vst [vmem:[%s2133_s12 + $0x108] sm:$0xff] %v496_v33 }
  0x29   : > { %499 = vst [vmem:[%s2133_s12 + $0x110] sm:$0xff] %v498_v34  ;;  %501 = vst [vmem:[%s2133_s12 + $0x118] sm:$0xff] %v500_v35  ;;  %v502_v36 = vld [vmem:[%s2128_s11 + $0x240] sm:$0xff]  ;;  %v504_v37 = vld [vmem:[%s2128_s11 + $0x250] sm:$0xff] }
  0x2a   : > { %v506_v38 = vld [vmem:[%s2128_s11 + $0x260] sm:$0xff]  ;;  %503 = vst [vmem:[%s2133_s12 + $0x120] sm:$0xff] %v502_v36  ;;  %505 = vst [vmem:[%s2133_s12 + $0x128] sm:$0xff] %v504_v37  ;;  %v508_v39 = vld [vmem:[%s2128_s11 + $0x270] sm:$0xff] }
  0x2b   : > { %507 = vst [vmem:[%s2133_s12 + $0x130] sm:$0xff] %v506_v38  ;;  %v510_v40 = vld [vmem:[%s2128_s11 + $0x280] sm:$0xff]  ;;  %v512_v41 = vld [vmem:[%s2128_s11 + $0x290] sm:$0xff]  ;;  %509 = vst [vmem:[%s2133_s12 + $0x138] sm:$0xff] %v508_v39 }
  0x2c   : > { %511 = vst [vmem:[%s2133_s12 + $0x140] sm:$0xff] %v510_v40  ;;  %513 = vst [vmem:[%s2133_s12 + $0x148] sm:$0xff] %v512_v41  ;;  %v514_v42 = vld [vmem:[%s2128_s11 + $0x2a0] sm:$0xff]  ;;  %v516_v43 = vld [vmem:[%s2128_s11 + $0x2b0] sm:$0xff] }
  0x2d   : > { %v518_v44 = vld [vmem:[%s2128_s11 + $0x2c0] sm:$0xff]  ;;  %515 = vst [vmem:[%s2133_s12 + $0x150] sm:$0xff] %v514_v42  ;;  %517 = vst [vmem:[%s2133_s12 + $0x158] sm:$0xff] %v516_v43  ;;  %v520_v45 = vld [vmem:[%s2128_s11 + $0x2d0] sm:$0xff] }
  0x2e   : > { %519 = vst [vmem:[%s2133_s12 + $0x160] sm:$0xff] %v518_v44  ;;  %v522_v46 = vld [vmem:[%s2128_s11 + $0x2e0] sm:$0xff]  ;;  %v524_v47 = vld [vmem:[%s2128_s11 + $0x2f0] sm:$0xff]  ;;  %521 = vst [vmem:[%s2133_s12 + $0x168] sm:$0xff] %v520_v45 }
  0x2f   : > { %523 = vst [vmem:[%s2133_s12 + $0x170] sm:$0xff] %v522_v46  ;;  %525 = vst [vmem:[%s2133_s12 + $0x178] sm:$0xff] %v524_v47  ;;  %v526_v48 = vld [vmem:[%s2128_s11 + $0x300] sm:$0xff]  ;;  %v528_v49 = vld [vmem:[%s2128_s11 + $0x310] sm:$0xff] }
  0x30   : > { %v530_v50 = vld [vmem:[%s2128_s11 + $0x320] sm:$0xff]  ;;  %527 = vst [vmem:[%s2133_s12 + $0x180] sm:$0xff] %v526_v48  ;;  %529 = vst [vmem:[%s2133_s12 + $0x188] sm:$0xff] %v528_v49  ;;  %v532_v51 = vld [vmem:[%s2128_s11 + $0x330] sm:$0xff] }
  0x31   : > { %531 = vst [vmem:[%s2133_s12 + $0x190] sm:$0xff] %v530_v50  ;;  %v534_v52 = vld [vmem:[%s2128_s11 + $0x340] sm:$0xff]  ;;  %v536_v53 = vld [vmem:[%s2128_s11 + $0x350] sm:$0xff]  ;;  %533 = vst [vmem:[%s2133_s12 + $0x198] sm:$0xff] %v532_v51 }
  0x32   : > { %535 = vst [vmem:[%s2133_s12 + $0x1a0] sm:$0xff] %v534_v52  ;;  %537 = vst [vmem:[%s2133_s12 + $0x1a8] sm:$0xff] %v536_v53  ;;  %v538_v54 = vld [vmem:[%s2128_s11 + $0x360] sm:$0xff]  ;;  %v540_v55 = vld [vmem:[%s2128_s11 + $0x370] sm:$0xff] }
  0x33   : > { %v542_v56 = vld [vmem:[%s2128_s11 + $0x380] sm:$0xff]  ;;  %539 = vst [vmem:[%s2133_s12 + $0x1b0] sm:$0xff] %v538_v54  ;;  %541 = vst [vmem:[%s2133_s12 + $0x1b8] sm:$0xff] %v540_v55  ;;  %v544_v57 = vld [vmem:[%s2128_s11 + $0x390] sm:$0xff] }
  0x34   : > { %543 = vst [vmem:[%s2133_s12 + $0x1c0] sm:$0xff] %v542_v56  ;;  %v546_v58 = vld [vmem:[%s2128_s11 + $0x3a0] sm:$0xff]  ;;  %v548_v59 = vld [vmem:[%s2128_s11 + $0x3b0] sm:$0xff]  ;;  %545 = vst [vmem:[%s2133_s12 + $0x1c8] sm:$0xff] %v544_v57 }
  0x35   : > { %547 = vst [vmem:[%s2133_s12 + $0x1d0] sm:$0xff] %v546_v58  ;;  %549 = vst [vmem:[%s2133_s12 + $0x1d8] sm:$0xff] %v548_v59  ;;  %v550_v60 = vld [vmem:[%s2128_s11 + $0x3c0] sm:$0xff]  ;;  %v552_v61 = vld [vmem:[%s2128_s11 + $0x3d0] sm:$0xff] }
  0x36   : > { %v554_v62 = vld [vmem:[%s2128_s11 + $0x3e0] sm:$0xff]  ;;  %551 = vst [vmem:[%s2133_s12 + $0x1e0] sm:$0xff] %v550_v60  ;;  %553 = vst [vmem:[%s2133_s12 + $0x1e8] sm:$0xff] %v552_v61  ;;  %v556_v63 = vld [vmem:[%s2128_s11 + $0x3f0] sm:$0xff] }
  0x37   : > { %555 = vst [vmem:[%s2133_s12 + $0x1f0] sm:$0xff] %v554_v62  ;;  %v558_v0 = vld [vmem:[%s2128_s11 + $0x400] sm:$0xff]  ;;  %v560_v1 = vld [vmem:[%s2128_s11 + $0x410] sm:$0xff]  ;;  %557 = vst [vmem:[%s2133_s12 + $0x1f8] sm:$0xff] %v556_v63 }
  0x38   : > { %559 = vst [vmem:[%s2133_s12 + $0x200] sm:$0xff] %v558_v0  ;;  %561 = vst [vmem:[%s2133_s12 + $0x208] sm:$0xff] %v560_v1  ;;  %v562_v2 = vld [vmem:[%s2128_s11 + $0x420] sm:$0xff]  ;;  %v564_v3 = vld [vmem:[%s2128_s11 + $0x430] sm:$0xff] }
  0x39   : > { %v566_v4 = vld [vmem:[%s2128_s11 + $0x440] sm:$0xff]  ;;  %563 = vst [vmem:[%s2133_s12 + $0x210] sm:$0xff] %v562_v2  ;;  %565 = vst [vmem:[%s2133_s12 + $0x218] sm:$0xff] %v564_v3  ;;  %v568_v5 = vld [vmem:[%s2128_s11 + $0x450] sm:$0xff] }
  0x3a   : > { %567 = vst [vmem:[%s2133_s12 + $0x220] sm:$0xff] %v566_v4  ;;  %v570_v6 = vld [vmem:[%s2128_s11 + $0x460] sm:$0xff]  ;;  %v572_v7 = vld [vmem:[%s2128_s11 + $0x470] sm:$0xff]  ;;  %569 = vst [vmem:[%s2133_s12 + $0x228] sm:$0xff] %v568_v5 }
  0x3b   : > { %571 = vst [vmem:[%s2133_s12 + $0x230] sm:$0xff] %v570_v6  ;;  %573 = vst [vmem:[%s2133_s12 + $0x238] sm:$0xff] %v572_v7  ;;  %v574_v8 = vld [vmem:[%s2128_s11 + $0x480] sm:$0xff]  ;;  %v576_v9 = vld [vmem:[%s2128_s11 + $0x490] sm:$0xff] }
  0x3c   : > { %v578_v10 = vld [vmem:[%s2128_s11 + $0x4a0] sm:$0xff]  ;;  %575 = vst [vmem:[%s2133_s12 + $0x240] sm:$0xff] %v574_v8  ;;  %577 = vst [vmem:[%s2133_s12 + $0x248] sm:$0xff] %v576_v9  ;;  %v580_v11 = vld [vmem:[%s2128_s11 + $0x4b0] sm:$0xff] }
  0x3d   : > { %579 = vst [vmem:[%s2133_s12 + $0x250] sm:$0xff] %v578_v10  ;;  %v582_v12 = vld [vmem:[%s2128_s11 + $0x4c0] sm:$0xff]  ;;  %v584_v13 = vld [vmem:[%s2128_s11 + $0x4d0] sm:$0xff]  ;;  %581 = vst [vmem:[%s2133_s12 + $0x258] sm:$0xff] %v580_v11 }
  0x3e   : > { %583 = vst [vmem:[%s2133_s12 + $0x260] sm:$0xff] %v582_v12  ;;  %585 = vst [vmem:[%s2133_s12 + $0x268] sm:$0xff] %v584_v13  ;;  %v586_v14 = vld [vmem:[%s2128_s11 + $0x4e0] sm:$0xff]  ;;  %v588_v15 = vld [vmem:[%s2128_s11 + $0x4f0] sm:$0xff] }
  0x3f   : > { %v590_v16 = vld [vmem:[%s2128_s11 + $0x500] sm:$0xff]  ;;  %587 = vst [vmem:[%s2133_s12 + $0x270] sm:$0xff] %v586_v14  ;;  %589 = vst [vmem:[%s2133_s12 + $0x278] sm:$0xff] %v588_v15  ;;  %v592_v17 = vld [vmem:[%s2128_s11 + $0x510] sm:$0xff] }
  0x40   : > { %591 = vst [vmem:[%s2133_s12 + $0x280] sm:$0xff] %v590_v16  ;;  %v594_v18 = vld [vmem:[%s2128_s11 + $0x520] sm:$0xff]  ;;  %v596_v19 = vld [vmem:[%s2128_s11 + $0x530] sm:$0xff]  ;;  %593 = vst [vmem:[%s2133_s12 + $0x288] sm:$0xff] %v592_v17 }
  0x41   : > { %595 = vst [vmem:[%s2133_s12 + $0x290] sm:$0xff] %v594_v18  ;;  %597 = vst [vmem:[%s2133_s12 + $0x298] sm:$0xff] %v596_v19  ;;  %v598_v20 = vld [vmem:[%s2128_s11 + $0x540] sm:$0xff]  ;;  %v600_v21 = vld [vmem:[%s2128_s11 + $0x550] sm:$0xff] }
  0x42   : > { %v602_v22 = vld [vmem:[%s2128_s11 + $0x560] sm:$0xff]  ;;  %599 = vst [vmem:[%s2133_s12 + $0x2a0] sm:$0xff] %v598_v20  ;;  %601 = vst [vmem:[%s2133_s12 + $0x2a8] sm:$0xff] %v600_v21  ;;  %v604_v23 = vld [vmem:[%s2128_s11 + $0x570] sm:$0xff] }
  0x43   : > { %603 = vst [vmem:[%s2133_s12 + $0x2b0] sm:$0xff] %v602_v22  ;;  %v606_v24 = vld [vmem:[%s2128_s11 + $0x580] sm:$0xff]  ;;  %v608_v25 = vld [vmem:[%s2128_s11 + $0x590] sm:$0xff]  ;;  %605 = vst [vmem:[%s2133_s12 + $0x2b8] sm:$0xff] %v604_v23 }
  0x44   : > { %607 = vst [vmem:[%s2133_s12 + $0x2c0] sm:$0xff] %v606_v24  ;;  %609 = vst [vmem:[%s2133_s12 + $0x2c8] sm:$0xff] %v608_v25  ;;  %v610_v26 = vld [vmem:[%s2128_s11 + $0x5a0] sm:$0xff]  ;;  %v612_v27 = vld [vmem:[%s2128_s11 + $0x5b0] sm:$0xff] }
  0x45   : > { %v614_v28 = vld [vmem:[%s2128_s11 + $0x5c0] sm:$0xff]  ;;  %611 = vst [vmem:[%s2133_s12 + $0x2d0] sm:$0xff] %v610_v26  ;;  %613 = vst [vmem:[%s2133_s12 + $0x2d8] sm:$0xff] %v612_v27  ;;  %v616_v29 = vld [vmem:[%s2128_s11 + $0x5d0] sm:$0xff] }
  0x46   : > { %615 = vst [vmem:[%s2133_s12 + $0x2e0] sm:$0xff] %v614_v28  ;;  %v618_v30 = vld [vmem:[%s2128_s11 + $0x5e0] sm:$0xff]  ;;  %v620_v31 = vld [vmem:[%s2128_s11 + $0x5f0] sm:$0xff]  ;;  %617 = vst [vmem:[%s2133_s12 + $0x2e8] sm:$0xff] %v616_v29 }
  0x47   : > { %619 = vst [vmem:[%s2133_s12 + $0x2f0] sm:$0xff] %v618_v30  ;;  %621 = vst [vmem:[%s2133_s12 + $0x2f8] sm:$0xff] %v620_v31 }
  0x48 PF: > { %p1661_p7 = scmp.ge.s32.totalorder %s2040_s21, 1  ;;  %p647_p8 = scmp.lt.s32.totalorder %s2040_s21, 13 }
  0x4a   : > { %p648_p9 = pnand %p1661_p7, %p647_p8 }
  0x4b   : > { %s654_s13 = sand.u32 (!%p648_p9), 1, %s2016_s15   ;;  %s705_s14 = smul.u32 (!%p648_p9), 6, %s2024_s17 }
  0x4c   : > { %651 = sbr.rel (%p648_p9) target bundleno = 438 (0x1b6), region = 70  ;;  %s1663_s25 = sshll.u32 (!%p648_p9), %s2028_s18, 1 }
  0x4d   : > { %s1778_s24 = smul.u32 (!%p648_p9), 768, %s654_s13  ;;  %p708_p10 = scmp.lt.s32.totalorder (!%p648_p9), %s705_s14, 35 }
  0x4e   : > { %p718_p11 = scmp.lt.s32.totalorder (!%p648_p9), %s1663_s25, 3  ;;  %p1668_p12 = scmp.ne.s32.totalorder (!%p648_p9), %s2024_s17, 0 }
  0x4f   : > { %s2351_s13 = scalar_lea.vmem (!%p648_p9), [#allocation3], %s1778_s24 }
  0x51   : > { %s2506_s14 = smov (!%p708_p10, %s705_s14), 35  ;;  %s2508_s25 = smov (!%p718_p11, %s1663_s25), 3 }
  0x52   : > { %s1662_s26 = sshll.u32 %s2506_s14, 2  ;;  %s720_s15 = scalar_lea.vmem %s2490_s2, %s2508_s25 }
  0x53   : > { %s2334_s30 = scalar_lea.vmem %s2488_s0, %s1662_s26  ;;  %s1665_s7 = sshll.u32 %s2508_s25, 2 }
  0x54   : > { %s2344_s9 = scalar_lea.vmem %s2491_s3, %s1665_s7  ;;  %s2349_s12 = scalar_lea.vmem %s2492_s4, %s1665_s7 }
  0x55   : > { %745 = sbr.rel (%p1668_p12) target bundleno = 92 (0x5c), region = 78 }
  0x5a   : > { %v2042_v32 = vmov 0.0  }
  0x5b   : > { %746 = vst [vmem:[#allocation2] sm:$0xff] %v2042_v32  ;;  %747 = vst [vmem:[#allocation2 + $0x8] sm:$0xff] %v2042_v32 }
  0x5c PF: > { %v1836_v33 = vld [vmem:[%s2351_s13 + $0x74] ss:$8 sps:$4 sm:$0xff]   ;;  %v1840_v35 = vld [vmem:[%s2351_s13 + $0x70] ss:$8 sps:$4 sm:$0xff]   ;;  %v1842_v37 = vld [vmem:[%s2351_s13 + $0x64] ss:$8 sps:$4 sm:$0xff]  }
  0x5d   : > { %v1838_v34 = vld [vmem:[%s2351_s13 + $0x174] ss:$8 sps:$4 sm:$0xff]   ;;  %1350 = vmatprep.subr.bf16.mxu0 %v1836_v33  ;;  %v1841_v36 = vld [vmem:[%s2351_s13 + $0x170] ss:$8 sps:$4 sm:$0xff]   ;;  %v1844_v38 = vld [vmem:[%s2351_s13 + $0x164] ss:$8 sps:$4 sm:$0xff]  }
  0x5e   : > { %1391 = vmatprep.subr.bf16.mxu1 %v1838_v34  ;;  %1351 = vmatpush1.bf16.msra.mxu0 %v1840_v35  ;;  %v1846_v39 = vld [vmem:[%s2351_s13 + $0x60] ss:$8 sps:$4 sm:$0xff]   ;;  %v1848_v41 = vld [vmem:[%s2351_s13 + $0x54] ss:$8 sps:$4 sm:$0xff]   ;;  %v1852_v43 = vld [vmem:[%s2351_s13 + $0x50] ss:$8 sps:$4 sm:$0xff]  }
  0x5f   : > { %1392 = vmatpush1.bf16.msra.mxu1 %v1841_v36  ;;  %1352 = vmatprep.subr.bf16.mxu0 %v1842_v37  ;;  %v1847_v40 = vld [vmem:[%s2351_s13 + $0x160] ss:$8 sps:$4 sm:$0xff]   ;;  %v1850_v42 = vld [vmem:[%s2351_s13 + $0x154] ss:$8 sps:$4 sm:$0xff]   ;;  %v1853_v44 = vld [vmem:[%s2351_s13 + $0x150] ss:$8 sps:$4 sm:$0xff]  }
  0x60   : > { %1393 = vmatprep.subr.bf16.mxu1 %v1844_v38  ;;  %v1854_v45 = vld [vmem:[%s2351_s13 + $0x44] ss:$8 sps:$4 sm:$0xff]   ;;  %v1858_v47 = vld [vmem:[%s2351_s13 + $0x40] ss:$8 sps:$4 sm:$0xff]   ;;  %v1860_v49 = vld [vmem:[%s2351_s13 + $0x34] ss:$8 sps:$4 sm:$0xff]  }
  0x61   : > { %v1856_v46 = vld [vmem:[%s2351_s13 + $0x144] ss:$8 sps:$4 sm:$0xff]   ;;  %v1859_v48 = vld [vmem:[%s2351_s13 + $0x140] ss:$8 sps:$4 sm:$0xff]   ;;  %v1862_v50 = vld [vmem:[%s2351_s13 + $0x134] ss:$8 sps:$4 sm:$0xff]  }
  0x62   : > { %1353 = vmatpush1.bf16.msra.mxu0 %v1846_v39  ;;  %v1864_v51 = vld [vmem:[%s2351_s13 + $0x30] ss:$8 sps:$4 sm:$0xff]   ;;  %v1866_v53 = vld [vmem:[%s2351_s13 + $0x24] ss:$8 sps:$4 sm:$0xff]   ;;  %v1870_v55 = vld [vmem:[%s2351_s13 + $0x20] ss:$8 sps:$4 sm:$0xff]  }
  0x63   : > { %1394 = vmatpush1.bf16.msra.mxu1 %v1847_v40  ;;  %1354 = vmatprep.subr.bf16.mxu0 %v1848_v41  ;;  %v1865_v52 = vld [vmem:[%s2351_s13 + $0x130] ss:$8 sps:$4 sm:$0xff]   ;;  %v1868_v54 = vld [vmem:[%s2351_s13 + $0x124] ss:$8 sps:$4 sm:$0xff]   ;;  %v1871_v56 = vld [vmem:[%s2351_s13 + $0x120] ss:$8 sps:$4 sm:$0xff]  }
  0x64   : > { %1395 = vmatprep.subr.bf16.mxu1 %v1850_v42  ;;  %v1872_v57 = vld [vmem:[%s2351_s13 + $0x14] ss:$8 sps:$4 sm:$0xff]   ;;  %v1876_v59 = vld [vmem:[%s2351_s13 + $0x10] ss:$8 sps:$4 sm:$0xff]   ;;  %v1878_v61 = vld [vmem:[%s2351_s13 + $0x4] ss:$8 sps:$4 sm:$0xff]  }
  0x65   : > { %v1874_v58 = vld [vmem:[%s2351_s13 + $0x114] ss:$8 sps:$4 sm:$0xff]   ;;  %v1877_v60 = vld [vmem:[%s2351_s13 + $0x110] ss:$8 sps:$4 sm:$0xff]   ;;  %v1880_v62 = vld [vmem:[%s2351_s13 + $0x104] ss:$8 sps:$4 sm:$0xff]  }
  0x66   : > { %1355 = vmatpush1.bf16.msra.mxu0 %v1852_v43  ;;  %v1882_v63 = vld [vmem:[%s2351_s13] ss:$8 sps:$4 sm:$0xff]   ;;  %v1884_v1 = vld [vmem:[%s2351_s13 + $0xf4] ss:$8 sps:$4 sm:$0xff]   ;;  %v1888_v3 = vld [vmem:[%s2351_s13 + $0xf0] ss:$8 sps:$4 sm:$0xff]  }
  0x67   : > { %1396 = vmatpush1.bf16.msra.mxu1 %v1853_v44  ;;  %1356 = vmatprep.subr.bf16.mxu0 %v1854_v45  ;;  %v1883_v0 = vld [vmem:[%s2351_s13 + $0x100] ss:$8 sps:$4 sm:$0xff]   ;;  %v1886_v2 = vld [vmem:[%s2351_s13 + $0x1f4] ss:$8 sps:$4 sm:$0xff]   ;;  %v1889_v4 = vld [vmem:[%s2351_s13 + $0x1f0] ss:$8 sps:$4 sm:$0xff]  }
  0x68   : > { %1397 = vmatprep.subr.bf16.mxu1 %v1856_v46  ;;  %v1890_v5 = vld [vmem:[%s2351_s13 + $0xe4] ss:$8 sps:$4 sm:$0xff]   ;;  %v1894_v7 = vld [vmem:[%s2351_s13 + $0xe0] ss:$8 sps:$4 sm:$0xff]   ;;  %v1896_v9 = vld [vmem:[%s2351_s13 + $0xd4] ss:$8 sps:$4 sm:$0xff]  }
  0x69   : > { %v1892_v6 = vld [vmem:[%s2351_s13 + $0x1e4] ss:$8 sps:$4 sm:$0xff]   ;;  %v1895_v8 = vld [vmem:[%s2351_s13 + $0x1e0] ss:$8 sps:$4 sm:$0xff]   ;;  %v1898_v10 = vld [vmem:[%s2351_s13 + $0x1d4] ss:$8 sps:$4 sm:$0xff]  }
  0x6a   : > { %1357 = vmatpush1.bf16.msra.mxu0 %v1858_v47  ;;  %v1900_v11 = vld [vmem:[%s2351_s13 + $0xd0] ss:$8 sps:$4 sm:$0xff]   ;;  %v1902_v13 = vld [vmem:[%s2351_s13 + $0xc4] ss:$8 sps:$4 sm:$0xff]   ;;  %v1906_v18 = vld [vmem:[%s2351_s13 + $0xc0] ss:$8 sps:$4 sm:$0xff]  }
  0x6b   : > { %1398 = vmatpush1.bf16.msra.mxu1 %v1859_v48  ;;  %1358 = vmatprep.subr.bf16.mxu0 %v1860_v49  ;;  %v1901_v12 = vld [vmem:[%s2351_s13 + $0x1d0] ss:$8 sps:$4 sm:$0xff]   ;;  %v1904_v14 = vld [vmem:[%s2351_s13 + $0x1c4] ss:$8 sps:$4 sm:$0xff]   ;;  %v1907_v19 = vld [vmem:[%s2351_s13 + $0x1c0] ss:$8 sps:$4 sm:$0xff]  }
  0x6c   : > { %1399 = vmatprep.subr.bf16.mxu1 %v1862_v50  ;;  %v750_v15 = vld [vmem:[%s2334_s30] sm:$0xff]  ;;  %v751_v17 = vld [vmem:[%s2334_s30 + $0x8] sm:$0xff]  ;;  %v1914_v25 = vld [vmem:[%s2351_s13 + $0xa4] ss:$8 sps:$4 sm:$0xff]   ;;  %p1771_p13 = scmp.ne.s32.totalorder %s2024_s17, 5 }
  0x6d   : > { %v1670_v16 = vcombine.high %v750_v15, %v750_v15  ;;  %v1672_v20 = vcombine.high %v751_v17, %v751_v17  ;;  %v1908_v21 = vld [vmem:[%s2351_s13 + $0xb4] ss:$8 sps:$4 sm:$0xff]   ;;  %v1912_v23 = vld [vmem:[%s2351_s13 + $0xb0] ss:$8 sps:$4 sm:$0xff]   ;;  %v1916_v26 = vld [vmem:[%s2351_s13 + $0x1a4] ss:$8 sps:$4 sm:$0xff]   ;;  %v1669_v38 = vcombine.low %v750_v15, %v750_v15  ;;  %v1671_v39 = vcombine.low %v751_v17, %v751_v17 }
  0x6e   : > { %1359 = vmatpush1.bf16.msra.mxu0 %v1864_v51  ;;  %v1910_v22 = vld [vmem:[%s2351_s13 + $0x1b4] ss:$8 sps:$4 sm:$0xff]   ;;  %v1913_v24 = vld [vmem:[%s2351_s13 + $0x1b0] ss:$8 sps:$4 sm:$0xff]   ;;  %v1918_v27 = vld [vmem:[%s2351_s13 + $0xa0] ss:$8 sps:$4 sm:$0xff]  }
  0x6f   : > { %1400 = vmatpush1.bf16.msra.mxu1 %v1865_v52  ;;  %1360 = vmatprep.subr.bf16.mxu0 %v1866_v53  ;;  %v1919_v28 = vld [vmem:[%s2351_s13 + $0x1a0] ss:$8 sps:$4 sm:$0xff]   ;;  %v1920_v29 = vld [vmem:[%s2351_s13 + $0x94] ss:$8 sps:$4 sm:$0xff]   ;;  %v1924_v31 = vld [vmem:[%s2351_s13 + $0x90] ss:$8 sps:$4 sm:$0xff]  }
  0x70   : > { %1401 = vmatprep.subr.bf16.mxu1 %v1868_v54  ;;  %1382 = vmatprep.mubr.bf16.mxu0 %v1670_v16  ;;  %v1922_v30 = vld [vmem:[%s2351_s13 + $0x194] ss:$8 sps:$4 sm:$0xff]   ;;  %v1925_v32 = vld [vmem:[%s2351_s13 + $0x190] ss:$8 sps:$4 sm:$0xff]   ;;  %v1926_v33 = vld [vmem:[%s2351_s13 + $0x84] ss:$8 sps:$4 sm:$0xff]  }
  0x71   : > { %1423 = vmatprep.mubr.bf16.mxu1 %v1672_v20  ;;  %v1928_v34 = vld [vmem:[%s2351_s13 + $0x184] ss:$8 sps:$4 sm:$0xff]   ;;  %v1930_v35 = vld [vmem:[%s2351_s13 + $0x80] ss:$8 sps:$4 sm:$0xff]   ;;  %v1938_v37 = vld [vmem:[%s2351_s13 + $0x274] ss:$8 sps:$4 sm:$0xff]  }
  0x72   : > { %1361 = vmatpush1.bf16.msra.mxu0 %v1870_v55  ;;  %v1931_v36 = vld [vmem:[%s2351_s13 + $0x180] ss:$8 sps:$4 sm:$0xff]   ;;  %v1936_v40 = vld [vmem:[%s2351_s13 + $0x270] ss:$8 sps:$4 sm:$0xff]   ;;  %v1941_v42 = vld [vmem:[%s2351_s13 + $0x264] ss:$8 sps:$4 sm:$0xff]  }
  0x73   : > { %1402 = vmatpush1.bf16.msra.mxu1 %v1871_v56  ;;  %1362 = vmatprep.subr.bf16.mxu0 %v1872_v57  ;;  %v2423_v41 = vld [vmem:[%s2334_s30 + $0x10] sm:$0xff]  ;;  %v1944_v45 = vld [vmem:[%s2351_s13 + $0x254] ss:$8 sps:$4 sm:$0xff]   ;;  %v1942_v46 = vld [vmem:[%s2351_s13 + $0x250] ss:$8 sps:$4 sm:$0xff]  }
  0x74   : > { %1403 = vmatprep.subr.bf16.mxu1 %v1874_v58  ;;  %v1674_v43 = vcombine.high %v2423_v41, %v2423_v41  ;;  %v1939_v44 = vld [vmem:[%s2351_s13 + $0x260] ss:$8 sps:$4 sm:$0xff]   ;;  %v1947_v47 = vld [vmem:[%s2351_s13 + $0x244] ss:$8 sps:$4 sm:$0xff]   ;;  %v1950_v49 = vld [vmem:[%s2351_s13 + $0x234] ss:$8 sps:$4 sm:$0xff]  }
  0x75   : > { %v1945_v48 = vld [vmem:[%s2351_s13 + $0x240] ss:$8 sps:$4 sm:$0xff]   ;;  %v1948_v50 = vld [vmem:[%s2351_s13 + $0x230] ss:$8 sps:$4 sm:$0xff]   ;;  %v1953_v51 = vld [vmem:[%s2351_s13 + $0x224] ss:$8 sps:$4 sm:$0xff]  }
  0x76   : > { %1363 = vmatpush1.bf16.msra.mxu0 %v1876_v59  ;;  %v1951_v52 = vld [vmem:[%s2351_s13 + $0x220] ss:$8 sps:$4 sm:$0xff]   ;;  %v1956_v53 = vld [vmem:[%s2351_s13 + $0x214] ss:$8 sps:$4 sm:$0xff]   ;;  %v1954_v54 = vld [vmem:[%s2351_s13 + $0x210] ss:$8 sps:$4 sm:$0xff]  }
  0x77   : > { %1404 = vmatpush1.bf16.msra.mxu1 %v1877_v60  ;;  %1364 = vmatprep.subr.bf16.mxu0 %v1878_v61  ;;  %v1959_v55 = vld [vmem:[%s2351_s13 + $0x204] ss:$8 sps:$4 sm:$0xff]   ;;  %v1957_v56 = vld [vmem:[%s2351_s13 + $0x200] ss:$8 sps:$4 sm:$0xff]   ;;  %v1962_v57 = vld [vmem:[%s2351_s13 + $0x2f4] ss:$8 sps:$4 sm:$0xff]  }
  0x78   : > { %1405 = vmatprep.subr.bf16.mxu1 %v1880_v62  ;;  %v1960_v58 = vld [vmem:[%s2351_s13 + $0x2f0] ss:$8 sps:$4 sm:$0xff]   ;;  %v1965_v59 = vld [vmem:[%s2351_s13 + $0x2e4] ss:$8 sps:$4 sm:$0xff]   ;;  %v1963_v60 = vld [vmem:[%s2351_s13 + $0x2e0] ss:$8 sps:$4 sm:$0xff]  }
  0x79   : > { %v1968_v61 = vld [vmem:[%s2351_s13 + $0x2d4] ss:$8 sps:$4 sm:$0xff]   ;;  %v1966_v62 = vld [vmem:[%s2351_s13 + $0x2d0] ss:$8 sps:$4 sm:$0xff]  }
  0x7a   : > { %1365 = vmatpush1.bf16.msra.mxu0 %v1882_v63  ;;  %v1971_v63 = vld [vmem:[%s2351_s13 + $0x2c4] ss:$8 sps:$4 sm:$0xff]  }
  0x7b   : > { %1406 = vmatpush1.bf16.msra.mxu1 %v1883_v0  ;;  %1366 = vmatprep.subr.bf16.mxu0 %v1884_v1  ;;  %v1969_v0 = vld [vmem:[%s2351_s13 + $0x2c0] ss:$8 sps:$4 sm:$0xff]   ;;  %v1974_v1 = vld [vmem:[%s2351_s13 + $0x2b4] ss:$8 sps:$4 sm:$0xff]  }
  0x7c   : > { %1407 = vmatprep.subr.bf16.mxu1 %v1886_v2  ;;  %v1972_v2 = vld [vmem:[%s2351_s13 + $0x2b0] ss:$8 sps:$4 sm:$0xff]  }
  0x7e   : > { %1367 = vmatpush2.bf16.msra.mxu0 %v1888_v3  ;;  %v1977_v3 = vld [vmem:[%s2351_s13 + $0x2a4] ss:$8 sps:$4 sm:$0xff]  }
  0x7f   : > { %1408 = vmatpush2.bf16.msra.mxu1 %v1889_v4  ;;  %1368 = vmatprep.subr.bf16.mxu0 %v1890_v5  ;;  %v1975_v4 = vld [vmem:[%s2351_s13 + $0x2a0] ss:$8 sps:$4 sm:$0xff]   ;;  %v1980_v5 = vld [vmem:[%s2351_s13 + $0x294] ss:$8 sps:$4 sm:$0xff]  }
  0x80   : > { %1409 = vmatprep.subr.bf16.mxu1 %v1892_v6  ;;  %v1978_v6 = vld [vmem:[%s2351_s13 + $0x290] ss:$8 sps:$4 sm:$0xff]  }
  0x82   : > { %1369 = vmatpush2.bf16.msra.mxu0 %v1894_v7  ;;  %v1983_v7 = vld [vmem:[%s2351_s13 + $0x284] ss:$8 sps:$4 sm:$0xff]  }
  0x83   : > { %1410 = vmatpush2.bf16.msra.mxu1 %v1895_v8  ;;  %1370 = vmatprep.subr.bf16.mxu0 %v1896_v9  ;;  %v1981_v8 = vld [vmem:[%s2351_s13 + $0x280] ss:$8 sps:$4 sm:$0xff]   ;;  %v1673_v9 = vcombine.low %v2423_v41, %v2423_v41 }
  0x84   : > { %1411 = vmatprep.subr.bf16.mxu1 %v1898_v10 }
  0x86   : > { %1371 = vmatpush2.bf16.msra.mxu0 %v1900_v11 }
  0x87   : > { %1412 = vmatpush2.bf16.msra.mxu1 %v1901_v12  ;;  %1372 = vmatprep.subr.bf16.mxu0 %v1902_v13 }
  0x88   : > { %1413 = vmatprep.subr.bf16.mxu1 %v1904_v14 }
  0x8a   : > { %1373 = vmatpush2.bf16.msra.mxu0 %v1906_v18 }
  0x8b   : > { %1414 = vmatpush2.bf16.msra.mxu1 %v1907_v19  ;;  %1374 = vmatprep.subr.bf16.mxu0 %v1908_v21  ;;  %v748_v19 = vld [vmem:[#allocation2] sm:$0xff] }
  0x8c   : > { %1415 = vmatprep.subr.bf16.mxu1 %v1910_v22 }
  0x8e   : > { %1375 = vmatpush2.bf16.msra.mxu0 %v1912_v23  ;;  %v749_v23 = vld [vmem:[#allocation2 + $0x8] sm:$0xff] }
  0x8f   : > { %1416 = vmatpush2.bf16.msra.mxu1 %v1913_v24  ;;  %1376 = vmatprep.subr.bf16.mxu0 %v1914_v25 }
  0x90   : > { %1417 = vmatprep.subr.bf16.mxu1 %v1916_v26 }
  0x92   : > { %1377 = vmatpush2.bf16.msra.mxu0 %v1918_v27 }
  0x93   : > { %1418 = vmatpush2.bf16.msra.mxu1 %v1919_v28  ;;  %1378 = vmatprep.subr.bf16.mxu0 %v1920_v29 }
  0x94   : > { %1419 = vmatprep.subr.bf16.mxu1 %v1922_v30 }
  0x96   : > { %1379 = vmatpush2.bf16.msra.mxu0 %v1924_v31 }
  0x97   : > { %1420 = vmatpush2.bf16.msra.mxu1 %v1925_v32  ;;  %1380 = vmatprep.subr.bf16.mxu0 %v1926_v33 }
  0x98   : > { %1421 = vmatprep.subr.bf16.mxu1 %v1928_v34 }
  0x9a   : > { %1381 = vmatpush2.bf16.msra.mxu0 %v1930_v35 }
  0x9b   : > { %1422 = vmatpush2.bf16.msra.mxu1 %v1931_v36  ;;  %1432 = vmatprep.subr.bf16.mxu0 %v1938_v37 }
  0x9d   : > { %1383 = vmatmul.mubr.bf16.vlgmr.msra.gmra.mxu0 %v1669_v38 }
  0x9e   : > { %1424 = vmatmul.mubr.bf16.vlgmr.msra.gmra.mxu1 %v1671_v39  ;;  %1433 = vmatpush1.bf16.msra.mxu0 %v1936_v40 }
  0x9f   : > { %1464 = vmatprep.mubr.bf16.mxu0 %v1674_v43  ;;  %1434 = vmatprep.subr.bf16.mxu0 %v1941_v42 }
  0xa2   : > { %1435 = vmatpush1.bf16.msra.mxu0 %v1939_v44 }
  0xa3   : > { %1436 = vmatprep.subr.bf16.mxu0 %v1944_v45 }
  0xa6   : > { %1437 = vmatpush1.bf16.msra.mxu0 %v1942_v46 }
  0xa7   : > { %1438 = vmatprep.subr.bf16.mxu0 %v1947_v47 }
  0xaa   : > { %1439 = vmatpush1.bf16.msra.mxu0 %v1945_v48 }
  0xab   : > { %1440 = vmatprep.subr.bf16.mxu0 %v1950_v49 }
  0xae   : > { %1441 = vmatpush1.bf16.msra.mxu0 %v1948_v50 }
  0xaf   : > { %1442 = vmatprep.subr.bf16.mxu0 %v1953_v51 }
  0xb2   : > { %1443 = vmatpush1.bf16.msra.mxu0 %v1951_v52 }
  0xb3   : > { %1444 = vmatprep.subr.bf16.mxu0 %v1956_v53 }
  0xb6   : > { %1445 = vmatpush1.bf16.msra.mxu0 %v1954_v54 }
  0xb7   : > { %1446 = vmatprep.subr.bf16.mxu0 %v1959_v55 }
  0xba   : > { %1447 = vmatpush1.bf16.msra.mxu0 %v1957_v56 }
  0xbb   : > { %1448 = vmatprep.subr.bf16.mxu0 %v1962_v57 }
  0xbe   : > { %1449 = vmatpush2.bf16.msra.mxu0 %v1960_v58 }
  0xbf   : > { %1450 = vmatprep.subr.bf16.mxu0 %v1965_v59 }
  0xc2   : > { %1451 = vmatpush2.bf16.msra.mxu0 %v1963_v60 }
  0xc3   : > { %1452 = vmatprep.subr.bf16.mxu0 %v1968_v61 }
  0xc6   : > { %1453 = vmatpush2.bf16.msra.mxu0 %v1966_v62 }
  0xc7   : > { %1454 = vmatprep.subr.bf16.mxu0 %v1971_v63 }
  0xca   : > { %1455 = vmatpush2.bf16.msra.mxu0 %v1969_v0 }
  0xcb   : > { %1456 = vmatprep.subr.bf16.mxu0 %v1974_v1 }
  0xce   : > { %1457 = vmatpush2.bf16.msra.mxu0 %v1972_v2 }
  0xcf   : > { %1458 = vmatprep.subr.bf16.mxu0 %v1977_v3 }
  0xd2   : > { %1459 = vmatpush2.bf16.msra.mxu0 %v1975_v4 }
  0xd3   : > { %1460 = vmatprep.subr.bf16.mxu0 %v1980_v5 }
  0xd6   : > { %1461 = vmatpush2.bf16.msra.mxu0 %v1978_v6 }
  0xd7   : > { %1462 = vmatprep.subr.bf16.mxu0 %v1983_v7 }
  0xda   : > { %1463 = vmatpush2.bf16.msra.mxu0 %v1981_v8 }
  0xdd   : > { %1465 = vmatmul.mubr.bf16.vlgmr.msra.gmra.mxu0 %v1673_v9 }
 0x15d   : > { %v1384_v10 = vpop.f32.mrf.mxu0 }
 0x15e   : > { %v1425_v11 = vpop.f32.mrf.mxu1 }
 0x15f   : > { %v1386_v12 = vpop.f32.mrf.mxu0  ;;  %v1426_v18 = vadd.f32 %v1425_v11, %v1384_v10 }
 0x160   : > { %v1427_v13 = vpop.f32.mrf.mxu1 }
 0x161   : > { %v1388_v14 = vpop.f32.mrf.mxu0  ;;  %v1428_v21 = vadd.f32 %v1427_v13, %v1386_v12 }
 0x162   : > { %v1429_v15 = vpop.f32.mrf.mxu1 }
 0x163   : > { %v1389_v16 = vpop.f32.mrf.mxu0 }
 0x164   : > { %v1430_v17 = vpop.f32.mrf.mxu1 }
 0x19d   : > { %v1466_v20 = vpop.f32.mrf.mxu0 }
 0x19e   : > { %v1467_v22 = vadd.f32 %v1466_v20, %v1426_v18 }
 0x19f   : > { %v1468_v24 = vpop.f32.mrf.mxu0 }
 0x1a0   : > { %v1473_v25 = vadd.f32 %v1467_v22, %v748_v19  ;;  %v1469_v26 = vadd.f32 %v1468_v24, %v1428_v21  ;;  %1480 = sbr.rel (%p1771_p13) target bundleno = 438 (0x1b6), region = 82 }
 0x1a1   : > { %v1470_v27 = vpop.f32.mrf.mxu0 }
 0x1a2   : > { %1475 = vst [vmem:[#allocation2] sm:$0xff] %v1473_v25  ;;  %v1474_v28 = vadd.f32 %v1469_v26, %v749_v23 }
 0x1a3   : > { %v1471_v29 = vpop.f32.mrf.mxu0 }
 0x1a4   : > { %1476 = vst [vmem:[#allocation2 + $0x8] sm:$0xff] %v1474_v28 }
 0x1a5   : > { %v1485_v30 = vlaneseq  ;;  %v1483_v32 = vld [vmem:[%s720_s15] sm:$0x3] }
 0x1a6   : > { %v1497_v33 = vld [vmem:[%s2344_s9] sm:$0xff] }
 0x1a7   : > { %v1486_v31 = vshrl.u32 %v1485_v30, 7  ;;  %v1498_v40 = vunpack.c.l.bf16 %v1497_v33  ;;  %v1499_v41 = vunpack.c.h.bf16 %v1497_v33 }
 0x1a9   : > { %v1487_v34 = vsub.s32 0, %v1486_v31  ;;  %v1491_v35 = vsub.s32 1, %v1486_v31  ;;  %v1481_v36 = vld [vmem:[#allocation2] sm:$0xff] }
 0x1ab   : > { %v1482_v37 = vld [vmem:[#allocation2 + $0x8] sm:$0xff]  ;;  %v1488_v38 = vrot.slane %v1483_v32, %v1487_v34  ;;  %v1492_v39 = vrot.slane %v1483_v32, %v1491_v35 }
 0x1ad   : > { %v1495_v42 = vadd.f32 %v1488_v38, %v1481_v36  ;;  %v1496_v43 = vadd.f32 %v1492_v39, %v1482_v37 }
 0x1af   : > { %v1500_v44 = vadd.f32 %v1498_v40, %v1495_v42  ;;  %v1501_v45 = vadd.f32 %v1499_v41, %v1496_v43 }
 0x1b1   : > { %v1502_v46 = vmax.f32 %v1500_v44, 0.0  ;;  %v1503_v47 = vmax.f32 %v1501_v45, 0.0 }
 0x1b3   : > { %v1776_v48 = vpack.c.bf16 %v1503_v47, %v1502_v46 }
 0x1b5   : > { %1512 = vst [vmem:[%s2349_s12] sm:$0xff] %v1776_v48 }
 0x1b6 PF: > { %s14_s21 = sadd.s32 1, %s2040_s21   ;;  %s2493_s15 = smov %s2020_s16 }
 0x1b7   : > { %p11_p0 = scmp.ge.s32.totalorder %s14_s21, 14   ;;  %s2494_s16 = smov %s2119_s28 }
 0x1b8   : > { %s2495_s17 = smov %s2032_s19  ;;  %s2496_s18 = smov %s2036_s20 }
 0x1b9   : > { %s2497_s19 = smov %s2500_s22  ;;  %s2498_s20 = smov %s2504_s23 }
 0x1ba   :  { %13 = sbr.rel (!%p11_p0) target bundleno = 4 (0x4), region = 126 }

</bundles_post_ra>
